<compile_context>
chip_gen: v6e
topology: v6e:2x2x1
jax: 0.10.0
libtpu: 0.0.40
codegen_flags: <defaults>
</compile_context>

<pallas_src>
import functools

import numpy as np
import jax
import jax.numpy as jnp
from jax.experimental import pallas as pl
from jax.experimental.pallas import tpu as pltpu


def _round_up(x, m):
    return (x + m - 1) // m * m


# ------------------------- Pallas kernel: GEMM + bias ------------------------ #
def _gemm_bias_kernel(a_ref, b_ref, bias_ref, o_ref):
    o_ref[...] = (
        jnp.dot(a_ref[...], b_ref[...], preferred_element_type=jnp.float32)
        + bias_ref[...]
    )


def conv_gemm(a, b, bias):
    """a: (M_pad, K_pad) bf16 im2col patches, b: (K_pad, Cp) bf16 weights,
    bias: (1, Cp) f32.  Returns (M_pad, Cp) f32 = a @ b + bias."""
    M_pad, K_pad = a.shape
    Cp = b.shape[1]
    if M_pad % 256 == 0:
        tm = 256           # feeds the 256-wide MXU on v6e/v7x; fine on v5e too
    elif M_pad % 128 == 0:
        tm = 128
    else:
        tm = M_pad         # small problems: single 8-aligned row block
    grid = (M_pad // tm, Cp // 128)
    return pl.pallas_call(
        _gemm_bias_kernel,
        out_shape=jax.ShapeDtypeStruct((M_pad, Cp), jnp.float32),
        grid_spec=pltpu.PrefetchScalarGridSpec(
            num_scalar_prefetch=0,
            grid=grid,
            in_specs=[
                pl.BlockSpec((tm, K_pad), lambda i, j: (i, 0)),
                pl.BlockSpec((K_pad, 128), lambda i, j: (0, j)),
                pl.BlockSpec((1, 128), lambda i, j: (0, j)),
            ],
            out_specs=pl.BlockSpec((tm, 128), lambda i, j: (i, j)),
        ),
        compiler_params=pltpu.CompilerParams(
            dimension_semantics=("parallel", "parallel")),
    )(a, b, bias)


# ------------- Pallas kernel: InstanceNorm + affine (+residual) (+ReLU) ------ #
def _instnorm_kernel(*refs, c_out, apply_relu, has_residual):
    if has_residual:
        y_ref, g_ref, b_ref, r_ref, o_ref = refs
    else:
        y_ref, g_ref, b_ref, o_ref = refs
    x = y_ref[...]                                    # (1, HW, Cp) f32
    mean = jnp.mean(x, axis=1, keepdims=True)
    xc = x - mean
    var = jnp.mean(xc * xc, axis=1, keepdims=True)    # biased variance (PyTorch IN)
    out = xc * jax.lax.rsqrt(var + 1e-5) * g_ref[...] + b_ref[...]
    out = out[:, :, :c_out]                           # drop channel (lane) padding
    if has_residual:
        out = out + r_ref[...]
    if apply_relu:
        out = jnp.maximum(out, 0.0)
    o_ref[...] = out


def instance_norm_nhwc(y3, gamma, beta, *, c_out, relu, residual=None):
    """y3: (N, HW, Cp) f32 conv+bias output.  Fused IN(affine)+opt.residual+opt.ReLU."""
    N, HW, Cp = y3.shape
    in_specs = [
        pl.BlockSpec((1, HW, Cp), lambda i: (i, 0, 0)),
        pl.BlockSpec((1, 1, Cp), lambda i: (0, 0, 0)),
        pl.BlockSpec((1, 1, Cp), lambda i: (0, 0, 0)),
    ]
    args = [y3, gamma, beta]
    if residual is not None:
        in_specs.append(pl.BlockSpec((1, HW, c_out), lambda i: (i, 0, 0)))
        args.append(residual)
    return pl.pallas_call(
        functools.partial(_instnorm_kernel, c_out=c_out, apply_relu=relu,
                          has_residual=residual is not None),
        out_shape=jax.ShapeDtypeStruct((N, HW, c_out), jnp.float32),
        grid=(N,),
        in_specs=in_specs,
        out_specs=pl.BlockSpec((1, HW, c_out), lambda i: (i, 0, 0)),
        compiler_params=pltpu.CompilerParams(dimension_semantics=("parallel",)),
    )(*args)


# ------------------------------- JAX glue ------------------------------------ #
def _src_indices(size, upsample, pad):
    """Source index (into the original, pre-upsample tensor) for every padded
    coordinate of the (optionally nearest-2x-upsampled) reflection-padded axis."""
    size_log = size * 2 if upsample else size
    q = np.arange(-pad, size_log + pad)
    q = np.where(q < 0, -q, q)
    q = np.where(q >= size_log, 2 * (size_log - 1) - q, q)
    if upsample:
        q = q // 2
    return q.astype(np.int32)


def conv_block(x, p, k, stride=1, upsample=False, norm=True, relu=True, residual=None):
    """x: (N, H, W, C_in) f32 NHWC.  Returns (N, Ho, Wo, C_out) f32 NHWC."""
    N, H, W, C_in = x.shape
    pad = k // 2
    H_log = H * 2 if upsample else H
    W_log = W * 2 if upsample else W
    Ho = (H_log + 2 * pad - k) // stride + 1
    Wo = (W_log + 2 * pad - k) // stride + 1
    row_src = _src_indices(H, upsample, pad)
    col_src = _src_indices(W, upsample, pad)
    ho = np.arange(Ho, dtype=np.int32) * stride
    wo = np.arange(Wo, dtype=np.int32) * stride

    # im2col with reflection pad / nearest upsample / stride folded into the gather
    # indices; columns ordered (kh, kw, c_in) to match the weight reshape below.
    cols = []
    for dy in range(k):
        xr = jnp.take(x, row_src[dy + ho], axis=1)               # (N, Ho, W, C_in)
        for dx in range(k):
            cols.append(jnp.take(xr, col_src[dx + wo], axis=2))  # (N, Ho, Wo, C_in)
    M, K = N * Ho * Wo, k * k * C_in
    a = jnp.stack(cols, axis=3).reshape(M, K).astype(jnp.bfloat16)

    C_out = p["w"].shape[0]
    K_pad = _round_up(K, 128)
    Cp = _round_up(C_out, 128)
    M_pad = _round_up(M, 256) if M > 128 else _round_up(M, 8)
    a = jnp.pad(a, ((0, M_pad - M), (0, K_pad - K)))

    b = p["w"].transpose(2, 3, 1, 0).reshape(K, C_out).astype(jnp.bfloat16)
    b = jnp.pad(b, ((0, K_pad - K), (0, Cp - C_out)))
    bias = jnp.pad(p["b"], (0, Cp - C_out)).reshape(1, Cp).astype(jnp.float32)

    y = conv_gemm(a, b, bias)                                    # (M_pad, Cp) f32

    if not norm:
        # In this architecture norm=False only for the final conv (relu=False too).
        out = y[:M, :C_out].reshape(N, Ho, Wo, C_out)
        return jnp.maximum(out, 0.0) if relu else out

    hw = Ho * Wo
    y3 = (y if M_pad == M else y[:M]).reshape(N, hw, Cp)
    gamma = jnp.pad(p["gamma"], (0, Cp - C_out)).reshape(1, 1, Cp)
    beta = jnp.pad(p["beta"], (0, Cp - C_out)).reshape(1, 1, Cp)
    res3 = None if residual is None else residual.reshape(N, hw, C_out)
    out = instance_norm_nhwc(y3, gamma, beta, c_out=C_out, relu=relu, residual=res3)
    return out.reshape(N, Ho, Wo, C_out)


# ------------------------------ parameters ----------------------------------- #
def _conv_params(key, c_in, c_out, k, norm=True):
    kw, kb, kg, kbe = jax.random.split(key, 4)
    bound = 1.0 / (c_in * k * k) ** 0.5                 # Conv2d default init scale
    p = {
        "w": jax.random.uniform(kw, (c_out, c_in, k, k), jnp.float32, -bound, bound),
        "b": jax.random.uniform(kb, (c_out,), jnp.float32, -bound, bound),
    }
    if norm:
        p["gamma"] = 1.0 + 0.1 * jax.random.normal(kg, (c_out,), jnp.float32)
        p["beta"] = 0.1 * jax.random.normal(kbe, (c_out,), jnp.float32)
    return p


def init_params(key, num_res_blocks=5):
    keys = jax.random.split(key, 6 + 2 * num_res_blocks)
    return {
        "c1": _conv_params(keys[0], 3, 32, 9),
        "c2": _conv_params(keys[1], 32, 64, 3),
        "c3": _conv_params(keys[2], 64, 128, 3),
        "res": [
            (
                _conv_params(keys[3 + 2 * i], 128, 128, 3),
                _conv_params(keys[4 + 2 * i], 128, 128, 3),
            )
            for i in range(num_res_blocks)
        ],
        "u1": _conv_params(keys[3 + 2 * num_res_blocks], 128, 64, 3),
        "u2": _conv_params(keys[4 + 2 * num_res_blocks], 64, 32, 3),
        "out": _conv_params(keys[5 + 2 * num_res_blocks], 32, 3, 9, norm=False),
    }


# -------------------------------- forward ------------------------------------ #
def image_transformation_network(params, x_nchw):
    x = jnp.transpose(x_nchw, (0, 2, 3, 1))             # NCHW -> NHWC, once
    y = conv_block(x, params["c1"], 9, stride=1)
    y = conv_block(y, params["c2"], 3, stride=2)
    y = conv_block(y, params["c3"], 3, stride=2)
    for p1, p2 in params["res"]:
        r = conv_block(y, p1, 3)
        y = conv_block(r, p2, 3, relu=False, residual=y)  # residual add fused into IN pass
    y = conv_block(y, params["u1"], 3, upsample=True)
    y = conv_block(y, params["u2"], 3, upsample=True)
    y = conv_block(y, params["out"], 9, norm=False, relu=False)
    return jnp.transpose(y, (0, 3, 1, 2))                # NHWC -> NCHW, once


if __name__ == "__main__":
    key = jax.random.PRNGKey(0)
    pkey, xkey = jax.random.split(key)
    params = init_params(pkey, num_res_blocks=5)
    x = jax.random.normal(xkey, (2, 3, 16, 16), jnp.float32)   # NCHW, 3 input channels

    fwd = jax.jit(image_transformation_network)
    out = fwd(params, x)
    jax.block_until_ready(out)
    assert out.shape == (2, 3, 16, 16), out.shape
    assert bool(jnp.all(jnp.isfinite(out)))
    print("KERNEL_OK")
</pallas_src>

<mosaic_0001>
module attributes {stable_mosaic.version = 11 : i64} {
  func.func @_instnorm_kernel(%arg0: i32, %arg1: memref<1x256x128xf32, #tpu.memory_space<vmem>>, %arg2: memref<1x1x128xf32, #tpu.memory_space<vmem>>, %arg3: memref<1x1x128xf32, #tpu.memory_space<vmem>>, %arg4: memref<1x256x32xf32, #tpu.memory_space<vmem>>) attributes {dimension_semantics = [#tpu.dimension_semantics<parallel>], iteration_bounds = array<i64: 2>, scalar_prefetch = 0 : i64, scratch_operands = 0 : i64, tpu.core_type = #tpu.core_type<tc>, window_params = [{transform_indices = @transform_0, window_bounds = array<i64: 1, 256, 128>}, {pipeline_mode = #tpu.pipeline_mode<synchronous>, transform_indices = @transform_1, window_bounds = array<i64: 1, 1, 128>}, {pipeline_mode = #tpu.pipeline_mode<synchronous>, transform_indices = @transform_2, window_bounds = array<i64: 1, 1, 128>}, {transform_indices = @transform_3, window_bounds = array<i64: 1, 256, 32>}]} {
    %c0 = arith.constant 0 : index
    %c0_0 = arith.constant 0 : index
    %c0_1 = arith.constant 0 : index
    %0 = vector.load %arg1[%c0, %c0_0, %c0_1] : memref<1x256x128xf32, #tpu.memory_space<vmem>>, vector<1x256x128xf32>
    %cst = arith.constant dense<0.000000e+00> : vector<1x128xf32>
    %1 = vector.multi_reduction <add>, %0, %cst [1] : vector<1x256x128xf32> to vector<1x128xf32>
    %2 = vector.shape_cast %1 : vector<1x128xf32> to vector<1x1x128xf32>
    %cst_2 = arith.constant 2.560000e+02 : f32
    %3 = vector.broadcast %cst_2 : f32 to vector<1x1x128xf32>
    %4 = arith.divf %2, %3 : vector<1x1x128xf32>
    %5 = vector.broadcast %4 : vector<1x1x128xf32> to vector<1x256x128xf32>
    %6 = arith.subf %0, %5 : vector<1x256x128xf32>
    %7 = arith.mulf %6, %6 : vector<1x256x128xf32>
    %cst_3 = arith.constant dense<0.000000e+00> : vector<1x128xf32>
    %8 = vector.multi_reduction <add>, %7, %cst_3 [1] : vector<1x256x128xf32> to vector<1x128xf32>
    %9 = vector.shape_cast %8 : vector<1x128xf32> to vector<1x1x128xf32>
    %cst_4 = arith.constant 2.560000e+02 : f32
    %10 = vector.broadcast %cst_4 : f32 to vector<1x1x128xf32>
    %11 = arith.divf %9, %10 : vector<1x1x128xf32>
    %cst_5 = arith.constant 9.99999974E-6 : f32
    %12 = vector.broadcast %cst_5 : f32 to vector<1x1x128xf32>
    %13 = arith.addf %11, %12 : vector<1x1x128xf32>
    %14 = math.rsqrt %13 : vector<1x1x128xf32>
    %15 = vector.broadcast %14 : vector<1x1x128xf32> to vector<1x256x128xf32>
    %16 = arith.mulf %6, %15 : vector<1x256x128xf32>
    %c0_6 = arith.constant 0 : index
    %c0_7 = arith.constant 0 : index
    %c0_8 = arith.constant 0 : index
    %17 = vector.load %arg2[%c0_6, %c0_7, %c0_8] : memref<1x1x128xf32, #tpu.memory_space<vmem>>, vector<1x1x128xf32>
    %18 = vector.broadcast %17 : vector<1x1x128xf32> to vector<1x256x128xf32>
    %19 = arith.mulf %16, %18 : vector<1x256x128xf32>
    %c0_9 = arith.constant 0 : index
    %c0_10 = arith.constant 0 : index
    %c0_11 = arith.constant 0 : index
    %20 = vector.load %arg3[%c0_9, %c0_10, %c0_11] : memref<1x1x128xf32, #tpu.memory_space<vmem>>, vector<1x1x128xf32>
    %21 = vector.broadcast %20 : vector<1x1x128xf32> to vector<1x256x128xf32>
    %22 = arith.addf %19, %21 : vector<1x256x128xf32>
    %23 = vector.extract_strided_slice %22 {offsets = [0, 0, 0], sizes = [1, 256, 32], strides = [1, 1, 1]} : vector<1x256x128xf32> to vector<1x256x32xf32>
    %cst_12 = arith.constant 0.000000e+00 : f32
    %24 = vector.broadcast %cst_12 : f32 to vector<1x256x32xf32>
    %25 = arith.maximumf %23, %24 : vector<1x256x32xf32>
    %c0_13 = arith.constant 0 : index
    %c0_14 = arith.constant 0 : index
    %c0_15 = arith.constant 0 : index
    %26 = vector.load %arg4[%c0_13, %c0_14, %c0_15] : memref<1x256x32xf32, #tpu.memory_space<vmem>>, vector<1x256x32xf32>
    tpu.vector_store %arg4[%c0_13, %c0_14, %c0_15], %25 {strides = array<i32>} : memref<1x256x32xf32, #tpu.memory_space<vmem>>, vector<1x256x32xf32>,
    return
  }
  func.func @transform_0(%arg0: i32) -> (i32, i32, i32) {
    %c0_i32 = arith.constant 0 : i32
    %c0_i32_0 = arith.constant 0 : i32
    %c0_i32_1 = arith.constant 0 : i32
    return %arg0, %c0_i32, %c0_i32_0 : i32, i32, i32
  }
  func.func @transform_1(%arg0: i32) -> (i32, i32, i32) {
    %c0_i32 = arith.constant 0 : i32
    %c0_i32_0 = arith.constant 0 : i32
    %c0_i32_1 = arith.constant 0 : i32
    %c0_i32_2 = arith.constant 0 : i32
    return %c0_i32, %c0_i32_0, %c0_i32_1 : i32, i32, i32
  }
  func.func @transform_2(%arg0: i32) -> (i32, i32, i32) {
    %c0_i32 = arith.constant 0 : i32
    %c0_i32_0 = arith.constant 0 : i32
    %c0_i32_1 = arith.constant 0 : i32
    %c0_i32_2 = arith.constant 0 : i32
    return %c0_i32, %c0_i32_0, %c0_i32_1 : i32, i32, i32
  }
  func.func @transform_3(%arg0: i32) -> (i32, i32, i32) {
    %c0_i32 = arith.constant 0 : i32
    %c0_i32_0 = arith.constant 0 : i32
    %c0_i32_1 = arith.constant 0 : i32
    return %arg0, %c0_i32, %c0_i32_0 : i32, i32, i32
  }
}

module attributes {stable_mosaic.version = 11 : i64} {
  func.func @_gemm_bias_kernel(%arg0: i32, %arg1: i32, %arg2: memref<256x256xbf16, #tpu.memory_space<vmem>>, %arg3: memref<256x128xbf16, #tpu.memory_space<vmem>>, %arg4: memref<1x128xf32, #tpu.memory_space<vmem>>, %arg5: memref<256x128xf32, #tpu.memory_space<vmem>>) attributes {dimension_semantics = [#tpu.dimension_semantics<parallel>, #tpu.dimension_semantics<parallel>], iteration_bounds = array<i64: 2, 1>, scalar_prefetch = 0 : i64, scratch_operands = 0 : i64, tpu.core_type = #tpu.core_type<tc>, window_params = [{transform_indices = @transform_0, window_bounds = array<i64: 256, 256>}, {transform_indices = @transform_1, window_bounds = array<i64: 256, 128>}, {transform_indices = @transform_2, window_bounds = array<i64: 1, 128>}, {transform_indices = @transform_3, window_bounds = array<i64: 256, 128>}]} {
    %c0 = arith.constant 0 : index
    %c0_0 = arith.constant 0 : index
    %0 = vector.load %arg2[%c0, %c0_0] : memref<256x256xbf16, #tpu.memory_space<vmem>>, vector<256x256xbf16>
    %c0_1 = arith.constant 0 : index
    %c0_2 = arith.constant 0 : index
    %1 = vector.load %arg3[%c0_1, %c0_2] : memref<256x128xbf16, #tpu.memory_space<vmem>>, vector<256x128xbf16>
    %cst = arith.constant dense<0.000000e+00> : vector<256x128xf32>
    %2 = tpu.matmul %0, %1, %cst {dimension_numbers = #tpu.dot_dimension_numbers<[1], [0], [0], [1], [0, 0, 1, 1], [], []>} : vector<256x256xbf16>, vector<256x128xbf16>, vector<256x128xf32> -> vector<256x128xf32>
    %c0_3 = arith.constant 0 : index
    %c0_4 = arith.constant 0 : index
    %3 = vector.load %arg4[%c0_3, %c0_4] : memref<1x128xf32, #tpu.memory_space<vmem>>, vector<1x128xf32>
    %4 = vector.broadcast %3 : vector<1x128xf32> to vector<256x128xf32>
    %5 = arith.addf %2, %4 : vector<256x128xf32>
    %c0_5 = arith.constant 0 : index
    %c0_6 = arith.constant 0 : index
    %6 = vector.load %arg5[%c0_5, %c0_6] : memref<256x128xf32, #tpu.memory_space<vmem>>, vector<256x128xf32>
    tpu.vector_store %arg5[%c0_5, %c0_6], %5 {strides = array<i32>} : memref<256x128xf32, #tpu.memory_space<vmem>>, vector<256x128xf32>,
    return
  }
  func.func @transform_0(%arg0: i32, %arg1: i32) -> (i32, i32) {
    %c0_i32 = arith.constant 0 : i32
    %c0_i32_0 = arith.constant 0 : i32
    return %arg0, %c0_i32 : i32, i32
  }
  func.func @transform_1(%arg0: i32, %arg1: i32) -> (i32, i32) {
    %c0_i32 = arith.constant 0 : i32
    %c0_i32_0 = arith.constant 0 : i32
    return %c0_i32, %arg1 : i32, i32
  }
  func.func @transform_2(%arg0: i32, %arg1: i32) -> (i32, i32) {
    %c0_i32 = arith.constant 0 : i32
    %c0_i32_0 = arith.constant 0 : i32
    return %c0_i32, %arg1 : i32, i32
  }
  func.func @transform_3(%arg0: i32, %arg1: i32) -> (i32, i32) {
    %c0_i32 = arith.constant 0 : i32
    return %arg0, %arg1 : i32, i32
  }
}

module attributes {stable_mosaic.version = 11 : i64} {
  func.func @_gemm_bias_kernel(%arg0: i32, %arg1: i32, %arg2: memref<128x384xbf16, #tpu.memory_space<vmem>>, %arg3: memref<384x128xbf16, #tpu.memory_space<vmem>>, %arg4: memref<1x128xf32, #tpu.memory_space<vmem>>, %arg5: memref<128x128xf32, #tpu.memory_space<vmem>>) attributes {dimension_semantics = [#tpu.dimension_semantics<parallel>, #tpu.dimension_semantics<parallel>], iteration_bounds = array<i64: 1, 1>, scalar_prefetch = 0 : i64, scratch_operands = 0 : i64, tpu.core_type = #tpu.core_type<tc>, window_params = [{transform_indices = @transform_0, window_bounds = array<i64: 128, 384>}, {transform_indices = @transform_1, window_bounds = array<i64: 384, 128>}, {transform_indices = @transform_2, window_bounds = array<i64: 1, 128>}, {transform_indices = @transform_3, window_bounds = array<i64: 128, 128>}]} {
    %c0 = arith.constant 0 : index
    %c0_0 = arith.constant 0 : index
    %0 = vector.load %arg2[%c0, %c0_0] : memref<128x384xbf16, #tpu.memory_space<vmem>>, vector<128x384xbf16>
    %c0_1 = arith.constant 0 : index
    %c0_2 = arith.constant 0 : index
    %1 = vector.load %arg3[%c0_1, %c0_2] : memref<384x128xbf16, #tpu.memory_space<vmem>>, vector<384x128xbf16>
    %cst = arith.constant dense<0.000000e+00> : vector<128x128xf32>
    %2 = tpu.matmul %0, %1, %cst {dimension_numbers = #tpu.dot_dimension_numbers<[1], [0], [0], [1], [0, 0, 1, 1], [], []>} : vector<128x384xbf16>, vector<384x128xbf16>, vector<128x128xf32> -> vector<128x128xf32>
    %c0_3 = arith.constant 0 : index
    %c0_4 = arith.constant 0 : index
    %3 = vector.load %arg4[%c0_3, %c0_4] : memref<1x128xf32, #tpu.memory_space<vmem>>, vector<1x128xf32>
    %4 = vector.broadcast %3 : vector<1x128xf32> to vector<128x128xf32>
    %5 = arith.addf %2, %4 : vector<128x128xf32>
    %c0_5 = arith.constant 0 : index
    %c0_6 = arith.constant 0 : index
    %6 = vector.load %arg5[%c0_5, %c0_6] : memref<128x128xf32, #tpu.memory_space<vmem>>, vector<128x128xf32>
    tpu.vector_store %arg5[%c0_5, %c0_6], %5 {strides = array<i32>} : memref<128x128xf32, #tpu.memory_space<vmem>>, vector<128x128xf32>,
    return
  }
  func.func @transform_0(%arg0: i32, %arg1: i32) -> (i32, i32) {
    %c0_i32 = arith.constant 0 : i32
    %c0_i32_0 = arith.constant 0 : i32
    return %arg0, %c0_i32 : i32, i32
  }
  func.func @transform_1(%arg0: i32, %arg1: i32) -> (i32, i32) {
    %c0_i32 = arith.constant 0 : i32
    %c0_i32_0 = arith.constant 0 : i32
    return %c0_i32, %arg1 : i32, i32
  }
  func.func @transform_2(%arg0: i32, %arg1: i32) -> (i32, i32) {
    %c0_i32 = arith.constant 0 : i32
    %c0_i32_0 = arith.constant 0 : i32
    return %c0_i32, %arg1 : i32, i32
  }
  func.func @transform_3(%arg0: i32, %arg1: i32) -> (i32, i32) {
    %c0_i32 = arith.constant 0 : i32
    return %arg0, %arg1 : i32, i32
  }
}

module attributes {stable_mosaic.version = 11 : i64} {
  func.func @_instnorm_kernel(%arg0: i32, %arg1: memref<1x64x128xf32, #tpu.memory_space<vmem>>, %arg2: memref<1x1x128xf32, #tpu.memory_space<vmem>>, %arg3: memref<1x1x128xf32, #tpu.memory_space<vmem>>, %arg4: memref<1x64x64xf32, #tpu.memory_space<vmem>>) attributes {dimension_semantics = [#tpu.dimension_semantics<parallel>], iteration_bounds = array<i64: 2>, scalar_prefetch = 0 : i64, scratch_operands = 0 : i64, tpu.core_type = #tpu.core_type<tc>, window_params = [{transform_indices = @transform_0, window_bounds = array<i64: 1, 64, 128>}, {pipeline_mode = #tpu.pipeline_mode<synchronous>, transform_indices = @transform_1, window_bounds = array<i64: 1, 1, 128>}, {pipeline_mode = #tpu.pipeline_mode<synchronous>, transform_indices = @transform_2, window_bounds = array<i64: 1, 1, 128>}, {transform_indices = @transform_3, window_bounds = array<i64: 1, 64, 64>}]} {
    %c0 = arith.constant 0 : index
    %c0_0 = arith.constant 0 : index
    %c0_1 = arith.constant 0 : index
    %0 = vector.load %arg1[%c0, %c0_0, %c0_1] : memref<1x64x128xf32, #tpu.memory_space<vmem>>, vector<1x64x128xf32>
    %cst = arith.constant dense<0.000000e+00> : vector<1x128xf32>
    %1 = vector.multi_reduction <add>, %0, %cst [1] : vector<1x64x128xf32> to vector<1x128xf32>
    %2 = vector.shape_cast %1 : vector<1x128xf32> to vector<1x1x128xf32>
    %cst_2 = arith.constant 6.400000e+01 : f32
    %3 = vector.broadcast %cst_2 : f32 to vector<1x1x128xf32>
    %4 = arith.divf %2, %3 : vector<1x1x128xf32>
    %5 = vector.broadcast %4 : vector<1x1x128xf32> to vector<1x64x128xf32>
    %6 = arith.subf %0, %5 : vector<1x64x128xf32>
    %7 = arith.mulf %6, %6 : vector<1x64x128xf32>
    %cst_3 = arith.constant dense<0.000000e+00> : vector<1x128xf32>
    %8 = vector.multi_reduction <add>, %7, %cst_3 [1] : vector<1x64x128xf32> to vector<1x128xf32>
    %9 = vector.shape_cast %8 : vector<1x128xf32> to vector<1x1x128xf32>
    %cst_4 = arith.constant 6.400000e+01 : f32
    %10 = vector.broadcast %cst_4 : f32 to vector<1x1x128xf32>
    %11 = arith.divf %9, %10 : vector<1x1x128xf32>
    %cst_5 = arith.constant 9.99999974E-6 : f32
    %12 = vector.broadcast %cst_5 : f32 to vector<1x1x128xf32>
    %13 = arith.addf %11, %12 : vector<1x1x128xf32>
    %14 = math.rsqrt %13 : vector<1x1x128xf32>
    %15 = vector.broadcast %14 : vector<1x1x128xf32> to vector<1x64x128xf32>
    %16 = arith.mulf %6, %15 : vector<1x64x128xf32>
    %c0_6 = arith.constant 0 : index
    %c0_7 = arith.constant 0 : index
    %c0_8 = arith.constant 0 : index
    %17 = vector.load %arg2[%c0_6, %c0_7, %c0_8] : memref<1x1x128xf32, #tpu.memory_space<vmem>>, vector<1x1x128xf32>
    %18 = vector.broadcast %17 : vector<1x1x128xf32> to vector<1x64x128xf32>
    %19 = arith.mulf %16, %18 : vector<1x64x128xf32>
    %c0_9 = arith.constant 0 : index
    %c0_10 = arith.constant 0 : index
    %c0_11 = arith.constant 0 : index
    %20 = vector.load %arg3[%c0_9, %c0_10, %c0_11] : memref<1x1x128xf32, #tpu.memory_space<vmem>>, vector<1x1x128xf32>
    %21 = vector.broadcast %20 : vector<1x1x128xf32> to vector<1x64x128xf32>
    %22 = arith.addf %19, %21 : vector<1x64x128xf32>
    %23 = vector.extract_strided_slice %22 {offsets = [0, 0, 0], sizes = [1, 64, 64], strides = [1, 1, 1]} : vector<1x64x128xf32> to vector<1x64x64xf32>
    %cst_12 = arith.constant 0.000000e+00 : f32
    %24 = vector.broadcast %cst_12 : f32 to vector<1x64x64xf32>
    %25 = arith.maximumf %23, %24 : vector<1x64x64xf32>
    %c0_13 = arith.constant 0 : index
    %c0_14 = arith.constant 0 : index
    %c0_15 = arith.constant 0 : index
    %26 = vector.load %arg4[%c0_13, %c0_14, %c0_15] : memref<1x64x64xf32, #tpu.memory_space<vmem>>, vector<1x64x64xf32>
    tpu.vector_store %arg4[%c0_13, %c0_14, %c0_15], %25 {strides = array<i32>} : memref<1x64x64xf32, #tpu.memory_space<vmem>>, vector<1x64x64xf32>,
    return
  }
  func.func @transform_0(%arg0: i32) -> (i32, i32, i32) {
    %c0_i32 = arith.constant 0 : i32
    %c0_i32_0 = arith.constant 0 : i32
    %c0_i32_1 = arith.constant 0 : i32
    return %arg0, %c0_i32, %c0_i32_0 : i32, i32, i32
  }
  func.func @transform_1(%arg0: i32) -> (i32, i32, i32) {
    %c0_i32 = arith.constant 0 : i32
    %c0_i32_0 = arith.constant 0 : i32
    %c0_i32_1 = arith.constant 0 : i32
    %c0_i32_2 = arith.constant 0 : i32
    return %c0_i32, %c0_i32_0, %c0_i32_1 : i32, i32, i32
  }
  func.func @transform_2(%arg0: i32) -> (i32, i32, i32) {
    %c0_i32 = arith.constant 0 : i32
    %c0_i32_0 = arith.constant 0 : i32
    %c0_i32_1 = arith.constant 0 : i32
    %c0_i32_2 = arith.constant 0 : i32
    return %c0_i32, %c0_i32_0, %c0_i32_1 : i32, i32, i32
  }
  func.func @transform_3(%arg0: i32) -> (i32, i32, i32) {
    %c0_i32 = arith.constant 0 : i32
    %c0_i32_0 = arith.constant 0 : i32
    %c0_i32_1 = arith.constant 0 : i32
    return %arg0, %c0_i32, %c0_i32_0 : i32, i32, i32
  }
}

module attributes {stable_mosaic.version = 11 : i64} {
  func.func @_gemm_bias_kernel(%arg0: i32, %arg1: i32, %arg2: memref<32x640xbf16, #tpu.memory_space<vmem>>, %arg3: memref<640x128xbf16, #tpu.memory_space<vmem>>, %arg4: memref<1x128xf32, #tpu.memory_space<vmem>>, %arg5: memref<32x128xf32, #tpu.memory_space<vmem>>) attributes {dimension_semantics = [#tpu.dimension_semantics<parallel>, #tpu.dimension_semantics<parallel>], iteration_bounds = array<i64: 1, 1>, scalar_prefetch = 0 : i64, scratch_operands = 0 : i64, tpu.core_type = #tpu.core_type<tc>, window_params = [{transform_indices = @transform_0, window_bounds = array<i64: 32, 640>}, {transform_indices = @transform_1, window_bounds = array<i64: 640, 128>}, {transform_indices = @transform_2, window_bounds = array<i64: 1, 128>}, {transform_indices = @transform_3, window_bounds = array<i64: 32, 128>}]} {
    %c0 = arith.constant 0 : index
    %c0_0 = arith.constant 0 : index
    %0 = vector.load %arg2[%c0, %c0_0] : memref<32x640xbf16, #tpu.memory_space<vmem>>, vector<32x640xbf16>
    %c0_1 = arith.constant 0 : index
    %c0_2 = arith.constant 0 : index
    %1 = vector.load %arg3[%c0_1, %c0_2] : memref<640x128xbf16, #tpu.memory_space<vmem>>, vector<640x128xbf16>
    %cst = arith.constant dense<0.000000e+00> : vector<32x128xf32>
    %2 = tpu.matmul %0, %1, %cst {dimension_numbers = #tpu.dot_dimension_numbers<[1], [0], [0], [1], [0, 0, 1, 1], [], []>} : vector<32x640xbf16>, vector<640x128xbf16>, vector<32x128xf32> -> vector<32x128xf32>
    %c0_3 = arith.constant 0 : index
    %c0_4 = arith.constant 0 : index
    %3 = vector.load %arg4[%c0_3, %c0_4] : memref<1x128xf32, #tpu.memory_space<vmem>>, vector<1x128xf32>
    %4 = vector.broadcast %3 : vector<1x128xf32> to vector<32x128xf32>
    %5 = arith.addf %2, %4 : vector<32x128xf32>
    %c0_5 = arith.constant 0 : index
    %c0_6 = arith.constant 0 : index
    %6 = vector.load %arg5[%c0_5, %c0_6] : memref<32x128xf32, #tpu.memory_space<vmem>>, vector<32x128xf32>
    tpu.vector_store %arg5[%c0_5, %c0_6], %5 {strides = array<i32>} : memref<32x128xf32, #tpu.memory_space<vmem>>, vector<32x128xf32>,
    return
  }
  func.func @transform_0(%arg0: i32, %arg1: i32) -> (i32, i32) {
    %c0_i32 = arith.constant 0 : i32
    %c0_i32_0 = arith.constant 0 : i32
    return %arg0, %c0_i32 : i32, i32
  }
  func.func @transform_1(%arg0: i32, %arg1: i32) -> (i32, i32) {
    %c0_i32 = arith.constant 0 : i32
    %c0_i32_0 = arith.constant 0 : i32
    return %c0_i32, %arg1 : i32, i32
  }
  func.func @transform_2(%arg0: i32, %arg1: i32) -> (i32, i32) {
    %c0_i32 = arith.constant 0 : i32
    %c0_i32_0 = arith.constant 0 : i32
    return %c0_i32, %arg1 : i32, i32
  }
  func.func @transform_3(%arg0: i32, %arg1: i32) -> (i32, i32) {
    %c0_i32 = arith.constant 0 : i32
    return %arg0, %arg1 : i32, i32
  }
}

module attributes {stable_mosaic.version = 11 : i64} {
  func.func @_instnorm_kernel(%arg0: i32, %arg1: memref<1x16x128xf32, #tpu.memory_space<vmem>>, %arg2: memref<1x1x128xf32, #tpu.memory_space<vmem>>, %arg3: memref<1x1x128xf32, #tpu.memory_space<vmem>>, %arg4: memref<1x16x128xf32, #tpu.memory_space<vmem>>) attributes {dimension_semantics = [#tpu.dimension_semantics<parallel>], iteration_bounds = array<i64: 2>, scalar_prefetch = 0 : i64, scratch_operands = 0 : i64, tpu.core_type = #tpu.core_type<tc>, window_params = [{transform_indices = @transform_0, window_bounds = array<i64: 1, 16, 128>}, {pipeline_mode = #tpu.pipeline_mode<synchronous>, transform_indices = @transform_1, window_bounds = array<i64: 1, 1, 128>}, {pipeline_mode = #tpu.pipeline_mode<synchronous>, transform_indices = @transform_2, window_bounds = array<i64: 1, 1, 128>}, {transform_indices = @transform_3, window_bounds = array<i64: 1, 16, 128>}]} {
    %c0 = arith.constant 0 : index
    %c0_0 = arith.constant 0 : index
    %c0_1 = arith.constant 0 : index
    %0 = vector.load %arg1[%c0, %c0_0, %c0_1] : memref<1x16x128xf32, #tpu.memory_space<vmem>>, vector<1x16x128xf32>
    %cst = arith.constant dense<0.000000e+00> : vector<1x128xf32>
    %1 = vector.multi_reduction <add>, %0, %cst [1] : vector<1x16x128xf32> to vector<1x128xf32>
    %2 = vector.shape_cast %1 : vector<1x128xf32> to vector<1x1x128xf32>
    %cst_2 = arith.constant 1.600000e+01 : f32
    %3 = vector.broadcast %cst_2 : f32 to vector<1x1x128xf32>
    %4 = arith.divf %2, %3 : vector<1x1x128xf32>
    %5 = vector.broadcast %4 : vector<1x1x128xf32> to vector<1x16x128xf32>
    %6 = arith.subf %0, %5 : vector<1x16x128xf32>
    %7 = arith.mulf %6, %6 : vector<1x16x128xf32>
    %cst_3 = arith.constant dense<0.000000e+00> : vector<1x128xf32>
    %8 = vector.multi_reduction <add>, %7, %cst_3 [1] : vector<1x16x128xf32> to vector<1x128xf32>
    %9 = vector.shape_cast %8 : vector<1x128xf32> to vector<1x1x128xf32>
    %cst_4 = arith.constant 1.600000e+01 : f32
    %10 = vector.broadcast %cst_4 : f32 to vector<1x1x128xf32>
    %11 = arith.divf %9, %10 : vector<1x1x128xf32>
    %cst_5 = arith.constant 9.99999974E-6 : f32
    %12 = vector.broadcast %cst_5 : f32 to vector<1x1x128xf32>
    %13 = arith.addf %11, %12 : vector<1x1x128xf32>
    %14 = math.rsqrt %13 : vector<1x1x128xf32>
    %15 = vector.broadcast %14 : vector<1x1x128xf32> to vector<1x16x128xf32>
    %16 = arith.mulf %6, %15 : vector<1x16x128xf32>
    %c0_6 = arith.constant 0 : index
    %c0_7 = arith.constant 0 : index
    %c0_8 = arith.constant 0 : index
    %17 = vector.load %arg2[%c0_6, %c0_7, %c0_8] : memref<1x1x128xf32, #tpu.memory_space<vmem>>, vector<1x1x128xf32>
    %18 = vector.broadcast %17 : vector<1x1x128xf32> to vector<1x16x128xf32>
    %19 = arith.mulf %16, %18 : vector<1x16x128xf32>
    %c0_9 = arith.constant 0 : index
    %c0_10 = arith.constant 0 : index
    %c0_11 = arith.constant 0 : index
    %20 = vector.load %arg3[%c0_9, %c0_10, %c0_11] : memref<1x1x128xf32, #tpu.memory_space<vmem>>, vector<1x1x128xf32>
    %21 = vector.broadcast %20 : vector<1x1x128xf32> to vector<1x16x128xf32>
    %22 = arith.addf %19, %21 : vector<1x16x128xf32>
    %cst_12 = arith.constant 0.000000e+00 : f32
    %23 = vector.broadcast %cst_12 : f32 to vector<1x16x128xf32>
    %24 = arith.maximumf %22, %23 : vector<1x16x128xf32>
    %c0_13 = arith.constant 0 : index
    %c0_14 = arith.constant 0 : index
    %c0_15 = arith.constant 0 : index
    %25 = vector.load %arg4[%c0_13, %c0_14, %c0_15] : memref<1x16x128xf32, #tpu.memory_space<vmem>>, vector<1x16x128xf32>
    tpu.vector_store %arg4[%c0_13, %c0_14, %c0_15], %24 {strides = array<i32>} : memref<1x16x128xf32, #tpu.memory_space<vmem>>, vector<1x16x128xf32>,
    return
  }
  func.func @transform_0(%arg0: i32) -> (i32, i32, i32) {
    %c0_i32 = arith.constant 0 : i32
    %c0_i32_0 = arith.constant 0 : i32
    %c0_i32_1 = arith.constant 0 : i32
    return %arg0, %c0_i32, %c0_i32_0 : i32, i32, i32
  }
  func.func @transform_1(%arg0: i32) -> (i32, i32, i32) {
    %c0_i32 = arith.constant 0 : i32
    %c0_i32_0 = arith.constant 0 : i32
    %c0_i32_1 = arith.constant 0 : i32
    %c0_i32_2 = arith.constant 0 : i32
    return %c0_i32, %c0_i32_0, %c0_i32_1 : i32, i32, i32
  }
  func.func @transform_2(%arg0: i32) -> (i32, i32, i32) {
    %c0_i32 = arith.constant 0 : i32
    %c0_i32_0 = arith.constant 0 : i32
    %c0_i32_1 = arith.constant 0 : i32
    %c0_i32_2 = arith.constant 0 : i32
    return %c0_i32, %c0_i32_0, %c0_i32_1 : i32, i32, i32
  }
  func.func @transform_3(%arg0: i32) -> (i32, i32, i32) {
    %c0_i32 = arith.constant 0 : i32
    %c0_i32_0 = arith.constant 0 : i32
    %c0_i32_1 = arith.constant 0 : i32
    return %arg0, %c0_i32, %c0_i32_0 : i32, i32, i32
  }
}

module attributes {stable_mosaic.version = 11 : i64} {
  func.func @_gemm_bias_kernel(%arg0: i32, %arg1: i32, %arg2: memref<32x1152xbf16, #tpu.memory_space<vmem>>, %arg3: memref<1152x128xbf16, #tpu.memory_space<vmem>>, %arg4: memref<1x128xf32, #tpu.memory_space<vmem>>, %arg5: memref<32x128xf32, #tpu.memory_space<vmem>>) attributes {dimension_semantics = [#tpu.dimension_semantics<parallel>, #tpu.dimension_semantics<parallel>], iteration_bounds = array<i64: 1, 1>, scalar_prefetch = 0 : i64, scratch_operands = 0 : i64, tpu.core_type = #tpu.core_type<tc>, window_params = [{transform_indices = @transform_0, window_bounds = array<i64: 32, 1152>}, {transform_indices = @transform_1, window_bounds = array<i64: 1152, 128>}, {transform_indices = @transform_2, window_bounds = array<i64: 1, 128>}, {transform_indices = @transform_3, window_bounds = array<i64: 32, 128>}]} {
    %c0 = arith.constant 0 : index
    %c0_0 = arith.constant 0 : index
    %0 = vector.load %arg2[%c0, %c0_0] : memref<32x1152xbf16, #tpu.memory_space<vmem>>, vector<32x1152xbf16>
    %c0_1 = arith.constant 0 : index
    %c0_2 = arith.constant 0 : index
    %1 = vector.load %arg3[%c0_1, %c0_2] : memref<1152x128xbf16, #tpu.memory_space<vmem>>, vector<1152x128xbf16>
    %cst = arith.constant dense<0.000000e+00> : vector<32x128xf32>
    %2 = tpu.matmul %0, %1, %cst {dimension_numbers = #tpu.dot_dimension_numbers<[1], [0], [0], [1], [0, 0, 1, 1], [], []>} : vector<32x1152xbf16>, vector<1152x128xbf16>, vector<32x128xf32> -> vector<32x128xf32>
    %c0_3 = arith.constant 0 : index
    %c0_4 = arith.constant 0 : index
    %3 = vector.load %arg4[%c0_3, %c0_4] : memref<1x128xf32, #tpu.memory_space<vmem>>, vector<1x128xf32>
    %4 = vector.broadcast %3 : vector<1x128xf32> to vector<32x128xf32>
    %5 = arith.addf %2, %4 : vector<32x128xf32>
    %c0_5 = arith.constant 0 : index
    %c0_6 = arith.constant 0 : index
    %6 = vector.load %arg5[%c0_5, %c0_6] : memref<32x128xf32, #tpu.memory_space<vmem>>, vector<32x128xf32>
    tpu.vector_store %arg5[%c0_5, %c0_6], %5 {strides = array<i32>} : memref<32x128xf32, #tpu.memory_space<vmem>>, vector<32x128xf32>,
    return
  }
  func.func @transform_0(%arg0: i32, %arg1: i32) -> (i32, i32) {
    %c0_i32 = arith.constant 0 : i32
    %c0_i32_0 = arith.constant 0 : i32
    return %arg0, %c0_i32 : i32, i32
  }
  func.func @transform_1(%arg0: i32, %arg1: i32) -> (i32, i32) {
    %c0_i32 = arith.constant 0 : i32
    %c0_i32_0 = arith.constant 0 : i32
    return %c0_i32, %arg1 : i32, i32
  }
  func.func @transform_2(%arg0: i32, %arg1: i32) -> (i32, i32) {
    %c0_i32 = arith.constant 0 : i32
    %c0_i32_0 = arith.constant 0 : i32
    return %c0_i32, %arg1 : i32, i32
  }
  func.func @transform_3(%arg0: i32, %arg1: i32) -> (i32, i32) {
    %c0_i32 = arith.constant 0 : i32
    return %arg0, %arg1 : i32, i32
  }
}

module attributes {stable_mosaic.version = 11 : i64} {
  func.func @_instnorm_kernel(%arg0: i32, %arg1: memref<1x16x128xf32, #tpu.memory_space<vmem>>, %arg2: memref<1x1x128xf32, #tpu.memory_space<vmem>>, %arg3: memref<1x1x128xf32, #tpu.memory_space<vmem>>, %arg4: memref<1x16x128xf32, #tpu.memory_space<vmem>>, %arg5: memref<1x16x128xf32, #tpu.memory_space<vmem>>) attributes {dimension_semantics = [#tpu.dimension_semantics<parallel>], iteration_bounds = array<i64: 2>, scalar_prefetch = 0 : i64, scratch_operands = 0 : i64, tpu.core_type = #tpu.core_type<tc>, window_params = [{transform_indices = @transform_0, window_bounds = array<i64: 1, 16, 128>}, {pipeline_mode = #tpu.pipeline_mode<synchronous>, transform_indices = @transform_1, window_bounds = array<i64: 1, 1, 128>}, {pipeline_mode = #tpu.pipeline_mode<synchronous>, transform_indices = @transform_2, window_bounds = array<i64: 1, 1, 128>}, {transform_indices = @transform_3, window_bounds = array<i64: 1, 16, 128>}, {transform_indices = @transform_4, window_bounds = array<i64: 1, 16, 128>}]} {
    %c0 = arith.constant 0 : index
    %c0_0 = arith.constant 0 : index
    %c0_1 = arith.constant 0 : index
    %0 = vector.load %arg1[%c0, %c0_0, %c0_1] : memref<1x16x128xf32, #tpu.memory_space<vmem>>, vector<1x16x128xf32>
    %cst = arith.constant dense<0.000000e+00> : vector<1x128xf32>
    %1 = vector.multi_reduction <add>, %0, %cst [1] : vector<1x16x128xf32> to vector<1x128xf32>
    %2 = vector.shape_cast %1 : vector<1x128xf32> to vector<1x1x128xf32>
    %cst_2 = arith.constant 1.600000e+01 : f32
    %3 = vector.broadcast %cst_2 : f32 to vector<1x1x128xf32>
    %4 = arith.divf %2, %3 : vector<1x1x128xf32>
    %5 = vector.broadcast %4 : vector<1x1x128xf32> to vector<1x16x128xf32>
    %6 = arith.subf %0, %5 : vector<1x16x128xf32>
    %7 = arith.mulf %6, %6 : vector<1x16x128xf32>
    %cst_3 = arith.constant dense<0.000000e+00> : vector<1x128xf32>
    %8 = vector.multi_reduction <add>, %7, %cst_3 [1] : vector<1x16x128xf32> to vector<1x128xf32>
    %9 = vector.shape_cast %8 : vector<1x128xf32> to vector<1x1x128xf32>
    %cst_4 = arith.constant 1.600000e+01 : f32
    %10 = vector.broadcast %cst_4 : f32 to vector<1x1x128xf32>
    %11 = arith.divf %9, %10 : vector<1x1x128xf32>
    %cst_5 = arith.constant 9.99999974E-6 : f32
    %12 = vector.broadcast %cst_5 : f32 to vector<1x1x128xf32>
    %13 = arith.addf %11, %12 : vector<1x1x128xf32>
    %14 = math.rsqrt %13 : vector<1x1x128xf32>
    %15 = vector.broadcast %14 : vector<1x1x128xf32> to vector<1x16x128xf32>
    %16 = arith.mulf %6, %15 : vector<1x16x128xf32>
    %c0_6 = arith.constant 0 : index
    %c0_7 = arith.constant 0 : index
    %c0_8 = arith.constant 0 : index
    %17 = vector.load %arg2[%c0_6, %c0_7, %c0_8] : memref<1x1x128xf32, #tpu.memory_space<vmem>>, vector<1x1x128xf32>
    %18 = vector.broadcast %17 : vector<1x1x128xf32> to vector<1x16x128xf32>
    %19 = arith.mulf %16, %18 : vector<1x16x128xf32>
    %c0_9 = arith.constant 0 : index
    %c0_10 = arith.constant 0 : index
    %c0_11 = arith.constant 0 : index
    %20 = vector.load %arg3[%c0_9, %c0_10, %c0_11] : memref<1x1x128xf32, #tpu.memory_space<vmem>>, vector<1x1x128xf32>
    %21 = vector.broadcast %20 : vector<1x1x128xf32> to vector<1x16x128xf32>
    %22 = arith.addf %19, %21 : vector<1x16x128xf32>
    %c0_12 = arith.constant 0 : index
    %c0_13 = arith.constant 0 : index
    %c0_14 = arith.constant 0 : index
    %23 = vector.load %arg4[%c0_12, %c0_13, %c0_14] : memref<1x16x128xf32, #tpu.memory_space<vmem>>, vector<1x16x128xf32>
    %24 = arith.addf %22, %23 : vector<1x16x128xf32>
    %c0_15 = arith.constant 0 : index
    %c0_16 = arith.constant 0 : index
    %c0_17 = arith.constant 0 : index
    %25 = vector.load %arg5[%c0_15, %c0_16, %c0_17] : memref<1x16x128xf32, #tpu.memory_space<vmem>>, vector<1x16x128xf32>
    tpu.vector_store %arg5[%c0_15, %c0_16, %c0_17], %24 {strides = array<i32>} : memref<1x16x128xf32, #tpu.memory_space<vmem>>, vector<1x16x128xf32>,
    return
  }
  func.func @transform_0(%arg0: i32) -> (i32, i32, i32) {
    %c0_i32 = arith.constant 0 : i32
    %c0_i32_0 = arith.constant 0 : i32
    %c0_i32_1 = arith.constant 0 : i32
    return %arg0, %c0_i32, %c0_i32_0 : i32, i32, i32
  }
  func.func @transform_1(%arg0: i32) -> (i32, i32, i32) {
    %c0_i32 = arith.constant 0 : i32
    %c0_i32_0 = arith.constant 0 : i32
    %c0_i32_1 = arith.constant 0 : i32
    %c0_i32_2 = arith.constant 0 : i32
    return %c0_i32, %c0_i32_0, %c0_i32_1 : i32, i32, i32
  }
  func.func @transform_2(%arg0: i32) -> (i32, i32, i32) {
    %c0_i32 = arith.constant 0 : i32
    %c0_i32_0 = arith.constant 0 : i32
    %c0_i32_1 = arith.constant 0 : i32
    %c0_i32_2 = arith.constant 0 : i32
    return %c0_i32, %c0_i32_0, %c0_i32_1 : i32, i32, i32
  }
  func.func @transform_3(%arg0: i32) -> (i32, i32, i32) {
    %c0_i32 = arith.constant 0 : i32
    %c0_i32_0 = arith.constant 0 : i32
    %c0_i32_1 = arith.constant 0 : i32
    return %arg0, %c0_i32, %c0_i32_0 : i32, i32, i32
  }
  func.func @transform_4(%arg0: i32) -> (i32, i32, i32) {
    %c0_i32 = arith.constant 0 : i32
    %c0_i32_0 = arith.constant 0 : i32
    %c0_i32_1 = arith.constant 0 : i32
    return %arg0, %c0_i32, %c0_i32_0 : i32, i32, i32
  }
}

module attributes {stable_mosaic.version = 11 : i64} {
  func.func @_gemm_bias_kernel(%arg0: i32, %arg1: i32, %arg2: memref<128x1152xbf16, #tpu.memory_space<vmem>>, %arg3: memref<1152x128xbf16, #tpu.memory_space<vmem>>, %arg4: memref<1x128xf32, #tpu.memory_space<vmem>>, %arg5: memref<128x128xf32, #tpu.memory_space<vmem>>) attributes {dimension_semantics = [#tpu.dimension_semantics<parallel>, #tpu.dimension_semantics<parallel>], iteration_bounds = array<i64: 1, 1>, scalar_prefetch = 0 : i64, scratch_operands = 0 : i64, tpu.core_type = #tpu.core_type<tc>, window_params = [{transform_indices = @transform_0, window_bounds = array<i64: 128, 1152>}, {transform_indices = @transform_1, window_bounds = array<i64: 1152, 128>}, {transform_indices = @transform_2, window_bounds = array<i64: 1, 128>}, {transform_indices = @transform_3, window_bounds = array<i64: 128, 128>}]} {
    %c0 = arith.constant 0 : index
    %c0_0 = arith.constant 0 : index
    %0 = vector.load %arg2[%c0, %c0_0] : memref<128x1152xbf16, #tpu.memory_space<vmem>>, vector<128x1152xbf16>
    %c0_1 = arith.constant 0 : index
    %c0_2 = arith.constant 0 : index
    %1 = vector.load %arg3[%c0_1, %c0_2] : memref<1152x128xbf16, #tpu.memory_space<vmem>>, vector<1152x128xbf16>
    %cst = arith.constant dense<0.000000e+00> : vector<128x128xf32>
    %2 = tpu.matmul %0, %1, %cst {dimension_numbers = #tpu.dot_dimension_numbers<[1], [0], [0], [1], [0, 0, 1, 1], [], []>} : vector<128x1152xbf16>, vector<1152x128xbf16>, vector<128x128xf32> -> vector<128x128xf32>
    %c0_3 = arith.constant 0 : index
    %c0_4 = arith.constant 0 : index
    %3 = vector.load %arg4[%c0_3, %c0_4] : memref<1x128xf32, #tpu.memory_space<vmem>>, vector<1x128xf32>
    %4 = vector.broadcast %3 : vector<1x128xf32> to vector<128x128xf32>
    %5 = arith.addf %2, %4 : vector<128x128xf32>
    %c0_5 = arith.constant 0 : index
    %c0_6 = arith.constant 0 : index
    %6 = vector.load %arg5[%c0_5, %c0_6] : memref<128x128xf32, #tpu.memory_space<vmem>>, vector<128x128xf32>
    tpu.vector_store %arg5[%c0_5, %c0_6], %5 {strides = array<i32>} : memref<128x128xf32, #tpu.memory_space<vmem>>, vector<128x128xf32>,
    return
  }
  func.func @transform_0(%arg0: i32, %arg1: i32) -> (i32, i32) {
    %c0_i32 = arith.constant 0 : i32
    %c0_i32_0 = arith.constant 0 : i32
    return %arg0, %c0_i32 : i32, i32
  }
  func.func @transform_1(%arg0: i32, %arg1: i32) -> (i32, i32) {
    %c0_i32 = arith.constant 0 : i32
    %c0_i32_0 = arith.constant 0 : i32
    return %c0_i32, %arg1 : i32, i32
  }
  func.func @transform_2(%arg0: i32, %arg1: i32) -> (i32, i32) {
    %c0_i32 = arith.constant 0 : i32
    %c0_i32_0 = arith.constant 0 : i32
    return %c0_i32, %arg1 : i32, i32
  }
  func.func @transform_3(%arg0: i32, %arg1: i32) -> (i32, i32) {
    %c0_i32 = arith.constant 0 : i32
    return %arg0, %arg1 : i32, i32
  }
}

module attributes {stable_mosaic.version = 11 : i64} {
  func.func @_gemm_bias_kernel(%arg0: i32, %arg1: i32, %arg2: memref<256x640xbf16, #tpu.memory_space<vmem>>, %arg3: memref<640x128xbf16, #tpu.memory_space<vmem>>, %arg4: memref<1x128xf32, #tpu.memory_space<vmem>>, %arg5: memref<256x128xf32, #tpu.memory_space<vmem>>) attributes {dimension_semantics = [#tpu.dimension_semantics<parallel>, #tpu.dimension_semantics<parallel>], iteration_bounds = array<i64: 2, 1>, scalar_prefetch = 0 : i64, scratch_operands = 0 : i64, tpu.core_type = #tpu.core_type<tc>, window_params = [{transform_indices = @transform_0, window_bounds = array<i64: 256, 640>}, {transform_indices = @transform_1, window_bounds = array<i64: 640, 128>}, {transform_indices = @transform_2, window_bounds = array<i64: 1, 128>}, {transform_indices = @transform_3, window_bounds = array<i64: 256, 128>}]} {
    %c0 = arith.constant 0 : index
    %c0_0 = arith.constant 0 : index
    %0 = vector.load %arg2[%c0, %c0_0] : memref<256x640xbf16, #tpu.memory_space<vmem>>, vector<256x640xbf16>
    %c0_1 = arith.constant 0 : index
    %c0_2 = arith.constant 0 : index
    %1 = vector.load %arg3[%c0_1, %c0_2] : memref<640x128xbf16, #tpu.memory_space<vmem>>, vector<640x128xbf16>
    %cst = arith.constant dense<0.000000e+00> : vector<256x128xf32>
    %2 = tpu.matmul %0, %1, %cst {dimension_numbers = #tpu.dot_dimension_numbers<[1], [0], [0], [1], [0, 0, 1, 1], [], []>} : vector<256x640xbf16>, vector<640x128xbf16>, vector<256x128xf32> -> vector<256x128xf32>
    %c0_3 = arith.constant 0 : index
    %c0_4 = arith.constant 0 : index
    %3 = vector.load %arg4[%c0_3, %c0_4] : memref<1x128xf32, #tpu.memory_space<vmem>>, vector<1x128xf32>
    %4 = vector.broadcast %3 : vector<1x128xf32> to vector<256x128xf32>
    %5 = arith.addf %2, %4 : vector<256x128xf32>
    %c0_5 = arith.constant 0 : index
    %c0_6 = arith.constant 0 : index
    %6 = vector.load %arg5[%c0_5, %c0_6] : memref<256x128xf32, #tpu.memory_space<vmem>>, vector<256x128xf32>
    tpu.vector_store %arg5[%c0_5, %c0_6], %5 {strides = array<i32>} : memref<256x128xf32, #tpu.memory_space<vmem>>, vector<256x128xf32>,
    return
  }
  func.func @transform_0(%arg0: i32, %arg1: i32) -> (i32, i32) {
    %c0_i32 = arith.constant 0 : i32
    %c0_i32_0 = arith.constant 0 : i32
    return %arg0, %c0_i32 : i32, i32
  }
  func.func @transform_1(%arg0: i32, %arg1: i32) -> (i32, i32) {
    %c0_i32 = arith.constant 0 : i32
    %c0_i32_0 = arith.constant 0 : i32
    return %c0_i32, %arg1 : i32, i32
  }
  func.func @transform_2(%arg0: i32, %arg1: i32) -> (i32, i32) {
    %c0_i32 = arith.constant 0 : i32
    %c0_i32_0 = arith.constant 0 : i32
    return %c0_i32, %arg1 : i32, i32
  }
  func.func @transform_3(%arg0: i32, %arg1: i32) -> (i32, i32) {
    %c0_i32 = arith.constant 0 : i32
    return %arg0, %arg1 : i32, i32
  }
}

module attributes {stable_mosaic.version = 11 : i64} {
  func.func @_gemm_bias_kernel(%arg0: i32, %arg1: i32, %arg2: memref<256x2688xbf16, #tpu.memory_space<vmem>>, %arg3: memref<2688x128xbf16, #tpu.memory_space<vmem>>, %arg4: memref<1x128xf32, #tpu.memory_space<vmem>>, %arg5: memref<256x128xf32, #tpu.memory_space<vmem>>) attributes {dimension_semantics = [#tpu.dimension_semantics<parallel>, #tpu.dimension_semantics<parallel>], iteration_bounds = array<i64: 2, 1>, scalar_prefetch = 0 : i64, scratch_operands = 0 : i64, tpu.core_type = #tpu.core_type<tc>, window_params = [{transform_indices = @transform_0, window_bounds = array<i64: 256, 2688>}, {transform_indices = @transform_1, window_bounds = array<i64: 2688, 128>}, {transform_indices = @transform_2, window_bounds = array<i64: 1, 128>}, {transform_indices = @transform_3, window_bounds = array<i64: 256, 128>}]} {
    %c0 = arith.constant 0 : index
    %c0_0 = arith.constant 0 : index
    %0 = vector.load %arg2[%c0, %c0_0] : memref<256x2688xbf16, #tpu.memory_space<vmem>>, vector<256x2688xbf16>
    %c0_1 = arith.constant 0 : index
    %c0_2 = arith.constant 0 : index
    %1 = vector.load %arg3[%c0_1, %c0_2] : memref<2688x128xbf16, #tpu.memory_space<vmem>>, vector<2688x128xbf16>
    %cst = arith.constant dense<0.000000e+00> : vector<256x128xf32>
    %2 = tpu.matmul %0, %1, %cst {dimension_numbers = #tpu.dot_dimension_numbers<[1], [0], [0], [1], [0, 0, 1, 1], [], []>} : vector<256x2688xbf16>, vector<2688x128xbf16>, vector<256x128xf32> -> vector<256x128xf32>
    %c0_3 = arith.constant 0 : index
    %c0_4 = arith.constant 0 : index
    %3 = vector.load %arg4[%c0_3, %c0_4] : memref<1x128xf32, #tpu.memory_space<vmem>>, vector<1x128xf32>
    %4 = vector.broadcast %3 : vector<1x128xf32> to vector<256x128xf32>
    %5 = arith.addf %2, %4 : vector<256x128xf32>
    %c0_5 = arith.constant 0 : index
    %c0_6 = arith.constant 0 : index
    %6 = vector.load %arg5[%c0_5, %c0_6] : memref<256x128xf32, #tpu.memory_space<vmem>>, vector<256x128xf32>
    tpu.vector_store %arg5[%c0_5, %c0_6], %5 {strides = array<i32>} : memref<256x128xf32, #tpu.memory_space<vmem>>, vector<256x128xf32>,
    return
  }
  func.func @transform_0(%arg0: i32, %arg1: i32) -> (i32, i32) {
    %c0_i32 = arith.constant 0 : i32
    %c0_i32_0 = arith.constant 0 : i32
    return %arg0, %c0_i32 : i32, i32
  }
  func.func @transform_1(%arg0: i32, %arg1: i32) -> (i32, i32) {
    %c0_i32 = arith.constant 0 : i32
    %c0_i32_0 = arith.constant 0 : i32
    return %c0_i32, %arg1 : i32, i32
  }
  func.func @transform_2(%arg0: i32, %arg1: i32) -> (i32, i32) {
    %c0_i32 = arith.constant 0 : i32
    %c0_i32_0 = arith.constant 0 : i32
    return %c0_i32, %arg1 : i32, i32
  }
  func.func @transform_3(%arg0: i32, %arg1: i32) -> (i32, i32) {
    %c0_i32 = arith.constant 0 : i32
    return %arg0, %arg1 : i32, i32
  }
}

</mosaic_0001>

<bundles_post_ra>
// kernel: image_transformation_network.32
= control target key start
LH: loop header
LB: loop body
LE: loop exit
PB: predicated region body
PF: predicated region fallthrough
CT: control target
= control target key end

     0   :  { %s629_s12 = smov 0   ;;  %s1183_s0 = inlined_call_operand.vmem [shape: f32[2,256,128], index: 0, kind: input, shape index: {}]   ;;  %s1184_s1 = inlined_call_operand.vmem [shape: f32[1,1,128], index: 1, kind: input, shape index: {}]   ;;  %s1185_s2 = inlined_call_operand.vmem [shape: f32[1,1,128], index: 2, kind: input, shape index: {}]   ;;  %s1186_s3 = inlined_call_operand.vmem [shape: f32[2,256,32], index: 3, kind: output, shape index: {}]  }
   0x1 LB: > { %s576_s13 = sadd.s32 4294967295, %s607_s12   ;;  %p580_p0 = scmp.ge.s32.totalorder %s607_s12, 1  ;;  %s607_s12 = sphi %s629_s12, %s13_s12  }
   0x2   : > { %p137_p1 = scmp.lt.s32.totalorder %s607_s12, 3 }
   0x4   : > { %p138_p2 = pnand %p580_p0, %p137_p1 }
   0x5   : > { %p161_p3 = scmp.lt.s32.totalorder (!%p138_p2), %s576_s13, 1 }
   0x6   : > { %141 = sbr.rel (%p138_p2) target bundleno = 226 (0xe2), region = 32 }
   0xb   : > { %s1188_s13 = smov (!%p161_p3, %s576_s13), 1  ;;  %vm488_vm0 = vcmask 261120  }
   0xc   : > { %s589_s14 = sshll.u32 %s1188_s13, 8 }
   0xd   : > { %s645_s17 = scalar_lea.vmem %s1183_s0, %s589_s14  ;;  %s1014_s24 = scalar_lea.vmem %s1186_s3, %s589_s14 }
   0xe   : > { %v648_v0 = vld [vmem:[%s645_s17] sm:$0xff]  ;;  %v651_v1 = vld [vmem:[%s645_s17 + $0x8] sm:$0xff]  ;;  %v654_v2 = vld [vmem:[%s645_s17 + $0x10] sm:$0xff] }
   0xf   : > { %v203_v3 = vadd.f32 %v651_v1, %v648_v0  ;;  %v659_v4 = vld [vmem:[%s645_s17 + $0x18] sm:$0xff]  ;;  %v663_v6 = vld [vmem:[%s645_s17 + $0x20] sm:$0xff]  ;;  %v667_v8 = vld [vmem:[%s645_s17 + $0x28] sm:$0xff] }
  0x10   : > { %v671_v10 = vld [vmem:[%s645_s17 + $0x30] sm:$0xff]  ;;  %v675_v12 = vld [vmem:[%s645_s17 + $0x38] sm:$0xff]  ;;  %v679_v14 = vld [vmem:[%s645_s17 + $0x40] sm:$0xff] }
  0x11   : > { %v204_v5 = vadd.f32 %v203_v3, %v654_v2  ;;  %v683_v16 = vld [vmem:[%s645_s17 + $0x48] sm:$0xff]  ;;  %v687_v18 = vld [vmem:[%s645_s17 + $0x50] sm:$0xff]  ;;  %v691_v20 = vld [vmem:[%s645_s17 + $0x58] sm:$0xff] }
  0x12   : > { %v695_v22 = vld [vmem:[%s645_s17 + $0x60] sm:$0xff]  ;;  %v699_v24 = vld [vmem:[%s645_s17 + $0x68] sm:$0xff]  ;;  %v703_v26 = vld [vmem:[%s645_s17 + $0x70] sm:$0xff] }
  0x13   : > { %v205_v7 = vadd.f32 %v204_v5, %v659_v4  ;;  %v707_v28 = vld [vmem:[%s645_s17 + $0x78] sm:$0xff]  ;;  %v711_v30 = vld [vmem:[%s645_s17 + $0x80] sm:$0xff]  ;;  %v715_v32 = vld [vmem:[%s645_s17 + $0x88] sm:$0xff] }
  0x14   : > { %v719_v34 = vld [vmem:[%s645_s17 + $0x90] sm:$0xff]  ;;  %v723_v36 = vld [vmem:[%s645_s17 + $0x98] sm:$0xff]  ;;  %v727_v38 = vld [vmem:[%s645_s17 + $0xa0] sm:$0xff] }
  0x15   : > { %v206_v9 = vadd.f32 %v205_v7, %v663_v6  ;;  %v731_v40 = vld [vmem:[%s645_s17 + $0xa8] sm:$0xff]  ;;  %v735_v42 = vld [vmem:[%s645_s17 + $0xb0] sm:$0xff]  ;;  %v739_v44 = vld [vmem:[%s645_s17 + $0xb8] sm:$0xff] }
  0x16   : > { %v743_v46 = vld [vmem:[%s645_s17 + $0xc0] sm:$0xff]  ;;  %v747_v48 = vld [vmem:[%s645_s17 + $0xc8] sm:$0xff]  ;;  %v751_v50 = vld [vmem:[%s645_s17 + $0xd0] sm:$0xff] }
  0x17   : > { %v207_v11 = vadd.f32 %v206_v9, %v667_v8  ;;  %v755_v52 = vld [vmem:[%s645_s17 + $0xd8] sm:$0xff]  ;;  %v759_v54 = vld [vmem:[%s645_s17 + $0xe0] sm:$0xff]  ;;  %v763_v56 = vld [vmem:[%s645_s17 + $0xe8] sm:$0xff] }
  0x18   : > { %v767_v58 = vld [vmem:[%s645_s17 + $0xf0] sm:$0xff]  ;;  %v771_v60 = vld [vmem:[%s645_s17 + $0xf8] sm:$0xff] }
  0x19   : > { %v208_v13 = vadd.f32 %v207_v11, %v671_v10 }
  0x1b   : > { %v209_v15 = vadd.f32 %v208_v13, %v675_v12 }
  0x1d   : > { %v210_v17 = vadd.f32 %v209_v15, %v679_v14 }
  0x1f   : > { %v211_v19 = vadd.f32 %v210_v17, %v683_v16 }
  0x21   : > { %v212_v21 = vadd.f32 %v211_v19, %v687_v18 }
  0x23   : > { %v213_v23 = vadd.f32 %v212_v21, %v691_v20 }
  0x25   : > { %v214_v25 = vadd.f32 %v213_v23, %v695_v22 }
  0x27   : > { %v215_v27 = vadd.f32 %v214_v25, %v699_v24 }
  0x29   : > { %v216_v29 = vadd.f32 %v215_v27, %v703_v26 }
  0x2b   : > { %v217_v31 = vadd.f32 %v216_v29, %v707_v28 }
  0x2d   : > { %v218_v33 = vadd.f32 %v217_v31, %v711_v30 }
  0x2f   : > { %v219_v35 = vadd.f32 %v218_v33, %v715_v32 }
  0x31   : > { %v220_v37 = vadd.f32 %v219_v35, %v719_v34 }
  0x33   : > { %v221_v39 = vadd.f32 %v220_v37, %v723_v36 }
  0x35   : > { %v222_v41 = vadd.f32 %v221_v39, %v727_v38 }
  0x37   : > { %v223_v43 = vadd.f32 %v222_v41, %v731_v40 }
  0x39   : > { %v224_v45 = vadd.f32 %v223_v43, %v735_v42 }
  0x3b   : > { %v225_v47 = vadd.f32 %v224_v45, %v739_v44 }
  0x3d   : > { %v226_v49 = vadd.f32 %v225_v47, %v743_v46 }
  0x3f   : > { %v227_v51 = vadd.f32 %v226_v49, %v747_v48 }
  0x41   : > { %v228_v53 = vadd.f32 %v227_v51, %v751_v50 }
  0x43   : > { %v229_v55 = vadd.f32 %v228_v53, %v755_v52 }
  0x45   : > { %v230_v57 = vadd.f32 %v229_v55, %v759_v54 }
  0x47   : > { %v231_v59 = vadd.f32 %v230_v57, %v763_v56 }
  0x49   : > { %v232_v61 = vadd.f32 %v231_v59, %v767_v58 }
  0x4b   : > { %v233_v62 = vadd.f32 %v232_v61, %v771_v60 }
  0x4d   : > { %v234_v63 = vrot.slane %v233_v62, 4 }
  0x4f   : > { %v235_v3 = vadd.f32 %v234_v63, %v233_v62 }
  0x51   : > { %v236_v5 = vrot.slane %v235_v3, 2 }
  0x53   : > { %v237_v7 = vadd.f32 %v236_v5, %v235_v3 }
  0x55   : > { %v238_v9 = vrot.slane %v237_v7, 1 }
  0x57   : > { %v239_v11 = vadd.f32 %v238_v9, %v237_v7 }
  0x59   : > { %v775_v13 = vmul.f32 0.00390625, %v239_v11 }
  0x5b   : > { %v779_v15 = vsub.f32 %v648_v0, %v775_v13  ;;  %v783_v17 = vsub.f32 %v651_v1, %v775_v13  ;;  %v787_v19 = vsub.f32 %v654_v2, %v775_v13  ;;  %v791_v21 = vsub.f32 %v659_v4, %v775_v13 }
  0x5c   : > { %v799_v0 = vsub.f32 %v663_v6, %v775_v13  ;;  %v805_v2 = vsub.f32 %v667_v8, %v775_v13  ;;  %v811_v29 = vsub.f32 %v671_v10, %v775_v13  ;;  %v817_v33 = vsub.f32 %v675_v12, %v775_v13 }
  0x5d   : > { %v274_v23 = vmul.f32 %v779_v15, %v779_v15  ;;  %v275_v25 = vmul.f32 %v783_v17, %v783_v17  ;;  %v276_v1 = vmul.f32 %v787_v19, %v787_v19  ;;  %v277_v4 = vmul.f32 %v791_v21, %v791_v21 }
  0x5e   : > { %v278_v31 = vmul.f32 %v799_v0, %v799_v0  ;;  %v279_v8 = vmul.f32 %v805_v2, %v805_v2  ;;  %v823_v37 = vsub.f32 %v679_v14, %v775_v13  ;;  %v280_v10 = vmul.f32 %v811_v29, %v811_v29 }
  0x5f   : > { %v306_v27 = vadd.f32 %v275_v25, %v274_v23  ;;  %v829_v41 = vsub.f32 %v683_v16, %v775_v13  ;;  %v281_v12 = vmul.f32 %v817_v33, %v817_v33  ;;  %v835_v45 = vsub.f32 %v687_v18, %v775_v13 }
  0x60   : > { %v282_v14 = vmul.f32 %v823_v37, %v823_v37  ;;  %v841_v49 = vsub.f32 %v691_v20, %v775_v13  ;;  %v847_v53 = vsub.f32 %v695_v22, %v775_v13  ;;  %v853_v57 = vsub.f32 %v699_v24, %v775_v13 }
  0x61   : > { %v307_v6 = vadd.f32 %v306_v27, %v276_v1  ;;  %v283_v16 = vmul.f32 %v829_v41, %v829_v41  ;;  %v284_v18 = vmul.f32 %v835_v45, %v835_v45  ;;  %v859_v61 = vsub.f32 %v703_v26, %v775_v13 }
  0x62   : > { %v285_v20 = vmul.f32 %v841_v49, %v841_v49  ;;  %v286_v22 = vmul.f32 %v847_v53, %v847_v53  ;;  %v865_v63 = vsub.f32 %v707_v28, %v775_v13  ;;  %v287_v24 = vmul.f32 %v853_v57, %v853_v57 }
  0x63   : > { %v308_v35 = vadd.f32 %v307_v6, %v277_v4  ;;  %v871_v5 = vsub.f32 %v711_v30, %v775_v13  ;;  %v288_v26 = vmul.f32 %v859_v61, %v859_v61  ;;  %v877_v9 = vsub.f32 %v715_v32, %v775_v13 }
  0x64   : > { %v289_v28 = vmul.f32 %v865_v63, %v865_v63  ;;  %v883_v23 = vsub.f32 %v719_v34, %v775_v13  ;;  %v889_v1 = vsub.f32 %v723_v36, %v775_v13  ;;  %v895_v27 = vsub.f32 %v727_v38, %v775_v13 }
  0x65   : > { %v309_v39 = vadd.f32 %v308_v35, %v278_v31  ;;  %v290_v30 = vmul.f32 %v871_v5, %v871_v5  ;;  %v291_v32 = vmul.f32 %v877_v9, %v877_v9  ;;  %v901_v6 = vsub.f32 %v731_v40, %v775_v13 }
  0x66   : > { %v292_v34 = vmul.f32 %v883_v23, %v883_v23  ;;  %v293_v36 = vmul.f32 %v889_v1, %v889_v1  ;;  %v907_v35 = vsub.f32 %v735_v42, %v775_v13  ;;  %v294_v38 = vmul.f32 %v895_v27, %v895_v27 }
  0x67   : > { %v310_v43 = vadd.f32 %v309_v39, %v279_v8  ;;  %v913_v39 = vsub.f32 %v739_v44, %v775_v13  ;;  %v295_v40 = vmul.f32 %v901_v6, %v901_v6 }
  0x68   : > { %v296_v42 = vmul.f32 %v907_v35, %v907_v35 }
  0x69   : > { %v311_v47 = vadd.f32 %v310_v43, %v280_v10  ;;  %v919_v43 = vsub.f32 %v743_v46, %v775_v13  ;;  %v297_v44 = vmul.f32 %v913_v39, %v913_v39 }
  0x6b   : > { %v312_v51 = vadd.f32 %v311_v47, %v281_v12  ;;  %v925_v47 = vsub.f32 %v747_v48, %v775_v13  ;;  %v298_v46 = vmul.f32 %v919_v43, %v919_v43 }
  0x6d   : > { %v313_v55 = vadd.f32 %v312_v51, %v282_v14  ;;  %v931_v51 = vsub.f32 %v751_v50, %v775_v13  ;;  %v299_v48 = vmul.f32 %v925_v47, %v925_v47 }
  0x6f   : > { %v314_v59 = vadd.f32 %v313_v55, %v283_v16  ;;  %v937_v55 = vsub.f32 %v755_v52, %v775_v13  ;;  %v300_v50 = vmul.f32 %v931_v51, %v931_v51 }
  0x71   : > { %v315_v62 = vadd.f32 %v314_v59, %v284_v18  ;;  %v943_v59 = vsub.f32 %v759_v54, %v775_v13  ;;  %v301_v52 = vmul.f32 %v937_v55, %v937_v55 }
  0x73   : > { %v316_v3 = vadd.f32 %v315_v62, %v285_v20  ;;  %v949_v62 = vsub.f32 %v763_v56, %v775_v13  ;;  %v302_v54 = vmul.f32 %v943_v59, %v943_v59 }
  0x75   : > { %v317_v7 = vadd.f32 %v316_v3, %v286_v22  ;;  %v955_v3 = vsub.f32 %v767_v58, %v775_v13  ;;  %v303_v56 = vmul.f32 %v949_v62, %v949_v62 }
  0x77   : > { %v318_v11 = vadd.f32 %v317_v7, %v287_v24  ;;  %v961_v7 = vsub.f32 %v771_v60, %v775_v13 }
  0x79   : > { %v319_v25 = vadd.f32 %v318_v11, %v288_v26  ;;  %v304_v11 = vmul.f32 %v955_v3, %v955_v3  ;;  %v305_v58 = vmul.f32 %v961_v7, %v961_v7 }
  0x7b   : > { %v320_v4 = vadd.f32 %v319_v25, %v289_v28 }
  0x7d   : > { %v321_v31 = vadd.f32 %v320_v4, %v290_v30 }
  0x7f   : > { %v322_v8 = vadd.f32 %v321_v31, %v291_v32 }
  0x81   : > { %v323_v10 = vadd.f32 %v322_v8, %v292_v34 }
  0x83   : > { %v324_v12 = vadd.f32 %v323_v10, %v293_v36 }
  0x85   : > { %v325_v14 = vadd.f32 %v324_v12, %v294_v38  ;;  %v974_v12 = vld [vmem:[%s1184_s1] ss:$0 sm:$0xff] }
  0x87   : > { %v326_v16 = vadd.f32 %v325_v14, %v295_v40 }
  0x89   : > { %v327_v18 = vadd.f32 %v326_v16, %v296_v42 }
  0x8b   : > { %v328_v20 = vadd.f32 %v327_v18, %v297_v44 }
  0x8d   : > { %v329_v22 = vadd.f32 %v328_v20, %v298_v46  ;;  %v987_v46 = vld [vmem:[%s1185_s2] ss:$0 sm:$0xff] }
  0x8f   : > { %v330_v24 = vadd.f32 %v329_v22, %v299_v48 }
  0x91   : > { %v331_v26 = vadd.f32 %v330_v24, %v300_v50 }
  0x93   : > { %v332_v28 = vadd.f32 %v331_v26, %v301_v52 }
  0x95   : > { %v333_v30 = vadd.f32 %v332_v28, %v302_v54 }
  0x97   : > { %v334_v25 = vadd.f32 %v333_v30, %v303_v56 }
  0x99   : > { %v335_v32 = vadd.f32 %v334_v25, %v304_v11 }
  0x9b   : > { %v336_v4 = vadd.f32 %v335_v32, %v305_v58 }
  0x9d   : > { %v337_v34 = vrot.slane %v336_v4, 4 }
  0x9f   : > { %v338_v31 = vadd.f32 %v337_v34, %v336_v4 }
  0xa1   : > { %v339_v36 = vrot.slane %v338_v31, 2 }
  0xa3   : > { %v340_v8 = vadd.f32 %v339_v36, %v338_v31 }
  0xa5   : > { %v341_v60 = vrot.slane %v340_v8, 1 }
  0xa7   : > { %v342_v13 = vadd.f32 %v341_v60, %v340_v8 }
  0xa9   : > { %v343_v38 = vmul.f32 0.00390625, %v342_v13 }
  0xab   : > { %v344_v10 = vadd.f32 1e-05, %v343_v38 }
  0xad   : > { %599 = vrsqrt.f32 %v344_v10 }
  0xba   : > { %v969_v40 = vpop.eup %599 }
  0xbb   : > { %v346_v42 = vmul.f32 %v969_v40, %v779_v15  ;;  %v347_v14 = vmul.f32 %v969_v40, %v783_v17  ;;  %v348_v44 = vmul.f32 %v969_v40, %v787_v19  ;;  %v349_v16 = vmul.f32 %v969_v40, %v791_v21 }
  0xbc   : > { %v350_v18 = vmul.f32 %v969_v40, %v799_v0  ;;  %v351_v15 = vmul.f32 %v969_v40, %v805_v2  ;;  %v352_v17 = vmul.f32 %v969_v40, %v811_v29  ;;  %v353_v19 = vmul.f32 %v969_v40, %v817_v33 }
  0xbd   : > { %v385_v21 = vmul.f32 %v974_v12, %v346_v42  ;;  %v386_v48 = vmul.f32 %v974_v12, %v347_v14  ;;  %v387_v20 = vmul.f32 %v974_v12, %v348_v44  ;;  %v388_v50 = vmul.f32 %v974_v12, %v349_v16 }
  0xbe   : > { %v389_v0 = vmul.f32 %v974_v12, %v350_v18  ;;  %v390_v22 = vmul.f32 %v974_v12, %v351_v15  ;;  %v391_v2 = vmul.f32 %v974_v12, %v352_v17  ;;  %v392_v52 = vmul.f32 %v974_v12, %v353_v19 }
  0xbf   : > { %v424_v29 = vadd.f32 %v987_v46, %v385_v21  ;;  %v425_v33 = vadd.f32 %v987_v46, %v386_v48  ;;  %v426_v24 = vadd.f32 %v987_v46, %v387_v20  ;;  %v427_v54 = vadd.f32 %v987_v46, %v388_v50 }
  0xc0   : > { %v428_v26 = vadd.f32 %v987_v46, %v389_v0  ;;  %v429_v56 = vadd.f32 %v987_v46, %v390_v22  ;;  %v430_v28 = vadd.f32 %v987_v46, %v391_v2  ;;  %v431_v11 = vadd.f32 %v987_v46, %v392_v52 }
  0xc1   : > { %v456_v30 = vmax.f32 %v424_v29, 0.0  ;;  %v457_v58 = vmax.f32 %v425_v33, 0.0  ;;  %v458_v25 = vmax.f32 %v426_v24, 0.0  ;;  %v459_v32 = vmax.f32 %v427_v54, 0.0 }
  0xc2   : > { %v460_v4 = vmax.f32 %v428_v26, 0.0  ;;  %v461_v34 = vmax.f32 %v429_v56, 0.0  ;;  %v462_v31 = vmax.f32 %v430_v28, 0.0  ;;  %v463_v36 = vmax.f32 %v431_v11, 0.0 }
  0xc3   : > { %489 = vst.msk [vmem:[%s1014_s24] sm:$0xff] %vm488_vm0, %v456_v30  ;;  %490 = vst.msk [vmem:[%s1014_s24 + $0x8] sm:$0xff] %vm488_vm0, %v457_v58  ;;  %v354_v8 = vmul.f32 %v969_v40, %v823_v37  ;;  %v355_v60 = vmul.f32 %v969_v40, %v829_v41  ;;  %v356_v13 = vmul.f32 %v969_v40, %v835_v45 }
  0xc4   : > { %491 = vst.msk [vmem:[%s1014_s24 + $0x10] sm:$0xff] %vm488_vm0, %v458_v25  ;;  %492 = vst.msk [vmem:[%s1014_s24 + $0x18] sm:$0xff] %vm488_vm0, %v459_v32  ;;  %v357_v38 = vmul.f32 %v969_v40, %v841_v49  ;;  %v358_v37 = vmul.f32 %v969_v40, %v847_v53  ;;  %v359_v41 = vmul.f32 %v969_v40, %v853_v57 }
  0xc5   : > { %493 = vst.msk [vmem:[%s1014_s24 + $0x20] sm:$0xff] %vm488_vm0, %v460_v4  ;;  %494 = vst.msk [vmem:[%s1014_s24 + $0x28] sm:$0xff] %vm488_vm0, %v461_v34  ;;  %v360_v45 = vmul.f32 %v969_v40, %v859_v61  ;;  %v361_v49 = vmul.f32 %v969_v40, %v865_v63  ;;  %v393_v10 = vmul.f32 %v974_v12, %v354_v8 }
  0xc6   : > { %495 = vst.msk [vmem:[%s1014_s24 + $0x30] sm:$0xff] %vm488_vm0, %v462_v31  ;;  %496 = vst.msk [vmem:[%s1014_s24 + $0x38] sm:$0xff] %vm488_vm0, %v463_v36  ;;  %v394_v42 = vmul.f32 %v974_v12, %v355_v60  ;;  %v395_v14 = vmul.f32 %v974_v12, %v356_v13  ;;  %v396_v44 = vmul.f32 %v974_v12, %v357_v38 }
  0xc7   : > { %v397_v16 = vmul.f32 %v974_v12, %v358_v37  ;;  %v398_v53 = vmul.f32 %v974_v12, %v359_v41  ;;  %v399_v57 = vmul.f32 %v974_v12, %v360_v45  ;;  %v400_v18 = vmul.f32 %v974_v12, %v361_v49 }
  0xc8   : > { %v432_v61 = vadd.f32 %v987_v46, %v393_v10  ;;  %v433_v63 = vadd.f32 %v987_v46, %v394_v42  ;;  %v434_v15 = vadd.f32 %v987_v46, %v395_v14  ;;  %v435_v17 = vadd.f32 %v987_v46, %v396_v44 }
  0xc9   : > { %v436_v19 = vadd.f32 %v987_v46, %v397_v16  ;;  %v437_v21 = vadd.f32 %v987_v46, %v398_v53  ;;  %v438_v48 = vadd.f32 %v987_v46, %v399_v57  ;;  %v439_v20 = vadd.f32 %v987_v46, %v400_v18 }
  0xca   : > { %v464_v50 = vmax.f32 %v432_v61, 0.0  ;;  %v465_v0 = vmax.f32 %v433_v63, 0.0  ;;  %v466_v22 = vmax.f32 %v434_v15, 0.0  ;;  %v467_v2 = vmax.f32 %v435_v17, 0.0 }
  0xcb   : > { %v468_v52 = vmax.f32 %v436_v19, 0.0  ;;  %v469_v29 = vmax.f32 %v437_v21, 0.0  ;;  %v470_v33 = vmax.f32 %v438_v48, 0.0  ;;  %v471_v24 = vmax.f32 %v439_v20, 0.0 }
  0xcc   : > { %497 = vst.msk [vmem:[%s1014_s24 + $0x40] sm:$0xff] %vm488_vm0, %v464_v50  ;;  %498 = vst.msk [vmem:[%s1014_s24 + $0x48] sm:$0xff] %vm488_vm0, %v465_v0  ;;  %v362_v54 = vmul.f32 %v969_v40, %v871_v5  ;;  %v363_v26 = vmul.f32 %v969_v40, %v877_v9  ;;  %v364_v56 = vmul.f32 %v969_v40, %v883_v23 }
  0xcd   : > { %499 = vst.msk [vmem:[%s1014_s24 + $0x50] sm:$0xff] %vm488_vm0, %v466_v22  ;;  %500 = vst.msk [vmem:[%s1014_s24 + $0x58] sm:$0xff] %vm488_vm0, %v467_v2  ;;  %v365_v28 = vmul.f32 %v969_v40, %v889_v1  ;;  %v366_v5 = vmul.f32 %v969_v40, %v895_v27  ;;  %v367_v9 = vmul.f32 %v969_v40, %v901_v6 }
  0xce   : > { %501 = vst.msk [vmem:[%s1014_s24 + $0x60] sm:$0xff] %vm488_vm0, %v468_v52  ;;  %502 = vst.msk [vmem:[%s1014_s24 + $0x68] sm:$0xff] %vm488_vm0, %v469_v29  ;;  %v368_v23 = vmul.f32 %v969_v40, %v907_v35  ;;  %v369_v1 = vmul.f32 %v969_v40, %v913_v39  ;;  %v401_v11 = vmul.f32 %v974_v12, %v362_v54 }
  0xcf   : > { %503 = vst.msk [vmem:[%s1014_s24 + $0x70] sm:$0xff] %vm488_vm0, %v470_v33  ;;  %504 = vst.msk [vmem:[%s1014_s24 + $0x78] sm:$0xff] %vm488_vm0, %v471_v24  ;;  %v402_v30 = vmul.f32 %v974_v12, %v363_v26  ;;  %v403_v58 = vmul.f32 %v974_v12, %v364_v56  ;;  %v404_v25 = vmul.f32 %v974_v12, %v365_v28 }
  0xd0   : > { %v405_v32 = vmul.f32 %v974_v12, %v366_v5  ;;  %v406_v27 = vmul.f32 %v974_v12, %v367_v9  ;;  %v407_v6 = vmul.f32 %v974_v12, %v368_v23  ;;  %v408_v4 = vmul.f32 %v974_v12, %v369_v1 }
  0xd1   : > { %v440_v35 = vadd.f32 %v987_v46, %v401_v11  ;;  %v441_v39 = vadd.f32 %v987_v46, %v402_v30  ;;  %v442_v34 = vadd.f32 %v987_v46, %v403_v58  ;;  %v443_v31 = vadd.f32 %v987_v46, %v404_v25 }
  0xd2   : > { %v444_v36 = vadd.f32 %v987_v46, %v405_v32  ;;  %v445_v8 = vadd.f32 %v987_v46, %v406_v27  ;;  %v446_v60 = vadd.f32 %v987_v46, %v407_v6  ;;  %v447_v13 = vadd.f32 %v987_v46, %v408_v4 }
  0xd3   : > { %v472_v38 = vmax.f32 %v440_v35, 0.0  ;;  %v473_v37 = vmax.f32 %v441_v39, 0.0  ;;  %v474_v41 = vmax.f32 %v442_v34, 0.0  ;;  %v475_v45 = vmax.f32 %v443_v31, 0.0 }
  0xd4   : > { %v476_v49 = vmax.f32 %v444_v36, 0.0  ;;  %v477_v10 = vmax.f32 %v445_v8, 0.0  ;;  %v478_v42 = vmax.f32 %v446_v60, 0.0  ;;  %v479_v14 = vmax.f32 %v447_v13, 0.0 }
  0xd5   : > { %505 = vst.msk [vmem:[%s1014_s24 + $0x80] sm:$0xff] %vm488_vm0, %v472_v38  ;;  %506 = vst.msk [vmem:[%s1014_s24 + $0x88] sm:$0xff] %vm488_vm0, %v473_v37  ;;  %v370_v44 = vmul.f32 %v969_v40, %v919_v43  ;;  %v371_v16 = vmul.f32 %v969_v40, %v925_v47  ;;  %v372_v53 = vmul.f32 %v969_v40, %v931_v51 }
  0xd6   : > { %507 = vst.msk [vmem:[%s1014_s24 + $0x90] sm:$0xff] %vm488_vm0, %v474_v41  ;;  %508 = vst.msk [vmem:[%s1014_s24 + $0x98] sm:$0xff] %vm488_vm0, %v475_v45  ;;  %v373_v57 = vmul.f32 %v969_v40, %v937_v55  ;;  %v374_v43 = vmul.f32 %v969_v40, %v943_v59  ;;  %v375_v47 = vmul.f32 %v969_v40, %v949_v62 }
  0xd7   : > { %509 = vst.msk [vmem:[%s1014_s24 + $0xa0] sm:$0xff] %vm488_vm0, %v476_v49  ;;  %510 = vst.msk [vmem:[%s1014_s24 + $0xa8] sm:$0xff] %vm488_vm0, %v477_v10  ;;  %v376_v51 = vmul.f32 %v969_v40, %v955_v3  ;;  %v377_v55 = vmul.f32 %v969_v40, %v961_v7  ;;  %v409_v18 = vmul.f32 %v974_v12, %v370_v44 }
  0xd8   : > { %511 = vst.msk [vmem:[%s1014_s24 + $0xb0] sm:$0xff] %vm488_vm0, %v478_v42  ;;  %512 = vst.msk [vmem:[%s1014_s24 + $0xb8] sm:$0xff] %vm488_vm0, %v479_v14  ;;  %v410_v61 = vmul.f32 %v974_v12, %v371_v16  ;;  %v411_v63 = vmul.f32 %v974_v12, %v372_v53  ;;  %v412_v15 = vmul.f32 %v974_v12, %v373_v57 }
  0xd9   : > { %v413_v17 = vmul.f32 %v974_v12, %v374_v43  ;;  %v414_v59 = vmul.f32 %v974_v12, %v375_v47  ;;  %v415_v62 = vmul.f32 %v974_v12, %v376_v51  ;;  %v416_v19 = vmul.f32 %v974_v12, %v377_v55 }
  0xda   : > { %v448_v3 = vadd.f32 %v987_v46, %v409_v18  ;;  %v449_v7 = vadd.f32 %v987_v46, %v410_v61  ;;  %v450_v40 = vadd.f32 %v987_v46, %v411_v63  ;;  %v451_v21 = vadd.f32 %v987_v46, %v412_v15 }
  0xdb   : > { %v452_v48 = vadd.f32 %v987_v46, %v413_v17  ;;  %v453_v20 = vadd.f32 %v987_v46, %v414_v59  ;;  %v454_v12 = vadd.f32 %v987_v46, %v415_v62  ;;  %v455_v50 = vadd.f32 %v987_v46, %v416_v19 }
  0xdc   : > { %v480_v0 = vmax.f32 %v448_v3, 0.0  ;;  %v481_v22 = vmax.f32 %v449_v7, 0.0  ;;  %v482_v2 = vmax.f32 %v450_v40, 0.0  ;;  %v483_v52 = vmax.f32 %v451_v21, 0.0 }
  0xdd   : > { %v484_v29 = vmax.f32 %v452_v48, 0.0  ;;  %v485_v33 = vmax.f32 %v453_v20, 0.0  ;;  %v486_v24 = vmax.f32 %v454_v12, 0.0  ;;  %v487_v54 = vmax.f32 %v455_v50, 0.0 }
  0xde   : > { %513 = vst.msk [vmem:[%s1014_s24 + $0xc0] sm:$0xff] %vm488_vm0, %v480_v0  ;;  %514 = vst.msk [vmem:[%s1014_s24 + $0xc8] sm:$0xff] %vm488_vm0, %v481_v22 }
  0xdf   : > { %515 = vst.msk [vmem:[%s1014_s24 + $0xd0] sm:$0xff] %vm488_vm0, %v482_v2  ;;  %516 = vst.msk [vmem:[%s1014_s24 + $0xd8] sm:$0xff] %vm488_vm0, %v483_v52 }
  0xe0   : > { %517 = vst.msk [vmem:[%s1014_s24 + $0xe0] sm:$0xff] %vm488_vm0, %v484_v29  ;;  %518 = vst.msk [vmem:[%s1014_s24 + $0xe8] sm:$0xff] %vm488_vm0, %v485_v33 }
  0xe1   : > { %519 = vst.msk [vmem:[%s1014_s24 + $0xf0] sm:$0xff] %vm488_vm0, %v486_v24  ;;  %520 = vst.msk [vmem:[%s1014_s24 + $0xf8] sm:$0xff] %vm488_vm0, %v487_v54 }
  0xe2 PF: > { %s13_s12 = sadd.s32 1, %s607_s12  }
  0xe3   : > { %p10_p4 = scmp.ge.s32.totalorder %s13_s12, 4  }
  0xe5   :  { %12 = sbr.rel (!%p10_p4) target bundleno = 1 (0x1), region = 62 }

// kernel: image_transformation_network.31
= control target key start
LH: loop header
LB: loop body
LE: loop exit
PB: predicated region body
PF: predicated region fallthrough
CT: control target
= control target key end

     0   :  { %s1175_s12 = smov 0   ;;  %s1177_s13 = smov 0   ;;  %s1368_s0 = inlined_call_operand.vmem [shape: bf16[512,256], index: 0, kind: input, shape index: {}]   ;;  %s1369_s1 = inlined_call_operand.vmem [shape: bf16[256,128], index: 1, kind: input, shape index: {}]   ;;  %s1370_s2 = inlined_call_operand.vmem [shape: f32[1,128], index: 2, kind: input, shape index: {}]   ;;  %s1371_s3 = inlined_call_operand.vmem [shape: f32[512,128], index: 3, kind: output, shape index: {}]  }
   0x1   :  { %s1179_s14 = smov 0  }
   0x2 LB: > { %s25_s15 = sadd.s32 1, %s1149_s13  ;;  %p857_p0 = scmp.ge.s32.totalorder %s1153_s14, 1  ;;  %s1153_s14 = sphi %s1179_s14, %s13_s14   ;;  %s1149_s13 = sphi %s1177_s13, %s1373_s13   ;;  %s1145_s12 = sphi %s1175_s12, %s1372_s12  }
   0x3   : > { %p27_p1 = scmp.ge.s32.totalorder %s25_s15, 2  ;;  %p170_p2 = scmp.lt.s32.totalorder %s1153_s14, 3 }
   0x5   : > { %s1375_s15 = smov (%p27_p1, %s25_s15), 0  ;;  %p171_p3 = pnand %p857_p0, %p170_p2 }
   0x6   : > { %s858_s18 = sshll.u32 (!%p171_p3), %s1145_s12, 5 }
   0x7   : > { %174 = sbr.rel (%p171_p3) target bundleno = 305 (0x131), region = 32  ;;  %p206_p4 = scmp.lt.s32.totalorder (!%p171_p3), %s858_s18, 63 }
   0xc   : > { %v1067_v0 = vld [vmem:[%s1369_s1 + $0x78] sm:$0xff]   ;;  %v1069_v2 = vld [vmem:[%s1369_s1 + $0x70] sm:$0xff]   ;;  %v1071_v4 = vld [vmem:[%s1369_s1 + $0x68] sm:$0xff]   ;;  %s1377_s18 = smov (!%p206_p4, %s858_s18), 63 }
   0xd   : > { %v1068_v1 = vld [vmem:[%s1369_s1 + $0x38] sm:$0xff]   ;;  %915 = vmatprep.subr.bf16.mxu0 %v1067_v0  ;;  %1027 = vmatprep.subr.bf16.mxu1 %v1067_v0  ;;  %v1070_v3 = vld [vmem:[%s1369_s1 + $0x30] sm:$0xff]   ;;  %v1072_v5 = vld [vmem:[%s1369_s1 + $0x28] sm:$0xff]   ;;  %s914_s6 = sshll.u32 %s1377_s18, 3 }
   0xe   : > { %916 = vmatpush3.bf16.msra.mxu0 %v1068_v1  ;;  %1035 = vmatpush3.bf16.msra.mxu1 %v1068_v1  ;;  %v1073_v6 = vld [vmem:[%s1369_s1 + $0x60] sm:$0xff]   ;;  %v1075_v8 = vld [vmem:[%s1369_s1 + $0x58] sm:$0xff]   ;;  %s1228_s11 = scalar_lea.vmem %s1368_s0, %s914_s6  ;;  %v1077_v10 = vld [vmem:[%s1369_s1 + $0x50] sm:$0xff]   ;;  %s1293_s8 = scalar_lea.vmem %s1371_s3, %s914_s6 }
   0xf   : > { %917 = vmatprep.subr.bf16.mxu0 %v1069_v2  ;;  %1028 = vmatprep.subr.bf16.mxu1 %v1069_v2  ;;  %v1074_v7 = vld [vmem:[%s1369_s1 + $0x20] sm:$0xff]   ;;  %v1076_v9 = vld [vmem:[%s1369_s1 + $0x18] sm:$0xff]   ;;  %v1078_v13 = vld [vmem:[%s1369_s1 + $0x10] sm:$0xff]  }
  0x10   : > { %v1085_v11 = vld [vmem:[%s1228_s11 + $0x4] ss:$8 sps:$4 sm:$0xff]   ;;  %v1083_v18 = vld [vmem:[%s1228_s11] ss:$8 sps:$4 sm:$0xff]   ;;  %v1089_v20 = vld [vmem:[%s1228_s11 + $0x14] ss:$8 sps:$4 sm:$0xff]  }
  0x11   : > { %v1088_v12 = vld [vmem:[%s1228_s11 + $0x84] ss:$8 sps:$4 sm:$0xff]   ;;  %588 = vmatprep.mubr.bf16.mxu0 %v1085_v11  ;;  %v1086_v19 = vld [vmem:[%s1228_s11 + $0x80] ss:$8 sps:$4 sm:$0xff]   ;;  %v1091_v21 = vld [vmem:[%s1228_s11 + $0x94] ss:$8 sps:$4 sm:$0xff]  }
  0x12   : > { %918 = vmatpush3.bf16.msra.mxu0 %v1070_v3  ;;  %1036 = vmatpush3.bf16.msra.mxu1 %v1070_v3  ;;  %v1079_v14 = vld [vmem:[%s1369_s1 + $0x48] sm:$0xff]   ;;  %v1081_v16 = vld [vmem:[%s1369_s1 + $0x40] sm:$0xff]   ;;  %v1093_v22 = vld [vmem:[%s1228_s11 + $0x10] ss:$8 sps:$4 sm:$0xff]  }
  0x13   : > { %919 = vmatprep.subr.bf16.mxu0 %v1071_v4  ;;  %1029 = vmatprep.subr.bf16.mxu1 %v1071_v4  ;;  %v1080_v15 = vld [vmem:[%s1369_s1 + $0x8] sm:$0xff]   ;;  %v1082_v17 = vld [vmem:[%s1369_s1] sm:$0xff]   ;;  %v1094_v23 = vld [vmem:[%s1228_s11 + $0x90] ss:$8 sps:$4 sm:$0xff]  }
  0x14   : > { %652 = vmatprep.mubr.bf16.mxu1 %v1088_v12  ;;  %v1095_v24 = vld [vmem:[%s1228_s11 + $0x24] ss:$8 sps:$4 sm:$0xff]   ;;  %v1099_v26 = vld [vmem:[%s1228_s11 + $0x20] ss:$8 sps:$4 sm:$0xff]   ;;  %v1101_v28 = vld [vmem:[%s1228_s11 + $0x34] ss:$8 sps:$4 sm:$0xff]  }
  0x15   : > { %v1097_v25 = vld [vmem:[%s1228_s11 + $0xa4] ss:$8 sps:$4 sm:$0xff]   ;;  %v1100_v27 = vld [vmem:[%s1228_s11 + $0xa0] ss:$8 sps:$4 sm:$0xff]   ;;  %v1103_v29 = vld [vmem:[%s1228_s11 + $0xb4] ss:$8 sps:$4 sm:$0xff]  }
  0x16   : > { %920 = vmatpush3.bf16.msra.mxu0 %v1072_v5  ;;  %1037 = vmatpush3.bf16.msra.mxu1 %v1072_v5  ;;  %v1105_v30 = vld [vmem:[%s1228_s11 + $0x30] ss:$8 sps:$4 sm:$0xff]   ;;  %v1107_v32 = vld [vmem:[%s1228_s11 + $0x44] ss:$8 sps:$4 sm:$0xff]   ;;  %v1111_v34 = vld [vmem:[%s1228_s11 + $0x40] ss:$8 sps:$4 sm:$0xff]  }
  0x17   : > { %921 = vmatprep.subr.bf16.mxu0 %v1073_v6  ;;  %1030 = vmatprep.subr.bf16.mxu1 %v1073_v6  ;;  %v1106_v31 = vld [vmem:[%s1228_s11 + $0xb0] ss:$8 sps:$4 sm:$0xff]   ;;  %v1109_v33 = vld [vmem:[%s1228_s11 + $0xc4] ss:$8 sps:$4 sm:$0xff]   ;;  %v1112_v35 = vld [vmem:[%s1228_s11 + $0xc0] ss:$8 sps:$4 sm:$0xff]  }
  0x18   : > { %v1113_v36 = vld [vmem:[%s1228_s11 + $0x54] ss:$8 sps:$4 sm:$0xff]   ;;  %v1117_v38 = vld [vmem:[%s1228_s11 + $0x50] ss:$8 sps:$4 sm:$0xff]   ;;  %v1119_v40 = vld [vmem:[%s1228_s11 + $0x64] ss:$8 sps:$4 sm:$0xff]  }
  0x19   : > { %v1115_v37 = vld [vmem:[%s1228_s11 + $0xd4] ss:$8 sps:$4 sm:$0xff]   ;;  %v1118_v39 = vld [vmem:[%s1228_s11 + $0xd0] ss:$8 sps:$4 sm:$0xff]   ;;  %v1121_v41 = vld [vmem:[%s1228_s11 + $0xe4] ss:$8 sps:$4 sm:$0xff]  }
  0x1a   : > { %922 = vmatpush3.bf16.msra.mxu0 %v1074_v7  ;;  %1038 = vmatpush3.bf16.msra.mxu1 %v1074_v7  ;;  %v1123_v42 = vld [vmem:[%s1228_s11 + $0x60] ss:$8 sps:$4 sm:$0xff]   ;;  %v1125_v44 = vld [vmem:[%s1228_s11 + $0x74] ss:$8 sps:$4 sm:$0xff]   ;;  %v1129_v46 = vld [vmem:[%s1228_s11 + $0x70] ss:$8 sps:$4 sm:$0xff]  }
  0x1b   : > { %923 = vmatprep.subr.bf16.mxu0 %v1075_v8  ;;  %1031 = vmatprep.subr.bf16.mxu1 %v1075_v8  ;;  %v1124_v43 = vld [vmem:[%s1228_s11 + $0xe0] ss:$8 sps:$4 sm:$0xff]   ;;  %v1127_v45 = vld [vmem:[%s1228_s11 + $0xf4] ss:$8 sps:$4 sm:$0xff]   ;;  %v1130_v47 = vld [vmem:[%s1228_s11 + $0xf0] ss:$8 sps:$4 sm:$0xff]  }
  0x1c   : > { %v1286_v50 = vld [vmem:[%s1370_s2] ss:$0 sm:$0xff] }
  0x1e   : > { %924 = vmatpush3.bf16.msra.mxu0 %v1076_v9  ;;  %1039 = vmatpush3.bf16.msra.mxu1 %v1076_v9 }
  0x1f   : > { %925 = vmatprep.subr.bf16.mxu0 %v1077_v10  ;;  %1032 = vmatprep.subr.bf16.mxu1 %v1077_v10 }
  0x22   : > { %926 = vmatpush3.bf16.msra.mxu0 %v1078_v13  ;;  %1040 = vmatpush3.bf16.msra.mxu1 %v1078_v13 }
  0x23   : > { %927 = vmatprep.subr.bf16.mxu0 %v1079_v14  ;;  %1033 = vmatprep.subr.bf16.mxu1 %v1079_v14 }
  0x26   : > { %928 = vmatpush3.bf16.msra.mxu0 %v1080_v15  ;;  %1041 = vmatpush3.bf16.msra.mxu1 %v1080_v15 }
  0x27   : > { %929 = vmatprep.subr.bf16.mxu0 %v1081_v16  ;;  %1034 = vmatprep.subr.bf16.mxu1 %v1081_v16 }
  0x2a   : > { %930 = vmatpush3.bf16.msra.mxu0 %v1082_v17  ;;  %1042 = vmatpush3.bf16.msra.mxu1 %v1082_v17 }
  0x2d   : > { %589 = vmatmul.mubr.bf16.vlgmr.msra.gmra.mxu0 %v1083_v18  ;;  %653 = vmatmul.mubr.bf16.vlgmr.msra.gmra.mxu1 %v1086_v19 }
  0x2e   : > { %596 = vmatprep.mubr.bf16.mxu0 %v1089_v20  ;;  %660 = vmatprep.mubr.bf16.mxu1 %v1091_v21 }
  0x35   : > { %597 = vmatmul.mubr.bf16.gmra.mxu0 %v1093_v22  ;;  %661 = vmatmul.mubr.bf16.gmra.mxu1 %v1094_v23 }
  0x36   : > { %604 = vmatprep.mubr.bf16.mxu0 %v1095_v24  ;;  %668 = vmatprep.mubr.bf16.mxu1 %v1097_v25 }
  0x3d   : > { %605 = vmatmul.mubr.bf16.gmra.mxu0 %v1099_v26  ;;  %669 = vmatmul.mubr.bf16.gmra.mxu1 %v1100_v27 }
  0x3e   : > { %612 = vmatprep.mubr.bf16.mxu0 %v1101_v28  ;;  %676 = vmatprep.mubr.bf16.mxu1 %v1103_v29 }
  0x45   : > { %613 = vmatmul.mubr.bf16.gmra.mxu0 %v1105_v30  ;;  %677 = vmatmul.mubr.bf16.gmra.mxu1 %v1106_v31 }
  0x46   : > { %620 = vmatprep.mubr.bf16.mxu0 %v1107_v32  ;;  %684 = vmatprep.mubr.bf16.mxu1 %v1109_v33 }
  0x4d   : > { %621 = vmatmul.mubr.bf16.gmra.mxu0 %v1111_v34  ;;  %685 = vmatmul.mubr.bf16.gmra.mxu1 %v1112_v35 }
  0x4e   : > { %628 = vmatprep.mubr.bf16.mxu0 %v1113_v36  ;;  %692 = vmatprep.mubr.bf16.mxu1 %v1115_v37 }
  0x55   : > { %629 = vmatmul.mubr.bf16.gmra.mxu0 %v1117_v38  ;;  %693 = vmatmul.mubr.bf16.gmra.mxu1 %v1118_v39 }
  0x56   : > { %636 = vmatprep.mubr.bf16.mxu0 %v1119_v40  ;;  %700 = vmatprep.mubr.bf16.mxu1 %v1121_v41 }
  0x5d   : > { %637 = vmatmul.mubr.bf16.gmra.mxu0 %v1123_v42  ;;  %701 = vmatmul.mubr.bf16.gmra.mxu1 %v1124_v43 }
  0x5e   : > { %644 = vmatprep.mubr.bf16.mxu0 %v1125_v44  ;;  %708 = vmatprep.mubr.bf16.mxu1 %v1127_v45 }
  0x65   : > { %645 = vmatmul.mubr.bf16.gmra.mxu0 %v1129_v46  ;;  %709 = vmatmul.mubr.bf16.gmra.mxu1 %v1130_v47 }
  0xed   : > { %v931_v48 = vpop.f32.mrf.mxu0  ;;  %v979_v49 = vpop.f32.mrf.mxu1 }
  0xef   : > { %v932_v51 = vpop.f32.mrf.mxu0  ;;  %v980_v52 = vpop.f32.mrf.mxu1 }
  0xf0   : > { %v933_v53 = vadd.f32 %v932_v51, %v931_v48  ;;  %v981_v54 = vadd.f32 %v980_v52, %v979_v49 }
  0xf1   : > { %v934_v55 = vpop.f32.mrf.mxu0  ;;  %v982_v56 = vpop.f32.mrf.mxu1 }
  0xf2   : > { %v591_v57 = vadd.f32 %v933_v53, %v1286_v50  ;;  %v655_v58 = vadd.f32 %v981_v54, %v1286_v50 }
  0xf3   : > { %v935_v59 = vpop.f32.mrf.mxu0  ;;  %v983_v60 = vpop.f32.mrf.mxu1 }
  0xf4   : > { %717 = vst [vmem:[%s1293_s8] sm:$0xff] %v591_v57  ;;  %733 = vst [vmem:[%s1293_s8 + $0x80] sm:$0xff] %v655_v58  ;;  %v936_v61 = vadd.f32 %v935_v59, %v934_v55  ;;  %v984_v62 = vadd.f32 %v983_v60, %v982_v56 }
  0xf5   : > { %v937_v63 = vpop.f32.mrf.mxu0  ;;  %v985_v0 = vpop.f32.mrf.mxu1 }
  0xf6   : > { %v594_v1 = vadd.f32 %v936_v61, %v1286_v50  ;;  %v658_v2 = vadd.f32 %v984_v62, %v1286_v50 }
  0xf7   : > { %v938_v3 = vpop.f32.mrf.mxu0  ;;  %v986_v4 = vpop.f32.mrf.mxu1 }
  0xf8   : > { %718 = vst [vmem:[%s1293_s8 + $0x8] sm:$0xff] %v594_v1  ;;  %734 = vst [vmem:[%s1293_s8 + $0x88] sm:$0xff] %v658_v2  ;;  %v939_v5 = vadd.f32 %v938_v3, %v937_v63  ;;  %v987_v6 = vadd.f32 %v986_v4, %v985_v0 }
  0xf9   : > { %v940_v7 = vpop.f32.mrf.mxu0  ;;  %v988_v8 = vpop.f32.mrf.mxu1 }
  0xfa   : > { %v599_v9 = vadd.f32 %v939_v5, %v1286_v50  ;;  %v663_v10 = vadd.f32 %v987_v6, %v1286_v50 }
  0xfb   : > { %v941_v11 = vpop.f32.mrf.mxu0  ;;  %v989_v12 = vpop.f32.mrf.mxu1 }
  0xfc   : > { %719 = vst [vmem:[%s1293_s8 + $0x10] sm:$0xff] %v599_v9  ;;  %735 = vst [vmem:[%s1293_s8 + $0x90] sm:$0xff] %v663_v10  ;;  %v942_v13 = vadd.f32 %v941_v11, %v940_v7  ;;  %v990_v14 = vadd.f32 %v989_v12, %v988_v8 }
  0xfd   : > { %v943_v15 = vpop.f32.mrf.mxu0  ;;  %v991_v16 = vpop.f32.mrf.mxu1 }
  0xfe   : > { %v602_v17 = vadd.f32 %v942_v13, %v1286_v50  ;;  %v666_v18 = vadd.f32 %v990_v14, %v1286_v50 }
  0xff   : > { %v944_v19 = vpop.f32.mrf.mxu0  ;;  %v992_v20 = vpop.f32.mrf.mxu1 }
 0x100   : > { %720 = vst [vmem:[%s1293_s8 + $0x18] sm:$0xff] %v602_v17  ;;  %736 = vst [vmem:[%s1293_s8 + $0x98] sm:$0xff] %v666_v18  ;;  %v945_v21 = vadd.f32 %v944_v19, %v943_v15  ;;  %v993_v22 = vadd.f32 %v992_v20, %v991_v16 }
 0x101   : > { %v946_v23 = vpop.f32.mrf.mxu0  ;;  %v994_v24 = vpop.f32.mrf.mxu1 }
 0x102   : > { %v607_v25 = vadd.f32 %v945_v21, %v1286_v50  ;;  %v671_v26 = vadd.f32 %v993_v22, %v1286_v50 }
 0x103   : > { %v947_v27 = vpop.f32.mrf.mxu0  ;;  %v995_v28 = vpop.f32.mrf.mxu1 }
 0x104   : > { %721 = vst [vmem:[%s1293_s8 + $0x20] sm:$0xff] %v607_v25  ;;  %737 = vst [vmem:[%s1293_s8 + $0xa0] sm:$0xff] %v671_v26  ;;  %v948_v29 = vadd.f32 %v947_v27, %v946_v23  ;;  %v996_v30 = vadd.f32 %v995_v28, %v994_v24 }
 0x105   : > { %v949_v31 = vpop.f32.mrf.mxu0  ;;  %v997_v32 = vpop.f32.mrf.mxu1 }
 0x106   : > { %v610_v33 = vadd.f32 %v948_v29, %v1286_v50  ;;  %v674_v34 = vadd.f32 %v996_v30, %v1286_v50 }
 0x107   : > { %v950_v35 = vpop.f32.mrf.mxu0  ;;  %v998_v36 = vpop.f32.mrf.mxu1 }
 0x108   : > { %722 = vst [vmem:[%s1293_s8 + $0x28] sm:$0xff] %v610_v33  ;;  %738 = vst [vmem:[%s1293_s8 + $0xa8] sm:$0xff] %v674_v34  ;;  %v951_v37 = vadd.f32 %v950_v35, %v949_v31  ;;  %v999_v38 = vadd.f32 %v998_v36, %v997_v32 }
 0x109   : > { %v952_v39 = vpop.f32.mrf.mxu0  ;;  %v1000_v40 = vpop.f32.mrf.mxu1 }
 0x10a   : > { %v615_v41 = vadd.f32 %v951_v37, %v1286_v50  ;;  %v679_v42 = vadd.f32 %v999_v38, %v1286_v50 }
 0x10b   : > { %v953_v43 = vpop.f32.mrf.mxu0  ;;  %v1001_v44 = vpop.f32.mrf.mxu1 }
 0x10c   : > { %723 = vst [vmem:[%s1293_s8 + $0x30] sm:$0xff] %v615_v41  ;;  %739 = vst [vmem:[%s1293_s8 + $0xb0] sm:$0xff] %v679_v42  ;;  %v954_v45 = vadd.f32 %v953_v43, %v952_v39  ;;  %v1002_v46 = vadd.f32 %v1001_v44, %v1000_v40 }
 0x10d   : > { %v955_v47 = vpop.f32.mrf.mxu0  ;;  %v1003_v48 = vpop.f32.mrf.mxu1 }
 0x10e   : > { %v618_v49 = vadd.f32 %v954_v45, %v1286_v50  ;;  %v682_v51 = vadd.f32 %v1002_v46, %v1286_v50 }
 0x10f   : > { %v956_v52 = vpop.f32.mrf.mxu0  ;;  %v1004_v53 = vpop.f32.mrf.mxu1 }
 0x110   : > { %724 = vst [vmem:[%s1293_s8 + $0x38] sm:$0xff] %v618_v49  ;;  %740 = vst [vmem:[%s1293_s8 + $0xb8] sm:$0xff] %v682_v51  ;;  %v957_v54 = vadd.f32 %v956_v52, %v955_v47  ;;  %v1005_v55 = vadd.f32 %v1004_v53, %v1003_v48 }
 0x111   : > { %v958_v56 = vpop.f32.mrf.mxu0  ;;  %v1006_v57 = vpop.f32.mrf.mxu1 }
 0x112   : > { %v623_v58 = vadd.f32 %v957_v54, %v1286_v50  ;;  %v687_v59 = vadd.f32 %v1005_v55, %v1286_v50 }
 0x113   : > { %v959_v60 = vpop.f32.mrf.mxu0  ;;  %v1007_v61 = vpop.f32.mrf.mxu1 }
 0x114   : > { %725 = vst [vmem:[%s1293_s8 + $0x40] sm:$0xff] %v623_v58  ;;  %741 = vst [vmem:[%s1293_s8 + $0xc0] sm:$0xff] %v687_v59  ;;  %v960_v62 = vadd.f32 %v959_v60, %v958_v56  ;;  %v1008_v63 = vadd.f32 %v1007_v61, %v1006_v57 }
 0x115   : > { %v961_v0 = vpop.f32.mrf.mxu0  ;;  %v1009_v1 = vpop.f32.mrf.mxu1 }
 0x116   : > { %v626_v2 = vadd.f32 %v960_v62, %v1286_v50  ;;  %v690_v3 = vadd.f32 %v1008_v63, %v1286_v50 }
 0x117   : > { %v962_v4 = vpop.f32.mrf.mxu0  ;;  %v1010_v5 = vpop.f32.mrf.mxu1 }
 0x118   : > { %726 = vst [vmem:[%s1293_s8 + $0x48] sm:$0xff] %v626_v2  ;;  %742 = vst [vmem:[%s1293_s8 + $0xc8] sm:$0xff] %v690_v3  ;;  %v963_v6 = vadd.f32 %v962_v4, %v961_v0  ;;  %v1011_v7 = vadd.f32 %v1010_v5, %v1009_v1 }
 0x119   : > { %v964_v8 = vpop.f32.mrf.mxu0  ;;  %v1012_v9 = vpop.f32.mrf.mxu1 }
 0x11a   : > { %v631_v10 = vadd.f32 %v963_v6, %v1286_v50  ;;  %v695_v11 = vadd.f32 %v1011_v7, %v1286_v50 }
 0x11b   : > { %v965_v12 = vpop.f32.mrf.mxu0  ;;  %v1013_v13 = vpop.f32.mrf.mxu1 }
 0x11c   : > { %727 = vst [vmem:[%s1293_s8 + $0x50] sm:$0xff] %v631_v10  ;;  %743 = vst [vmem:[%s1293_s8 + $0xd0] sm:$0xff] %v695_v11  ;;  %v966_v14 = vadd.f32 %v965_v12, %v964_v8  ;;  %v1014_v15 = vadd.f32 %v1013_v13, %v1012_v9 }
 0x11d   : > { %v967_v16 = vpop.f32.mrf.mxu0  ;;  %v1015_v17 = vpop.f32.mrf.mxu1 }
 0x11e   : > { %v634_v18 = vadd.f32 %v966_v14, %v1286_v50  ;;  %v698_v19 = vadd.f32 %v1014_v15, %v1286_v50 }
 0x11f   : > { %v968_v20 = vpop.f32.mrf.mxu0  ;;  %v1016_v21 = vpop.f32.mrf.mxu1 }
 0x120   : > { %728 = vst [vmem:[%s1293_s8 + $0x58] sm:$0xff] %v634_v18  ;;  %744 = vst [vmem:[%s1293_s8 + $0xd8] sm:$0xff] %v698_v19  ;;  %v969_v22 = vadd.f32 %v968_v20, %v967_v16  ;;  %v1017_v23 = vadd.f32 %v1016_v21, %v1015_v17 }
 0x121   : > { %v970_v24 = vpop.f32.mrf.mxu0  ;;  %v1018_v25 = vpop.f32.mrf.mxu1 }
 0x122   : > { %v639_v26 = vadd.f32 %v969_v22, %v1286_v50  ;;  %v703_v27 = vadd.f32 %v1017_v23, %v1286_v50 }
 0x123   : > { %v971_v28 = vpop.f32.mrf.mxu0  ;;  %v1019_v29 = vpop.f32.mrf.mxu1 }
 0x124   : > { %729 = vst [vmem:[%s1293_s8 + $0x60] sm:$0xff] %v639_v26  ;;  %745 = vst [vmem:[%s1293_s8 + $0xe0] sm:$0xff] %v703_v27  ;;  %v972_v30 = vadd.f32 %v971_v28, %v970_v24  ;;  %v1020_v31 = vadd.f32 %v1019_v29, %v1018_v25 }
 0x125   : > { %v973_v32 = vpop.f32.mrf.mxu0  ;;  %v1021_v33 = vpop.f32.mrf.mxu1 }
 0x126   : > { %v642_v34 = vadd.f32 %v972_v30, %v1286_v50  ;;  %v706_v35 = vadd.f32 %v1020_v31, %v1286_v50 }
 0x127   : > { %v974_v36 = vpop.f32.mrf.mxu0  ;;  %v1022_v37 = vpop.f32.mrf.mxu1 }
 0x128   : > { %730 = vst [vmem:[%s1293_s8 + $0x68] sm:$0xff] %v642_v34  ;;  %746 = vst [vmem:[%s1293_s8 + $0xe8] sm:$0xff] %v706_v35  ;;  %v975_v38 = vadd.f32 %v974_v36, %v973_v32  ;;  %v1023_v39 = vadd.f32 %v1022_v37, %v1021_v33 }
 0x129   : > { %v976_v40 = vpop.f32.mrf.mxu0  ;;  %v1024_v41 = vpop.f32.mrf.mxu1 }
 0x12a   : > { %v647_v42 = vadd.f32 %v975_v38, %v1286_v50  ;;  %v711_v43 = vadd.f32 %v1023_v39, %v1286_v50 }
 0x12b   : > { %v977_v44 = vpop.f32.mrf.mxu0  ;;  %v1025_v45 = vpop.f32.mrf.mxu1 }
 0x12c   : > { %731 = vst [vmem:[%s1293_s8 + $0x70] sm:$0xff] %v647_v42  ;;  %747 = vst [vmem:[%s1293_s8 + $0xf0] sm:$0xff] %v711_v43  ;;  %v978_v46 = vadd.f32 %v977_v44, %v976_v40  ;;  %v1026_v47 = vadd.f32 %v1025_v45, %v1024_v41 }
 0x12e   : > { %v650_v48 = vadd.f32 %v978_v46, %v1286_v50  ;;  %v714_v49 = vadd.f32 %v1026_v47, %v1286_v50 }
 0x130   : > { %732 = vst [vmem:[%s1293_s8 + $0x78] sm:$0xff] %v650_v48  ;;  %748 = vst [vmem:[%s1293_s8 + $0xf8] sm:$0xff] %v714_v49 }
 0x131 PF: > { %s13_s14 = sadd.s32 1, %s1153_s14   ;;  %s1372_s12 = smov %s1149_s13 }
 0x132   : > { %p10_p5 = scmp.ge.s32.totalorder %s13_s14, 4   ;;  %s1373_s13 = smov %s1375_s15 }
 0x134   :  { %12 = sbr.rel (!%p10_p5) target bundleno = 2 (0x2), region = 68 }

// kernel: image_transformation_network.33
= control target key start
LH: loop header
LB: loop body
LE: loop exit
PB: predicated region body
PF: predicated region fallthrough
CT: control target
= control target key end

     0   :  { %s1038_s1 = inlined_call_operand.vmem [shape: bf16[384,128], index: 1, kind: input, shape index: {}]   ;;  %s1039_s0 = inlined_call_operand.vmem [shape: bf16[128,384], index: 0, kind: input, shape index: {}]   ;;  %s1040_s2 = inlined_call_operand.vmem [shape: f32[1,128], index: 2, kind: input, shape index: {}]   ;;  %s1041_s3 = inlined_call_operand.vmem [shape: f32[128,128], index: 3, kind: output, shape index: {}]  }
   0x1   :  { %v749_v0 = vld [vmem:[%s1038_s1 + $0x78] sm:$0xff]   ;;  %v751_v2 = vld [vmem:[%s1038_s1 + $0x70] sm:$0xff]   ;;  %v754_v5 = vld [vmem:[%s1038_s1 + $0x68] sm:$0xff]  }
   0x2   :  { %v750_v1 = vld [vmem:[%s1038_s1 + $0x38] sm:$0xff]   ;;  %637 = vmatprep.subr.bf16.mxu0 %v749_v0  ;;  %v753_v4 = vld [vmem:[%s1038_s1 + $0x30] sm:$0xff]   ;;  %v756_v7 = vld [vmem:[%s1038_s1 + $0x28] sm:$0xff]  }
   0x3   :  { %638 = vmatpush3.bf16.msra.mxu0 %v750_v1  ;;  %v752_v3 = vld [vmem:[%s1038_s1 + $0xb8] sm:$0xff]   ;;  %v755_v6 = vld [vmem:[%s1038_s1 + $0xb0] sm:$0xff]   ;;  %v757_v8 = vld [vmem:[%s1038_s1 + $0x60] sm:$0xff]  }
   0x4   :  { %639 = vmatprep.subr.bf16.mxu0 %v751_v2  ;;  %717 = vmatprep.subr.bf16.mxu1 %v752_v3  ;;  %v758_v9 = vld [vmem:[%s1038_s1 + $0xa8] sm:$0xff]   ;;  %v759_v10 = vld [vmem:[%s1038_s1 + $0x20] sm:$0xff]   ;;  %v760_v11 = vld [vmem:[%s1038_s1 + $0x58] sm:$0xff]  }
   0x5   :  { %718 = vmatpush3.bf16.msra.mxu1 %v752_v3  ;;  %v761_v12 = vld [vmem:[%s1038_s1 + $0xa0] sm:$0xff]   ;;  %v762_v13 = vld [vmem:[%s1038_s1 + $0x18] sm:$0xff]   ;;  %v763_v15 = vld [vmem:[%s1038_s1 + $0x50] sm:$0xff]  }
   0x6   :  { %719 = vmatprep.subr.bf16.mxu1 %v755_v6  ;;  %v764_v14 = vld [vmem:[%s1038_s1 + $0x98] sm:$0xff]   ;;  %v765_v16 = vld [vmem:[%s1038_s1 + $0x10] sm:$0xff]   ;;  %v766_v18 = vld [vmem:[%s1038_s1 + $0x48] sm:$0xff]  }
   0x7   :  { %640 = vmatpush3.bf16.msra.mxu0 %v753_v4  ;;  %v767_v17 = vld [vmem:[%s1038_s1 + $0x90] sm:$0xff]   ;;  %v768_v19 = vld [vmem:[%s1038_s1 + $0x8] sm:$0xff]   ;;  %v769_v20 = vld [vmem:[%s1038_s1 + $0x40] sm:$0xff]  }
   0x8   :  { %641 = vmatprep.subr.bf16.mxu0 %v754_v5  ;;  %v770_v21 = vld [vmem:[%s1038_s1 + $0x88] sm:$0xff]   ;;  %v774_v22 = vld [vmem:[%s1039_s0 + $0x4] ss:$12 sps:$4 sm:$0xff]   ;;  %v781_v31 = vld [vmem:[%s1039_s0 + $0x34] ss:$12 sps:$4 sm:$0xff]  }
   0x9   :  { %720 = vmatpush3.bf16.msra.mxu1 %v755_v6  ;;  %v771_v23 = vld [vmem:[%s1038_s1] sm:$0xff]   ;;  %406 = vmatprep.mubr.bf16.mxu0 %v774_v22  ;;  %v776_v24 = vld [vmem:[%s1039_s0 + $0x8] ss:$12 sps:$4 sm:$0xff]   ;;  %v785_v32 = vld [vmem:[%s1039_s0 + $0x50] ss:$12 sps:$4 sm:$0xff]  }
   0xa   :  { %721 = vmatprep.subr.bf16.mxu1 %v758_v9  ;;  %v775_v25 = vld [vmem:[%s1038_s1 + $0x80] sm:$0xff]   ;;  %733 = vmatprep.mubr.bf16.mxu1 %v776_v24  ;;  %v778_v27 = vld [vmem:[%s1039_s0 + $0x1c] ss:$12 sps:$4 sm:$0xff]   ;;  %v786_v35 = vld [vmem:[%s1039_s0 + $0x4c] ss:$12 sps:$4 sm:$0xff]  }
   0xb   :  { %642 = vmatpush3.bf16.msra.mxu0 %v756_v7  ;;  %v772_v26 = vld [vmem:[%s1039_s0] ss:$12 sps:$4 sm:$0xff]   ;;  %v784_v29 = vld [vmem:[%s1039_s0 + $0x38] ss:$12 sps:$4 sm:$0xff]   ;;  %v792_v33 = vld [vmem:[%s1039_s0 + $0x68] ss:$12 sps:$4 sm:$0xff]  }
   0xc   :  { %643 = vmatprep.subr.bf16.mxu0 %v757_v8  ;;  %v777_v28 = vld [vmem:[%s1039_s0 + $0x20] ss:$12 sps:$4 sm:$0xff]   ;;  %v780_v30 = vld [vmem:[%s1039_s0 + $0x18] ss:$12 sps:$4 sm:$0xff]   ;;  %v783_v34 = vld [vmem:[%s1039_s0 + $0x30] ss:$12 sps:$4 sm:$0xff]  }
   0xd   :  { %722 = vmatpush3.bf16.msra.mxu1 %v758_v9  ;;  %v793_v36 = vld [vmem:[%s1039_s0 + $0x80] ss:$12 sps:$4 sm:$0xff]   ;;  %v800_v37 = vld [vmem:[%s1039_s0 + $0x98] ss:$12 sps:$4 sm:$0xff]   ;;  %v788_v38 = vld [vmem:[%s1039_s0 + $0x48] ss:$12 sps:$4 sm:$0xff]  }
   0xe   :  { %723 = vmatprep.subr.bf16.mxu1 %v761_v12  ;;  %v789_v39 = vld [vmem:[%s1039_s0 + $0x64] ss:$12 sps:$4 sm:$0xff]   ;;  %v791_v41 = vld [vmem:[%s1039_s0 + $0x60] ss:$12 sps:$4 sm:$0xff]   ;;  %v794_v42 = vld [vmem:[%s1039_s0 + $0x7c] ss:$12 sps:$4 sm:$0xff]  }
   0xf   :  { %644 = vmatpush3.bf16.msra.mxu0 %v759_v10  ;;  %v801_v40 = vld [vmem:[%s1039_s0 + $0xb0] ss:$12 sps:$4 sm:$0xff]   ;;  %v796_v43 = vld [vmem:[%s1039_s0 + $0x78] ss:$12 sps:$4 sm:$0xff]   ;;  %v797_v44 = vld [vmem:[%s1039_s0 + $0x94] ss:$12 sps:$4 sm:$0xff]  }
  0x10   :  { %645 = vmatprep.subr.bf16.mxu0 %v760_v11  ;;  %v799_v45 = vld [vmem:[%s1039_s0 + $0x90] ss:$12 sps:$4 sm:$0xff]   ;;  %v802_v46 = vld [vmem:[%s1039_s0 + $0xac] ss:$12 sps:$4 sm:$0xff]   ;;  %v804_v47 = vld [vmem:[%s1039_s0 + $0xa8] ss:$12 sps:$4 sm:$0xff]  }
  0x11   :  { %724 = vmatpush3.bf16.msra.mxu1 %v761_v12  ;;  %v972_v50 = vld [vmem:[%s1040_s2] ss:$0 sm:$0xff] }
  0x12   :  { %725 = vmatprep.subr.bf16.mxu1 %v764_v14 }
  0x13   :  { %646 = vmatpush3.bf16.msra.mxu0 %v762_v13 }
  0x14   :  { %647 = vmatprep.subr.bf16.mxu0 %v763_v15 }
  0x15   :  { %726 = vmatpush3.bf16.msra.mxu1 %v764_v14 }
  0x16   :  { %727 = vmatprep.subr.bf16.mxu1 %v767_v17 }
  0x17   :  { %648 = vmatpush3.bf16.msra.mxu0 %v765_v16 }
  0x18   :  { %649 = vmatprep.subr.bf16.mxu0 %v766_v18 }
  0x19   :  { %728 = vmatpush3.bf16.msra.mxu1 %v767_v17 }
  0x1a   :  { %729 = vmatprep.subr.bf16.mxu1 %v770_v21 }
  0x1b   :  { %650 = vmatpush3.bf16.msra.mxu0 %v768_v19 }
  0x1c   :  { %651 = vmatprep.subr.bf16.mxu0 %v769_v20 }
  0x1d   :  { %730 = vmatpush3.bf16.msra.mxu1 %v770_v21 }
  0x1e   :  { %731 = vmatprep.subr.bf16.mxu1 %v775_v25 }
  0x1f   :  { %652 = vmatpush3.bf16.msra.mxu0 %v771_v23 }
  0x21   :  { %732 = vmatpush3.bf16.msra.mxu1 %v775_v25 }
  0x22   :  { %407 = vmatmul.mubr.bf16.vlgmr.msra.gmra.mxu0 %v772_v26 }
  0x23   :  { %414 = vmatprep.mubr.bf16.mxu0 %v778_v27 }
  0x24   :  { %734 = vmatmul.mubr.bf16.vlgmr.msra.gmra.mxu1 %v777_v28 }
  0x25   :  { %737 = vmatprep.mubr.bf16.mxu1 %v784_v29 }
  0x2a   :  { %415 = vmatmul.mubr.bf16.gmra.mxu0 %v780_v30 }
  0x2b   :  { %422 = vmatprep.mubr.bf16.mxu0 %v781_v31 }
  0x2c   :  { %738 = vmatmul.mubr.bf16.gmra.mxu1 %v785_v32 }
  0x2d   :  { %741 = vmatprep.mubr.bf16.mxu1 %v792_v33 }
  0x32   :  { %423 = vmatmul.mubr.bf16.gmra.mxu0 %v783_v34 }
  0x33   :  { %430 = vmatprep.mubr.bf16.mxu0 %v786_v35 }
  0x34   :  { %742 = vmatmul.mubr.bf16.gmra.mxu1 %v793_v36 }
  0x35   :  { %745 = vmatprep.mubr.bf16.mxu1 %v800_v37 }
  0x3a   :  { %431 = vmatmul.mubr.bf16.gmra.mxu0 %v788_v38 }
  0x3b   :  { %438 = vmatprep.mubr.bf16.mxu0 %v789_v39 }
  0x3c   :  { %746 = vmatmul.mubr.bf16.gmra.mxu1 %v801_v40 }
  0x42   :  { %439 = vmatmul.mubr.bf16.gmra.mxu0 %v791_v41 }
  0x43   :  { %446 = vmatprep.mubr.bf16.mxu0 %v794_v42 }
  0x4a   :  { %447 = vmatmul.mubr.bf16.gmra.mxu0 %v796_v43 }
  0x4b   :  { %454 = vmatprep.mubr.bf16.mxu0 %v797_v44 }
  0x52   :  { %455 = vmatmul.mubr.bf16.gmra.mxu0 %v799_v45 }
  0x53   :  { %462 = vmatprep.mubr.bf16.mxu0 %v802_v46 }
  0x5a   :  { %463 = vmatmul.mubr.bf16.gmra.mxu0 %v804_v47 }
  0xe2   :  { %v653_v48 = vpop.f32.mrf.mxu0 }
  0xe4   :  { %v654_v49 = vpop.f32.mrf.mxu0  ;;  %v735_v52 = vpop.f32.mrf.mxu1 }
  0xe5   :  { %v655_v51 = vadd.f32 %v654_v49, %v653_v48 }
  0xe6   :  { %v656_v53 = vpop.f32.mrf.mxu0  ;;  %v505_v55 = vpop.f32.mrf.mxu1 }
  0xe7   :  { %v409_v54 = vadd.f32 %v655_v51, %v972_v50 }
  0xe8   :  { %v657_v56 = vpop.f32.mrf.mxu0  ;;  %v736_v59 = vpop.f32.mrf.mxu1 }
  0xe9   :  { %v658_v57 = vadd.f32 %v657_v56, %v656_v53  ;;  %v506_v58 = vadd.f32 %v505_v55, %v409_v54 }
  0xea   :  { %v659_v60 = vpop.f32.mrf.mxu0  ;;  %v508_v62 = vpop.f32.mrf.mxu1 }
  0xeb   :  { %568 = vst [vmem:[%s1041_s3] sm:$0xff] %v506_v58  ;;  %v412_v61 = vadd.f32 %v658_v57, %v972_v50 }
  0xec   :  { %v660_v63 = vpop.f32.mrf.mxu0  ;;  %v739_v3 = vpop.f32.mrf.mxu1 }
  0xed   :  { %v661_v0 = vadd.f32 %v660_v63, %v659_v60  ;;  %v509_v1 = vadd.f32 %v508_v62, %v412_v61 }
  0xee   :  { %v662_v2 = vpop.f32.mrf.mxu0  ;;  %v521_v9 = vpop.f32.mrf.mxu1 }
  0xef   :  { %v417_v4 = vadd.f32 %v661_v0, %v972_v50  ;;  %569 = vst [vmem:[%s1041_s3 + $0x8] sm:$0xff] %v509_v1 }
  0xf0   :  { %v663_v5 = vpop.f32.mrf.mxu0  ;;  %v740_v15 = vpop.f32.mrf.mxu1 }
  0xf1   :  { %v514_v6 = vadd.f32 %v735_v52, %v417_v4  ;;  %v664_v7 = vadd.f32 %v663_v5, %v662_v2 }
  0xf2   :  { %v665_v8 = vpop.f32.mrf.mxu0  ;;  %v524_v21 = vpop.f32.mrf.mxu1 }
  0xf3   :  { %570 = vst [vmem:[%s1041_s3 + $0x10] sm:$0xff] %v514_v6  ;;  %v420_v10 = vadd.f32 %v664_v7, %v972_v50 }
  0xf4   :  { %v666_v11 = vpop.f32.mrf.mxu0  ;;  %v743_v27 = vpop.f32.mrf.mxu1 }
  0xf5   :  { %v517_v12 = vadd.f32 %v736_v59, %v420_v10  ;;  %v667_v13 = vadd.f32 %v666_v11, %v665_v8 }
  0xf6   :  { %v668_v14 = vpop.f32.mrf.mxu0  ;;  %v537_v33 = vpop.f32.mrf.mxu1 }
  0xf7   :  { %571 = vst [vmem:[%s1041_s3 + $0x18] sm:$0xff] %v517_v12  ;;  %v425_v16 = vadd.f32 %v667_v13, %v972_v50 }
  0xf8   :  { %v669_v17 = vpop.f32.mrf.mxu0  ;;  %v744_v39 = vpop.f32.mrf.mxu1 }
  0xf9   :  { %v670_v18 = vadd.f32 %v669_v17, %v668_v14  ;;  %v522_v19 = vadd.f32 %v521_v9, %v425_v16 }
  0xfa   :  { %v671_v20 = vpop.f32.mrf.mxu0  ;;  %v540_v45 = vpop.f32.mrf.mxu1 }
  0xfb   :  { %572 = vst [vmem:[%s1041_s3 + $0x20] sm:$0xff] %v522_v19  ;;  %v428_v22 = vadd.f32 %v670_v18, %v972_v50 }
  0xfc   :  { %v672_v23 = vpop.f32.mrf.mxu0  ;;  %v747_v52 = vpop.f32.mrf.mxu1 }
  0xfd   :  { %v673_v24 = vadd.f32 %v672_v23, %v671_v20  ;;  %v525_v25 = vadd.f32 %v524_v21, %v428_v22 }
  0xfe   :  { %v674_v26 = vpop.f32.mrf.mxu0  ;;  %v553_v58 = vpop.f32.mrf.mxu1 }
  0xff   :  { %v433_v28 = vadd.f32 %v673_v24, %v972_v50  ;;  %573 = vst [vmem:[%s1041_s3 + $0x28] sm:$0xff] %v525_v25 }
 0x100   :  { %v675_v29 = vpop.f32.mrf.mxu0  ;;  %v748_v0 = vpop.f32.mrf.mxu1 }
 0x101   :  { %v530_v30 = vadd.f32 %v739_v3, %v433_v28  ;;  %v676_v31 = vadd.f32 %v675_v29, %v674_v26 }
 0x102   :  { %v677_v32 = vpop.f32.mrf.mxu0  ;;  %v556_v6 = vpop.f32.mrf.mxu1 }
 0x103   :  { %574 = vst [vmem:[%s1041_s3 + $0x30] sm:$0xff] %v530_v30  ;;  %v436_v34 = vadd.f32 %v676_v31, %v972_v50 }
 0x104   :  { %v678_v35 = vpop.f32.mrf.mxu0 }
 0x105   :  { %v533_v36 = vadd.f32 %v740_v15, %v436_v34  ;;  %v679_v37 = vadd.f32 %v678_v35, %v677_v32 }
 0x106   :  { %v680_v38 = vpop.f32.mrf.mxu0 }
 0x107   :  { %575 = vst [vmem:[%s1041_s3 + $0x38] sm:$0xff] %v533_v36  ;;  %v441_v40 = vadd.f32 %v679_v37, %v972_v50 }
 0x108   :  { %v681_v41 = vpop.f32.mrf.mxu0 }
 0x109   :  { %v682_v42 = vadd.f32 %v681_v41, %v680_v38  ;;  %v538_v43 = vadd.f32 %v537_v33, %v441_v40 }
 0x10a   :  { %v683_v44 = vpop.f32.mrf.mxu0 }
 0x10b   :  { %576 = vst [vmem:[%s1041_s3 + $0x40] sm:$0xff] %v538_v43  ;;  %v444_v46 = vadd.f32 %v682_v42, %v972_v50 }
 0x10c   :  { %v684_v47 = vpop.f32.mrf.mxu0 }
 0x10d   :  { %v685_v48 = vadd.f32 %v684_v47, %v683_v44  ;;  %v541_v49 = vadd.f32 %v540_v45, %v444_v46 }
 0x10e   :  { %v686_v51 = vpop.f32.mrf.mxu0 }
 0x10f   :  { %v449_v53 = vadd.f32 %v685_v48, %v972_v50  ;;  %577 = vst [vmem:[%s1041_s3 + $0x48] sm:$0xff] %v541_v49 }
 0x110   :  { %v687_v54 = vpop.f32.mrf.mxu0 }
 0x111   :  { %v546_v55 = vadd.f32 %v743_v27, %v449_v53  ;;  %v688_v56 = vadd.f32 %v687_v54, %v686_v51 }
 0x112   :  { %v689_v57 = vpop.f32.mrf.mxu0 }
 0x113   :  { %578 = vst [vmem:[%s1041_s3 + $0x50] sm:$0xff] %v546_v55  ;;  %v452_v59 = vadd.f32 %v688_v56, %v972_v50 }
 0x114   :  { %v690_v60 = vpop.f32.mrf.mxu0 }
 0x115   :  { %v549_v61 = vadd.f32 %v744_v39, %v452_v59  ;;  %v691_v62 = vadd.f32 %v690_v60, %v689_v57 }
 0x116   :  { %v692_v63 = vpop.f32.mrf.mxu0 }
 0x117   :  { %579 = vst [vmem:[%s1041_s3 + $0x58] sm:$0xff] %v549_v61  ;;  %v457_v1 = vadd.f32 %v691_v62, %v972_v50 }
 0x118   :  { %v693_v2 = vpop.f32.mrf.mxu0 }
 0x119   :  { %v694_v3 = vadd.f32 %v693_v2, %v692_v63  ;;  %v554_v4 = vadd.f32 %v553_v58, %v457_v1 }
 0x11a   :  { %v695_v5 = vpop.f32.mrf.mxu0 }
 0x11b   :  { %580 = vst [vmem:[%s1041_s3 + $0x60] sm:$0xff] %v554_v4  ;;  %v460_v7 = vadd.f32 %v694_v3, %v972_v50 }
 0x11c   :  { %v696_v8 = vpop.f32.mrf.mxu0 }
 0x11d   :  { %v697_v9 = vadd.f32 %v696_v8, %v695_v5  ;;  %v557_v10 = vadd.f32 %v556_v6, %v460_v7 }
 0x11e   :  { %v698_v11 = vpop.f32.mrf.mxu0 }
 0x11f   :  { %v465_v12 = vadd.f32 %v697_v9, %v972_v50  ;;  %581 = vst [vmem:[%s1041_s3 + $0x68] sm:$0xff] %v557_v10 }
 0x120   :  { %v699_v13 = vpop.f32.mrf.mxu0 }
 0x121   :  { %v562_v14 = vadd.f32 %v747_v52, %v465_v12  ;;  %v700_v15 = vadd.f32 %v699_v13, %v698_v11 }
 0x123   :  { %582 = vst [vmem:[%s1041_s3 + $0x70] sm:$0xff] %v562_v14  ;;  %v468_v16 = vadd.f32 %v700_v15, %v972_v50 }
 0x125   :  { %v565_v17 = vadd.f32 %v748_v0, %v468_v16 }
 0x127   :  { %583 = vst [vmem:[%s1041_s3 + $0x78] sm:$0xff] %v565_v17 }

// kernel: image_transformation_network.34
= control target key start
LH: loop header
LB: loop body
LE: loop exit
PB: predicated region body
PF: predicated region fallthrough
CT: control target
= control target key end

     0   :  { %s389_s12 = smov 0   ;;  %s427_s0 = inlined_call_operand.vmem [shape: f32[2,64,128], index: 0, kind: input, shape index: {}]   ;;  %s428_s1 = inlined_call_operand.vmem [shape: f32[1,1,128], index: 1, kind: input, shape index: {}]   ;;  %s429_s2 = inlined_call_operand.vmem [shape: f32[1,1,128], index: 2, kind: input, shape index: {}]   ;;  %s430_s3 = inlined_call_operand.vmem [shape: f32[2,64,64], index: 3, kind: output, shape index: {}]  }
   0x1 LB: > { %s336_s13 = sadd.s32 4294967295, %s367_s12   ;;  %p340_p0 = scmp.ge.s32.totalorder %s367_s12, 1  ;;  %s367_s12 = sphi %s389_s12, %s13_s12  }
   0x2   : > { %p137_p1 = scmp.lt.s32.totalorder %s367_s12, 3 }
   0x4   : > { %p138_p2 = pnand %p340_p0, %p137_p1 }
   0x5   : > { %p161_p3 = scmp.lt.s32.totalorder (!%p138_p2), %s336_s13, 1 }
   0x6   : > { %141 = sbr.rel (%p138_p2) target bundleno = 103 (0x67), region = 32 }
   0xb   : > { %s432_s13 = smov (!%p161_p3, %s336_s13), 1  ;;  %v345_v54 = vld [vmem:[%s428_s1] ss:$0 sm:$0xff]  ;;  %vm272_vm0 = vcmask 523264  }
   0xc   : > { %s349_s14 = sshll.u32 %s432_s13, 6  ;;  %v346_v59 = vld [vmem:[%s429_s2] ss:$0 sm:$0xff] }
   0xd   : > { %s165_s17 = scalar_lea.vmem %s427_s0, %s349_s14  ;;  %s170_s24 = scalar_lea.vmem %s430_s3, %s349_s14 }
   0xe   : > { %v171_v0 = vld [vmem:[%s165_s17] sm:$0xff]  ;;  %v172_v1 = vld [vmem:[%s165_s17 + $0x8] sm:$0xff]  ;;  %v173_v2 = vld [vmem:[%s165_s17 + $0x10] sm:$0xff] }
   0xf   : > { %v179_v3 = vadd.f32 %v172_v1, %v171_v0  ;;  %v174_v4 = vld [vmem:[%s165_s17 + $0x18] sm:$0xff]  ;;  %v175_v6 = vld [vmem:[%s165_s17 + $0x20] sm:$0xff]  ;;  %v176_v8 = vld [vmem:[%s165_s17 + $0x28] sm:$0xff] }
  0x10   : > { %v177_v10 = vld [vmem:[%s165_s17 + $0x30] sm:$0xff]  ;;  %v178_v12 = vld [vmem:[%s165_s17 + $0x38] sm:$0xff] }
  0x11   : > { %v180_v5 = vadd.f32 %v179_v3, %v173_v2 }
  0x13   : > { %v181_v7 = vadd.f32 %v180_v5, %v174_v4 }
  0x15   : > { %v182_v9 = vadd.f32 %v181_v7, %v175_v6 }
  0x17   : > { %v183_v11 = vadd.f32 %v182_v9, %v176_v8 }
  0x19   : > { %v184_v13 = vadd.f32 %v183_v11, %v177_v10 }
  0x1b   : > { %v185_v14 = vadd.f32 %v184_v13, %v178_v12 }
  0x1d   : > { %v186_v15 = vrot.slane %v185_v14, 4 }
  0x1f   : > { %v187_v16 = vadd.f32 %v186_v15, %v185_v14 }
  0x21   : > { %v188_v17 = vrot.slane %v187_v16, 2 }
  0x23   : > { %v189_v18 = vadd.f32 %v188_v17, %v187_v16 }
  0x25   : > { %v190_v19 = vrot.slane %v189_v18, 1 }
  0x27   : > { %v191_v20 = vadd.f32 %v190_v19, %v189_v18 }
  0x29   : > { %v193_v21 = vmul.f32 0.015625, %v191_v20 }
  0x2b   : > { %v194_v22 = vsub.f32 %v171_v0, %v193_v21  ;;  %v195_v23 = vsub.f32 %v172_v1, %v193_v21  ;;  %v196_v24 = vsub.f32 %v173_v2, %v193_v21  ;;  %v197_v25 = vsub.f32 %v174_v4, %v193_v21 }
  0x2c   : > { %v198_v26 = vsub.f32 %v175_v6, %v193_v21  ;;  %v199_v30 = vsub.f32 %v176_v8, %v193_v21  ;;  %v200_v33 = vsub.f32 %v177_v10, %v193_v21  ;;  %v201_v36 = vsub.f32 %v178_v12, %v193_v21 }
  0x2d   : > { %v202_v27 = vmul.f32 %v194_v22, %v194_v22  ;;  %v203_v28 = vmul.f32 %v195_v23, %v195_v23  ;;  %v204_v29 = vmul.f32 %v196_v24, %v196_v24  ;;  %v205_v31 = vmul.f32 %v197_v25, %v197_v25 }
  0x2e   : > { %v206_v34 = vmul.f32 %v198_v26, %v198_v26  ;;  %v207_v37 = vmul.f32 %v199_v30, %v199_v30  ;;  %v208_v39 = vmul.f32 %v200_v33, %v200_v33  ;;  %v209_v41 = vmul.f32 %v201_v36, %v201_v36 }
  0x2f   : > { %v210_v32 = vadd.f32 %v203_v28, %v202_v27 }
  0x31   : > { %v211_v35 = vadd.f32 %v210_v32, %v204_v29 }
  0x33   : > { %v212_v38 = vadd.f32 %v211_v35, %v205_v31 }
  0x35   : > { %v213_v40 = vadd.f32 %v212_v38, %v206_v34 }
  0x37   : > { %v214_v42 = vadd.f32 %v213_v40, %v207_v37 }
  0x39   : > { %v215_v43 = vadd.f32 %v214_v42, %v208_v39 }
  0x3b   : > { %v216_v44 = vadd.f32 %v215_v43, %v209_v41 }
  0x3d   : > { %v217_v45 = vrot.slane %v216_v44, 4 }
  0x3f   : > { %v218_v46 = vadd.f32 %v217_v45, %v216_v44 }
  0x41   : > { %v219_v47 = vrot.slane %v218_v46, 2 }
  0x43   : > { %v220_v48 = vadd.f32 %v219_v47, %v218_v46 }
  0x45   : > { %v221_v49 = vrot.slane %v220_v48, 1 }
  0x47   : > { %v222_v50 = vadd.f32 %v221_v49, %v220_v48 }
  0x49   : > { %v223_v51 = vmul.f32 0.015625, %v222_v50 }
  0x4b   : > { %v224_v52 = vadd.f32 1e-05, %v223_v51 }
  0x4d   : > { %359 = vrsqrt.f32 %v224_v52 }
  0x5a   : > { %v360_v53 = vpop.eup %359 }
  0x5b   : > { %v226_v55 = vmul.f32 %v360_v53, %v194_v22  ;;  %v227_v56 = vmul.f32 %v360_v53, %v195_v23  ;;  %v228_v57 = vmul.f32 %v360_v53, %v196_v24  ;;  %v229_v58 = vmul.f32 %v360_v53, %v197_v25 }
  0x5c   : > { %v230_v60 = vmul.f32 %v360_v53, %v198_v26  ;;  %v231_v61 = vmul.f32 %v360_v53, %v199_v30  ;;  %v232_v62 = vmul.f32 %v360_v53, %v200_v33  ;;  %v233_v63 = vmul.f32 %v360_v53, %v201_v36 }
  0x5d   : > { %v241_v0 = vmul.f32 %v345_v54, %v226_v55  ;;  %v242_v1 = vmul.f32 %v345_v54, %v227_v56  ;;  %v243_v2 = vmul.f32 %v345_v54, %v228_v57  ;;  %v244_v3 = vmul.f32 %v345_v54, %v229_v58 }
  0x5e   : > { %v245_v4 = vmul.f32 %v345_v54, %v230_v60  ;;  %v246_v5 = vmul.f32 %v345_v54, %v231_v61  ;;  %v247_v6 = vmul.f32 %v345_v54, %v232_v62  ;;  %v248_v7 = vmul.f32 %v345_v54, %v233_v63 }
  0x5f   : > { %v256_v8 = vadd.f32 %v346_v59, %v241_v0  ;;  %v257_v9 = vadd.f32 %v346_v59, %v242_v1  ;;  %v258_v10 = vadd.f32 %v346_v59, %v243_v2  ;;  %v259_v11 = vadd.f32 %v346_v59, %v244_v3 }
  0x60   : > { %v260_v12 = vadd.f32 %v346_v59, %v245_v4  ;;  %v261_v13 = vadd.f32 %v346_v59, %v246_v5  ;;  %v262_v14 = vadd.f32 %v346_v59, %v247_v6  ;;  %v263_v15 = vadd.f32 %v346_v59, %v248_v7 }
  0x61   : > { %v264_v16 = vmax.f32 %v256_v8, 0.0  ;;  %v265_v17 = vmax.f32 %v257_v9, 0.0  ;;  %v266_v18 = vmax.f32 %v258_v10, 0.0  ;;  %v267_v19 = vmax.f32 %v259_v11, 0.0 }
  0x62   : > { %v268_v20 = vmax.f32 %v260_v12, 0.0  ;;  %v269_v21 = vmax.f32 %v261_v13, 0.0  ;;  %v270_v22 = vmax.f32 %v262_v14, 0.0  ;;  %v271_v23 = vmax.f32 %v263_v15, 0.0 }
  0x63   : > { %273 = vst.msk [vmem:[%s170_s24] sm:$0xff] %vm272_vm0, %v264_v16  ;;  %274 = vst.msk [vmem:[%s170_s24 + $0x8] sm:$0xff] %vm272_vm0, %v265_v17 }
  0x64   : > { %275 = vst.msk [vmem:[%s170_s24 + $0x10] sm:$0xff] %vm272_vm0, %v266_v18  ;;  %276 = vst.msk [vmem:[%s170_s24 + $0x18] sm:$0xff] %vm272_vm0, %v267_v19 }
  0x65   : > { %277 = vst.msk [vmem:[%s170_s24 + $0x20] sm:$0xff] %vm272_vm0, %v268_v20  ;;  %278 = vst.msk [vmem:[%s170_s24 + $0x28] sm:$0xff] %vm272_vm0, %v269_v21 }
  0x66   : > { %279 = vst.msk [vmem:[%s170_s24 + $0x30] sm:$0xff] %vm272_vm0, %v270_v22  ;;  %280 = vst.msk [vmem:[%s170_s24 + $0x38] sm:$0xff] %vm272_vm0, %v271_v23 }
  0x67 PF: > { %s13_s12 = sadd.s32 1, %s367_s12  }
  0x68   : > { %p10_p4 = scmp.ge.s32.totalorder %s13_s12, 4  }
  0x6a   :  { %12 = sbr.rel (!%p10_p4) target bundleno = 1 (0x1), region = 62 }

// kernel: image_transformation_network.36
= control target key start
LH: loop header
LB: loop body
LE: loop exit
PB: predicated region body
PF: predicated region fallthrough
CT: control target
= control target key end

     0   :  { %s328_s12 = smov 0   ;;  %s358_s0 = inlined_call_operand.vmem [shape: f32[2,16,128], index: 0, kind: input, shape index: {}]   ;;  %s359_s1 = inlined_call_operand.vmem [shape: f32[1,1,128], index: 1, kind: input, shape index: {}]   ;;  %s360_s2 = inlined_call_operand.vmem [shape: f32[1,1,128], index: 2, kind: input, shape index: {}]   ;;  %s361_s3 = inlined_call_operand.vmem [shape: f32[2,16,128], index: 3, kind: output, shape index: {}]  }
   0x1 LB: > { %s275_s13 = sadd.s32 4294967295, %s306_s12   ;;  %p279_p0 = scmp.ge.s32.totalorder %s306_s12, 1  ;;  %s306_s12 = sphi %s328_s12, %s13_s12  }
   0x2   : > { %p137_p1 = scmp.lt.s32.totalorder %s306_s12, 3 }
   0x4   : > { %p138_p2 = pnand %p279_p0, %p137_p1 }
   0x5   : > { %p161_p3 = scmp.lt.s32.totalorder (!%p138_p2), %s275_s13, 1 }
   0x6   : > { %141 = sbr.rel (%p138_p2) target bundleno = 76 (0x4c), region = 32 }
   0xb   : > { %s363_s13 = smov (!%p161_p3, %s275_s13), 1  ;;  %v284_v24 = vld [vmem:[%s359_s1] ss:$0 sm:$0xff] }
   0xc   : > { %s288_s14 = sshll.u32 %s363_s13, 4  ;;  %v285_v27 = vld [vmem:[%s360_s2] ss:$0 sm:$0xff] }
   0xd   : > { %s165_s17 = scalar_lea.vmem %s358_s0, %s288_s14  ;;  %s170_s24 = scalar_lea.vmem %s361_s3, %s288_s14 }
   0xe   : > { %v171_v0 = vld [vmem:[%s165_s17] sm:$0xff]  ;;  %v172_v1 = vld [vmem:[%s165_s17 + $0x8] sm:$0xff] }
   0xf   : > { %v173_v2 = vadd.f32 %v172_v1, %v171_v0 }
  0x11   : > { %v174_v3 = vrot.slane %v173_v2, 4 }
  0x13   : > { %v175_v4 = vadd.f32 %v174_v3, %v173_v2 }
  0x15   : > { %v176_v5 = vrot.slane %v175_v4, 2 }
  0x17   : > { %v177_v6 = vadd.f32 %v176_v5, %v175_v4 }
  0x19   : > { %v178_v7 = vrot.slane %v177_v6, 1 }
  0x1b   : > { %v179_v8 = vadd.f32 %v178_v7, %v177_v6 }
  0x1d   : > { %v181_v9 = vmul.f32 0.0625, %v179_v8 }
  0x1f   : > { %v182_v10 = vsub.f32 %v171_v0, %v181_v9  ;;  %v183_v11 = vsub.f32 %v172_v1, %v181_v9 }
  0x21   : > { %v184_v12 = vmul.f32 %v182_v10, %v182_v10  ;;  %v185_v13 = vmul.f32 %v183_v11, %v183_v11 }
  0x23   : > { %v186_v14 = vadd.f32 %v185_v13, %v184_v12 }
  0x25   : > { %v187_v15 = vrot.slane %v186_v14, 4 }
  0x27   : > { %v188_v16 = vadd.f32 %v187_v15, %v186_v14 }
  0x29   : > { %v189_v17 = vrot.slane %v188_v16, 2 }
  0x2b   : > { %v190_v18 = vadd.f32 %v189_v17, %v188_v16 }
  0x2d   : > { %v191_v19 = vrot.slane %v190_v18, 1 }
  0x2f   : > { %v192_v20 = vadd.f32 %v191_v19, %v190_v18 }
  0x31   : > { %v193_v21 = vmul.f32 0.0625, %v192_v20 }
  0x33   : > { %v194_v22 = vadd.f32 1e-05, %v193_v21 }
  0x35   : > { %298 = vrsqrt.f32 %v194_v22 }
  0x42   : > { %v299_v23 = vpop.eup %298 }
  0x43   : > { %v196_v25 = vmul.f32 %v299_v23, %v182_v10  ;;  %v197_v26 = vmul.f32 %v299_v23, %v183_v11 }
  0x45   : > { %v205_v28 = vmul.f32 %v284_v24, %v196_v25  ;;  %v206_v29 = vmul.f32 %v284_v24, %v197_v26 }
  0x47   : > { %v214_v30 = vadd.f32 %v285_v27, %v205_v28  ;;  %v215_v31 = vadd.f32 %v285_v27, %v206_v29 }
  0x49   : > { %v216_v32 = vmax.f32 %v214_v30, 0.0  ;;  %v217_v33 = vmax.f32 %v215_v31, 0.0 }
  0x4b   : > { %218 = vst [vmem:[%s170_s24] sm:$0xff] %v216_v32  ;;  %219 = vst [vmem:[%s170_s24 + $0x8] sm:$0xff] %v217_v33 }
  0x4c PF: > { %s13_s12 = sadd.s32 1, %s306_s12  }
  0x4d   : > { %p10_p4 = scmp.ge.s32.totalorder %s13_s12, 4  }
  0x4f   :  { %12 = sbr.rel (!%p10_p4) target bundleno = 1 (0x1), region = 62 }

// kernel: image_transformation_network.35
= control target key start
LH: loop header
LB: loop body
LE: loop exit
PB: predicated region body
PF: predicated region fallthrough
CT: control target
= control target key end

     0   :  { %s937_s1 = inlined_call_operand.vmem [shape: bf16[640,128], index: 1, kind: input, shape index: {}]   ;;  %s938_s0 = inlined_call_operand.vmem [shape: bf16[32,640], index: 0, kind: input, shape index: {}]   ;;  %s939_s2 = inlined_call_operand.vmem [shape: f32[1,128], index: 2, kind: input, shape index: {}]   ;;  %s940_s3 = inlined_call_operand.vmem [shape: f32[32,128], index: 3, kind: output, shape index: {}]  }
   0x1   :  { %v698_v0 = vld [vmem:[%s937_s1 + $0x78] sm:$0xff]   ;;  %v702_v4 = vld [vmem:[%s937_s1 + $0x70] sm:$0xff]   ;;  %v706_v8 = vld [vmem:[%s937_s1 + $0x68] sm:$0xff]  }
   0x2   :  { %v699_v1 = vld [vmem:[%s937_s1 + $0x38] sm:$0xff]   ;;  %612 = vmatprep.subr.bf16.mxu0 %v698_v0  ;;  %v703_v5 = vld [vmem:[%s937_s1 + $0x30] sm:$0xff]   ;;  %v707_v9 = vld [vmem:[%s937_s1 + $0x28] sm:$0xff]  }
   0x3   :  { %v700_v2 = vld [vmem:[%s937_s1 + $0xf8] sm:$0xff]   ;;  %613 = vmatpush3.bf16.msra.mxu0 %v699_v1  ;;  %v704_v6 = vld [vmem:[%s937_s1 + $0xf0] sm:$0xff]   ;;  %v708_v10 = vld [vmem:[%s937_s1 + $0xe8] sm:$0xff]  }
   0x4   :  { %v701_v3 = vld [vmem:[%s937_s1 + $0xb8] sm:$0xff]   ;;  %640 = vmatprep.subr.bf16.mxu1 %v700_v2  ;;  %614 = vmatprep.subr.bf16.mxu0 %v702_v4  ;;  %v705_v7 = vld [vmem:[%s937_s1 + $0xb0] sm:$0xff]   ;;  %v709_v11 = vld [vmem:[%s937_s1 + $0xa8] sm:$0xff]  }
   0x5   :  { %641 = vmatpush3.bf16.msra.mxu1 %v701_v3  ;;  %v710_v12 = vld [vmem:[%s937_s1 + $0x60] sm:$0xff]   ;;  %v714_v16 = vld [vmem:[%s937_s1 + $0x58] sm:$0xff]   ;;  %v718_v20 = vld [vmem:[%s937_s1 + $0x50] sm:$0xff]  }
   0x6   :  { %642 = vmatprep.subr.bf16.mxu1 %v704_v6  ;;  %v711_v13 = vld [vmem:[%s937_s1 + $0x20] sm:$0xff]   ;;  %v715_v17 = vld [vmem:[%s937_s1 + $0x18] sm:$0xff]   ;;  %v719_v21 = vld [vmem:[%s937_s1 + $0x10] sm:$0xff]  }
   0x7   :  { %615 = vmatpush3.bf16.msra.mxu0 %v703_v5  ;;  %v712_v14 = vld [vmem:[%s937_s1 + $0xe0] sm:$0xff]   ;;  %v716_v18 = vld [vmem:[%s937_s1 + $0xd8] sm:$0xff]   ;;  %v720_v22 = vld [vmem:[%s937_s1 + $0xd0] sm:$0xff]  }
   0x8   :  { %616 = vmatprep.subr.bf16.mxu0 %v706_v8  ;;  %v713_v15 = vld [vmem:[%s937_s1 + $0xa0] sm:$0xff]   ;;  %v717_v19 = vld [vmem:[%s937_s1 + $0x98] sm:$0xff]   ;;  %v721_v23 = vld [vmem:[%s937_s1 + $0x90] sm:$0xff]  }
   0x9   :  { %643 = vmatpush3.bf16.msra.mxu1 %v705_v7  ;;  %v722_v24 = vld [vmem:[%s937_s1 + $0x48] sm:$0xff]   ;;  %v726_v28 = vld [vmem:[%s937_s1 + $0x40] sm:$0xff]   ;;  %v733_v34 = vld [vmem:[%s937_s1 + $0x138] sm:$0xff]  }
   0xa   :  { %644 = vmatprep.subr.bf16.mxu1 %v708_v10  ;;  %v723_v25 = vld [vmem:[%s937_s1 + $0x8] sm:$0xff]   ;;  %v727_v29 = vld [vmem:[%s937_s1] sm:$0xff]   ;;  %v737_v37 = vld [vmem:[%s937_s1 + $0x130] sm:$0xff]  }
   0xb   :  { %617 = vmatpush3.bf16.msra.mxu0 %v707_v9  ;;  %v724_v26 = vld [vmem:[%s937_s1 + $0xc8] sm:$0xff]   ;;  %v728_v30 = vld [vmem:[%s937_s1 + $0xc0] sm:$0xff]   ;;  %v740_v44 = vld [vmem:[%s937_s1 + $0x118] sm:$0xff]  }
   0xc   :  { %618 = vmatprep.subr.bf16.mxu0 %v710_v12  ;;  %v725_v27 = vld [vmem:[%s937_s1 + $0x88] sm:$0xff]   ;;  %v729_v31 = vld [vmem:[%s938_s0] ss:$20 sps:$4 sm:$0xff]   ;;  %v731_v32 = vld [vmem:[%s938_s0 + $0x4] ss:$20 sps:$4 sm:$0xff]  }
   0xd   :  { %645 = vmatpush3.bf16.msra.mxu1 %v709_v11  ;;  %v732_v33 = vld [vmem:[%s937_s1 + $0x80] sm:$0xff]   ;;  %438 = vmatprep.mubr.bf16.mxu0 %v731_v32  ;;  %v734_v35 = vld [vmem:[%s938_s0 + $0x8] ss:$20 sps:$4 sm:$0xff]   ;;  %v747_v46 = vld [vmem:[%s937_s1 + $0x110] sm:$0xff]  }
   0xe   :  { %646 = vmatprep.subr.bf16.mxu1 %v712_v14  ;;  %v736_v36 = vld [vmem:[%s938_s0 + $0xc] ss:$20 sps:$4 sm:$0xff]   ;;  %v743_v41 = vld [vmem:[%s938_s0 + $0x28] ss:$20 sps:$4 sm:$0xff]   ;;  %v746_v43 = vld [vmem:[%s938_s0 + $0x30] ss:$20 sps:$4 sm:$0xff]  }
   0xf   :  { %619 = vmatpush3.bf16.msra.mxu0 %v711_v13  ;;  %487 = vmatprep.mubr.bf16.mxu1 %v736_v36  ;;  %v738_v38 = vld [vmem:[%s937_s1 + $0x128] sm:$0xff]   ;;  %v739_v39 = vld [vmem:[%s937_s1 + $0x120] sm:$0xff]  }
  0x10   :  { %620 = vmatprep.subr.bf16.mxu0 %v714_v16  ;;  %v741_v40 = vld [vmem:[%s938_s0 + $0x2c] ss:$20 sps:$4 sm:$0xff]   ;;  %v744_v42 = vld [vmem:[%s938_s0 + $0x34] ss:$20 sps:$4 sm:$0xff]   ;;  %v750_v45 = vld [vmem:[%s938_s0 + $0x10] ss:$20 sps:$4 sm:$0xff]  }
  0x11   :  { %647 = vmatpush3.bf16.msra.mxu1 %v713_v15  ;;  %v748_v47 = vld [vmem:[%s937_s1 + $0x108] sm:$0xff]   ;;  %v749_v48 = vld [vmem:[%s937_s1 + $0x100] sm:$0xff]  }
  0x12   :  { %648 = vmatprep.subr.bf16.mxu1 %v716_v18  ;;  %v751_v49 = vld [vmem:[%s938_s0 + $0x38] ss:$20 sps:$4 sm:$0xff]   ;;  %v561_v3 = vld [vmem:[%s939_s2] ss:$0 sm:$0xff] }
  0x13   :  { %621 = vmatpush3.bf16.msra.mxu0 %v715_v17 }
  0x14   :  { %622 = vmatprep.subr.bf16.mxu0 %v718_v20 }
  0x15   :  { %649 = vmatpush3.bf16.msra.mxu1 %v717_v19 }
  0x16   :  { %650 = vmatprep.subr.bf16.mxu1 %v720_v22 }
  0x17   :  { %623 = vmatpush3.bf16.msra.mxu0 %v719_v21 }
  0x18   :  { %624 = vmatprep.subr.bf16.mxu0 %v722_v24 }
  0x19   :  { %651 = vmatpush3.bf16.msra.mxu1 %v721_v23 }
  0x1a   :  { %652 = vmatprep.subr.bf16.mxu1 %v724_v26 }
  0x1b   :  { %625 = vmatpush3.bf16.msra.mxu0 %v723_v25 }
  0x1c   :  { %626 = vmatprep.subr.bf16.mxu0 %v726_v28 }
  0x1d   :  { %653 = vmatpush3.bf16.msra.mxu1 %v725_v27 }
  0x1e   :  { %654 = vmatprep.subr.bf16.mxu1 %v728_v30 }
  0x1f   :  { %627 = vmatpush3.bf16.msra.mxu0 %v727_v29 }
  0x20   :  { %678 = vmatprep.subr.bf16.mxu0 %v733_v34 }
  0x21   :  { %655 = vmatpush3.bf16.msra.mxu1 %v732_v33 }
  0x22   :  { %439 = vmatmul.mubr.bf16.vlgmr.msra.gmra.mxu0 %v729_v31 }
  0x23   :  { %679 = vmatpush3.bf16.msra.mxu0 %v733_v34  ;;  %446 = vmatprep.mubr.bf16.mxu0 %v741_v40 }
  0x24   :  { %488 = vmatmul.mubr.bf16.vlgmr.msra.gmra.mxu1 %v734_v35  ;;  %680 = vmatprep.subr.bf16.mxu0 %v737_v37 }
  0x25   :  { %495 = vmatprep.mubr.bf16.mxu1 %v744_v42 }
  0x27   :  { %681 = vmatpush3.bf16.msra.mxu0 %v737_v37 }
  0x28   :  { %682 = vmatprep.subr.bf16.mxu0 %v738_v38 }
  0x2a   :  { %447 = vmatmul.mubr.bf16.gmra.mxu0 %v743_v41 }
  0x2b   :  { %683 = vmatpush3.bf16.msra.mxu0 %v738_v38  ;;  %694 = vmatprep.mubr.bf16.mxu0 %v750_v45 }
  0x2c   :  { %684 = vmatprep.subr.bf16.mxu0 %v739_v39  ;;  %496 = vmatmul.mubr.bf16.gmra.mxu1 %v746_v43 }
  0x2f   :  { %685 = vmatpush3.bf16.msra.mxu0 %v739_v39 }
  0x30   :  { %686 = vmatprep.subr.bf16.mxu0 %v740_v44 }
  0x33   :  { %687 = vmatpush3.bf16.msra.mxu0 %v740_v44 }
  0x34   :  { %688 = vmatprep.subr.bf16.mxu0 %v747_v46 }
  0x37   :  { %689 = vmatpush3.bf16.msra.mxu0 %v747_v46 }
  0x38   :  { %690 = vmatprep.subr.bf16.mxu0 %v748_v47 }
  0x3b   :  { %691 = vmatpush3.bf16.msra.mxu0 %v748_v47 }
  0x3c   :  { %692 = vmatprep.subr.bf16.mxu0 %v749_v48 }
  0x3f   :  { %693 = vmatpush3.bf16.msra.mxu0 %v749_v48 }
  0x42   :  { %695 = vmatmul.mubr.bf16.vlgmr.msra.gmra.mxu0 %v751_v49 }
  0xe2   :  { %v628_v50 = vpop.f32.mrf.mxu0 }
  0xe4   :  { %v629_v51 = vpop.f32.mrf.mxu0  ;;  %v656_v52 = vpop.f32.mrf.mxu1 }
  0xe5   :  { %v630_v2 = vadd.f32 %v629_v51, %v628_v50 }
  0xe6   :  { %v631_v53 = vpop.f32.mrf.mxu0  ;;  %v657_v54 = vpop.f32.mrf.mxu1 }
  0xe7   :  { %v441_v8 = vadd.f32 %v630_v2, %v561_v3  ;;  %v658_v9 = vadd.f32 %v657_v54, %v656_v52 }
  0xe8   :  { %v632_v55 = vpop.f32.mrf.mxu0  ;;  %v659_v56 = vpop.f32.mrf.mxu1 }
  0xe9   :  { %v633_v10 = vadd.f32 %v632_v55, %v631_v53  ;;  %v490_v18 = vadd.f32 %v658_v9, %v441_v8 }
  0xea   :  { %v634_v57 = vpop.f32.mrf.mxu0  ;;  %v660_v58 = vpop.f32.mrf.mxu1 }
  0xeb   :  { %v444_v15 = vadd.f32 %v633_v10, %v561_v3  ;;  %v661_v16 = vadd.f32 %v660_v58, %v659_v56 }
  0xec   :  { %v635_v59 = vpop.f32.mrf.mxu0  ;;  %v662_v60 = vpop.f32.mrf.mxu1 }
  0xed   :  { %v636_v63 = vadd.f32 %v635_v59, %v634_v57  ;;  %v493_v24 = vadd.f32 %v661_v16, %v444_v15 }
  0xee   :  { %v637_v61 = vpop.f32.mrf.mxu0  ;;  %v663_v62 = vpop.f32.mrf.mxu1 }
  0xef   :  { %v449_v4 = vadd.f32 %v636_v63, %v561_v3  ;;  %v664_v5 = vadd.f32 %v663_v62, %v662_v60 }
  0xf0   :  { %v638_v0 = vpop.f32.mrf.mxu0  ;;  %v665_v1 = vpop.f32.mrf.mxu1 }
  0xf1   :  { %v639_v6 = vadd.f32 %v638_v0, %v637_v61  ;;  %v498_v13 = vadd.f32 %v664_v5, %v449_v4 }
  0xf2   :  { %v666_v7 = vpop.f32.mrf.mxu1 }
  0xf3   :  { %v452_v11 = vadd.f32 %v639_v6, %v561_v3  ;;  %v667_v12 = vadd.f32 %v666_v7, %v665_v1 }
  0xf5   :  { %v501_v21 = vadd.f32 %v667_v12, %v452_v11 }
 0x102   :  { %v696_v14 = vpop.f32.mrf.mxu0 }
 0x103   :  { %v547_v17 = vadd.f32 %v696_v14, %v498_v13 }
 0x104   :  { %v538_v19 = vpop.f32.mrf.mxu0 }
 0x105   :  { %555 = vst [vmem:[%s940_s3 + $0x10] sm:$0xff] %v547_v17  ;;  %v539_v20 = vadd.f32 %v538_v19, %v490_v18 }
 0x106   :  { %v697_v22 = vpop.f32.mrf.mxu0 }
 0x107   :  { %553 = vst [vmem:[%s940_s3] sm:$0xff] %v539_v20  ;;  %v550_v23 = vadd.f32 %v697_v22, %v501_v21 }
 0x108   :  { %v541_v25 = vpop.f32.mrf.mxu0 }
 0x109   :  { %556 = vst [vmem:[%s940_s3 + $0x18] sm:$0xff] %v550_v23  ;;  %v542_v26 = vadd.f32 %v541_v25, %v493_v24 }
 0x10b   :  { %554 = vst [vmem:[%s940_s3 + $0x8] sm:$0xff] %v542_v26 }

// kernel: image_transformation_network.40
= control target key start
LH: loop header
LB: loop body
LE: loop exit
PB: predicated region body
PF: predicated region fallthrough
CT: control target
= control target key end

     0   :  { %s397_s15 = smov 0   ;;  %s428_s0 = inlined_call_operand.vmem [shape: f32[2,16,128], index: 0, kind: input, shape index: {}]   ;;  %s429_s1 = inlined_call_operand.vmem [shape: f32[1,1,128], index: 1, kind: input, shape index: {}]   ;;  %s430_s2 = inlined_call_operand.vmem [shape: f32[1,1,128], index: 2, kind: input, shape index: {}]   ;;  %s431_s3 = inlined_call_operand.vmem [shape: f32[2,16,128], index: 3, kind: input, shape index: {}]   ;;  %s432_s4 = inlined_call_operand.vmem [shape: f32[2,16,128], index: 4, kind: output, shape index: {}]  }
   0x1 LB: > { %s336_s16 = sadd.s32 4294967295, %s370_s15   ;;  %p340_p0 = scmp.ge.s32.totalorder %s370_s15, 1  ;;  %s370_s15 = sphi %s397_s15, %s14_s15  }
   0x2   : > { %p172_p1 = scmp.lt.s32.totalorder %s370_s15, 3 }
   0x4   : > { %p173_p2 = pnand %p340_p0, %p172_p1 }
   0x5   : > { %p203_p3 = scmp.lt.s32.totalorder (!%p173_p2), %s336_s16, 1 }
   0x6   : > { %176 = sbr.rel (%p173_p2) target bundleno = 76 (0x4c), region = 36 }
   0xb   : > { %s434_s16 = smov (!%p203_p3, %s336_s16), 1  ;;  %v347_v24 = vld [vmem:[%s429_s1] ss:$0 sm:$0xff] }
   0xc   : > { %s405_s17 = sshll.u32 %s434_s16, 4  ;;  %v348_v27 = vld [vmem:[%s430_s2] ss:$0 sm:$0xff] }
   0xd   : > { %s207_s20 = scalar_lea.vmem %s428_s0, %s405_s17  ;;  %s212_s25 = scalar_lea.vmem %s431_s3, %s405_s17 }
   0xe   : > { %v218_v0 = vld [vmem:[%s207_s20] sm:$0xff]  ;;  %v219_v1 = vld [vmem:[%s207_s20 + $0x8] sm:$0xff]  ;;  %s217_s30 = scalar_lea.vmem %s432_s4, %s405_s17 }
   0xf   : > { %v220_v2 = vadd.f32 %v219_v1, %v218_v0  ;;  %v263_v30 = vld [vmem:[%s212_s25] sm:$0xff]  ;;  %v264_v31 = vld [vmem:[%s212_s25 + $0x8] sm:$0xff] }
  0x11   : > { %v221_v3 = vrot.slane %v220_v2, 4 }
  0x13   : > { %v222_v4 = vadd.f32 %v221_v3, %v220_v2 }
  0x15   : > { %v223_v5 = vrot.slane %v222_v4, 2 }
  0x17   : > { %v224_v6 = vadd.f32 %v223_v5, %v222_v4 }
  0x19   : > { %v225_v7 = vrot.slane %v224_v6, 1 }
  0x1b   : > { %v226_v8 = vadd.f32 %v225_v7, %v224_v6 }
  0x1d   : > { %v228_v9 = vmul.f32 0.0625, %v226_v8 }
  0x1f   : > { %v229_v10 = vsub.f32 %v218_v0, %v228_v9  ;;  %v230_v11 = vsub.f32 %v219_v1, %v228_v9 }
  0x21   : > { %v231_v12 = vmul.f32 %v229_v10, %v229_v10  ;;  %v232_v13 = vmul.f32 %v230_v11, %v230_v11 }
  0x23   : > { %v233_v14 = vadd.f32 %v232_v13, %v231_v12 }
  0x25   : > { %v234_v15 = vrot.slane %v233_v14, 4 }
  0x27   : > { %v235_v16 = vadd.f32 %v234_v15, %v233_v14 }
  0x29   : > { %v236_v17 = vrot.slane %v235_v16, 2 }
  0x2b   : > { %v237_v18 = vadd.f32 %v236_v17, %v235_v16 }
  0x2d   : > { %v238_v19 = vrot.slane %v237_v18, 1 }
  0x2f   : > { %v239_v20 = vadd.f32 %v238_v19, %v237_v18 }
  0x31   : > { %v240_v21 = vmul.f32 0.0625, %v239_v20 }
  0x33   : > { %v241_v22 = vadd.f32 1e-05, %v240_v21 }
  0x35   : > { %362 = vrsqrt.f32 %v241_v22 }
  0x42   : > { %v363_v23 = vpop.eup %362 }
  0x43   : > { %v243_v25 = vmul.f32 %v363_v23, %v229_v10  ;;  %v244_v26 = vmul.f32 %v363_v23, %v230_v11 }
  0x45   : > { %v252_v28 = vmul.f32 %v347_v24, %v243_v25  ;;  %v253_v29 = vmul.f32 %v347_v24, %v244_v26 }
  0x47   : > { %v261_v32 = vadd.f32 %v348_v27, %v252_v28  ;;  %v262_v33 = vadd.f32 %v348_v27, %v253_v29 }
  0x49   : > { %v265_v34 = vadd.f32 %v263_v30, %v261_v32  ;;  %v266_v35 = vadd.f32 %v264_v31, %v262_v33 }
  0x4b   : > { %267 = vst [vmem:[%s217_s30] sm:$0xff] %v265_v34  ;;  %268 = vst [vmem:[%s217_s30 + $0x8] sm:$0xff] %v266_v35 }
  0x4c PF: > { %s14_s15 = sadd.s32 1, %s370_s15  }
  0x4d   : > { %p11_p4 = scmp.ge.s32.totalorder %s14_s15, 4  }
  0x4f   :  { %13 = sbr.rel (!%p11_p4) target bundleno = 1 (0x1), region = 69 }

// kernel: image_transformation_network.37
= control target key start
LH: loop header
LB: loop body
LE: loop exit
PB: predicated region body
PF: predicated region fallthrough
CT: control target
= control target key end

     0   :  { %s1599_s1 = inlined_call_operand.vmem [shape: bf16[1152,128], index: 1, kind: input, shape index: {}]   ;;  %s1600_s0 = inlined_call_operand.vmem [shape: bf16[32,1152], index: 0, kind: input, shape index: {}]   ;;  %s1601_s2 = inlined_call_operand.vmem [shape: f32[1,128], index: 2, kind: input, shape index: {}]   ;;  %s1602_s3 = inlined_call_operand.vmem [shape: f32[32,128], index: 3, kind: output, shape index: {}]  }
   0x1   :  { %v1196_v0 = vld [vmem:[%s1599_s1 + $0x78] sm:$0xff]   ;;  %v1200_v4 = vld [vmem:[%s1599_s1 + $0x70] sm:$0xff]   ;;  %v1204_v8 = vld [vmem:[%s1599_s1 + $0x68] sm:$0xff]  }
   0x2   :  { %v1197_v1 = vld [vmem:[%s1599_s1 + $0x38] sm:$0xff]   ;;  %1054 = vmatprep.subr.bf16.mxu0 %v1196_v0  ;;  %v1201_v5 = vld [vmem:[%s1599_s1 + $0x30] sm:$0xff]   ;;  %v1205_v9 = vld [vmem:[%s1599_s1 + $0x28] sm:$0xff]  }
   0x3   :  { %v1198_v2 = vld [vmem:[%s1599_s1 + $0xf8] sm:$0xff]   ;;  %1055 = vmatpush3.bf16.msra.mxu0 %v1197_v1  ;;  %v1202_v6 = vld [vmem:[%s1599_s1 + $0xf0] sm:$0xff]   ;;  %v1206_v10 = vld [vmem:[%s1599_s1 + $0xe8] sm:$0xff]  }
   0x4   :  { %v1199_v3 = vld [vmem:[%s1599_s1 + $0xb8] sm:$0xff]   ;;  %1082 = vmatprep.subr.bf16.mxu1 %v1198_v2  ;;  %1056 = vmatprep.subr.bf16.mxu0 %v1200_v4  ;;  %v1203_v7 = vld [vmem:[%s1599_s1 + $0xb0] sm:$0xff]   ;;  %v1207_v11 = vld [vmem:[%s1599_s1 + $0xa8] sm:$0xff]  }
   0x5   :  { %1083 = vmatpush3.bf16.msra.mxu1 %v1199_v3  ;;  %v1208_v12 = vld [vmem:[%s1599_s1 + $0x60] sm:$0xff]   ;;  %v1212_v16 = vld [vmem:[%s1599_s1 + $0x58] sm:$0xff]   ;;  %v1216_v20 = vld [vmem:[%s1599_s1 + $0x50] sm:$0xff]  }
   0x6   :  { %1084 = vmatprep.subr.bf16.mxu1 %v1202_v6  ;;  %v1209_v13 = vld [vmem:[%s1599_s1 + $0x20] sm:$0xff]   ;;  %v1213_v17 = vld [vmem:[%s1599_s1 + $0x18] sm:$0xff]   ;;  %v1217_v21 = vld [vmem:[%s1599_s1 + $0x10] sm:$0xff]  }
   0x7   :  { %1057 = vmatpush3.bf16.msra.mxu0 %v1201_v5  ;;  %v1210_v14 = vld [vmem:[%s1599_s1 + $0xe0] sm:$0xff]   ;;  %v1214_v18 = vld [vmem:[%s1599_s1 + $0xd8] sm:$0xff]   ;;  %v1218_v22 = vld [vmem:[%s1599_s1 + $0xd0] sm:$0xff]  }
   0x8   :  { %1058 = vmatprep.subr.bf16.mxu0 %v1204_v8  ;;  %v1211_v15 = vld [vmem:[%s1599_s1 + $0xa0] sm:$0xff]   ;;  %v1215_v19 = vld [vmem:[%s1599_s1 + $0x98] sm:$0xff]   ;;  %v1219_v23 = vld [vmem:[%s1599_s1 + $0x90] sm:$0xff]  }
   0x9   :  { %1085 = vmatpush3.bf16.msra.mxu1 %v1203_v7  ;;  %v1220_v24 = vld [vmem:[%s1599_s1 + $0x48] sm:$0xff]   ;;  %v1224_v28 = vld [vmem:[%s1599_s1 + $0x40] sm:$0xff]   ;;  %v1231_v34 = vld [vmem:[%s1599_s1 + $0x178] sm:$0xff]  }
   0xa   :  { %1086 = vmatprep.subr.bf16.mxu1 %v1206_v10  ;;  %v1221_v25 = vld [vmem:[%s1599_s1 + $0x8] sm:$0xff]   ;;  %v1225_v29 = vld [vmem:[%s1599_s1] sm:$0xff]   ;;  %v1235_v37 = vld [vmem:[%s1599_s1 + $0x138] sm:$0xff]  }
   0xb   :  { %1059 = vmatpush3.bf16.msra.mxu0 %v1205_v9  ;;  %v1222_v26 = vld [vmem:[%s1599_s1 + $0xc8] sm:$0xff]   ;;  %v1226_v30 = vld [vmem:[%s1599_s1 + $0xc0] sm:$0xff]   ;;  %v1236_v38 = vld [vmem:[%s1599_s1 + $0x1f8] sm:$0xff]  }
   0xc   :  { %1060 = vmatprep.subr.bf16.mxu0 %v1208_v12  ;;  %v1223_v27 = vld [vmem:[%s1599_s1 + $0x88] sm:$0xff]   ;;  %v1227_v31 = vld [vmem:[%s1600_s0] ss:$36 sps:$4 sm:$0xff]   ;;  %v1237_v39 = vld [vmem:[%s1599_s1 + $0x1b8] sm:$0xff]  }
   0xd   :  { %1087 = vmatpush3.bf16.msra.mxu1 %v1207_v11  ;;  %v1229_v32 = vld [vmem:[%s1600_s0 + $0x4] ss:$36 sps:$4 sm:$0xff]   ;;  %v1234_v36 = vld [vmem:[%s1600_s0 + $0xc] ss:$36 sps:$4 sm:$0xff]   ;;  %v1250_v52 = vld [vmem:[%s1599_s1 + $0x158] sm:$0xff]  }
   0xe   :  { %1088 = vmatprep.subr.bf16.mxu1 %v1210_v14  ;;  %v1230_v33 = vld [vmem:[%s1599_s1 + $0x80] sm:$0xff]   ;;  %742 = vmatprep.mubr.bf16.mxu0 %v1229_v32  ;;  %v1232_v35 = vld [vmem:[%s1600_s0 + $0x8] ss:$36 sps:$4 sm:$0xff]   ;;  %v1238_v40 = vld [vmem:[%s1599_s1 + $0x170] sm:$0xff]  }
   0xf   :  { %1061 = vmatpush3.bf16.msra.mxu0 %v1209_v13  ;;  %791 = vmatprep.mubr.bf16.mxu1 %v1234_v36  ;;  %v1239_v41 = vld [vmem:[%s1599_s1 + $0x130] sm:$0xff]   ;;  %v1242_v44 = vld [vmem:[%s1599_s1 + $0x168] sm:$0xff]   ;;  %v1246_v48 = vld [vmem:[%s1599_s1 + $0x160] sm:$0xff]  }
  0x10   :  { %1062 = vmatprep.subr.bf16.mxu0 %v1212_v16  ;;  %v1240_v42 = vld [vmem:[%s1599_s1 + $0x1f0] sm:$0xff]   ;;  %v1243_v45 = vld [vmem:[%s1599_s1 + $0x128] sm:$0xff]   ;;  %v1247_v49 = vld [vmem:[%s1599_s1 + $0x120] sm:$0xff]  }
  0x11   :  { %1089 = vmatpush3.bf16.msra.mxu1 %v1211_v15  ;;  %v1241_v43 = vld [vmem:[%s1599_s1 + $0x1b0] sm:$0xff]   ;;  %v1244_v46 = vld [vmem:[%s1599_s1 + $0x1e8] sm:$0xff]   ;;  %v1248_v50 = vld [vmem:[%s1599_s1 + $0x1e0] sm:$0xff]  }
  0x12   :  { %1090 = vmatprep.subr.bf16.mxu1 %v1214_v18  ;;  %v1245_v47 = vld [vmem:[%s1599_s1 + $0x1a8] sm:$0xff]   ;;  %v1249_v51 = vld [vmem:[%s1599_s1 + $0x1a0] sm:$0xff]   ;;  %v1251_v53 = vld [vmem:[%s1599_s1 + $0x118] sm:$0xff]  }
  0x13   :  { %1063 = vmatpush3.bf16.msra.mxu0 %v1213_v17  ;;  %v1252_v54 = vld [vmem:[%s1600_s0 + $0x4c] ss:$36 sps:$4 sm:$0xff]   ;;  %v1254_v55 = vld [vmem:[%s1599_s1 + $0x1d8] sm:$0xff]   ;;  %v1268_v4 = vld [vmem:[%s1599_s1 + $0x140] sm:$0xff]  }
  0x14   :  { %1064 = vmatprep.subr.bf16.mxu0 %v1216_v20  ;;  %v1255_v56 = vld [vmem:[%s1600_s0 + $0x48] ss:$36 sps:$4 sm:$0xff]   ;;  %v1256_v57 = vld [vmem:[%s1599_s1 + $0x198] sm:$0xff]   ;;  %v1259_v59 = vld [vmem:[%s1599_s1 + $0x150] sm:$0xff]  }
  0x15   :  { %1091 = vmatpush3.bf16.msra.mxu1 %v1215_v19  ;;  %v1257_v58 = vld [vmem:[%s1600_s0 + $0x54] ss:$36 sps:$4 sm:$0xff]   ;;  %v1264_v0 = vld [vmem:[%s1599_s1 + $0x148] sm:$0xff]   ;;  %v1269_v5 = vld [vmem:[%s1599_s1 + $0x100] sm:$0xff]  }
  0x16   :  { %1092 = vmatprep.subr.bf16.mxu1 %v1218_v22  ;;  %v1260_v60 = vld [vmem:[%s1600_s0 + $0x50] ss:$36 sps:$4 sm:$0xff]   ;;  %v1265_v1 = vld [vmem:[%s1599_s1 + $0x108] sm:$0xff]   ;;  %v1270_v6 = vld [vmem:[%s1599_s1 + $0x1c0] sm:$0xff]  }
  0x17   :  { %1065 = vmatpush3.bf16.msra.mxu0 %v1217_v21  ;;  %v1261_v61 = vld [vmem:[%s1599_s1 + $0x110] sm:$0xff]   ;;  %v1266_v2 = vld [vmem:[%s1599_s1 + $0x1c8] sm:$0xff]   ;;  %v1274_v9 = vld [vmem:[%s1599_s1 + $0x180] sm:$0xff]  }
  0x18   :  { %1066 = vmatprep.subr.bf16.mxu0 %v1220_v24  ;;  %v1262_v62 = vld [vmem:[%s1599_s1 + $0x1d0] sm:$0xff]   ;;  %v1267_v3 = vld [vmem:[%s1599_s1 + $0x188] sm:$0xff]   ;;  %v1275_v10 = vld [vmem:[%s1599_s1 + $0x238] sm:$0xff]  }
  0x19   :  { %1093 = vmatpush3.bf16.msra.mxu1 %v1219_v23  ;;  %v1263_v63 = vld [vmem:[%s1599_s1 + $0x190] sm:$0xff]   ;;  %v1276_v11 = vld [vmem:[%s1600_s0 + $0x18] ss:$36 sps:$4 sm:$0xff]   ;;  %v1283_v16 = vld [vmem:[%s1599_s1 + $0x228] sm:$0xff]  }
  0x1a   :  { %1094 = vmatprep.subr.bf16.mxu1 %v1222_v26  ;;  %v1271_v7 = vld [vmem:[%s1600_s0 + $0x10] ss:$36 sps:$4 sm:$0xff]   ;;  %v1278_v12 = vld [vmem:[%s1600_s0 + $0x1c] ss:$36 sps:$4 sm:$0xff]   ;;  %v1284_v17 = vld [vmem:[%s1600_s0 + $0x64] ss:$36 sps:$4 sm:$0xff]  }
  0x1b   :  { %1067 = vmatpush3.bf16.msra.mxu0 %v1221_v25  ;;  %v1273_v8 = vld [vmem:[%s1600_s0 + $0x14] ss:$36 sps:$4 sm:$0xff]   ;;  %v1280_v14 = vld [vmem:[%s1600_s0 + $0x5c] ss:$36 sps:$4 sm:$0xff]   ;;  %v1290_v23 = vld [vmem:[%s1599_s1 + $0x208] sm:$0xff]  }
  0x1c   :  { %1068 = vmatprep.subr.bf16.mxu0 %v1224_v28  ;;  %v1279_v13 = vld [vmem:[%s1599_s1 + $0x230] sm:$0xff]   ;;  %v1282_v15 = vld [vmem:[%s1600_s0 + $0x58] ss:$36 sps:$4 sm:$0xff]   ;;  %v1286_v18 = vld [vmem:[%s1600_s0 + $0x60] ss:$36 sps:$4 sm:$0xff]  }
  0x1d   :  { %1095 = vmatpush3.bf16.msra.mxu1 %v1223_v27  ;;  %v1287_v19 = vld [vmem:[%s1599_s1 + $0x220] sm:$0xff]   ;;  %v1288_v20 = vld [vmem:[%s1599_s1 + $0x218] sm:$0xff]   ;;  %v1289_v22 = vld [vmem:[%s1599_s1 + $0x210] sm:$0xff]  }
  0x1e   :  { %1096 = vmatprep.subr.bf16.mxu1 %v1226_v30  ;;  %v1292_v21 = vld [vmem:[%s1600_s0 + $0x20] ss:$36 sps:$4 sm:$0xff]   ;;  %v1293_v25 = vld [vmem:[%s1600_s0 + $0x68] ss:$36 sps:$4 sm:$0xff]  }
  0x1f   :  { %1069 = vmatpush3.bf16.msra.mxu0 %v1225_v29  ;;  %v1291_v24 = vld [vmem:[%s1599_s1 + $0x200] sm:$0xff]  }
  0x20   :  { %1110 = vmatprep.subr.bf16.mxu0 %v1231_v34 }
  0x21   :  { %1097 = vmatpush3.bf16.msra.mxu1 %v1230_v33 }
  0x22   :  { %743 = vmatmul.mubr.bf16.vlgmr.msra.gmra.mxu0 %v1227_v31  ;;  %1138 = vmatprep.subr.bf16.mxu1 %v1236_v38 }
  0x23   :  { %1111 = vmatpush3.bf16.msra.mxu0 %v1235_v37  ;;  %750 = vmatprep.mubr.bf16.mxu0 %v1252_v54 }
  0x24   :  { %792 = vmatmul.mubr.bf16.vlgmr.msra.gmra.mxu1 %v1232_v35  ;;  %1112 = vmatprep.subr.bf16.mxu0 %v1238_v40 }
  0x25   :  { %1139 = vmatpush3.bf16.msra.mxu1 %v1237_v39  ;;  %799 = vmatprep.mubr.bf16.mxu1 %v1257_v58 }
  0x26   :  { %1140 = vmatprep.subr.bf16.mxu1 %v1240_v42 }
  0x27   :  { %1113 = vmatpush3.bf16.msra.mxu0 %v1239_v41 }
  0x28   :  { %1114 = vmatprep.subr.bf16.mxu0 %v1242_v44 }
  0x29   :  { %1141 = vmatpush3.bf16.msra.mxu1 %v1241_v43 }
  0x2a   :  { %1142 = vmatprep.subr.bf16.mxu1 %v1244_v46  ;;  %751 = vmatmul.mubr.bf16.gmra.mxu0 %v1255_v56 }
  0x2b   :  { %1115 = vmatpush3.bf16.msra.mxu0 %v1243_v45  ;;  %840 = vmatprep.mubr.bf16.mxu0 %v1273_v8 }
  0x2c   :  { %1116 = vmatprep.subr.bf16.mxu0 %v1246_v48  ;;  %800 = vmatmul.mubr.bf16.gmra.mxu1 %v1260_v60 }
  0x2d   :  { %1143 = vmatpush3.bf16.msra.mxu1 %v1245_v47  ;;  %889 = vmatprep.mubr.bf16.mxu1 %v1278_v12 }
  0x2e   :  { %1144 = vmatprep.subr.bf16.mxu1 %v1248_v50 }
  0x2f   :  { %1117 = vmatpush3.bf16.msra.mxu0 %v1247_v49 }
  0x30   :  { %1118 = vmatprep.subr.bf16.mxu0 %v1250_v52 }
  0x31   :  { %1145 = vmatpush3.bf16.msra.mxu1 %v1249_v51 }
  0x32   :  { %1146 = vmatprep.subr.bf16.mxu1 %v1254_v55  ;;  %v963_v55 = vld [vmem:[%s1601_s2] ss:$0 sm:$0xff] }
  0x33   :  { %1119 = vmatpush3.bf16.msra.mxu0 %v1251_v53 }
  0x34   :  { %1120 = vmatprep.subr.bf16.mxu0 %v1259_v59 }
  0x35   :  { %1147 = vmatpush3.bf16.msra.mxu1 %v1256_v57 }
  0x36   :  { %1148 = vmatprep.subr.bf16.mxu1 %v1262_v62 }
  0x37   :  { %1121 = vmatpush3.bf16.msra.mxu0 %v1261_v61 }
  0x38   :  { %1122 = vmatprep.subr.bf16.mxu0 %v1264_v0 }
  0x39   :  { %1149 = vmatpush3.bf16.msra.mxu1 %v1263_v63 }
  0x3a   :  { %1150 = vmatprep.subr.bf16.mxu1 %v1266_v2 }
  0x3b   :  { %1123 = vmatpush3.bf16.msra.mxu0 %v1265_v1 }
  0x3c   :  { %1124 = vmatprep.subr.bf16.mxu0 %v1268_v4 }
  0x3d   :  { %1151 = vmatpush3.bf16.msra.mxu1 %v1267_v3 }
  0x3e   :  { %1152 = vmatprep.subr.bf16.mxu1 %v1270_v6 }
  0x3f   :  { %1125 = vmatpush3.bf16.msra.mxu0 %v1269_v5 }
  0x40   :  { %1176 = vmatprep.subr.bf16.mxu0 %v1275_v10 }
  0x41   :  { %1153 = vmatpush3.bf16.msra.mxu1 %v1274_v9 }
  0x42   :  { %841 = vmatmul.mubr.bf16.vlgmr.msra.gmra.mxu0 %v1271_v7 }
  0x43   :  { %1177 = vmatpush3.bf16.msra.mxu0 %v1275_v10  ;;  %848 = vmatprep.mubr.bf16.mxu0 %v1280_v14 }
  0x44   :  { %890 = vmatmul.mubr.bf16.vlgmr.msra.gmra.mxu1 %v1276_v11  ;;  %1178 = vmatprep.subr.bf16.mxu0 %v1279_v13 }
  0x45   :  { %897 = vmatprep.mubr.bf16.mxu1 %v1284_v17 }
  0x47   :  { %1179 = vmatpush3.bf16.msra.mxu0 %v1279_v13 }
  0x48   :  { %1180 = vmatprep.subr.bf16.mxu0 %v1283_v16 }
  0x4a   :  { %849 = vmatmul.mubr.bf16.gmra.mxu0 %v1282_v15 }
  0x4b   :  { %1181 = vmatpush3.bf16.msra.mxu0 %v1283_v16  ;;  %1192 = vmatprep.mubr.bf16.mxu0 %v1292_v21 }
  0x4c   :  { %898 = vmatmul.mubr.bf16.gmra.mxu1 %v1286_v18  ;;  %1182 = vmatprep.subr.bf16.mxu0 %v1287_v19 }
  0x4f   :  { %1183 = vmatpush3.bf16.msra.mxu0 %v1287_v19 }
  0x50   :  { %1184 = vmatprep.subr.bf16.mxu0 %v1288_v20 }
  0x53   :  { %1185 = vmatpush3.bf16.msra.mxu0 %v1288_v20 }
  0x54   :  { %1186 = vmatprep.subr.bf16.mxu0 %v1289_v22 }
  0x57   :  { %1187 = vmatpush3.bf16.msra.mxu0 %v1289_v22 }
  0x58   :  { %1188 = vmatprep.subr.bf16.mxu0 %v1290_v23 }
  0x5b   :  { %1189 = vmatpush3.bf16.msra.mxu0 %v1290_v23 }
  0x5c   :  { %1190 = vmatprep.subr.bf16.mxu0 %v1291_v24 }
  0x5f   :  { %1191 = vmatpush3.bf16.msra.mxu0 %v1291_v24 }
  0x62   :  { %1193 = vmatmul.mubr.bf16.vlgmr.msra.gmra.mxu0 %v1293_v25 }
  0xe2   :  { %v1070_v26 = vpop.f32.mrf.mxu0 }
  0xe4   :  { %v1098_v27 = vpop.f32.mrf.mxu1  ;;  %v1071_v28 = vpop.f32.mrf.mxu0 }
  0xe5   :  { %v1072_v54 = vadd.f32 %v1071_v28, %v1070_v26 }
  0xe6   :  { %v1099_v29 = vpop.f32.mrf.mxu1  ;;  %v1073_v30 = vpop.f32.mrf.mxu0 }
  0xe7   :  { %v745_v61 = vadd.f32 %v1072_v54, %v963_v55  ;;  %v1100_v62 = vadd.f32 %v1099_v29, %v1098_v27 }
  0xe8   :  { %v1101_v31 = vpop.f32.mrf.mxu1  ;;  %v1074_v32 = vpop.f32.mrf.mxu0 }
  0xe9   :  { %v1075_v63 = vadd.f32 %v1074_v32, %v1073_v30  ;;  %v794_v7 = vadd.f32 %v1100_v62, %v745_v61 }
  0xea   :  { %v1076_v33 = vpop.f32.mrf.mxu0  ;;  %v1102_v34 = vpop.f32.mrf.mxu1 }
  0xeb   :  { %v748_v8 = vadd.f32 %v1075_v63, %v963_v55  ;;  %v1103_v9 = vadd.f32 %v1102_v34, %v1101_v31 }
  0xec   :  { %v1104_v35 = vpop.f32.mrf.mxu1  ;;  %v1077_v36 = vpop.f32.mrf.mxu0 }
  0xed   :  { %v1078_v53 = vadd.f32 %v1077_v36, %v1076_v33  ;;  %v797_v18 = vadd.f32 %v1103_v9, %v748_v8 }
  0xee   :  { %v1105_v37 = vpop.f32.mrf.mxu1  ;;  %v1079_v38 = vpop.f32.mrf.mxu0 }
  0xef   :  { %v753_v58 = vadd.f32 %v1078_v53, %v963_v55  ;;  %v1106_v59 = vadd.f32 %v1105_v37, %v1104_v35 }
  0xf0   :  { %v1107_v39 = vpop.f32.mrf.mxu1  ;;  %v1080_v40 = vpop.f32.mrf.mxu0 }
  0xf1   :  { %v1081_v60 = vadd.f32 %v1080_v40, %v1079_v38  ;;  %v802_v3 = vadd.f32 %v1106_v59, %v753_v58 }
  0xf2   :  { %v1108_v42 = vpop.f32.mrf.mxu1 }
  0xf3   :  { %v756_v4 = vadd.f32 %v1081_v60, %v963_v55  ;;  %v1109_v5 = vadd.f32 %v1108_v42, %v1107_v39 }
  0xf5   :  { %v805_v14 = vadd.f32 %v1109_v5, %v756_v4 }
 0x102   :  { %v1126_v41 = vpop.f32.mrf.mxu0 }
 0x104   :  { %v1127_v43 = vpop.f32.mrf.mxu0  ;;  %v1154_v44 = vpop.f32.mrf.mxu1 }
 0x105   :  { %v1128_v6 = vadd.f32 %v1127_v43, %v1126_v41 }
 0x106   :  { %v1129_v45 = vpop.f32.mrf.mxu0  ;;  %v1155_v46 = vpop.f32.mrf.mxu1 }
 0x107   :  { %v843_v15 = vadd.f32 %v1128_v6, %v794_v7  ;;  %v1156_v16 = vadd.f32 %v1155_v46, %v1154_v44 }
 0x108   :  { %v1130_v47 = vpop.f32.mrf.mxu0  ;;  %v1157_v48 = vpop.f32.mrf.mxu1 }
 0x109   :  { %v1131_v17 = vadd.f32 %v1130_v47, %v1129_v45  ;;  %v892_v26 = vadd.f32 %v1156_v16, %v843_v15 }
 0x10a   :  { %v1132_v49 = vpop.f32.mrf.mxu0  ;;  %v1158_v50 = vpop.f32.mrf.mxu1 }
 0x10b   :  { %v846_v23 = vadd.f32 %v1131_v17, %v797_v18  ;;  %v1159_v24 = vadd.f32 %v1158_v50, %v1157_v48 }
 0x10c   :  { %v1133_v51 = vpop.f32.mrf.mxu0  ;;  %v1160_v52 = vpop.f32.mrf.mxu1 }
 0x10d   :  { %v1134_v0 = vadd.f32 %v1133_v51, %v1132_v49  ;;  %v895_v32 = vadd.f32 %v1159_v24, %v846_v23 }
 0x10e   :  { %v1135_v56 = vpop.f32.mrf.mxu0  ;;  %v1161_v57 = vpop.f32.mrf.mxu1 }
 0x10f   :  { %v851_v10 = vadd.f32 %v1134_v0, %v802_v3  ;;  %v1162_v11 = vadd.f32 %v1161_v57, %v1160_v52 }
 0x110   :  { %v1136_v1 = vpop.f32.mrf.mxu0  ;;  %v1163_v2 = vpop.f32.mrf.mxu1 }
 0x111   :  { %v1137_v12 = vadd.f32 %v1136_v1, %v1135_v56  ;;  %v900_v21 = vadd.f32 %v1162_v11, %v851_v10 }
 0x112   :  { %v1164_v13 = vpop.f32.mrf.mxu1 }
 0x113   :  { %v854_v19 = vadd.f32 %v1137_v12, %v805_v14  ;;  %v1165_v20 = vadd.f32 %v1164_v13, %v1163_v2 }
 0x115   :  { %v903_v29 = vadd.f32 %v1165_v20, %v854_v19 }
 0x122   :  { %v1194_v22 = vpop.f32.mrf.mxu0 }
 0x123   :  { %v949_v25 = vadd.f32 %v1194_v22, %v900_v21 }
 0x124   :  { %v940_v27 = vpop.f32.mrf.mxu0 }
 0x125   :  { %957 = vst [vmem:[%s1602_s3 + $0x10] sm:$0xff] %v949_v25  ;;  %v941_v28 = vadd.f32 %v940_v27, %v892_v26 }
 0x126   :  { %v1195_v30 = vpop.f32.mrf.mxu0 }
 0x127   :  { %955 = vst [vmem:[%s1602_s3] sm:$0xff] %v941_v28  ;;  %v952_v31 = vadd.f32 %v1195_v30, %v903_v29 }
 0x128   :  { %v943_v33 = vpop.f32.mrf.mxu0 }
 0x129   :  { %958 = vst [vmem:[%s1602_s3 + $0x18] sm:$0xff] %v952_v31  ;;  %v944_v34 = vadd.f32 %v943_v33, %v895_v32 }
 0x12b   :  { %956 = vst [vmem:[%s1602_s3 + $0x8] sm:$0xff] %v944_v34 }

// kernel: image_transformation_network.57
= control target key start
LH: loop header
LB: loop body
LE: loop exit
PB: predicated region body
PF: predicated region fallthrough
CT: control target
= control target key end

     0   :  { %s2848_s1 = inlined_call_operand.vmem [shape: bf16[1152,128], index: 1, kind: input, shape index: {}]   ;;  %s2849_s0 = inlined_call_operand.vmem [shape: bf16[128,1152], index: 0, kind: input, shape index: {}]   ;;  %s2850_s2 = inlined_call_operand.vmem [shape: f32[1,128], index: 2, kind: input, shape index: {}]   ;;  %s2851_s3 = inlined_call_operand.vmem [shape: f32[128,128], index: 3, kind: output, shape index: {}]  }
   0x1   :  { %v2016_v0 = vld [vmem:[%s2848_s1 + $0x78] sm:$0xff]   ;;  %v2020_v4 = vld [vmem:[%s2848_s1 + $0x70] sm:$0xff]   ;;  %v2024_v8 = vld [vmem:[%s2848_s1 + $0x68] sm:$0xff]  }
   0x2   :  { %v2017_v1 = vld [vmem:[%s2848_s1 + $0xf8] sm:$0xff]   ;;  %1696 = vmatprep.subr.bf16.mxu0 %v2016_v0  ;;  %v2021_v5 = vld [vmem:[%s2848_s1 + $0xf0] sm:$0xff]   ;;  %v2025_v9 = vld [vmem:[%s2848_s1 + $0xe8] sm:$0xff]  }
   0x3   :  { %v2018_v2 = vld [vmem:[%s2848_s1 + $0x38] sm:$0xff]   ;;  %1760 = vmatprep.subr.bf16.mxu1 %v2017_v1  ;;  %v2022_v6 = vld [vmem:[%s2848_s1 + $0x30] sm:$0xff]   ;;  %v2026_v10 = vld [vmem:[%s2848_s1 + $0x28] sm:$0xff]  }
   0x4   :  { %v2019_v3 = vld [vmem:[%s2848_s1 + $0xb8] sm:$0xff]   ;;  %1697 = vmatpush3.bf16.msra.mxu0 %v2018_v2  ;;  %v2023_v7 = vld [vmem:[%s2848_s1 + $0xb0] sm:$0xff]   ;;  %v2027_v11 = vld [vmem:[%s2848_s1 + $0xa8] sm:$0xff]  }
   0x5   :  { %1761 = vmatpush3.bf16.msra.mxu1 %v2019_v3  ;;  %1698 = vmatprep.subr.bf16.mxu0 %v2020_v4  ;;  %v2028_v12 = vld [vmem:[%s2848_s1 + $0x60] sm:$0xff]   ;;  %v2032_v16 = vld [vmem:[%s2848_s1 + $0x58] sm:$0xff]   ;;  %v2036_v20 = vld [vmem:[%s2848_s1 + $0x50] sm:$0xff]  }
   0x6   :  { %1762 = vmatprep.subr.bf16.mxu1 %v2021_v5  ;;  %v2029_v13 = vld [vmem:[%s2848_s1 + $0xe0] sm:$0xff]   ;;  %v2033_v17 = vld [vmem:[%s2848_s1 + $0xd8] sm:$0xff]   ;;  %v2037_v21 = vld [vmem:[%s2848_s1 + $0xd0] sm:$0xff]  }
   0x7   :  { %v2030_v14 = vld [vmem:[%s2848_s1 + $0x20] sm:$0xff]   ;;  %v2034_v18 = vld [vmem:[%s2848_s1 + $0x18] sm:$0xff]   ;;  %v2038_v22 = vld [vmem:[%s2848_s1 + $0x10] sm:$0xff]  }
   0x8   :  { %1699 = vmatpush3.bf16.msra.mxu0 %v2022_v6  ;;  %v2031_v15 = vld [vmem:[%s2848_s1 + $0xa0] sm:$0xff]   ;;  %v2035_v19 = vld [vmem:[%s2848_s1 + $0x98] sm:$0xff]   ;;  %v2039_v23 = vld [vmem:[%s2848_s1 + $0x90] sm:$0xff]  }
   0x9   :  { %1763 = vmatpush3.bf16.msra.mxu1 %v2023_v7  ;;  %1700 = vmatprep.subr.bf16.mxu0 %v2024_v8  ;;  %v2040_v24 = vld [vmem:[%s2848_s1 + $0x48] sm:$0xff]   ;;  %v2044_v28 = vld [vmem:[%s2848_s1 + $0x40] sm:$0xff]   ;;  %v2054_v36 = vld [vmem:[%s2848_s1 + $0x178] sm:$0xff]  }
   0xa   :  { %1764 = vmatprep.subr.bf16.mxu1 %v2025_v9  ;;  %v2041_v25 = vld [vmem:[%s2848_s1 + $0xc8] sm:$0xff]   ;;  %v2045_v29 = vld [vmem:[%s2848_s1 + $0xc0] sm:$0xff]   ;;  %v2055_v37 = vld [vmem:[%s2848_s1 + $0x1f8] sm:$0xff]  }
   0xb   :  { %v2042_v26 = vld [vmem:[%s2848_s1 + $0x8] sm:$0xff]   ;;  %v2046_v30 = vld [vmem:[%s2848_s1] sm:$0xff]   ;;  %v2056_v38 = vld [vmem:[%s2848_s1 + $0x138] sm:$0xff]  }
   0xc   :  { %1701 = vmatpush3.bf16.msra.mxu0 %v2026_v10  ;;  %v2043_v27 = vld [vmem:[%s2848_s1 + $0x88] sm:$0xff]   ;;  %v2047_v31 = vld [vmem:[%s2848_s1 + $0x80] sm:$0xff]   ;;  %v2057_v39 = vld [vmem:[%s2848_s1 + $0x1b8] sm:$0xff]  }
   0xd   :  { %1765 = vmatpush3.bf16.msra.mxu1 %v2027_v11  ;;  %1702 = vmatprep.subr.bf16.mxu0 %v2028_v12  ;;  %v2048_v32 = vld [vmem:[%s2849_s0] ss:$36 sps:$4 sm:$0xff]   ;;  %v2051_v34 = vld [vmem:[%s2849_s0 + $0x8] ss:$36 sps:$4 sm:$0xff]   ;;  %v2060_v41 = vld [vmem:[%s2849_s0 + $0x54] ss:$36 sps:$4 sm:$0xff]  }
   0xe   :  { %1766 = vmatprep.subr.bf16.mxu1 %v2029_v13  ;;  %v2050_v33 = vld [vmem:[%s2849_s0 + $0x4] ss:$36 sps:$4 sm:$0xff]   ;;  %v2053_v35 = vld [vmem:[%s2849_s0 + $0xc] ss:$36 sps:$4 sm:$0xff]   ;;  %v2068_v48 = vld [vmem:[%s2849_s0 + $0x94] ss:$36 sps:$4 sm:$0xff]  }
   0xf   :  { %1078 = vmatprep.mubr.bf16.mxu0 %v2050_v33  ;;  %1175 = vmatprep.mubr.bf16.mxu1 %v2053_v35  ;;  %v2058_v40 = vld [vmem:[%s2849_s0 + $0x4c] ss:$36 sps:$4 sm:$0xff]   ;;  %v2070_v49 = vld [vmem:[%s2849_s0 + $0x9c] ss:$36 sps:$4 sm:$0xff]   ;;  %v2080_v57 = vld [vmem:[%s2849_s0 + $0xe4] ss:$36 sps:$4 sm:$0xff]  }
  0x10   :  { %1703 = vmatpush3.bf16.msra.mxu0 %v2030_v14  ;;  %v2062_v42 = vld [vmem:[%s2849_s0 + $0x48] ss:$36 sps:$4 sm:$0xff]   ;;  %v2063_v43 = vld [vmem:[%s2849_s0 + $0x50] ss:$36 sps:$4 sm:$0xff]   ;;  %v2073_v51 = vld [vmem:[%s2849_s0 + $0x98] ss:$36 sps:$4 sm:$0xff]  }
  0x11   :  { %1767 = vmatpush3.bf16.msra.mxu1 %v2031_v15  ;;  %1704 = vmatprep.subr.bf16.mxu0 %v2032_v16  ;;  %v2064_v44 = vld [vmem:[%s2848_s1 + $0x170] sm:$0xff]   ;;  %v2074_v52 = vld [vmem:[%s2848_s1 + $0x168] sm:$0xff]   ;;  %v2078_v56 = vld [vmem:[%s2849_s0 + $0xdc] ss:$36 sps:$4 sm:$0xff]  }
  0x12   :  { %1768 = vmatprep.subr.bf16.mxu1 %v2033_v17  ;;  %v2065_v45 = vld [vmem:[%s2848_s1 + $0x1f0] sm:$0xff]   ;;  %v2075_v53 = vld [vmem:[%s2848_s1 + $0x1e8] sm:$0xff]   ;;  %v2082_v58 = vld [vmem:[%s2849_s0 + $0xd8] ss:$36 sps:$4 sm:$0xff]  }
  0x13   :  { %v2066_v46 = vld [vmem:[%s2848_s1 + $0x130] sm:$0xff]   ;;  %v2076_v54 = vld [vmem:[%s2848_s1 + $0x128] sm:$0xff]   ;;  %v2083_v59 = vld [vmem:[%s2849_s0 + $0xe0] ss:$36 sps:$4 sm:$0xff]  }
  0x14   :  { %1705 = vmatpush3.bf16.msra.mxu0 %v2034_v18  ;;  %v2067_v47 = vld [vmem:[%s2848_s1 + $0x1b0] sm:$0xff]   ;;  %v2077_v55 = vld [vmem:[%s2848_s1 + $0x1a8] sm:$0xff]   ;;  %v2084_v60 = vld [vmem:[%s2848_s1 + $0x160] sm:$0xff]  }
  0x15   :  { %1769 = vmatpush3.bf16.msra.mxu1 %v2035_v19  ;;  %1706 = vmatprep.subr.bf16.mxu0 %v2036_v20  ;;  %v2072_v50 = vld [vmem:[%s2849_s0 + $0x90] ss:$36 sps:$4 sm:$0xff]   ;;  %v2085_v61 = vld [vmem:[%s2848_s1 + $0x1e0] sm:$0xff]   ;;  %v2094_v3 = vld [vmem:[%s2848_s1 + $0x158] sm:$0xff]  }
  0x16   :  { %1770 = vmatprep.subr.bf16.mxu1 %v2037_v21  ;;  %v2086_v62 = vld [vmem:[%s2848_s1 + $0x120] sm:$0xff]   ;;  %v2090_v1 = vld [vmem:[%s2849_s0 + $0x12c] ss:$36 sps:$4 sm:$0xff]   ;;  %v2095_v5 = vld [vmem:[%s2848_s1 + $0x1d8] sm:$0xff]  }
  0x17   :  { %v2087_v63 = vld [vmem:[%s2848_s1 + $0x1a0] sm:$0xff]   ;;  %v2093_v4 = vld [vmem:[%s2849_s0 + $0x128] ss:$36 sps:$4 sm:$0xff]   ;;  %v2096_v6 = vld [vmem:[%s2848_s1 + $0x118] sm:$0xff]  }
  0x18   :  { %1707 = vmatpush3.bf16.msra.mxu0 %v2038_v22  ;;  %v2088_v0 = vld [vmem:[%s2849_s0 + $0x124] ss:$36 sps:$4 sm:$0xff]   ;;  %v2097_v7 = vld [vmem:[%s2848_s1 + $0x198] sm:$0xff]   ;;  %v2098_v8 = vld [vmem:[%s2849_s0 + $0x16c] ss:$36 sps:$4 sm:$0xff]  }
  0x19   :  { %1771 = vmatpush3.bf16.msra.mxu1 %v2039_v23  ;;  %1708 = vmatprep.subr.bf16.mxu0 %v2040_v24  ;;  %v2092_v2 = vld [vmem:[%s2849_s0 + $0x120] ss:$36 sps:$4 sm:$0xff]   ;;  %v2100_v9 = vld [vmem:[%s2849_s0 + $0x174] ss:$36 sps:$4 sm:$0xff]   ;;  %v2102_v12 = vld [vmem:[%s2849_s0 + $0x168] ss:$36 sps:$4 sm:$0xff]  }
  0x1a   :  { %1772 = vmatprep.subr.bf16.mxu1 %v2041_v25  ;;  %v2104_v10 = vld [vmem:[%s2848_s1 + $0x150] sm:$0xff]   ;;  %v2110_v17 = vld [vmem:[%s2849_s0 + $0x1bc] ss:$36 sps:$4 sm:$0xff]   ;;  %v2114_v18 = vld [vmem:[%s2848_s1 + $0x148] sm:$0xff]  }
  0x1b   :  { %v2105_v11 = vld [vmem:[%s2848_s1 + $0x1d0] sm:$0xff]   ;;  %v2115_v19 = vld [vmem:[%s2848_s1 + $0x1c8] sm:$0xff]   ;;  %v2113_v23 = vld [vmem:[%s2849_s0 + $0x1b8] ss:$36 sps:$4 sm:$0xff]  }
  0x1c   :  { %1709 = vmatpush3.bf16.msra.mxu0 %v2042_v26  ;;  %v2106_v13 = vld [vmem:[%s2848_s1 + $0x110] sm:$0xff]   ;;  %v2116_v20 = vld [vmem:[%s2848_s1 + $0x108] sm:$0xff]   ;;  %v2118_v24 = vld [vmem:[%s2849_s0 + $0x1fc] ss:$36 sps:$4 sm:$0xff]  }
  0x1d   :  { %1773 = vmatpush3.bf16.msra.mxu1 %v2043_v27  ;;  %1710 = vmatprep.subr.bf16.mxu0 %v2044_v28  ;;  %v2107_v14 = vld [vmem:[%s2848_s1 + $0x190] sm:$0xff]   ;;  %v2117_v21 = vld [vmem:[%s2848_s1 + $0x188] sm:$0xff]   ;;  %v2124_v26 = vld [vmem:[%s2848_s1 + $0x140] sm:$0xff]  }
  0x1e   :  { %1774 = vmatprep.subr.bf16.mxu1 %v2045_v29  ;;  %v2103_v15 = vld [vmem:[%s2849_s0 + $0x170] ss:$36 sps:$4 sm:$0xff]   ;;  %v2120_v25 = vld [vmem:[%s2849_s0 + $0x204] ss:$36 sps:$4 sm:$0xff]  }
  0x1f   :  { %v2108_v16 = vld [vmem:[%s2849_s0 + $0x1b4] ss:$36 sps:$4 sm:$0xff]   ;;  %v2125_v27 = vld [vmem:[%s2848_s1 + $0x1c0] sm:$0xff]  }
  0x20   :  { %1711 = vmatpush3.bf16.msra.mxu0 %v2046_v30  ;;  %v2112_v22 = vld [vmem:[%s2849_s0 + $0x1b0] ss:$36 sps:$4 sm:$0xff]   ;;  %v2126_v28 = vld [vmem:[%s2848_s1 + $0x100] sm:$0xff]   ;;  %v2122_v30 = vld [vmem:[%s2849_s0 + $0x1f8] ss:$36 sps:$4 sm:$0xff]  }
  0x21   :  { %1775 = vmatpush3.bf16.msra.mxu1 %v2047_v31  ;;  %1824 = vmatprep.subr.bf16.mxu0 %v2054_v36  ;;  %v2127_v29 = vld [vmem:[%s2848_s1 + $0x180] sm:$0xff]   ;;  %v2130_v33 = vld [vmem:[%s2849_s0 + $0x14] ss:$36 sps:$4 sm:$0xff]  }
  0x22   :  { %1888 = vmatprep.subr.bf16.mxu1 %v2055_v37  ;;  %v2123_v31 = vld [vmem:[%s2849_s0 + $0x200] ss:$36 sps:$4 sm:$0xff]   ;;  %v2128_v35 = vld [vmem:[%s2849_s0 + $0x10] ss:$36 sps:$4 sm:$0xff]   ;;  %v2131_v36 = vld [vmem:[%s2849_s0 + $0x18] ss:$36 sps:$4 sm:$0xff]  }
  0x23   :  { %1079 = vmatmul.mubr.bf16.vlgmr.msra.gmra.mxu0 %v2048_v32  ;;  %v2134_v32 = vld [vmem:[%s2848_s1 + $0x238] sm:$0xff]  }
  0x24   :  { %1176 = vmatmul.mubr.bf16.vlgmr.msra.gmra.mxu1 %v2051_v34  ;;  %1825 = vmatpush3.bf16.msra.mxu0 %v2056_v38  ;;  %v2133_v34 = vld [vmem:[%s2849_s0 + $0x1c] ss:$36 sps:$4 sm:$0xff]   ;;  %v2137_v38 = vld [vmem:[%s2849_s0 + $0x64] ss:$36 sps:$4 sm:$0xff]  }
  0x25   :  { %1889 = vmatpush3.bf16.msra.mxu1 %v2057_v39  ;;  %1086 = vmatprep.mubr.bf16.mxu0 %v2058_v40  ;;  %v2135_v37 = vld [vmem:[%s2849_s0 + $0x5c] ss:$36 sps:$4 sm:$0xff]   ;;  %v2141_v39 = vld [vmem:[%s2848_s1 + $0x230] sm:$0xff]   ;;  %v2148_v40 = vld [vmem:[%s2848_s1 + $0x228] sm:$0xff]  }
  0x26   :  { %1183 = vmatprep.mubr.bf16.mxu1 %v2060_v41  ;;  %1826 = vmatprep.subr.bf16.mxu0 %v2064_v44  ;;  %v2139_v41 = vld [vmem:[%s2849_s0 + $0x58] ss:$36 sps:$4 sm:$0xff]   ;;  %v2144_v44 = vld [vmem:[%s2849_s0 + $0xac] ss:$36 sps:$4 sm:$0xff]  }
  0x27   :  { %1890 = vmatprep.subr.bf16.mxu1 %v2065_v45  ;;  %v2155_v45 = vld [vmem:[%s2848_s1 + $0x220] sm:$0xff]  }
  0x28   :  { %1827 = vmatpush3.bf16.msra.mxu0 %v2066_v46  ;;  %v2162_v46 = vld [vmem:[%s2848_s1 + $0x218] sm:$0xff]  }
  0x29   :  { %1891 = vmatpush3.bf16.msra.mxu1 %v2067_v47  ;;  %1828 = vmatprep.subr.bf16.mxu0 %v2074_v52  ;;  %v2146_v47 = vld [vmem:[%s2849_s0 + $0xa0] ss:$36 sps:$4 sm:$0xff]   ;;  %v2153_v52 = vld [vmem:[%s2849_s0 + $0xe8] ss:$36 sps:$4 sm:$0xff]  }
  0x2a   :  { %1892 = vmatprep.subr.bf16.mxu1 %v2075_v53  ;;  %v2176_v53 = vld [vmem:[%s2848_s1 + $0x208] sm:$0xff]  }
  0x2b   :  { %1087 = vmatmul.mubr.bf16.gmra.mxu0 %v2062_v42  ;;  %v2140_v42 = vld [vmem:[%s2849_s0 + $0x60] ss:$36 sps:$4 sm:$0xff]  }
  0x2c   :  { %1184 = vmatmul.mubr.bf16.gmra.mxu1 %v2063_v43  ;;  %1094 = vmatprep.mubr.bf16.mxu0 %v2068_v48  ;;  %v2142_v43 = vld [vmem:[%s2849_s0 + $0xa4] ss:$36 sps:$4 sm:$0xff]  }
  0x2d   :  { %1191 = vmatprep.mubr.bf16.mxu1 %v2070_v49  ;;  %1829 = vmatpush3.bf16.msra.mxu0 %v2076_v54  ;;  %v2147_v48 = vld [vmem:[%s2849_s0 + $0xa8] ss:$36 sps:$4 sm:$0xff]   ;;  %v2154_v54 = vld [vmem:[%s2849_s0 + $0xf0] ss:$36 sps:$4 sm:$0xff]  }
  0x2e   :  { %1893 = vmatpush3.bf16.msra.mxu1 %v2077_v55  ;;  %1830 = vmatprep.subr.bf16.mxu0 %v2084_v60  ;;  %v2149_v49 = vld [vmem:[%s2849_s0 + $0xec] ss:$36 sps:$4 sm:$0xff]   ;;  %v2156_v55 = vld [vmem:[%s2849_s0 + $0x134] ss:$36 sps:$4 sm:$0xff]   ;;  %v2163_v60 = vld [vmem:[%s2849_s0 + $0x17c] ss:$36 sps:$4 sm:$0xff]  }
  0x2f   :  { %1894 = vmatprep.subr.bf16.mxu1 %v2085_v61  ;;  %v2165_v61 = vld [vmem:[%s2849_s0 + $0x184] ss:$36 sps:$4 sm:$0xff]  }
  0x31   :  { %1831 = vmatpush3.bf16.msra.mxu0 %v2086_v62  ;;  %v2167_v62 = vld [vmem:[%s2849_s0 + $0x178] ss:$36 sps:$4 sm:$0xff]  }
  0x32   :  { %1895 = vmatpush3.bf16.msra.mxu1 %v2087_v63  ;;  %1832 = vmatprep.subr.bf16.mxu0 %v2094_v3  ;;  %v2168_v63 = vld [vmem:[%s2849_s0 + $0x180] ss:$36 sps:$4 sm:$0xff]   ;;  %v2175_v3 = vld [vmem:[%s2849_s0 + $0x1c8] ss:$36 sps:$4 sm:$0xff]  }
  0x33   :  { %1095 = vmatmul.mubr.bf16.gmra.mxu0 %v2072_v50  ;;  %1896 = vmatprep.subr.bf16.mxu1 %v2095_v5  ;;  %v2151_v50 = vld [vmem:[%s2849_s0 + $0xf4] ss:$36 sps:$4 sm:$0xff]  }
  0x34   :  { %1192 = vmatmul.mubr.bf16.gmra.mxu1 %v2073_v51  ;;  %1102 = vmatprep.mubr.bf16.mxu0 %v2078_v56  ;;  %v2169_v51 = vld [vmem:[%s2848_s1 + $0x210] sm:$0xff]   ;;  %v2158_v56 = vld [vmem:[%s2849_s0 + $0x13c] ss:$36 sps:$4 sm:$0xff]  }
  0x35   :  { %1199 = vmatprep.mubr.bf16.mxu1 %v2080_v57  ;;  %1833 = vmatpush3.bf16.msra.mxu0 %v2096_v6  ;;  %v2183_v57 = vld [vmem:[%s2848_s1 + $0x200] sm:$0xff]   ;;  %v2179_v5 = vld [vmem:[%s2849_s0 + $0x214] ss:$36 sps:$4 sm:$0xff]   ;;  %v2181_v6 = vld [vmem:[%s2849_s0 + $0x208] ss:$36 sps:$4 sm:$0xff]  }
  0x36   :  { %1897 = vmatpush3.bf16.msra.mxu1 %v2097_v7  ;;  %1834 = vmatprep.subr.bf16.mxu0 %v2104_v10  ;;  %v2182_v7 = vld [vmem:[%s2849_s0 + $0x210] ss:$36 sps:$4 sm:$0xff]   ;;  %v2186_v10 = vld [vmem:[%s2849_s0 + $0x68] ss:$36 sps:$4 sm:$0xff]  }
  0x37   :  { %1898 = vmatprep.subr.bf16.mxu1 %v2105_v11  ;;  %v2187_v11 = vld [vmem:[%s2849_s0 + $0x188] ss:$36 sps:$4 sm:$0xff]  }
  0x39   :  { %1835 = vmatpush3.bf16.msra.mxu0 %v2106_v13  ;;  %v2189_v13 = vld [vmem:[%s2849_s0 + $0x1d0] ss:$36 sps:$4 sm:$0xff]  }
  0x3a   :  { %1899 = vmatpush3.bf16.msra.mxu1 %v2107_v14  ;;  %1836 = vmatprep.subr.bf16.mxu0 %v2114_v18  ;;  %v2190_v14 = vld [vmem:[%s2849_s0 + $0xf8] ss:$36 sps:$4 sm:$0xff]   ;;  %v2647_v18 = vld [vmem:[%s2850_s2] ss:$0 sm:$0xff] }
  0x3b   :  { %1103 = vmatmul.mubr.bf16.gmra.mxu0 %v2082_v58  ;;  %1900 = vmatprep.subr.bf16.mxu1 %v2115_v19  ;;  %v2160_v58 = vld [vmem:[%s2849_s0 + $0x130] ss:$36 sps:$4 sm:$0xff]  }
  0x3c   :  { %1200 = vmatmul.mubr.bf16.gmra.mxu1 %v2083_v59  ;;  %1110 = vmatprep.mubr.bf16.mxu0 %v2088_v0  ;;  %v2161_v59 = vld [vmem:[%s2849_s0 + $0x138] ss:$36 sps:$4 sm:$0xff]   ;;  %v2170_v0 = vld [vmem:[%s2849_s0 + $0x1c4] ss:$36 sps:$4 sm:$0xff]  }
  0x3d   :  { %1207 = vmatprep.mubr.bf16.mxu1 %v2090_v1  ;;  %1837 = vmatpush3.bf16.msra.mxu0 %v2116_v20  ;;  %v2172_v1 = vld [vmem:[%s2849_s0 + $0x1cc] ss:$36 sps:$4 sm:$0xff]  }
  0x3e   :  { %1901 = vmatpush3.bf16.msra.mxu1 %v2117_v21  ;;  %1838 = vmatprep.subr.bf16.mxu0 %v2124_v26 }
  0x3f   :  { %1902 = vmatprep.subr.bf16.mxu1 %v2125_v27 }
  0x41   :  { %1839 = vmatpush3.bf16.msra.mxu0 %v2126_v28 }
  0x42   :  { %1903 = vmatpush3.bf16.msra.mxu1 %v2127_v29  ;;  %1968 = vmatprep.subr.bf16.mxu0 %v2134_v32 }
  0x43   :  { %1111 = vmatmul.mubr.bf16.gmra.mxu0 %v2092_v2  ;;  %2000 = vmatprep.subr.bf16.mxu1 %v2134_v32  ;;  %v2174_v2 = vld [vmem:[%s2849_s0 + $0x1c0] ss:$36 sps:$4 sm:$0xff]  }
  0x44   :  { %1208 = vmatmul.mubr.bf16.gmra.mxu1 %v2093_v4  ;;  %1118 = vmatprep.mubr.bf16.mxu0 %v2098_v8  ;;  %v2177_v4 = vld [vmem:[%s2849_s0 + $0x20c] ss:$36 sps:$4 sm:$0xff]   ;;  %v2184_v8 = vld [vmem:[%s2849_s0 + $0x20] ss:$36 sps:$4 sm:$0xff]  }
  0x45   :  { %1215 = vmatprep.mubr.bf16.mxu1 %v2100_v9  ;;  %v2185_v9 = vld [vmem:[%s2849_s0 + $0x140] ss:$36 sps:$4 sm:$0xff]  }
  0x4b   :  { %1119 = vmatmul.mubr.bf16.gmra.mxu0 %v2102_v12  ;;  %v2188_v12 = vld [vmem:[%s2849_s0 + $0xb0] ss:$36 sps:$4 sm:$0xff]  }
  0x4c   :  { %1216 = vmatmul.mubr.bf16.gmra.mxu1 %v2103_v15  ;;  %1126 = vmatprep.mubr.bf16.mxu0 %v2108_v16  ;;  %v2191_v15 = vld [vmem:[%s2849_s0 + $0x218] ss:$36 sps:$4 sm:$0xff]  }
  0x4d   :  { %1223 = vmatprep.mubr.bf16.mxu1 %v2110_v17 }
  0x53   :  { %1127 = vmatmul.mubr.bf16.gmra.mxu0 %v2112_v22 }
  0x54   :  { %1224 = vmatmul.mubr.bf16.gmra.mxu1 %v2113_v23  ;;  %1134 = vmatprep.mubr.bf16.mxu0 %v2118_v24 }
  0x55   :  { %1231 = vmatprep.mubr.bf16.mxu1 %v2120_v25 }
  0x5b   :  { %1135 = vmatmul.mubr.bf16.gmra.mxu0 %v2122_v30 }
  0x5c   :  { %1232 = vmatmul.mubr.bf16.gmra.mxu1 %v2123_v31  ;;  %1272 = vmatprep.mubr.bf16.mxu0 %v2130_v33 }
  0x5d   :  { %1369 = vmatprep.mubr.bf16.mxu1 %v2133_v34 }
  0x63   :  { %1273 = vmatmul.mubr.bf16.vlgmr.msra.gmra.mxu0 %v2128_v35 }
  0x64   :  { %1370 = vmatmul.mubr.bf16.vlgmr.msra.gmra.mxu1 %v2131_v36  ;;  %1969 = vmatpush3.bf16.msra.mxu0 %v2134_v32 }
  0x65   :  { %2008 = vmatpush3.bf16.msra.mxu1 %v2134_v32  ;;  %1280 = vmatprep.mubr.bf16.mxu0 %v2135_v37 }
  0x66   :  { %1377 = vmatprep.mubr.bf16.mxu1 %v2137_v38  ;;  %1970 = vmatprep.subr.bf16.mxu0 %v2141_v39 }
  0x67   :  { %2001 = vmatprep.subr.bf16.mxu1 %v2141_v39 }
  0x68   :  { %1971 = vmatpush3.bf16.msra.mxu0 %v2141_v39 }
  0x69   :  { %2009 = vmatpush3.bf16.msra.mxu1 %v2141_v39  ;;  %1972 = vmatprep.subr.bf16.mxu0 %v2148_v40 }
  0x6a   :  { %2002 = vmatprep.subr.bf16.mxu1 %v2148_v40 }
  0x6b   :  { %1281 = vmatmul.mubr.bf16.gmra.mxu0 %v2139_v41 }
  0x6c   :  { %1378 = vmatmul.mubr.bf16.gmra.mxu1 %v2140_v42  ;;  %1288 = vmatprep.mubr.bf16.mxu0 %v2142_v43 }
  0x6d   :  { %1385 = vmatprep.mubr.bf16.mxu1 %v2144_v44  ;;  %1973 = vmatpush3.bf16.msra.mxu0 %v2148_v40 }
  0x6e   :  { %2010 = vmatpush3.bf16.msra.mxu1 %v2148_v40  ;;  %1974 = vmatprep.subr.bf16.mxu0 %v2155_v45 }
  0x6f   :  { %2003 = vmatprep.subr.bf16.mxu1 %v2155_v45 }
  0x71   :  { %1975 = vmatpush3.bf16.msra.mxu0 %v2155_v45 }
  0x72   :  { %2011 = vmatpush3.bf16.msra.mxu1 %v2155_v45  ;;  %1976 = vmatprep.subr.bf16.mxu0 %v2162_v46 }
  0x73   :  { %1289 = vmatmul.mubr.bf16.gmra.mxu0 %v2146_v47  ;;  %2004 = vmatprep.subr.bf16.mxu1 %v2162_v46 }
  0x74   :  { %1386 = vmatmul.mubr.bf16.gmra.mxu1 %v2147_v48  ;;  %1296 = vmatprep.mubr.bf16.mxu0 %v2149_v49 }
  0x75   :  { %1393 = vmatprep.mubr.bf16.mxu1 %v2151_v50  ;;  %1977 = vmatpush3.bf16.msra.mxu0 %v2162_v46 }
  0x76   :  { %2012 = vmatpush3.bf16.msra.mxu1 %v2162_v46  ;;  %1978 = vmatprep.subr.bf16.mxu0 %v2169_v51 }
  0x77   :  { %2005 = vmatprep.subr.bf16.mxu1 %v2169_v51 }
  0x79   :  { %1979 = vmatpush3.bf16.msra.mxu0 %v2169_v51 }
  0x7a   :  { %2013 = vmatpush3.bf16.msra.mxu1 %v2169_v51  ;;  %1980 = vmatprep.subr.bf16.mxu0 %v2176_v53 }
  0x7b   :  { %1297 = vmatmul.mubr.bf16.gmra.mxu0 %v2153_v52  ;;  %2006 = vmatprep.subr.bf16.mxu1 %v2176_v53 }
  0x7c   :  { %1394 = vmatmul.mubr.bf16.gmra.mxu1 %v2154_v54  ;;  %1304 = vmatprep.mubr.bf16.mxu0 %v2156_v55 }
  0x7d   :  { %1401 = vmatprep.mubr.bf16.mxu1 %v2158_v56  ;;  %1981 = vmatpush3.bf16.msra.mxu0 %v2176_v53 }
  0x7e   :  { %2014 = vmatpush3.bf16.msra.mxu1 %v2176_v53  ;;  %1982 = vmatprep.subr.bf16.mxu0 %v2183_v57 }
  0x7f   :  { %2007 = vmatprep.subr.bf16.mxu1 %v2183_v57 }
  0x81   :  { %1983 = vmatpush3.bf16.msra.mxu0 %v2183_v57 }
  0x82   :  { %2015 = vmatpush3.bf16.msra.mxu1 %v2183_v57 }
  0x83   :  { %1305 = vmatmul.mubr.bf16.gmra.mxu0 %v2160_v58 }
  0x84   :  { %1402 = vmatmul.mubr.bf16.gmra.mxu1 %v2161_v59  ;;  %1312 = vmatprep.mubr.bf16.mxu0 %v2163_v60 }
  0x85   :  { %1409 = vmatprep.mubr.bf16.mxu1 %v2165_v61 }
  0x8b   :  { %1313 = vmatmul.mubr.bf16.gmra.mxu0 %v2167_v62 }
  0x8c   :  { %1410 = vmatmul.mubr.bf16.gmra.mxu1 %v2168_v63  ;;  %1320 = vmatprep.mubr.bf16.mxu0 %v2170_v0 }
  0x8d   :  { %1417 = vmatprep.mubr.bf16.mxu1 %v2172_v1 }
  0x93   :  { %1321 = vmatmul.mubr.bf16.gmra.mxu0 %v2174_v2 }
  0x94   :  { %1418 = vmatmul.mubr.bf16.gmra.mxu1 %v2175_v3  ;;  %1328 = vmatprep.mubr.bf16.mxu0 %v2177_v4 }
  0x95   :  { %1425 = vmatprep.mubr.bf16.mxu1 %v2179_v5 }
  0x9b   :  { %1329 = vmatmul.mubr.bf16.gmra.mxu0 %v2181_v6 }
  0x9c   :  { %1426 = vmatmul.mubr.bf16.gmra.mxu1 %v2182_v7  ;;  %1984 = vmatprep.mubr.bf16.mxu0 %v2184_v8 }
  0x9d   :  { %1992 = vmatprep.mubr.bf16.mxu1 %v2185_v9 }
  0xa3   :  { %1985 = vmatmul.mubr.bf16.vlgmr.msra.gmra.mxu0 %v2186_v10 }
  0xa4   :  { %1993 = vmatmul.mubr.bf16.vlgmr.msra.gmra.mxu1 %v2187_v11  ;;  %1988 = vmatprep.mubr.bf16.mxu0 %v2188_v12 }
  0xa5   :  { %1996 = vmatprep.mubr.bf16.mxu1 %v2189_v13 }
  0xab   :  { %1989 = vmatmul.mubr.bf16.gmra.mxu0 %v2190_v14 }
  0xac   :  { %1997 = vmatmul.mubr.bf16.gmra.mxu1 %v2191_v15 }
  0xe3   :  { %v1712_v16 = vpop.f32.mrf.mxu0 }
  0xe4   :  { %v1776_v17 = vpop.f32.mrf.mxu1 }
  0xe5   :  { %v1713_v19 = vpop.f32.mrf.mxu0 }
  0xe6   :  { %v1714_v20 = vadd.f32 %v1713_v19, %v1712_v16  ;;  %v1777_v21 = vpop.f32.mrf.mxu1 }
  0xe7   :  { %v1778_v22 = vadd.f32 %v1777_v21, %v1776_v17  ;;  %v1715_v23 = vpop.f32.mrf.mxu0 }
  0xe8   :  { %v1081_v24 = vadd.f32 %v1714_v20, %v2647_v18  ;;  %v1779_v25 = vpop.f32.mrf.mxu1 }
  0xe9   :  { %v1716_v26 = vpop.f32.mrf.mxu0 }
  0xea   :  { %v2650_v27 = vadd.f32 %v1778_v22, %v1081_v24  ;;  %v1717_v28 = vadd.f32 %v1716_v26, %v1715_v23  ;;  %v1780_v29 = vpop.f32.mrf.mxu1 }
  0xeb   :  { %v1781_v30 = vadd.f32 %v1780_v29, %v1779_v25  ;;  %v1718_v31 = vpop.f32.mrf.mxu0 }
  0xec   :  { %v1084_v32 = vadd.f32 %v1717_v28, %v2647_v18  ;;  %v1782_v33 = vpop.f32.mrf.mxu1 }
  0xed   :  { %v1719_v34 = vpop.f32.mrf.mxu0 }
  0xee   :  { %v2653_v35 = vadd.f32 %v1781_v30, %v1084_v32  ;;  %v1720_v36 = vadd.f32 %v1719_v34, %v1718_v31  ;;  %v1783_v37 = vpop.f32.mrf.mxu1 }
  0xef   :  { %v1784_v38 = vadd.f32 %v1783_v37, %v1782_v33  ;;  %v1721_v39 = vpop.f32.mrf.mxu0 }
  0xf0   :  { %v1089_v40 = vadd.f32 %v1720_v36, %v2647_v18  ;;  %v1785_v41 = vpop.f32.mrf.mxu1 }
  0xf1   :  { %v1722_v42 = vpop.f32.mrf.mxu0 }
  0xf2   :  { %v2656_v43 = vadd.f32 %v1784_v38, %v1089_v40  ;;  %v1723_v44 = vadd.f32 %v1722_v42, %v1721_v39  ;;  %v1786_v45 = vpop.f32.mrf.mxu1 }
  0xf3   :  { %v1787_v46 = vadd.f32 %v1786_v45, %v1785_v41  ;;  %v1724_v47 = vpop.f32.mrf.mxu0 }
  0xf4   :  { %v1092_v48 = vadd.f32 %v1723_v44, %v2647_v18  ;;  %v1788_v49 = vpop.f32.mrf.mxu1 }
  0xf5   :  { %v1725_v50 = vpop.f32.mrf.mxu0 }
  0xf6   :  { %v2659_v51 = vadd.f32 %v1787_v46, %v1092_v48  ;;  %v1726_v52 = vadd.f32 %v1725_v50, %v1724_v47  ;;  %v1789_v53 = vpop.f32.mrf.mxu1 }
  0xf7   :  { %v1790_v54 = vadd.f32 %v1789_v53, %v1788_v49  ;;  %v1727_v55 = vpop.f32.mrf.mxu0 }
  0xf8   :  { %v1097_v56 = vadd.f32 %v1726_v52, %v2647_v18  ;;  %v1791_v57 = vpop.f32.mrf.mxu1 }
  0xf9   :  { %v1728_v58 = vpop.f32.mrf.mxu0 }
  0xfa   :  { %v2662_v59 = vadd.f32 %v1790_v54, %v1097_v56  ;;  %v1729_v60 = vadd.f32 %v1728_v58, %v1727_v55  ;;  %v1792_v61 = vpop.f32.mrf.mxu1 }
  0xfb   :  { %v1793_v62 = vadd.f32 %v1792_v61, %v1791_v57  ;;  %v1730_v63 = vpop.f32.mrf.mxu0 }
  0xfc   :  { %v1100_v0 = vadd.f32 %v1729_v60, %v2647_v18  ;;  %v1794_v1 = vpop.f32.mrf.mxu1 }
  0xfd   :  { %v1731_v2 = vpop.f32.mrf.mxu0 }
  0xfe   :  { %v2665_v3 = vadd.f32 %v1793_v62, %v1100_v0  ;;  %v1732_v4 = vadd.f32 %v1731_v2, %v1730_v63  ;;  %v1795_v5 = vpop.f32.mrf.mxu1 }
  0xff   :  { %v1796_v6 = vadd.f32 %v1795_v5, %v1794_v1  ;;  %v1733_v7 = vpop.f32.mrf.mxu0 }
 0x100   :  { %2852 = vst [vmem:[#allocation2_spill] sm:$0xff] %v2665_v3  ;;  %v1105_v8 = vadd.f32 %v1732_v4, %v2647_v18  ;;  %v1797_v9 = vpop.f32.mrf.mxu1 }
 0x101   :  { %v1734_v10 = vpop.f32.mrf.mxu0 }
 0x102   :  { %v2668_v11 = vadd.f32 %v1796_v6, %v1105_v8  ;;  %v1735_v12 = vadd.f32 %v1734_v10, %v1733_v7  ;;  %v1798_v13 = vpop.f32.mrf.mxu1 }
 0x103   :  { %v1799_v14 = vadd.f32 %v1798_v13, %v1797_v9  ;;  %v1736_v15 = vpop.f32.mrf.mxu0 }
 0x104   :  { %v1108_v16 = vadd.f32 %v1735_v12, %v2647_v18  ;;  %v1800_v17 = vpop.f32.mrf.mxu1 }
 0x105   :  { %v1737_v19 = vpop.f32.mrf.mxu0 }
 0x106   :  { %v2671_v20 = vadd.f32 %v1799_v14, %v1108_v16  ;;  %v1738_v21 = vadd.f32 %v1737_v19, %v1736_v15  ;;  %v1801_v22 = vpop.f32.mrf.mxu1 }
 0x107   :  { %v1802_v23 = vadd.f32 %v1801_v22, %v1800_v17  ;;  %v1739_v24 = vpop.f32.mrf.mxu0 }
 0x108   :  { %2853 = vst [vmem:[#allocation3_spill] sm:$0xff] %v2671_v20  ;;  %v1113_v25 = vadd.f32 %v1738_v21, %v2647_v18  ;;  %v1803_v26 = vpop.f32.mrf.mxu1 }
 0x109   :  { %v1740_v28 = vpop.f32.mrf.mxu0 }
 0x10a   :  { %v2674_v29 = vadd.f32 %v1802_v23, %v1113_v25  ;;  %v1741_v30 = vadd.f32 %v1740_v28, %v1739_v24  ;;  %v1804_v31 = vpop.f32.mrf.mxu1 }
 0x10b   :  { %v1805_v32 = vadd.f32 %v1804_v31, %v1803_v26  ;;  %v1742_v33 = vpop.f32.mrf.mxu0 }
 0x10c   :  { %v1116_v34 = vadd.f32 %v1741_v30, %v2647_v18  ;;  %v1806_v36 = vpop.f32.mrf.mxu1 }
 0x10d   :  { %v1743_v37 = vpop.f32.mrf.mxu0 }
 0x10e   :  { %v2677_v38 = vadd.f32 %v1805_v32, %v1116_v34  ;;  %v1744_v39 = vadd.f32 %v1743_v37, %v1742_v33  ;;  %v1807_v40 = vpop.f32.mrf.mxu1 }
 0x10f   :  { %v1808_v41 = vadd.f32 %v1807_v40, %v1806_v36  ;;  %v1745_v42 = vpop.f32.mrf.mxu0 }
 0x110   :  { %v1121_v44 = vadd.f32 %v1744_v39, %v2647_v18  ;;  %v1809_v45 = vpop.f32.mrf.mxu1 }
 0x111   :  { %v1746_v46 = vpop.f32.mrf.mxu0 }
 0x112   :  { %v2680_v47 = vadd.f32 %v1808_v41, %v1121_v44  ;;  %v1747_v48 = vadd.f32 %v1746_v46, %v1745_v42  ;;  %v1810_v49 = vpop.f32.mrf.mxu1 }
 0x113   :  { %v1811_v50 = vadd.f32 %v1810_v49, %v1809_v45  ;;  %v1748_v52 = vpop.f32.mrf.mxu0 }
 0x114   :  { %v1124_v53 = vadd.f32 %v1747_v48, %v2647_v18  ;;  %v1812_v54 = vpop.f32.mrf.mxu1 }
 0x115   :  { %v1749_v55 = vpop.f32.mrf.mxu0 }
 0x116   :  { %v2683_v56 = vadd.f32 %v1811_v50, %v1124_v53  ;;  %v1750_v57 = vadd.f32 %v1749_v55, %v1748_v52  ;;  %v1813_v58 = vpop.f32.mrf.mxu1 }
 0x117   :  { %v1814_v60 = vadd.f32 %v1813_v58, %v1812_v54  ;;  %v1751_v61 = vpop.f32.mrf.mxu0 }
 0x118   :  { %v1129_v62 = vadd.f32 %v1750_v57, %v2647_v18  ;;  %v1815_v63 = vpop.f32.mrf.mxu1 }
 0x119   :  { %v1752_v0 = vpop.f32.mrf.mxu0 }
 0x11a   :  { %v2686_v1 = vadd.f32 %v1814_v60, %v1129_v62  ;;  %v1753_v2 = vadd.f32 %v1752_v0, %v1751_v61  ;;  %v1816_v4 = vpop.f32.mrf.mxu1 }
 0x11b   :  { %v1817_v5 = vadd.f32 %v1816_v4, %v1815_v63  ;;  %v1754_v6 = vpop.f32.mrf.mxu0 }
 0x11c   :  { %2854 = vst [vmem:[#allocation4_spill] sm:$0xff] %v2686_v1  ;;  %v1132_v7 = vadd.f32 %v1753_v2, %v2647_v18  ;;  %v1818_v8 = vpop.f32.mrf.mxu1 }
 0x11d   :  { %v1755_v9 = vpop.f32.mrf.mxu0 }
 0x11e   :  { %v2689_v10 = vadd.f32 %v1817_v5, %v1132_v7  ;;  %v1756_v12 = vadd.f32 %v1755_v9, %v1754_v6  ;;  %v1819_v13 = vpop.f32.mrf.mxu1 }
 0x11f   :  { %v1820_v14 = vadd.f32 %v1819_v13, %v1818_v8  ;;  %v1757_v15 = vpop.f32.mrf.mxu0 }
 0x120   :  { %2855 = vst [vmem:[#allocation5_spill] sm:$0xff] %v2689_v10  ;;  %v1137_v16 = vadd.f32 %v1756_v12, %v2647_v18  ;;  %v1821_v17 = vpop.f32.mrf.mxu1 }
 0x121   :  { %v1758_v19 = vpop.f32.mrf.mxu0 }
 0x122   :  { %v2692_v21 = vadd.f32 %v1820_v14, %v1137_v16  ;;  %v1759_v22 = vadd.f32 %v1758_v19, %v1757_v15  ;;  %v1822_v23 = vpop.f32.mrf.mxu1 }
 0x123   :  { %v1823_v24 = vadd.f32 %v1822_v23, %v1821_v17  ;;  %v1840_v25 = vpop.f32.mrf.mxu0 }
 0x124   :  { %2856 = vst [vmem:[#allocation6_spill] sm:$0xff] %v2692_v21  ;;  %v1140_v26 = vadd.f32 %v1759_v22, %v2647_v18  ;;  %v2695_v28 = vpop.f32.mrf.mxu1 }
 0x125   :  { %v1841_v30 = vpop.f32.mrf.mxu0 }
 0x126   :  { %v2697_v31 = vadd.f32 %v1823_v24, %v1140_v26  ;;  %v2699_v32 = vpop.f32.mrf.mxu1 }
 0x127   :  { %v1843_v33 = vpop.f32.mrf.mxu0 }
 0x128   :  { %2857 = vst [vmem:[#allocation7_spill] sm:$0xff] %v2697_v31  ;;  %v2701_v34 = vpop.f32.mrf.mxu1  ;;  %v1842_v31 = vadd.f32 %v1841_v30, %v1840_v25  ;;  %v1906_v25 = vadd.f32 %v2699_v32, %v2695_v28 }
 0x129   :  { %v1844_v36 = vpop.f32.mrf.mxu0 }
 0x12a   :  { %v2703_v37 = vpop.f32.mrf.mxu1 }
 0x12b   :  { %v1846_v39 = vpop.f32.mrf.mxu0  ;;  %v1909_v30 = vadd.f32 %v2703_v37, %v2701_v34 }
 0x12c   :  { %v2705_v40 = vpop.f32.mrf.mxu1 }
 0x12d   :  { %v1847_v41 = vpop.f32.mrf.mxu0 }
 0x12e   :  { %v2707_v42 = vpop.f32.mrf.mxu1 }
 0x12f   :  { %v1849_v18 = vpop.f32.mrf.mxu0 }
 0x130   :  { %v2709_v44 = vpop.f32.mrf.mxu1 }
 0x131   :  { %v1850_v45 = vpop.f32.mrf.mxu0 }
 0x132   :  { %v2711_v46 = vpop.f32.mrf.mxu1 }
 0x133   :  { %v1852_v48 = vpop.f32.mrf.mxu0  ;;  %v1915_v34 = vadd.f32 %v2711_v46, %v2709_v44 }
 0x134   :  { %v2713_v49 = vpop.f32.mrf.mxu1 }
 0x135   :  { %2858 = vst [vmem:[#allocation8_spill] sm:$0xff] %v2713_v49  ;;  %v1853_v50 = vpop.f32.mrf.mxu0  ;;  %v1848_v49 = vadd.f32 %v1847_v41, %v1846_v39 }
 0x136   :  { %v2715_v52 = vpop.f32.mrf.mxu1  ;;  %v1854_v41 = vadd.f32 %v1853_v50, %v1852_v48 }
 0x137   :  { %2859 = vst [vmem:[#allocation9_spill] sm:$0xff] %v2715_v52  ;;  %v2717_v53 = vpop.f32.mrf.mxu0  ;;  %v1845_v52 = vadd.f32 %v1844_v36, %v1843_v33 }
 0x138   :  { %2860 = vst [vmem:[#allocation10_spill] sm:$0xff] %v2717_v53  ;;  %v2719_v54 = vpop.f32.mrf.mxu1  ;;  %v1291_v50 = vadd.f32 %v1854_v41, %v2662_v59 }
 0x139   :  { %2861 = vst [vmem:[#allocation11_spill] sm:$0xff] %v2719_v54  ;;  %v2721_v55 = vpop.f32.mrf.mxu0 }
 0x13a   :  { %2862 = vst [vmem:[#allocation12_spill] sm:$0xff] %v2721_v55  ;;  %v2723_v57 = vpop.f32.mrf.mxu1  ;;  %v1851_v55 = vadd.f32 %v1850_v45, %v1849_v18 }
 0x13b   :  { %2863 = vst [vmem:[#allocation13_spill] sm:$0xff] %v2723_v57  ;;  %v1858_v58 = vpop.f32.mrf.mxu0 }
 0x13c   :  { %v2725_v60 = vpop.f32.mrf.mxu1 }
 0x13d   :  { %2864 = vst [vmem:[#allocation14_spill] sm:$0xff] %v2725_v60  ;;  %v1859_v61 = vpop.f32.mrf.mxu0 }
 0x13e   :  { %v2727_v62 = vpop.f32.mrf.mxu1 }
 0x13f   :  { %2865 = vst [vmem:[#allocation15_spill] sm:$0xff] %v2727_v62  ;;  %v2729_v63 = vpop.f32.mrf.mxu0 }
 0x140   :  { %v2731_v0 = vpop.f32.mrf.mxu1 }
 0x141   :  { %2866 = vst [vmem:[#allocation16_spill] sm:$0xff] %v2731_v0  ;;  %v2733_v2 = vpop.f32.mrf.mxu0 }
 0x142   :  { %v2735_v4 = vpop.f32.mrf.mxu1 }
 0x143   :  { %2867 = vst [vmem:[#allocation17_spill] sm:$0xff] %v2735_v4  ;;  %v1864_v5 = vpop.f32.mrf.mxu0 }
 0x144   :  { %v1928_v6 = vpop.f32.mrf.mxu1 }
 0x145   :  { %v1865_v7 = vpop.f32.mrf.mxu0 }
 0x146   :  { %v1929_v8 = vpop.f32.mrf.mxu1  ;;  %v1866_v21 = vadd.f32 %v1865_v7, %v1864_v5 }
 0x147   :  { %v1867_v9 = vpop.f32.mrf.mxu0 }
 0x148   :  { %v2737_v12 = vpop.f32.mrf.mxu1 }
 0x149   :  { %v1868_v13 = vpop.f32.mrf.mxu0 }
 0x14a   :  { %v2739_v14 = vpop.f32.mrf.mxu1 }
 0x14b   :  { %2868 = vst [vmem:[#allocation18_spill] sm:$0xff] %v2739_v14  ;;  %v1870_v15 = vpop.f32.mrf.mxu0 }
 0x14c   :  { %v1934_v16 = vpop.f32.mrf.mxu1 }
 0x14d   :  { %v1871_v17 = vpop.f32.mrf.mxu0 }
 0x14e   :  { %v1935_v19 = vpop.f32.mrf.mxu1  ;;  %v1872_v62 = vadd.f32 %v1871_v17, %v1870_v15 }
 0x14f   :  { %v1873_v22 = vpop.f32.mrf.mxu0  ;;  %v1936_v45 = vadd.f32 %v1935_v19, %v1934_v16  ;;  %v2879_v19 = vld [vmem:[#allocation4_spill] sm:$0xff] }
 0x150   :  { %v1937_v23 = vpop.f32.mrf.mxu1  ;;  %v1315_v33 = vadd.f32 %v1872_v62, %v2680_v47  ;;  %v1860_v47 = vadd.f32 %v1859_v61, %v1858_v58  ;;  %v1930_v62 = vadd.f32 %v1929_v8, %v1928_v6 }
 0x151   :  { %v1874_v24 = vpop.f32.mrf.mxu0 }
 0x152   :  { %v1938_v26 = vpop.f32.mrf.mxu1  ;;  %v1875_v36 = vadd.f32 %v1874_v24, %v1873_v22  ;;  %v1412_v48 = vadd.f32 %v1936_v45, %v1315_v33  ;;  %v1299_v61 = vadd.f32 %v1860_v47, %v2668_v11  ;;  %v2881_v33 = vld [vmem:[#allocation8_spill] sm:$0xff]  ;;  %v2886_v45 = vld [vmem:[#allocation7_spill] sm:$0xff] }
 0x153   :  { %v1876_v57 = vpop.f32.mrf.mxu0  ;;  %v1939_v5 = vadd.f32 %v1938_v26, %v1937_v23 }
 0x154   :  { %v2741_v54 = vpop.f32.mrf.mxu1 }
 0x155   :  { %2869 = vst [vmem:[#allocation19_spill] sm:$0xff] %v2741_v54  ;;  %v1877_v10 = vpop.f32.mrf.mxu0  ;;  %v1275_v54 = vadd.f32 %v1842_v31, %v2650_v27  ;;  %v1912_v27 = vadd.f32 %v2707_v42, %v2705_v40  ;;  %v1286_v31 = vadd.f32 %v1851_v55, %v2659_v51  ;;  %v1318_v40 = vadd.f32 %v1875_v36, %v2683_v56  ;;  %v2882_v36 = vld [vmem:[#allocation9_spill] sm:$0xff] }
 0x156   :  { %v2743_v4 = vpop.f32.mrf.mxu1  ;;  %v1878_v7 = vadd.f32 %v1877_v10, %v1876_v57  ;;  %v1863_v56 = vadd.f32 %v2733_v2, %v2729_v63  ;;  %v2875_v63 = vld [vmem:[#allocation10_spill] sm:$0xff]  ;;  %v2876_v2 = vld [vmem:[#allocation12_spill] sm:$0xff] }
 0x157   :  { %2870 = vst [vmem:[#allocation20_spill] sm:$0xff] %v2743_v4  ;;  %v2745_v0 = vpop.f32.mrf.mxu0  ;;  %v1278_v4 = vadd.f32 %v1845_v52, %v2653_v35  ;;  %v1869_v35 = vadd.f32 %v1868_v13, %v1867_v9  ;;  %v1372_v32 = vadd.f32 %v1906_v25, %v1275_v54  ;;  %v1383_v54 = vadd.f32 %v1915_v34, %v1286_v31  ;;  %v2878_v13 = vld [vmem:[#allocation15_spill] sm:$0xff] }
 0x158   :  { %2871 = vst [vmem:[#allocation21_spill] sm:$0xff] %v2745_v0  ;;  %v2747_v3 = vpop.f32.mrf.mxu1  ;;  %v1283_v0 = vadd.f32 %v1848_v49, %v2656_v43  ;;  %v1307_v43 = vadd.f32 %v1866_v21, %v2674_v29  ;;  %v1415_v8 = vadd.f32 %v1939_v5, %v1318_v40  ;;  %v1857_v9 = vadd.f32 %v2876_v2, %v2875_v63  ;;  %v2888_v40 = vld [vmem:[#allocation16_spill] sm:$0xff] }
 0x159   :  { %2872 = vst [vmem:[#allocation22_spill] sm:$0xff] %v2747_v3  ;;  %v2749_v20 = vpop.f32.mrf.mxu0  ;;  %v1375_v52 = vadd.f32 %v1909_v30, %v1278_v4  ;;  %v1310_v29 = vadd.f32 %v1869_v35, %v2677_v38  ;;  %v2874_v4 = vld [vmem:[#allocation6_spill] sm:$0xff]  ;;  %v1323_v22 = vadd.f32 %v1878_v7, %v2879_v19 }
 0x15a   :  { %v2751_v1 = vpop.f32.mrf.mxu1  ;;  %v1380_v49 = vadd.f32 %v1912_v27, %v1283_v0  ;;  %v1404_v58 = vadd.f32 %v1930_v62, %v1307_v43  ;;  %v2883_v27 = vld [vmem:[#allocation3_spill] sm:$0xff] }
 0x15b   :  { %v1882_v60 = vpop.f32.mrf.mxu0  ;;  %v1302_v31 = vadd.f32 %v1863_v56, %v2883_v27 }
 0x15c   :  { %v1946_v53 = vpop.f32.mrf.mxu1 }
 0x15d   :  { %v1883_v14 = vpop.f32.mrf.mxu0 }
 0x15e   :  { %v1947_v3 = vpop.f32.mrf.mxu1  ;;  %v1884_v51 = vadd.f32 %v1883_v14, %v1882_v60  ;;  %v2873_v60 = vld [vmem:[#allocation18_spill] sm:$0xff] }
 0x15f   :  { %v1885_v39 = vpop.f32.mrf.mxu0  ;;  %v1933_v0 = vadd.f32 %v2873_v60, %v2737_v12  ;;  %v2877_v12 = vld [vmem:[#allocation14_spill] sm:$0xff]  ;;  %v2880_v23 = vld [vmem:[#allocation21_spill] sm:$0xff]  ;;  %v1948_v26 = vadd.f32 %v1947_v3, %v1946_v53  ;;  %v2885_v3 = vld [vmem:[#allocation20_spill] sm:$0xff] }
 0x160   :  { %v2764_v18 = vpop.f32.mrf.mxu1  ;;  %v1331_v6 = vadd.f32 %v1884_v51, %v2874_v4  ;;  %v1924_v14 = vadd.f32 %v2878_v13, %v2877_v12  ;;  %v1881_v24 = vadd.f32 %v2749_v20, %v2880_v23  ;;  %v2884_v20 = vld [vmem:[#allocation19_spill] sm:$0xff]  ;;  %v2889_v51 = vld [vmem:[#allocation17_spill] sm:$0xff] }
 0x161   :  { %v1886_v28 = vpop.f32.mrf.mxu0  ;;  %v1407_v17 = vadd.f32 %v1933_v0, %v1310_v29  ;;  %v1942_v53 = vadd.f32 %v2885_v3, %v2884_v20  ;;  %v2893_v0 = vld [vmem:[#allocation22_spill] sm:$0xff] }
 0x162   :  { %v1950_v37 = vpop.f32.mrf.mxu1  ;;  %v1887_v10 = vadd.f32 %v1886_v28, %v1885_v39  ;;  %v1918_v39 = vadd.f32 %v2882_v36, %v2881_v33  ;;  %v1396_v43 = vadd.f32 %v1924_v14, %v1299_v61  ;;  %v1428_v47 = vadd.f32 %v1948_v26, %v1331_v6 }
 0x163   :  { %v1986_v42 = vpop.f32.mrf.mxu0 }
 0x164   :  { %v1477_v21 = vadd.f32 %v1986_v42, %v1380_v49  ;;  %v1994_v55 = vpop.f32.mrf.mxu1  ;;  %v1334_v28 = vadd.f32 %v1887_v10, %v2886_v45  ;;  %v2887_v49 = vld [vmem:[#allocation2_spill] sm:$0xff]  ;;  %v1927_v42 = vadd.f32 %v2889_v51, %v2888_v40  ;;  %v1388_v29 = vadd.f32 %v1918_v39, %v1291_v50 }
 0x165   :  { %v1509_v44 = vadd.f32 %v1994_v55, %v1412_v48  ;;  %v1468_v46 = vpop.f32.mrf.mxu0  ;;  %v1294_v62 = vadd.f32 %v1857_v9, %v2887_v49 }
 0x166   :  { %1533 = vst [vmem:[%s2851_s3 + $0x10] sm:$0xff] %v1477_v21  ;;  %v1469_v59 = vadd.f32 %v1468_v46, %v1372_v32  ;;  %v1500_v38 = vpop.f32.mrf.mxu1  ;;  %v2890_v21 = vld [vmem:[#allocation5_spill] sm:$0xff]  ;;  %v2891_v46 = vld [vmem:[#allocation11_spill] sm:$0xff]  ;;  %v1399_v60 = vadd.f32 %v1927_v42, %v1302_v31 }
 0x167   :  { %1541 = vst [vmem:[%s2851_s3 + $0x50] sm:$0xff] %v1509_v44  ;;  %v1501_v11 = vadd.f32 %v1500_v38, %v1404_v58  ;;  %v1987_v57 = vpop.f32.mrf.mxu0  ;;  %v1326_v55 = vadd.f32 %v1881_v24, %v2890_v21  ;;  %v1420_v44 = vadd.f32 %v1942_v53, %v1323_v22  ;;  %v2892_v58 = vld [vmem:[#allocation13_spill] sm:$0xff] }
 0x168   :  { %1531 = vst [vmem:[%s2851_s3] sm:$0xff] %v1469_v59  ;;  %v1480_v15 = vadd.f32 %v1987_v57, %v1383_v54  ;;  %v1995_v16 = vpop.f32.mrf.mxu1  ;;  %v1951_v54 = vadd.f32 %v1950_v37, %v2764_v18  ;;  %v1921_v61 = vadd.f32 %v2892_v58, %v2891_v46  ;;  %v1945_v18 = vadd.f32 %v2751_v1, %v2893_v0 }
 0x169   :  { %1539 = vst [vmem:[%s2851_s3 + $0x40] sm:$0xff] %v1501_v11  ;;  %v1512_v25 = vadd.f32 %v1995_v16, %v1415_v8  ;;  %v1471_v30 = vpop.f32.mrf.mxu0 }
 0x16a   :  { %1534 = vst [vmem:[%s2851_s3 + $0x18] sm:$0xff] %v1480_v15  ;;  %v1472_v41 = vadd.f32 %v1471_v30, %v1375_v52  ;;  %v1503_v35 = vpop.f32.mrf.mxu1  ;;  %v1431_v38 = vadd.f32 %v1951_v54, %v1334_v28  ;;  %v1391_v10 = vadd.f32 %v1921_v61, %v1294_v62  ;;  %v1423_v57 = vadd.f32 %v1945_v18, %v1326_v55 }
 0x16b   :  { %1542 = vst [vmem:[%s2851_s3 + $0x58] sm:$0xff] %v1512_v25  ;;  %v1504_v32 = vadd.f32 %v1503_v35, %v1407_v17  ;;  %v1990_v34 = vpop.f32.mrf.mxu0 }
 0x16c   :  { %1532 = vst [vmem:[%s2851_s3 + $0x8] sm:$0xff] %v1472_v41  ;;  %v1493_v52 = vadd.f32 %v1990_v34, %v1396_v43  ;;  %v1998_v48 = vpop.f32.mrf.mxu1 }
 0x16d   :  { %1540 = vst [vmem:[%s2851_s3 + $0x48] sm:$0xff] %v1504_v32  ;;  %v1525_v5 = vadd.f32 %v1998_v48, %v1428_v47  ;;  %v1484_v7 = vpop.f32.mrf.mxu0 }
 0x16e   :  { %1537 = vst [vmem:[%s2851_s3 + $0x30] sm:$0xff] %v1493_v52  ;;  %v1485_v56 = vadd.f32 %v1484_v7, %v1388_v29  ;;  %v1516_v50 = vpop.f32.mrf.mxu1 }
 0x16f   :  { %1545 = vst [vmem:[%s2851_s3 + $0x70] sm:$0xff] %v1525_v5  ;;  %v1517_v37 = vadd.f32 %v1516_v50, %v1420_v44  ;;  %v1991_v59 = vpop.f32.mrf.mxu0 }
 0x170   :  { %1535 = vst [vmem:[%s2851_s3 + $0x20] sm:$0xff] %v1485_v56  ;;  %v1496_v4 = vadd.f32 %v1991_v59, %v1399_v60  ;;  %v1999_v6 = vpop.f32.mrf.mxu1 }
 0x171   :  { %1543 = vst [vmem:[%s2851_s3 + $0x60] sm:$0xff] %v1517_v37  ;;  %v1528_v11 = vadd.f32 %v1999_v6, %v1431_v38  ;;  %v1487_v1 = vpop.f32.mrf.mxu0 }
 0x172   :  { %1538 = vst [vmem:[%s2851_s3 + $0x38] sm:$0xff] %v1496_v4  ;;  %v1488_v8 = vadd.f32 %v1487_v1, %v1391_v10  ;;  %v1519_v63 = vpop.f32.mrf.mxu1 }
 0x173   :  { %1546 = vst [vmem:[%s2851_s3 + $0x78] sm:$0xff] %v1528_v11  ;;  %v1520_v2 = vadd.f32 %v1519_v63, %v1423_v57 }
 0x174   :  { %1536 = vst [vmem:[%s2851_s3 + $0x28] sm:$0xff] %v1488_v8 }
 0x175   :  { %1544 = vst [vmem:[%s2851_s3 + $0x68] sm:$0xff] %v1520_v2 }

// kernel: image_transformation_network.59
= control target key start
LH: loop header
LB: loop body
LE: loop exit
PB: predicated region body
PF: predicated region fallthrough
CT: control target
= control target key end

     0   :  { %s2352_s12 = smov 0   ;;  %s2354_s13 = smov 0   ;;  %s2902_s0 = inlined_call_operand.vmem [shape: bf16[512,640], index: 0, kind: input, shape index: {}]   ;;  %s2903_s1 = inlined_call_operand.vmem [shape: bf16[640,128], index: 1, kind: input, shape index: {}]   ;;  %s2904_s2 = inlined_call_operand.vmem [shape: f32[1,128], index: 2, kind: input, shape index: {}]   ;;  %s2905_s3 = inlined_call_operand.vmem [shape: f32[512,128], index: 3, kind: output, shape index: {}]  }
   0x1   :  { %s2356_s14 = smov 0  }
   0x2 LB: > { %s25_s15 = sadd.s32 1, %s2326_s13  ;;  %p1691_p0 = scmp.ge.s32.totalorder %s2330_s14, 1  ;;  %s2330_s14 = sphi %s2356_s14, %s13_s14   ;;  %s2326_s13 = sphi %s2354_s13, %s2949_s13   ;;  %s2322_s12 = sphi %s2352_s12, %s2948_s12  }
   0x3   : > { %p27_p1 = scmp.ge.s32.totalorder %s25_s15, 2  ;;  %p170_p2 = scmp.lt.s32.totalorder %s2330_s14, 3 }
   0x5   : > { %s2951_s15 = smov (%p27_p1, %s25_s15), 0  ;;  %p171_p3 = pnand %p1691_p0, %p170_p2 }
   0x7   : > { %174 = sbr.rel (%p171_p3) target bundleno = 403 (0x193), region = 32 }
   0xc   : > { %v2156_v0 = vld [vmem:[%s2903_s1 + $0x78] sm:$0xff]   ;;  %s1692_s18 = sshll.u32 %s2322_s12, 5  ;;  %v2158_v2 = vld [vmem:[%s2903_s1 + $0x70] sm:$0xff]   ;;  %v2160_v4 = vld [vmem:[%s2903_s1 + $0x68] sm:$0xff]  }
   0xd   : > { %v2157_v1 = vld [vmem:[%s2903_s1 + $0x38] sm:$0xff]   ;;  %1819 = vmatprep.subr.bf16.mxu0 %v2156_v0  ;;  %2115 = vmatprep.subr.bf16.mxu1 %v2156_v0  ;;  %p206_p4 = scmp.lt.s32.totalorder %s1692_s18, 63  ;;  %v2159_v3 = vld [vmem:[%s2903_s1 + $0x30] sm:$0xff]   ;;  %v2161_v5 = vld [vmem:[%s2903_s1 + $0x28] sm:$0xff]  }
   0xe   : > { %1820 = vmatpush3.bf16.msra.mxu0 %v2157_v1  ;;  %2123 = vmatpush3.bf16.msra.mxu1 %v2157_v1  ;;  %v2162_v6 = vld [vmem:[%s2903_s1 + $0x60] sm:$0xff]   ;;  %v2164_v8 = vld [vmem:[%s2903_s1 + $0x58] sm:$0xff]   ;;  %v2166_v10 = vld [vmem:[%s2903_s1 + $0x50] sm:$0xff]  }
   0xf   : > { %1821 = vmatprep.subr.bf16.mxu0 %v2158_v2  ;;  %2116 = vmatprep.subr.bf16.mxu1 %v2158_v2  ;;  %s2953_s18 = smov (!%p206_p4, %s1692_s18), 63  ;;  %v2163_v7 = vld [vmem:[%s2903_s1 + $0x20] sm:$0xff]   ;;  %v2165_v9 = vld [vmem:[%s2903_s1 + $0x18] sm:$0xff]   ;;  %v2167_v13 = vld [vmem:[%s2903_s1 + $0x10] sm:$0xff]  }
  0x10   : > { %s2131_s4 = smul.u32 20, %s2953_s18  ;;  %v2168_v14 = vld [vmem:[%s2903_s1 + $0x48] sm:$0xff]   ;;  %v2170_v16 = vld [vmem:[%s2903_s1 + $0x40] sm:$0xff]   ;;  %v2178_v18 = vld [vmem:[%s2903_s1 + $0xf8] sm:$0xff]   ;;  %s1695_s8 = sshll.u32 %s2953_s18, 3 }
  0x11   : > { %v2169_v15 = vld [vmem:[%s2903_s1 + $0x8] sm:$0xff]   ;;  %v2171_v17 = vld [vmem:[%s2903_s1] sm:$0xff]   ;;  %v2181_v19 = vld [vmem:[%s2903_s1 + $0x138] sm:$0xff]   ;;  %s2731_s12 = scalar_lea.vmem %s2905_s3, %s1695_s8 }
  0x12   : > { %1822 = vmatpush3.bf16.msra.mxu0 %v2159_v3  ;;  %2124 = vmatpush3.bf16.msra.mxu1 %v2159_v3  ;;  %s2403_s11 = scalar_lea.vmem %s2902_s0, %s2131_s4  ;;  %v2179_v22 = vld [vmem:[%s2903_s1 + $0xb8] sm:$0xff]   ;;  %v2180_v23 = vld [vmem:[%s2903_s1 + $0xf0] sm:$0xff]   ;;  %v2189_v29 = vld [vmem:[%s2903_s1 + $0xe8] sm:$0xff]  }
  0x13   : > { %1823 = vmatprep.subr.bf16.mxu0 %v2160_v4  ;;  %2117 = vmatprep.subr.bf16.mxu1 %v2160_v4  ;;  %v2174_v11 = vld [vmem:[%s2403_s11 + $0x4] ss:$20 sps:$4 sm:$0xff]   ;;  %v2172_v20 = vld [vmem:[%s2403_s11] ss:$20 sps:$4 sm:$0xff]   ;;  %v2187_v28 = vld [vmem:[%s2403_s11 + $0x28] ss:$20 sps:$4 sm:$0xff]  }
  0x14   : > { %v2177_v12 = vld [vmem:[%s2403_s11 + $0x1e4] ss:$20 sps:$4 sm:$0xff]   ;;  %1100 = vmatprep.mubr.bf16.mxu0 %v2174_v11  ;;  %v2175_v21 = vld [vmem:[%s2403_s11 + $0x1e0] ss:$20 sps:$4 sm:$0xff]   ;;  %v2188_v30 = vld [vmem:[%s2403_s11 + $0x208] ss:$20 sps:$4 sm:$0xff]  }
  0x15   : > { %1196 = vmatprep.mubr.bf16.mxu1 %v2177_v12  ;;  %v2183_v24 = vld [vmem:[%s2403_s11 + $0x2c] ss:$20 sps:$4 sm:$0xff]   ;;  %v2200_v26 = vld [vmem:[%s2903_s1 + $0x130] sm:$0xff]   ;;  %v2199_v36 = vld [vmem:[%s2903_s1 + $0xd8] sm:$0xff]  }
  0x16   : > { %1824 = vmatpush3.bf16.msra.mxu0 %v2161_v5  ;;  %2125 = vmatpush3.bf16.msra.mxu1 %v2161_v5  ;;  %v2185_v25 = vld [vmem:[%s2403_s11 + $0x20c] ss:$20 sps:$4 sm:$0xff]   ;;  %v2182_v27 = vld [vmem:[%s2903_s1 + $0xb0] sm:$0xff]   ;;  %v2201_v40 = vld [vmem:[%s2903_s1 + $0x98] sm:$0xff]  }
  0x17   : > { %1825 = vmatprep.subr.bf16.mxu0 %v2162_v6  ;;  %2118 = vmatprep.subr.bf16.mxu1 %v2162_v6  ;;  %v2190_v31 = vld [vmem:[%s2903_s1 + $0xa8] sm:$0xff]   ;;  %v2191_v33 = vld [vmem:[%s2903_s1 + $0xe0] sm:$0xff]   ;;  %v2202_v41 = vld [vmem:[%s2903_s1 + $0xd0] sm:$0xff]  }
  0x18   : > { %v2193_v32 = vld [vmem:[%s2403_s11 + $0x54] ss:$20 sps:$4 sm:$0xff]   ;;  %v2192_v35 = vld [vmem:[%s2903_s1 + $0xa0] sm:$0xff]   ;;  %v2204_v42 = vld [vmem:[%s2403_s11 + $0x7c] ss:$20 sps:$4 sm:$0xff]  }
  0x19   : > { %v2195_v34 = vld [vmem:[%s2403_s11 + $0x234] ss:$20 sps:$4 sm:$0xff]   ;;  %v2197_v37 = vld [vmem:[%s2403_s11 + $0x50] ss:$20 sps:$4 sm:$0xff]   ;;  %v2208_v46 = vld [vmem:[%s2403_s11 + $0x78] ss:$20 sps:$4 sm:$0xff]  }
  0x1a   : > { %1826 = vmatpush3.bf16.msra.mxu0 %v2163_v7  ;;  %2126 = vmatpush3.bf16.msra.mxu1 %v2163_v7  ;;  %v2213_v38 = vld [vmem:[%s2903_s1 + $0x128] sm:$0xff]   ;;  %v2198_v39 = vld [vmem:[%s2403_s11 + $0x230] ss:$20 sps:$4 sm:$0xff]   ;;  %v2234_v52 = vld [vmem:[%s2903_s1 + $0x118] sm:$0xff]  }
  0x1b   : > { %1827 = vmatprep.subr.bf16.mxu0 %v2164_v8  ;;  %2119 = vmatprep.subr.bf16.mxu1 %v2164_v8  ;;  %v2206_v43 = vld [vmem:[%s2403_s11 + $0x25c] ss:$20 sps:$4 sm:$0xff]   ;;  %v2227_v45 = vld [vmem:[%s2903_s1 + $0x120] sm:$0xff]   ;;  %v2209_v47 = vld [vmem:[%s2403_s11 + $0x258] ss:$20 sps:$4 sm:$0xff]  }
  0x1c   : > { %v2203_v44 = vld [vmem:[%s2903_s1 + $0x90] sm:$0xff]   ;;  %v2210_v48 = vld [vmem:[%s2903_s1 + $0xc8] sm:$0xff]   ;;  %v2212_v50 = vld [vmem:[%s2903_s1 + $0xc0] sm:$0xff]  }
  0x1d   : > { %v2211_v49 = vld [vmem:[%s2903_s1 + $0x88] sm:$0xff]   ;;  %v2215_v51 = vld [vmem:[%s2403_s11 + $0xa4] ss:$20 sps:$4 sm:$0xff]   ;;  %v2220_v56 = vld [vmem:[%s2403_s11 + $0xa0] ss:$20 sps:$4 sm:$0xff]  }
  0x1e   : > { %1828 = vmatpush3.bf16.msra.mxu0 %v2165_v9  ;;  %2127 = vmatpush3.bf16.msra.mxu1 %v2165_v9  ;;  %v2219_v53 = vld [vmem:[%s2403_s11 + $0xc] ss:$20 sps:$4 sm:$0xff]   ;;  %v2217_v55 = vld [vmem:[%s2403_s11 + $0x8] ss:$20 sps:$4 sm:$0xff]   ;;  %v2247_v57 = vld [vmem:[%s2903_s1 + $0x110] sm:$0xff]  }
  0x1f   : > { %1829 = vmatprep.subr.bf16.mxu0 %v2166_v10  ;;  %2120 = vmatprep.subr.bf16.mxu1 %v2166_v10  ;;  %v2214_v54 = vld [vmem:[%s2903_s1 + $0x80] sm:$0xff]   ;;  %v2223_v59 = vld [vmem:[%s2403_s11 + $0x34] ss:$20 sps:$4 sm:$0xff]   ;;  %v2230_v0 = vld [vmem:[%s2403_s11 + $0x5c] ss:$20 sps:$4 sm:$0xff]  }
  0x20   : > { %v2221_v58 = vld [vmem:[%s2403_s11 + $0xcc] ss:$20 sps:$4 sm:$0xff]   ;;  %v2225_v61 = vld [vmem:[%s2403_s11 + $0xc8] ss:$20 sps:$4 sm:$0xff]   ;;  %v2226_v62 = vld [vmem:[%s2403_s11 + $0x30] ss:$20 sps:$4 sm:$0xff]  }
  0x21   : > { %v2254_v60 = vld [vmem:[%s2903_s1 + $0x108] sm:$0xff]   ;;  %v2267_v1 = vld [vmem:[%s2903_s1 + $0x100] sm:$0xff]   ;;  %v2235_v4 = vld [vmem:[%s2403_s11 + $0x11c] ss:$20 sps:$4 sm:$0xff]  }
  0x22   : > { %1830 = vmatpush3.bf16.msra.mxu0 %v2167_v13  ;;  %2128 = vmatpush3.bf16.msra.mxu1 %v2167_v13  ;;  %v2228_v63 = vld [vmem:[%s2403_s11 + $0xf4] ss:$20 sps:$4 sm:$0xff]   ;;  %v2232_v2 = vld [vmem:[%s2403_s11 + $0xf0] ss:$20 sps:$4 sm:$0xff]   ;;  %v2233_v3 = vld [vmem:[%s2403_s11 + $0x58] ss:$20 sps:$4 sm:$0xff]  }
  0x23   : > { %1831 = vmatprep.subr.bf16.mxu0 %v2168_v14  ;;  %2121 = vmatprep.subr.bf16.mxu1 %v2168_v14  ;;  %v2237_v5 = vld [vmem:[%s2403_s11 + $0x84] ss:$20 sps:$4 sm:$0xff]   ;;  %v2240_v7 = vld [vmem:[%s2403_s11 + $0x80] ss:$20 sps:$4 sm:$0xff]   ;;  %v2246_v11 = vld [vmem:[%s2403_s11 + $0xa8] ss:$20 sps:$4 sm:$0xff]  }
  0x24   : > { %v2239_v6 = vld [vmem:[%s2403_s11 + $0x118] ss:$20 sps:$4 sm:$0xff]   ;;  %v2245_v10 = vld [vmem:[%s2403_s11 + $0x140] ss:$20 sps:$4 sm:$0xff]   ;;  %v2252_v14 = vld [vmem:[%s2403_s11 + $0x168] ss:$20 sps:$4 sm:$0xff]  }
  0x25   : > { %v2241_v8 = vld [vmem:[%s2403_s11 + $0x144] ss:$20 sps:$4 sm:$0xff]   ;;  %v2243_v9 = vld [vmem:[%s2403_s11 + $0xac] ss:$20 sps:$4 sm:$0xff]   ;;  %v2250_v13 = vld [vmem:[%s2403_s11 + $0xd4] ss:$20 sps:$4 sm:$0xff]  }
  0x26   : > { %1832 = vmatpush3.bf16.msra.mxu0 %v2169_v15  ;;  %2129 = vmatpush3.bf16.msra.mxu1 %v2169_v15  ;;  %v2248_v12 = vld [vmem:[%s2403_s11 + $0x16c] ss:$20 sps:$4 sm:$0xff]   ;;  %v2253_v15 = vld [vmem:[%s2403_s11 + $0xd0] ss:$20 sps:$4 sm:$0xff]  }
  0x27   : > { %1833 = vmatprep.subr.bf16.mxu0 %v2170_v16  ;;  %2122 = vmatprep.subr.bf16.mxu1 %v2170_v16  ;;  %v2255_v16 = vld [vmem:[%s2403_s11 + $0x194] ss:$20 sps:$4 sm:$0xff]  }
  0x2a   : > { %1834 = vmatpush3.bf16.msra.mxu0 %v2171_v17  ;;  %2130 = vmatpush3.bf16.msra.mxu1 %v2171_v17  ;;  %v2257_v17 = vld [vmem:[%s2403_s11 + $0xfc] ss:$20 sps:$4 sm:$0xff]  }
  0x2b   : > { %1931 = vmatprep.subr.bf16.mxu1 %v2178_v18  ;;  %2067 = vmatprep.subr.bf16.mxu0 %v2181_v19  ;;  %v2259_v18 = vld [vmem:[%s2403_s11 + $0x190] ss:$20 sps:$4 sm:$0xff]  }
  0x2d   : > { %1101 = vmatmul.mubr.bf16.vlgmr.msra.gmra.mxu0 %v2172_v20  ;;  %1197 = vmatmul.mubr.bf16.vlgmr.msra.gmra.mxu1 %v2175_v21  ;;  %v2261_v20 = vld [vmem:[%s2403_s11 + $0x1bc] ss:$20 sps:$4 sm:$0xff]   ;;  %v2263_v21 = vld [vmem:[%s2403_s11 + $0x124] ss:$20 sps:$4 sm:$0xff]  }
  0x2e   : > { %1932 = vmatpush3.bf16.msra.mxu1 %v2179_v22  ;;  %2068 = vmatpush3.bf16.msra.mxu0 %v2181_v19  ;;  %v2260_v19 = vld [vmem:[%s2403_s11 + $0xf8] ss:$20 sps:$4 sm:$0xff]  }
  0x2f   : > { %1933 = vmatprep.subr.bf16.mxu1 %v2180_v23  ;;  %1108 = vmatprep.mubr.bf16.mxu0 %v2183_v24  ;;  %v2265_v22 = vld [vmem:[%s2403_s11 + $0x1b8] ss:$20 sps:$4 sm:$0xff]   ;;  %v2266_v23 = vld [vmem:[%s2403_s11 + $0x120] ss:$20 sps:$4 sm:$0xff]  }
  0x30   : > { %1204 = vmatprep.mubr.bf16.mxu1 %v2185_v25  ;;  %2069 = vmatprep.subr.bf16.mxu0 %v2200_v26  ;;  %v2268_v24 = vld [vmem:[%s2403_s11 + $0x14c] ss:$20 sps:$4 sm:$0xff]   ;;  %v2270_v25 = vld [vmem:[%s2403_s11 + $0x10] ss:$20 sps:$4 sm:$0xff]  }
  0x32   : > { %1934 = vmatpush3.bf16.msra.mxu1 %v2182_v27  ;;  %2070 = vmatpush3.bf16.msra.mxu0 %v2200_v26  ;;  %v2271_v26 = vld [vmem:[%s2403_s11 + $0x148] ss:$20 sps:$4 sm:$0xff]   ;;  %v2272_v27 = vld [vmem:[%s2403_s11 + $0x38] ss:$20 sps:$4 sm:$0xff]  }
  0x33   : > { %1935 = vmatprep.subr.bf16.mxu1 %v2189_v29  ;;  %2071 = vmatprep.subr.bf16.mxu0 %v2213_v38  ;;  %v2275_v29 = vld [vmem:[%s2403_s11 + $0x60] ss:$20 sps:$4 sm:$0xff]  }
  0x35   : > { %1109 = vmatmul.mubr.bf16.gmra.mxu0 %v2187_v28  ;;  %1205 = vmatmul.mubr.bf16.gmra.mxu1 %v2188_v30  ;;  %v2273_v28 = vld [vmem:[%s2403_s11 + $0x174] ss:$20 sps:$4 sm:$0xff]   ;;  %v2276_v30 = vld [vmem:[%s2403_s11 + $0x170] ss:$20 sps:$4 sm:$0xff]  }
  0x36   : > { %1936 = vmatpush3.bf16.msra.mxu1 %v2190_v31  ;;  %1116 = vmatprep.mubr.bf16.mxu0 %v2193_v32  ;;  %v2277_v31 = vld [vmem:[%s2403_s11 + $0x88] ss:$20 sps:$4 sm:$0xff]  }
  0x37   : > { %1937 = vmatprep.subr.bf16.mxu1 %v2191_v33  ;;  %1212 = vmatprep.mubr.bf16.mxu1 %v2195_v34  ;;  %v2278_v32 = vld [vmem:[%s2403_s11 + $0x19c] ss:$20 sps:$4 sm:$0xff]   ;;  %v2281_v34 = vld [vmem:[%s2403_s11 + $0x198] ss:$20 sps:$4 sm:$0xff]  }
  0x38   : > { %2072 = vmatpush3.bf16.msra.mxu0 %v2213_v38  ;;  %v2280_v33 = vld [vmem:[%s2403_s11 + $0xb0] ss:$20 sps:$4 sm:$0xff]   ;;  %v2286_v38 = vld [vmem:[%s2403_s11 + $0x1c0] ss:$20 sps:$4 sm:$0xff]  }
  0x39   : > { %2073 = vmatprep.subr.bf16.mxu0 %v2227_v45 }
  0x3a   : > { %1938 = vmatpush3.bf16.msra.mxu1 %v2192_v35  ;;  %v2282_v35 = vld [vmem:[%s2403_s11 + $0xd8] ss:$20 sps:$4 sm:$0xff]  }
  0x3b   : > { %1939 = vmatprep.subr.bf16.mxu1 %v2199_v36  ;;  %v2283_v36 = vld [vmem:[%s2403_s11 + $0x1c4] ss:$20 sps:$4 sm:$0xff]  }
  0x3c   : > { %2074 = vmatpush3.bf16.msra.mxu0 %v2227_v45  ;;  %v2295_v45 = vld [vmem:[%s2403_s11 + $0x1a0] ss:$20 sps:$4 sm:$0xff]  }
  0x3d   : > { %1117 = vmatmul.mubr.bf16.gmra.mxu0 %v2197_v37  ;;  %1213 = vmatmul.mubr.bf16.gmra.mxu1 %v2198_v39  ;;  %v2285_v37 = vld [vmem:[%s2403_s11 + $0x100] ss:$20 sps:$4 sm:$0xff]   ;;  %v2287_v39 = vld [vmem:[%s2403_s11 + $0x128] ss:$20 sps:$4 sm:$0xff]  }
  0x3e   : > { %1940 = vmatpush3.bf16.msra.mxu1 %v2201_v40  ;;  %1124 = vmatprep.mubr.bf16.mxu0 %v2204_v42  ;;  %v2288_v40 = vld [vmem:[%s2403_s11 + $0x1ec] ss:$20 sps:$4 sm:$0xff]   ;;  %v2291_v42 = vld [vmem:[%s2403_s11 + $0x1e8] ss:$20 sps:$4 sm:$0xff]  }
  0x3f   : > { %1941 = vmatprep.subr.bf16.mxu1 %v2202_v41  ;;  %1220 = vmatprep.mubr.bf16.mxu1 %v2206_v43  ;;  %v2290_v41 = vld [vmem:[%s2403_s11 + $0x150] ss:$20 sps:$4 sm:$0xff]   ;;  %v2292_v43 = vld [vmem:[%s2403_s11 + $0x178] ss:$20 sps:$4 sm:$0xff]  }
  0x40   : > { %2075 = vmatprep.subr.bf16.mxu0 %v2234_v52 }
  0x41   : > { %2076 = vmatpush3.bf16.msra.mxu0 %v2234_v52  ;;  %v2303_v52 = vld [vmem:[%s2403_s11 + $0x264] ss:$20 sps:$4 sm:$0xff]  }
  0x42   : > { %1942 = vmatpush3.bf16.msra.mxu1 %v2203_v44  ;;  %2077 = vmatprep.subr.bf16.mxu0 %v2247_v57  ;;  %v2293_v44 = vld [vmem:[%s2403_s11 + $0x214] ss:$20 sps:$4 sm:$0xff]  }
  0x43   : > { %1943 = vmatprep.subr.bf16.mxu1 %v2210_v48  ;;  %v2298_v48 = vld [vmem:[%s2403_s11 + $0x23c] ss:$20 sps:$4 sm:$0xff]  }
  0x45   : > { %1125 = vmatmul.mubr.bf16.gmra.mxu0 %v2208_v46  ;;  %1221 = vmatmul.mubr.bf16.gmra.mxu1 %v2209_v47  ;;  %v2296_v46 = vld [vmem:[%s2403_s11 + $0x210] ss:$20 sps:$4 sm:$0xff]   ;;  %v2297_v47 = vld [vmem:[%s2403_s11 + $0x1c8] ss:$20 sps:$4 sm:$0xff]  }
  0x46   : > { %1944 = vmatpush3.bf16.msra.mxu1 %v2211_v49  ;;  %1132 = vmatprep.mubr.bf16.mxu0 %v2215_v51  ;;  %v2300_v49 = vld [vmem:[%s2403_s11 + $0x1f0] ss:$20 sps:$4 sm:$0xff]   ;;  %v2302_v51 = vld [vmem:[%s2403_s11 + $0x218] ss:$20 sps:$4 sm:$0xff]  }
  0x47   : > { %1945 = vmatprep.subr.bf16.mxu1 %v2212_v50  ;;  %1261 = vmatprep.mubr.bf16.mxu1 %v2219_v53  ;;  %v2301_v50 = vld [vmem:[%s2403_s11 + $0x238] ss:$20 sps:$4 sm:$0xff]   ;;  %v2305_v53 = vld [vmem:[%s2403_s11 + $0x240] ss:$20 sps:$4 sm:$0xff]  }
  0x48   : > { %2078 = vmatpush3.bf16.msra.mxu0 %v2247_v57 }
  0x49   : > { %2079 = vmatprep.subr.bf16.mxu0 %v2254_v60 }
  0x4a   : > { %1946 = vmatpush3.bf16.msra.mxu1 %v2214_v54  ;;  %v2306_v54 = vld [vmem:[%s2403_s11 + $0x260] ss:$20 sps:$4 sm:$0xff]  }
  0x4c   : > { %2080 = vmatpush3.bf16.msra.mxu0 %v2254_v60 }
  0x4d   : > { %1133 = vmatmul.mubr.bf16.gmra.mxu0 %v2220_v56  ;;  %1262 = vmatmul.mubr.bf16.vlgmr.msra.gmra.mxu1 %v2217_v55  ;;  %v2307_v55 = vld [vmem:[%s2403_s11 + $0x268] ss:$20 sps:$4 sm:$0xff]  }
  0x4e   : > { %1140 = vmatprep.mubr.bf16.mxu0 %v2221_v58  ;;  %1269 = vmatprep.mubr.bf16.mxu1 %v2223_v59 }
  0x4f   : > { %2081 = vmatprep.subr.bf16.mxu0 %v2267_v1 }
  0x50   : > { %2082 = vmatpush3.bf16.msra.mxu0 %v2267_v1 }
  0x55   : > { %1141 = vmatmul.mubr.bf16.gmra.mxu0 %v2225_v61  ;;  %1270 = vmatmul.mubr.bf16.gmra.mxu1 %v2226_v62 }
  0x56   : > { %1148 = vmatprep.mubr.bf16.mxu0 %v2228_v63  ;;  %1277 = vmatprep.mubr.bf16.mxu1 %v2230_v0 }
  0x5d   : > { %1149 = vmatmul.mubr.bf16.gmra.mxu0 %v2232_v2  ;;  %1278 = vmatmul.mubr.bf16.gmra.mxu1 %v2233_v3 }
  0x5e   : > { %1156 = vmatprep.mubr.bf16.mxu0 %v2235_v4  ;;  %1285 = vmatprep.mubr.bf16.mxu1 %v2237_v5 }
  0x65   : > { %1157 = vmatmul.mubr.bf16.gmra.mxu0 %v2239_v6  ;;  %1286 = vmatmul.mubr.bf16.gmra.mxu1 %v2240_v7 }
  0x66   : > { %1164 = vmatprep.mubr.bf16.mxu0 %v2241_v8  ;;  %1293 = vmatprep.mubr.bf16.mxu1 %v2243_v9 }
  0x6d   : > { %1165 = vmatmul.mubr.bf16.gmra.mxu0 %v2245_v10  ;;  %1294 = vmatmul.mubr.bf16.gmra.mxu1 %v2246_v11 }
  0x6e   : > { %1172 = vmatprep.mubr.bf16.mxu0 %v2248_v12  ;;  %1301 = vmatprep.mubr.bf16.mxu1 %v2250_v13 }
  0x75   : > { %1173 = vmatmul.mubr.bf16.gmra.mxu0 %v2252_v14  ;;  %1302 = vmatmul.mubr.bf16.gmra.mxu1 %v2253_v15 }
  0x76   : > { %1180 = vmatprep.mubr.bf16.mxu0 %v2255_v16  ;;  %1309 = vmatprep.mubr.bf16.mxu1 %v2257_v17 }
  0x7d   : > { %1181 = vmatmul.mubr.bf16.gmra.mxu0 %v2259_v18  ;;  %1310 = vmatmul.mubr.bf16.gmra.mxu1 %v2260_v19 }
  0x7e   : > { %1188 = vmatprep.mubr.bf16.mxu0 %v2261_v20  ;;  %1317 = vmatprep.mubr.bf16.mxu1 %v2263_v21 }
  0x85   : > { %1189 = vmatmul.mubr.bf16.gmra.mxu0 %v2265_v22  ;;  %1318 = vmatmul.mubr.bf16.gmra.mxu1 %v2266_v23 }
  0x86   : > { %1325 = vmatprep.mubr.bf16.mxu1 %v2268_v24  ;;  %2083 = vmatprep.mubr.bf16.mxu0 %v2270_v25 }
  0x8d   : > { %1326 = vmatmul.mubr.bf16.gmra.mxu1 %v2271_v26  ;;  %2084 = vmatmul.mubr.bf16.vlgmr.msra.gmra.mxu0 %v2272_v27 }
  0x8e   : > { %1333 = vmatprep.mubr.bf16.mxu1 %v2273_v28  ;;  %2087 = vmatprep.mubr.bf16.mxu0 %v2275_v29 }
  0x95   : > { %1334 = vmatmul.mubr.bf16.gmra.mxu1 %v2276_v30  ;;  %2088 = vmatmul.mubr.bf16.gmra.mxu0 %v2277_v31 }
  0x96   : > { %1341 = vmatprep.mubr.bf16.mxu1 %v2278_v32  ;;  %2091 = vmatprep.mubr.bf16.mxu0 %v2280_v33 }
  0x9d   : > { %1342 = vmatmul.mubr.bf16.gmra.mxu1 %v2281_v34  ;;  %2092 = vmatmul.mubr.bf16.gmra.mxu0 %v2282_v35 }
  0x9e   : > { %1349 = vmatprep.mubr.bf16.mxu1 %v2283_v36  ;;  %2095 = vmatprep.mubr.bf16.mxu0 %v2285_v37 }
  0xa5   : > { %1350 = vmatmul.mubr.bf16.gmra.mxu1 %v2286_v38  ;;  %2096 = vmatmul.mubr.bf16.gmra.mxu0 %v2287_v39 }
  0xa6   : > { %1357 = vmatprep.mubr.bf16.mxu1 %v2288_v40  ;;  %2099 = vmatprep.mubr.bf16.mxu0 %v2290_v41 }
  0xad   : > { %1358 = vmatmul.mubr.bf16.gmra.mxu1 %v2291_v42  ;;  %2100 = vmatmul.mubr.bf16.gmra.mxu0 %v2292_v43 }
  0xae   : > { %1365 = vmatprep.mubr.bf16.mxu1 %v2293_v44  ;;  %2103 = vmatprep.mubr.bf16.mxu0 %v2295_v45 }
  0xb5   : > { %1366 = vmatmul.mubr.bf16.gmra.mxu1 %v2296_v46  ;;  %2104 = vmatmul.mubr.bf16.gmra.mxu0 %v2297_v47 }
  0xb6   : > { %1373 = vmatprep.mubr.bf16.mxu1 %v2298_v48  ;;  %2107 = vmatprep.mubr.bf16.mxu0 %v2300_v49 }
  0xbd   : > { %1374 = vmatmul.mubr.bf16.gmra.mxu1 %v2301_v50  ;;  %2108 = vmatmul.mubr.bf16.gmra.mxu0 %v2302_v51 }
  0xbe   : > { %1381 = vmatprep.mubr.bf16.mxu1 %v2303_v52  ;;  %2111 = vmatprep.mubr.bf16.mxu0 %v2305_v53 }
  0xc5   : > { %1382 = vmatmul.mubr.bf16.gmra.mxu1 %v2306_v54  ;;  %2112 = vmatmul.mubr.bf16.gmra.mxu0 %v2307_v55 }
  0xed   : > { %v1835_v56 = vpop.f32.mrf.mxu0  ;;  %v1907_v57 = vpop.f32.mrf.mxu1 }
  0xef   : > { %v1836_v58 = vpop.f32.mrf.mxu0  ;;  %v1908_v59 = vpop.f32.mrf.mxu1 }
  0xf0   : > { %v2578_v60 = vadd.f32 %v1836_v58, %v1835_v56  ;;  %v2580_v61 = vadd.f32 %v1908_v59, %v1907_v57 }
  0xf1   : > { %v1838_v62 = vpop.f32.mrf.mxu0  ;;  %v1910_v63 = vpop.f32.mrf.mxu1 }
  0xf2   : > { %2906 = vst [vmem:[#allocation2_spill] sm:$0xff] %v2580_v61 }
  0xf3   : > { %v1839_v0 = vpop.f32.mrf.mxu0  ;;  %v1911_v1 = vpop.f32.mrf.mxu1 }
  0xf4   : > { %v2582_v2 = vadd.f32 %v1839_v0, %v1838_v62  ;;  %v2584_v3 = vadd.f32 %v1911_v1, %v1910_v63 }
  0xf5   : > { %v1841_v4 = vpop.f32.mrf.mxu0  ;;  %v1913_v5 = vpop.f32.mrf.mxu1 }
  0xf6   : > { %2907 = vst [vmem:[#allocation3_spill] sm:$0xff] %v2584_v3 }
  0xf7   : > { %v1842_v6 = vpop.f32.mrf.mxu0  ;;  %v1914_v7 = vpop.f32.mrf.mxu1 }
  0xf8   : > { %v2586_v8 = vadd.f32 %v1842_v6, %v1841_v4  ;;  %v2588_v9 = vadd.f32 %v1914_v7, %v1913_v5 }
  0xf9   : > { %v1844_v10 = vpop.f32.mrf.mxu0  ;;  %v1916_v11 = vpop.f32.mrf.mxu1 }
  0xfa   : > { %2908 = vst [vmem:[#allocation4_spill] sm:$0xff] %v2588_v9  ;;  %v2709_v9 = vld [vmem:[%s2904_s2] ss:$0 sm:$0xff] }
  0xfb   : > { %v1845_v12 = vpop.f32.mrf.mxu0  ;;  %v1917_v13 = vpop.f32.mrf.mxu1 }
  0xfc   : > { %v2590_v14 = vadd.f32 %v1845_v12, %v1844_v10  ;;  %v2592_v15 = vadd.f32 %v1917_v13, %v1916_v11 }
  0xfd   : > { %v1847_v16 = vpop.f32.mrf.mxu0  ;;  %v1919_v17 = vpop.f32.mrf.mxu1 }
  0xfe   : > { %2909 = vst [vmem:[#allocation5_spill] sm:$0xff] %v2592_v15 }
  0xff   : > { %v1848_v18 = vpop.f32.mrf.mxu0  ;;  %v1920_v19 = vpop.f32.mrf.mxu1 }
 0x100   : > { %v2594_v20 = vadd.f32 %v1848_v18, %v1847_v16  ;;  %v2596_v21 = vadd.f32 %v1920_v19, %v1919_v17 }
 0x101   : > { %v1850_v22 = vpop.f32.mrf.mxu0  ;;  %v1922_v23 = vpop.f32.mrf.mxu1 }
 0x102   : > { %2910 = vst [vmem:[#allocation6_spill] sm:$0xff] %v2596_v21 }
 0x103   : > { %v1851_v24 = vpop.f32.mrf.mxu0  ;;  %v1923_v25 = vpop.f32.mrf.mxu1 }
 0x104   : > { %v2598_v26 = vadd.f32 %v1851_v24, %v1850_v22  ;;  %v2600_v27 = vadd.f32 %v1923_v25, %v1922_v23 }
 0x105   : > { %v1853_v28 = vpop.f32.mrf.mxu0  ;;  %v1925_v29 = vpop.f32.mrf.mxu1 }
 0x106   : > { %2911 = vst [vmem:[#allocation7_spill] sm:$0xff] %v2600_v27 }
 0x107   : > { %v1854_v30 = vpop.f32.mrf.mxu0  ;;  %v1926_v31 = vpop.f32.mrf.mxu1 }
 0x108   : > { %v2602_v32 = vadd.f32 %v1854_v30, %v1853_v28  ;;  %v2604_v33 = vadd.f32 %v1926_v31, %v1925_v29 }
 0x109   : > { %v1856_v34 = vpop.f32.mrf.mxu0  ;;  %v1928_v35 = vpop.f32.mrf.mxu1 }
 0x10a   : > { %2912 = vst [vmem:[#allocation8_spill] sm:$0xff] %v2604_v33 }
 0x10b   : > { %v1857_v36 = vpop.f32.mrf.mxu0  ;;  %v1929_v37 = vpop.f32.mrf.mxu1 }
 0x10c   : > { %v2606_v38 = vadd.f32 %v1857_v36, %v1856_v34  ;;  %v2608_v39 = vadd.f32 %v1929_v37, %v1928_v35 }
 0x10d   : > { %v1859_v40 = vpop.f32.mrf.mxu0  ;;  %v2610_v41 = vpop.f32.mrf.mxu1 }
 0x10e   : > { %2913 = vst [vmem:[#allocation9_spill] sm:$0xff] %v2608_v39 }
 0x10f   : > { %v1860_v42 = vpop.f32.mrf.mxu0  ;;  %v2612_v43 = vpop.f32.mrf.mxu1 }
 0x110   : > { %v2614_v44 = vadd.f32 %v1860_v42, %v1859_v40 }
 0x111   : > { %v1862_v45 = vpop.f32.mrf.mxu0  ;;  %v2616_v46 = vpop.f32.mrf.mxu1 }
 0x113   : > { %v1863_v47 = vpop.f32.mrf.mxu0  ;;  %v2618_v48 = vpop.f32.mrf.mxu1 }
 0x114   : > { %v2620_v49 = vadd.f32 %v1863_v47, %v1862_v45 }
 0x115   : > { %v1865_v50 = vpop.f32.mrf.mxu0  ;;  %v1953_v51 = vpop.f32.mrf.mxu1 }
 0x117   : > { %v1866_v52 = vpop.f32.mrf.mxu0  ;;  %v1954_v53 = vpop.f32.mrf.mxu1 }
 0x118   : > { %v2622_v54 = vadd.f32 %v1866_v52, %v1865_v50  ;;  %v1955_v61 = vadd.f32 %v1954_v53, %v1953_v51  ;;  %v1103_v51 = vadd.f32 %v2578_v60, %v2709_v9 }
 0x119   : > { %v1868_v55 = vpop.f32.mrf.mxu0  ;;  %v1956_v56 = vpop.f32.mrf.mxu1 }
 0x11b   : > { %v1869_v57 = vpop.f32.mrf.mxu0  ;;  %v1957_v58 = vpop.f32.mrf.mxu1 }
 0x11c   : > { %v2624_v59 = vadd.f32 %v1869_v57, %v1868_v55  ;;  %v1958_v53 = vadd.f32 %v1957_v58, %v1956_v56 }
 0x11d   : > { %v1871_v62 = vpop.f32.mrf.mxu0  ;;  %v2626_v63 = vpop.f32.mrf.mxu1 }
 0x11f   : > { %v1872_v0 = vpop.f32.mrf.mxu0  ;;  %v2628_v1 = vpop.f32.mrf.mxu1 }
 0x120   : > { %v2630_v4 = vadd.f32 %v1872_v0, %v1871_v62 }
 0x121   : > { %v1874_v5 = vpop.f32.mrf.mxu0  ;;  %v2632_v6 = vpop.f32.mrf.mxu1 }
 0x123   : > { %v1875_v7 = vpop.f32.mrf.mxu0  ;;  %v2634_v10 = vpop.f32.mrf.mxu1 }
 0x124   : > { %v2636_v11 = vadd.f32 %v1875_v7, %v1874_v5 }
 0x125   : > { %v2638_v12 = vpop.f32.mrf.mxu0  ;;  %v1965_v13 = vpop.f32.mrf.mxu1 }
 0x127   : > { %v2640_v16 = vpop.f32.mrf.mxu0  ;;  %v1966_v17 = vpop.f32.mrf.mxu1 }
 0x128   : > { %v1967_v58 = vadd.f32 %v1966_v17, %v1965_v13 }
 0x129   : > { %v2642_v18 = vpop.f32.mrf.mxu0  ;;  %v2644_v19 = vpop.f32.mrf.mxu1 }
 0x12b   : > { %v2646_v22 = vpop.f32.mrf.mxu0  ;;  %v2648_v23 = vpop.f32.mrf.mxu1 }
 0x12c   : > { %v1970_v13 = vadd.f32 %v2648_v23, %v2644_v19  ;;  %v1122_v19 = vadd.f32 %v2598_v26, %v2709_v9 }
 0x12d   : > { %v2650_v24 = vpop.f32.mrf.mxu0  ;;  %v2652_v25 = vpop.f32.mrf.mxu1 }
 0x12f   : > { %v2654_v28 = vpop.f32.mrf.mxu0  ;;  %v2656_v29 = vpop.f32.mrf.mxu1 }
 0x131   : > { %v2658_v30 = vpop.f32.mrf.mxu0  ;;  %v2660_v31 = vpop.f32.mrf.mxu1 }
 0x132   : > { %2914 = vst [vmem:[#allocation10_spill] sm:$0xff] %v2658_v30 }
 0x133   : > { %v2662_v34 = vpop.f32.mrf.mxu0  ;;  %v2664_v35 = vpop.f32.mrf.mxu1 }
 0x134   : > { %2915 = vst [vmem:[#allocation11_spill] sm:$0xff] %v2662_v34 }
 0x135   : > { %v2666_v36 = vpop.f32.mrf.mxu0  ;;  %v2668_v37 = vpop.f32.mrf.mxu1 }
 0x137   : > { %v2670_v40 = vpop.f32.mrf.mxu0  ;;  %v2672_v42 = vpop.f32.mrf.mxu1 }
 0x138   : > { %v1979_v23 = vadd.f32 %v2672_v42, %v2668_v37  ;;  %v1135_v37 = vadd.f32 %v2614_v44, %v2709_v9 }
 0x139   : > { %v2674_v45 = vpop.f32.mrf.mxu0  ;;  %v2676_v47 = vpop.f32.mrf.mxu1 }
 0x13a   : > { %2916 = vst [vmem:[#allocation12_spill] sm:$0xff] %v2674_v45 }
 0x13b   : > { %v2678_v50 = vpop.f32.mrf.mxu0  ;;  %v2680_v52 = vpop.f32.mrf.mxu1 }
 0x13c   : > { %2917 = vst [vmem:[#allocation13_spill] sm:$0xff] %v2678_v50  ;;  %v1982_v42 = vadd.f32 %v2680_v52, %v2676_v47 }
 0x13d   : > { %v2682_v55 = vpop.f32.mrf.mxu0  ;;  %v2684_v57 = vpop.f32.mrf.mxu1 }
 0x13e   : > { %2918 = vst [vmem:[#allocation14_spill] sm:$0xff] %v2682_v55  ;;  %v1949_v55 = vadd.f32 %v2612_v43, %v2610_v41  ;;  %v1114_v41 = vadd.f32 %v2590_v14, %v2709_v9  ;;  %v1952_v43 = vadd.f32 %v2618_v48, %v2616_v46  ;;  %v1127_v14 = vadd.f32 %v2602_v32, %v2709_v9 }
 0x13f   : > { %v2686_v62 = vpop.f32.mrf.mxu0  ;;  %v2688_v0 = vpop.f32.mrf.mxu1  ;;  %v1961_v46 = vadd.f32 %v2628_v1, %v2626_v63  ;;  %v1130_v63 = vadd.f32 %v2606_v38, %v2709_v9  ;;  %v1964_v1 = vadd.f32 %v2634_v10, %v2632_v6  ;;  %v1143_v6 = vadd.f32 %v2622_v54, %v2709_v9 }
 0x140   : > { %2919 = vst [vmem:[#allocation15_spill] sm:$0xff] %v2686_v62  ;;  %v1264_v60 = vadd.f32 %v1949_v55, %v1103_v51  ;;  %v1288_v32 = vadd.f32 %v1967_v58, %v1127_v14  ;;  %v1973_v10 = vadd.f32 %v2656_v29, %v2652_v25  ;;  %v1879_v25 = vadd.f32 %v2640_v16, %v2638_v12 }
 0x141   : > { %v2690_v5 = vpop.f32.mrf.mxu0  ;;  %v2692_v7 = vpop.f32.mrf.mxu1  ;;  %v1291_v38 = vadd.f32 %v1970_v13, %v1130_v63  ;;  %v1283_v26 = vadd.f32 %v1964_v1, %v1122_v19  ;;  %v1304_v54 = vadd.f32 %v1979_v23, %v1143_v6  ;;  %v1882_v13 = vadd.f32 %v2646_v22, %v2642_v18 }
 0x142   : > { %2920 = vst [vmem:[#allocation16_spill] sm:$0xff] %v2690_v5  ;;  %v1296_v47 = vadd.f32 %v1973_v10, %v1135_v37  ;;  %v1891_v22 = vadd.f32 %v2670_v40, %v2666_v36  ;;  %v1154_v23 = vadd.f32 %v2636_v11, %v2709_v9  ;;  %v2931_v37 = vld [vmem:[#allocation11_spill] sm:$0xff] }
 0x143   : > { %v2694_v39 = vpop.f32.mrf.mxu0  ;;  %v2696_v33 = vpop.f32.mrf.mxu1  ;;  %v2928_v6 = vld [vmem:[#allocation13_spill] sm:$0xff] }
 0x144   : > { %2921 = vst [vmem:[#allocation17_spill] sm:$0xff] %v2694_v39  ;;  %v1111_v39 = vadd.f32 %v2586_v8, %v2709_v9 }
 0x145   : > { %v2698_v27 = vpop.f32.mrf.mxu0  ;;  %v2700_v21 = vpop.f32.mrf.mxu1 }
 0x146   : > { %2922 = vst [vmem:[#allocation18_spill] sm:$0xff] %v2698_v27  ;;  %v1272_v34 = vadd.f32 %v1955_v61, %v1111_v39  ;;  %v1106_v39 = vadd.f32 %v2582_v2, %v2709_v9 }
 0x147   : > { %v2702_v3 = vpop.f32.mrf.mxu0  ;;  %v2704_v15 = vpop.f32.mrf.mxu1 }
 0x148   : > { %2923 = vst [vmem:[#allocation19_spill] sm:$0xff] %v2702_v3  ;;  %v1991_v12 = vadd.f32 %v2704_v15, %v2700_v21 }
 0x149   : > { %v2711_v5 = vpop.f32.mrf.mxu0  ;;  %v2713_v62 = vpop.f32.mrf.mxu1 }
 0x14a   : > { %2924 = vst [vmem:[#allocation20_spill] sm:$0xff] %v2711_v5 }
 0x14b   : > { %v2720_v3 = vpop.f32.mrf.mxu0  ;;  %v2722_v27 = vpop.f32.mrf.mxu1 }
 0x14c   : > { %2925 = vst [vmem:[#allocation21_spill] sm:$0xff] %v2720_v3  ;;  %v1994_v63 = vadd.f32 %v2722_v27, %v2713_v62  ;;  %v1885_v27 = vadd.f32 %v2654_v28, %v2650_v24 }
 0x14d   : > { %v2726_v30 = vpop.f32.mrf.mxu1  ;;  %v2085_v8 = vpop.f32.mrf.mxu0 }
 0x14e   : > { %2926 = vst [vmem:[#allocation22_spill] sm:$0xff] %v2726_v30  ;;  %v1433_v3 = vadd.f32 %v2085_v8, %v1272_v34  ;;  %v1275_v30 = vadd.f32 %v1958_v53, %v1114_v41  ;;  %v1267_v34 = vadd.f32 %v1952_v43, %v1106_v39 }
 0x14f   : > { %v2737_v56 = vpop.f32.mrf.mxu1  ;;  %v1424_v61 = vpop.f32.mrf.mxu0 }
 0x150   : > { %1553 = vst [vmem:[%s2731_s12 + $0x10] sm:$0xff] %v1433_v3  ;;  %v1425_v5 = vadd.f32 %v1424_v61, %v1264_v60  ;;  %v1119_v3 = vadd.f32 %v2594_v20, %v2709_v9 }
 0x151   : > { %v2742_v50 = vpop.f32.mrf.mxu1  ;;  %v2086_v45 = vpop.f32.mrf.mxu0 }
 0x152   : > { %1551 = vst [vmem:[%s2731_s12] sm:$0xff] %v1425_v5  ;;  %v1436_v48 = vadd.f32 %v2086_v45, %v1275_v30  ;;  %v1280_v20 = vadd.f32 %v1961_v46, %v1119_v3  ;;  %v1146_v46 = vadd.f32 %v2624_v59, %v2709_v9  ;;  %v1159_v3 = vadd.f32 %v1879_v25, %v2709_v9 }
 0x153   : > { %v2749_v55 = vpop.f32.mrf.mxu1  ;;  %v1427_v2 = vpop.f32.mrf.mxu0 }
 0x154   : > { %1554 = vst [vmem:[%s2731_s12 + $0x18] sm:$0xff] %v1436_v48  ;;  %v1428_v17 = vadd.f32 %v1427_v2, %v1267_v34  ;;  %v1976_v48 = vadd.f32 %v2664_v35, %v2660_v31  ;;  %v1138_v2 = vadd.f32 %v2620_v49, %v2709_v9  ;;  %v1307_v59 = vadd.f32 %v1982_v42, %v1146_v46 }
 0x155   : > { %v2756_v51 = vpop.f32.mrf.mxu1  ;;  %v2089_v53 = vpop.f32.mrf.mxu0  ;;  %v1320_v18 = vadd.f32 %v1991_v12, %v1159_v3  ;;  %v2929_v24 = vld [vmem:[#allocation22_spill] sm:$0xff] }
 0x156   : > { %1552 = vst [vmem:[%s2731_s12 + $0x8] sm:$0xff] %v1428_v17  ;;  %v1449_v30 = vadd.f32 %v2089_v53, %v1288_v32  ;;  %v1985_v17 = vadd.f32 %v2688_v0, %v2684_v57  ;;  %v1299_v32 = vadd.f32 %v1976_v48, %v1138_v2  ;;  %v1151_v53 = vadd.f32 %v2630_v4, %v2709_v9 }
 0x157   : > { %v2763_v45 = vpop.f32.mrf.mxu1  ;;  %v1440_v5 = vpop.f32.mrf.mxu0  ;;  %v1997_v28 = vadd.f32 %v2737_v56, %v2929_v24  ;;  %v2933_v56 = vld [vmem:[#allocation19_spill] sm:$0xff] }
 0x158   : > { %1557 = vst [vmem:[%s2731_s12 + $0x30] sm:$0xff] %v1449_v30  ;;  %v1441_v8 = vadd.f32 %v1440_v5, %v1280_v20  ;;  %v1162_v30 = vadd.f32 %v1882_v13, %v2709_v9  ;;  %v1988_v20 = vadd.f32 %v2696_v33, %v2692_v7  ;;  %v1312_v5 = vadd.f32 %v1985_v17, %v1151_v53  ;;  %v2937_v53 = vld [vmem:[#allocation21_spill] sm:$0xff] }
 0x159   : > { %v2770_v41 = vpop.f32.mrf.mxu1  ;;  %v2090_v43 = vpop.f32.mrf.mxu0  ;;  %v2003_v36 = vadd.f32 %v2763_v45, %v2756_v51  ;;  %v1175_v33 = vadd.f32 %v1891_v22, %v2709_v9  ;;  %v1167_v51 = vadd.f32 %v1885_v27, %v2709_v9 }
 0x15a   : > { %1555 = vst [vmem:[%s2731_s12 + $0x20] sm:$0xff] %v1441_v8  ;;  %v1452_v60 = vadd.f32 %v2090_v43, %v1291_v38  ;;  %v1323_v8 = vadd.f32 %v1994_v63, %v1162_v30  ;;  %v2927_v43 = vld [vmem:[#allocation12_spill] sm:$0xff] }
 0x15b   : > { %v2777_v61 = vpop.f32.mrf.mxu1  ;;  %v1443_v39 = vpop.f32.mrf.mxu0  ;;  %v1894_v10 = vadd.f32 %v2928_v6, %v2927_v43  ;;  %v1336_v25 = vadd.f32 %v2003_v36, %v1175_v33  ;;  %v1328_v12 = vadd.f32 %v1997_v28, %v1167_v51 }
 0x15c   : > { %1558 = vst [vmem:[%s2731_s12 + $0x38] sm:$0xff] %v1452_v60  ;;  %v1444_v58 = vadd.f32 %v1443_v39, %v1283_v26  ;;  %v1315_v60 = vadd.f32 %v1988_v20, %v1154_v23  ;;  %v2930_v39 = vld [vmem:[#allocation10_spill] sm:$0xff]  ;;  %v2938_v20 = vld [vmem:[#allocation16_spill] sm:$0xff] }
 0x15d   : > { %v2786_v29 = vpop.f32.mrf.mxu1  ;;  %v2093_v14 = vpop.f32.mrf.mxu0  ;;  %v1888_v42 = vadd.f32 %v2931_v37, %v2930_v39  ;;  %v2941_v39 = vld [vmem:[#allocation2_spill] sm:$0xff] }
 0x15e   : > { %1556 = vst [vmem:[%s2731_s12 + $0x28] sm:$0xff] %v1444_v58  ;;  %v1465_v44 = vadd.f32 %v2093_v14, %v1304_v54  ;;  %v2006_v58 = vadd.f32 %v2777_v61, %v2770_v41  ;;  %v2932_v14 = vld [vmem:[#allocation18_spill] sm:$0xff]  ;;  %v2935_v41 = vld [vmem:[#allocation15_spill] sm:$0xff]  ;;  %v1199_v37 = vadd.f32 %v2941_v39, %v2709_v9 }
 0x15f   : > { %v2793_v52 = vpop.f32.mrf.mxu1  ;;  %v1456_v34 = vpop.f32.mrf.mxu0  ;;  %v1903_v46 = vadd.f32 %v2933_v56, %v2932_v14  ;;  %v2942_v56 = vld [vmem:[#allocation5_spill] sm:$0xff] }
 0x160   : > { %1561 = vst [vmem:[%s2731_s12 + $0x50] sm:$0xff] %v1465_v44  ;;  %v1457_v16 = vadd.f32 %v1456_v34, %v1296_v47  ;;  %v1178_v47 = vadd.f32 %v1894_v10, %v2709_v9  ;;  %v2000_v34 = vadd.f32 %v2749_v55, %v2742_v50  ;;  %v2936_v55 = vld [vmem:[#allocation20_spill] sm:$0xff] }
 0x161   : > { %v2801_v31 = vpop.f32.mrf.mxu1  ;;  %v2094_v35 = vpop.f32.mrf.mxu0  ;;  %v1906_v63 = vadd.f32 %v2937_v53, %v2936_v55 }
 0x162   : > { %1559 = vst [vmem:[%s2731_s12 + $0x40] sm:$0xff] %v1457_v16  ;;  %v1468_v49 = vadd.f32 %v2094_v35, %v1307_v59  ;;  %v2934_v16 = vld [vmem:[#allocation14_spill] sm:$0xff]  ;;  %v1170_v35 = vadd.f32 %v1888_v42, %v2709_v9 }
 0x163   : > { %v2808_v15 = vpop.f32.mrf.mxu1  ;;  %v1459_v21 = vpop.f32.mrf.mxu0  ;;  %v1897_v61 = vadd.f32 %v2935_v41, %v2934_v16 }
 0x164   : > { %1562 = vst [vmem:[%s2731_s12 + $0x58] sm:$0xff] %v1468_v49  ;;  %v1460_v1 = vadd.f32 %v1459_v21, %v1299_v32  ;;  %v1339_v49 = vadd.f32 %v2006_v58, %v1178_v47  ;;  %v1191_v32 = vadd.f32 %v1903_v46, %v2709_v9  ;;  %v1331_v22 = vadd.f32 %v2000_v34, %v1170_v35 }
 0x165   : > { %v2013_v57 = vpop.f32.mrf.mxu1  ;;  %v2097_v0 = vpop.f32.mrf.mxu0  ;;  %v1210_v46 = vadd.f32 %v2942_v56, %v2709_v9 }
 0x166   : > { %1560 = vst [vmem:[%s2731_s12 + $0x48] sm:$0xff] %v1460_v1  ;;  %v1481_v4 = vadd.f32 %v2097_v0, %v1320_v18  ;;  %v2009_v1 = vadd.f32 %v2793_v52, %v2786_v29  ;;  %v1194_v29 = vadd.f32 %v1906_v63, %v2709_v9  ;;  %v2012_v52 = vadd.f32 %v2808_v15, %v2801_v31 }
 0x167   : > { %v2014_v62 = vpop.f32.mrf.mxu1  ;;  %v1472_v19 = vpop.f32.mrf.mxu0 }
 0x168   : > { %1565 = vst [vmem:[%s2731_s12 + $0x70] sm:$0xff] %v1481_v4  ;;  %v1473_v40 = vadd.f32 %v1472_v19, %v1312_v5  ;;  %v2015_v13 = vadd.f32 %v2014_v62, %v2013_v57  ;;  %v1183_v57 = vadd.f32 %v1897_v61, %v2709_v9  ;;  %v2939_v4 = vld [vmem:[#allocation17_spill] sm:$0xff] }
 0x169   : > { %v2016_v7 = vpop.f32.mrf.mxu1  ;;  %v2098_v38 = vpop.f32.mrf.mxu0  ;;  %v1900_v5 = vadd.f32 %v2939_v4, %v2938_v20  ;;  %v2946_v20 = vld [vmem:[#allocation8_spill] sm:$0xff] }
 0x16a   : > { %1563 = vst [vmem:[%s2731_s12 + $0x60] sm:$0xff] %v1473_v40  ;;  %v1484_v11 = vadd.f32 %v2098_v38, %v1323_v8  ;;  %v1352_v19 = vadd.f32 %v2015_v13, %v1191_v32  ;;  %v1344_v8 = vadd.f32 %v2009_v1, %v1183_v57  ;;  %v1223_v4 = vadd.f32 %v2946_v20, %v2709_v9 }
 0x16b   : > { %v2017_v45 = vpop.f32.mrf.mxu1  ;;  %v1475_v26 = vpop.f32.mrf.mxu0  ;;  %v1186_v43 = vadd.f32 %v1900_v5, %v2709_v9 }
 0x16c   : > { %1566 = vst [vmem:[%s2731_s12 + $0x78] sm:$0xff] %v1484_v11  ;;  %v1476_v54 = vadd.f32 %v1475_v26, %v1315_v60  ;;  %v2018_v27 = vadd.f32 %v2017_v45, %v2016_v7  ;;  %v2940_v11 = vld [vmem:[#allocation4_spill] sm:$0xff] }
 0x16d   : > { %v2019_v48 = vpop.f32.mrf.mxu1  ;;  %v2101_v44 = vpop.f32.mrf.mxu0  ;;  %v1207_v60 = vadd.f32 %v2940_v11, %v2709_v9  ;;  %v1347_v15 = vadd.f32 %v2012_v52, %v1186_v43 }
 0x16e   : > { %1564 = vst [vmem:[%s2731_s12 + $0x68] sm:$0xff] %v1476_v54  ;;  %v1497_v2 = vadd.f32 %v2101_v44, %v1336_v25  ;;  %v1355_v10 = vadd.f32 %v2018_v27, %v1194_v29 }
 0x16f   : > { %v2020_v59 = vpop.f32.mrf.mxu1  ;;  %v1488_v3 = vpop.f32.mrf.mxu0 }
 0x170   : > { %1569 = vst [vmem:[%s2731_s12 + $0x90] sm:$0xff] %v1497_v2  ;;  %v1489_v17 = vadd.f32 %v1488_v3, %v1328_v12  ;;  %v2021_v51 = vadd.f32 %v2020_v59, %v2019_v48  ;;  %v2943_v12 = vld [vmem:[#allocation3_spill] sm:$0xff] }
 0x171   : > { %v2022_v21 = vpop.f32.mrf.mxu1  ;;  %v2102_v50 = vpop.f32.mrf.mxu0  ;;  %v1202_v16 = vadd.f32 %v2943_v12, %v2709_v9 }
 0x172   : > { %1567 = vst [vmem:[%s2731_s12 + $0x80] sm:$0xff] %v1489_v17  ;;  %v1500_v18 = vadd.f32 %v2102_v50, %v1339_v49  ;;  %v1360_v47 = vadd.f32 %v2021_v51, %v1199_v37 }
 0x173   : > { %v2023_v0 = vpop.f32.mrf.mxu1  ;;  %v1491_v30 = vpop.f32.mrf.mxu0 }
 0x174   : > { %1570 = vst [vmem:[%s2731_s12 + $0x98] sm:$0xff] %v1500_v18  ;;  %v1492_v62 = vadd.f32 %v1491_v30, %v1331_v22  ;;  %v2024_v48 = vadd.f32 %v2023_v0, %v2022_v21  ;;  %v2944_v21 = vld [vmem:[#allocation6_spill] sm:$0xff]  ;;  %v2945_v0 = vld [vmem:[#allocation7_spill] sm:$0xff] }
 0x175   : > { %v2025_v23 = vpop.f32.mrf.mxu1  ;;  %v2105_v36 = vpop.f32.mrf.mxu0  ;;  %v1215_v50 = vadd.f32 %v2944_v21, %v2709_v9  ;;  %v1218_v30 = vadd.f32 %v2945_v0, %v2709_v9 }
 0x176   : > { %1568 = vst [vmem:[%s2731_s12 + $0x88] sm:$0xff] %v1492_v62  ;;  %v1513_v40 = vadd.f32 %v2105_v36, %v1352_v19  ;;  %v1363_v17 = vadd.f32 %v2024_v48, %v1202_v16 }
 0x177   : > { %v2026_v33 = vpop.f32.mrf.mxu1  ;;  %v1504_v38 = vpop.f32.mrf.mxu0 }
 0x178   : > { %1573 = vst [vmem:[%s2731_s12 + $0xb0] sm:$0xff] %v1513_v40  ;;  %v2027_v7 = vadd.f32 %v2026_v33, %v2025_v23  ;;  %v1505_v6 = vadd.f32 %v1504_v38, %v1344_v8  ;;  %v2947_v40 = vld [vmem:[#allocation9_spill] sm:$0xff] }
 0x179   : > { %v2028_v24 = vpop.f32.mrf.mxu1  ;;  %v2106_v28 = vpop.f32.mrf.mxu0  ;;  %v1226_v8 = vadd.f32 %v2947_v40, %v2709_v9 }
 0x17a   : > { %1571 = vst [vmem:[%s2731_s12 + $0xa0] sm:$0xff] %v1505_v6  ;;  %v1516_v31 = vadd.f32 %v2106_v28, %v1355_v10  ;;  %v1368_v54 = vadd.f32 %v2027_v7, %v1207_v60 }
 0x17b   : > { %v2029_v45 = vpop.f32.mrf.mxu1  ;;  %v1507_v26 = vpop.f32.mrf.mxu0 }
 0x17c   : > { %1574 = vst [vmem:[%s2731_s12 + $0xb8] sm:$0xff] %v1516_v31  ;;  %v2030_v42 = vadd.f32 %v2029_v45, %v2028_v24  ;;  %v1508_v58 = vadd.f32 %v1507_v26, %v1347_v15 }
 0x17d   : > { %v2031_v25 = vpop.f32.mrf.mxu1  ;;  %v2109_v14 = vpop.f32.mrf.mxu0 }
 0x17e   : > { %1572 = vst [vmem:[%s2731_s12 + $0xa8] sm:$0xff] %v1508_v58  ;;  %v1529_v44 = vadd.f32 %v2109_v14, %v1368_v54  ;;  %v1371_v61 = vadd.f32 %v2030_v42, %v1210_v46 }
 0x17f   : > { %v2032_v34 = vpop.f32.mrf.mxu1  ;;  %v1520_v2 = vpop.f32.mrf.mxu0 }
 0x180   : > { %1577 = vst [vmem:[%s2731_s12 + $0xd0] sm:$0xff] %v1529_v44  ;;  %v1521_v41 = vadd.f32 %v1520_v2, %v1360_v47  ;;  %v2033_v35 = vadd.f32 %v2032_v34, %v2031_v25 }
 0x181   : > { %v2034_v59 = vpop.f32.mrf.mxu1  ;;  %v2110_v3 = vpop.f32.mrf.mxu0 }
 0x182   : > { %1575 = vst [vmem:[%s2731_s12 + $0xc0] sm:$0xff] %v1521_v41  ;;  %v1532_v13 = vadd.f32 %v2110_v3, %v1371_v61  ;;  %v1376_v18 = vadd.f32 %v2033_v35, %v1215_v50 }
 0x183   : > { %v2035_v49 = vpop.f32.mrf.mxu1  ;;  %v1523_v32 = vpop.f32.mrf.mxu0 }
 0x184   : > { %1578 = vst [vmem:[%s2731_s12 + $0xd8] sm:$0xff] %v1532_v13  ;;  %v1524_v55 = vadd.f32 %v1523_v32, %v1363_v17  ;;  %v2036_v1 = vadd.f32 %v2035_v49, %v2034_v59 }
 0x185   : > { %v2037_v53 = vpop.f32.mrf.mxu1  ;;  %v2113_v63 = vpop.f32.mrf.mxu0 }
 0x186   : > { %1576 = vst [vmem:[%s2731_s12 + $0xc8] sm:$0xff] %v1524_v55  ;;  %v1379_v36 = vadd.f32 %v2036_v1, %v1218_v30 }
 0x187   : > { %v2038_v22 = vpop.f32.mrf.mxu1  ;;  %v1536_v57 = vpop.f32.mrf.mxu0 }
 0x188   : > { %v2039_v5 = vadd.f32 %v2038_v22, %v2037_v53  ;;  %v1537_v27 = vadd.f32 %v1536_v57, %v1376_v18 }
 0x189   : > { %v2040_v62 = vpop.f32.mrf.mxu1  ;;  %v2114_v19 = vpop.f32.mrf.mxu0 }
 0x18a   : > { %v1384_v23 = vadd.f32 %v2039_v5, %v1223_v4  ;;  %1579 = vst [vmem:[%s2731_s12 + $0xe0] sm:$0xff] %v1537_v27 }
 0x18b   : > { %v2041_v29 = vpop.f32.mrf.mxu1  ;;  %v1539_v52 = vpop.f32.mrf.mxu0 }
 0x18c   : > { %v1545_v33 = vadd.f32 %v2113_v63, %v1384_v23  ;;  %v2042_v38 = vadd.f32 %v2041_v29, %v2040_v62  ;;  %v1540_v43 = vadd.f32 %v1539_v52, %v1379_v36 }
 0x18e   : > { %1581 = vst [vmem:[%s2731_s12 + $0xf0] sm:$0xff] %v1545_v33  ;;  %v1387_v7 = vadd.f32 %v2042_v38, %v1226_v8  ;;  %1580 = vst [vmem:[%s2731_s12 + $0xe8] sm:$0xff] %v1540_v43 }
 0x190   : > { %v1548_v6 = vadd.f32 %v2114_v19, %v1387_v7 }
 0x192   : > { %1582 = vst [vmem:[%s2731_s12 + $0xf8] sm:$0xff] %v1548_v6 }
 0x193 PF: > { %s13_s14 = sadd.s32 1, %s2330_s14   ;;  %s2948_s12 = smov %s2326_s13 }
 0x194   : > { %p10_p5 = scmp.ge.s32.totalorder %s13_s14, 4   ;;  %s2949_s13 = smov %s2951_s15 }
 0x196   :  { %12 = sbr.rel (!%p10_p5) target bundleno = 2 (0x2), region = 68 }

// kernel: image_transformation_network.61
= control target key start
LH: loop header
LB: loop body
LE: loop exit
PB: predicated region body
PF: predicated region fallthrough
CT: control target
= control target key end

     0   :  { %s7993_s12 = smov 0   ;;  %s7995_s13 = smov 0   ;;  %s9924_s0 = inlined_call_operand.vmem [shape: bf16[512,2688], index: 0, kind: input, shape index: {}]   ;;  %s9925_s1 = inlined_call_operand.vmem [shape: bf16[2688,128], index: 1, kind: input, shape index: {}]   ;;  %s9926_s2 = inlined_call_operand.vmem [shape: f32[1,128], index: 2, kind: input, shape index: {}]   ;;  %s9927_s3 = inlined_call_operand.vmem [shape: f32[512,128], index: 3, kind: output, shape index: {}]  }
   0x1   :  { %s7997_s14 = smov 0  }
   0x2 LB: > { %s25_s15 = sadd.s32 1, %s7967_s13  ;;  %p5539_p0 = scmp.ge.s32.totalorder %s7971_s14, 1  ;;  %s7971_s14 = sphi %s7997_s14, %s13_s14   ;;  %s7967_s13 = sphi %s7995_s13, %s9949_s13   ;;  %s7963_s12 = sphi %s7993_s12, %s9948_s12  }
   0x3   : > { %p27_p1 = scmp.ge.s32.totalorder %s25_s15, 2  ;;  %p170_p2 = scmp.lt.s32.totalorder %s7971_s14, 3 }
   0x5   : > { %s9951_s15 = smov (%p27_p1, %s25_s15), 0  ;;  %p171_p3 = pnand %p5539_p0, %p170_p2 }
   0x7   : > { %174 = sbr.rel (%p171_p3) target bundleno = 915 (0x393), region = 32 }
   0xc   : > { %v7284_v0 = vld [vmem:[%s9925_s1 + $0x78] sm:$0xff]   ;;  %s5540_s18 = sshll.u32 %s7963_s12, 5  ;;  %v7286_v2 = vld [vmem:[%s9925_s1 + $0x70] sm:$0xff]   ;;  %v7288_v4 = vld [vmem:[%s9925_s1 + $0x68] sm:$0xff]  }
   0xd   : > { %v7285_v1 = vld [vmem:[%s9925_s1 + $0x38] sm:$0xff]   ;;  %6051 = vmatprep.subr.bf16.mxu0 %v7284_v0  ;;  %7243 = vmatprep.subr.bf16.mxu1 %v7284_v0  ;;  %p206_p4 = scmp.lt.s32.totalorder %s5540_s18, 63  ;;  %v7287_v3 = vld [vmem:[%s9925_s1 + $0x30] sm:$0xff]   ;;  %v7289_v5 = vld [vmem:[%s9925_s1 + $0x28] sm:$0xff]  }
   0xe   : > { %6052 = vmatpush3.bf16.msra.mxu0 %v7285_v1  ;;  %7251 = vmatpush3.bf16.msra.mxu1 %v7285_v1  ;;  %v7290_v6 = vld [vmem:[%s9925_s1 + $0x60] sm:$0xff]   ;;  %v7292_v8 = vld [vmem:[%s9925_s1 + $0x58] sm:$0xff]   ;;  %v7294_v10 = vld [vmem:[%s9925_s1 + $0x50] sm:$0xff]  }
   0xf   : > { %6053 = vmatprep.subr.bf16.mxu0 %v7286_v2  ;;  %7244 = vmatprep.subr.bf16.mxu1 %v7286_v2  ;;  %s9953_s18 = smov (!%p206_p4, %s5540_s18), 63  ;;  %v7291_v7 = vld [vmem:[%s9925_s1 + $0x20] sm:$0xff]   ;;  %v7293_v9 = vld [vmem:[%s9925_s1 + $0x18] sm:$0xff]   ;;  %v7295_v13 = vld [vmem:[%s9925_s1 + $0x10] sm:$0xff]  }
  0x10   : > { %s7259_s4 = smul.u32 84, %s9953_s18  ;;  %v7296_v14 = vld [vmem:[%s9925_s1 + $0x48] sm:$0xff]   ;;  %v7298_v16 = vld [vmem:[%s9925_s1 + $0x40] sm:$0xff]   ;;  %v7306_v18 = vld [vmem:[%s9925_s1 + $0xf8] sm:$0xff]  }
  0x11   : > { %v7297_v15 = vld [vmem:[%s9925_s1 + $0x8] sm:$0xff]   ;;  %v7299_v17 = vld [vmem:[%s9925_s1] sm:$0xff]   ;;  %v7309_v21 = vld [vmem:[%s9925_s1 + $0x178] sm:$0xff]  }
  0x12   : > { %6054 = vmatpush3.bf16.msra.mxu0 %v7287_v3  ;;  %7252 = vmatpush3.bf16.msra.mxu1 %v7287_v3  ;;  %s8044_s11 = scalar_lea.vmem %s9924_s0, %s7259_s4  ;;  %v7307_v22 = vld [vmem:[%s9925_s1 + $0xb8] sm:$0xff]   ;;  %v7308_v23 = vld [vmem:[%s9925_s1 + $0xf0] sm:$0xff]   ;;  %v7318_v31 = vld [vmem:[%s9925_s1 + $0xe8] sm:$0xff]  }
  0x13   : > { %6055 = vmatprep.subr.bf16.mxu0 %v7288_v4  ;;  %7245 = vmatprep.subr.bf16.mxu1 %v7288_v4  ;;  %v7302_v11 = vld [vmem:[%s8044_s11 + $0x4] ss:$84 sps:$4 sm:$0xff]   ;;  %v7300_v19 = vld [vmem:[%s8044_s11] ss:$84 sps:$4 sm:$0xff]   ;;  %v7316_v29 = vld [vmem:[%s8044_s11 + $0xa8] ss:$84 sps:$4 sm:$0xff]  }
  0x14   : > { %v7305_v12 = vld [vmem:[%s8044_s11 + $0x7e4] ss:$84 sps:$4 sm:$0xff]   ;;  %3660 = vmatprep.mubr.bf16.mxu0 %v7302_v11  ;;  %v7303_v20 = vld [vmem:[%s8044_s11 + $0x7e0] ss:$84 sps:$4 sm:$0xff]   ;;  %v7317_v30 = vld [vmem:[%s8044_s11 + $0x888] ss:$84 sps:$4 sm:$0xff]  }
  0x15   : > { %3756 = vmatprep.mubr.bf16.mxu1 %v7305_v12  ;;  %v7311_v24 = vld [vmem:[%s9925_s1 + $0x138] sm:$0xff]   ;;  %v7312_v25 = vld [vmem:[%s8044_s11 + $0xac] ss:$84 sps:$4 sm:$0xff]   ;;  %v7310_v27 = vld [vmem:[%s9925_s1 + $0xb0] sm:$0xff]  }
  0x16   : > { %6056 = vmatpush3.bf16.msra.mxu0 %v7289_v5  ;;  %7253 = vmatpush3.bf16.msra.mxu1 %v7289_v5  ;;  %v7314_v26 = vld [vmem:[%s8044_s11 + $0x88c] ss:$84 sps:$4 sm:$0xff]   ;;  %v7329_v28 = vld [vmem:[%s9925_s1 + $0x170] sm:$0xff]   ;;  %v7328_v40 = vld [vmem:[%s9925_s1 + $0xd8] sm:$0xff]  }
  0x17   : > { %6057 = vmatprep.subr.bf16.mxu0 %v7290_v6  ;;  %7246 = vmatprep.subr.bf16.mxu1 %v7290_v6  ;;  %v7319_v32 = vld [vmem:[%s9925_s1 + $0xa8] sm:$0xff]   ;;  %v7331_v33 = vld [vmem:[%s9925_s1 + $0x130] sm:$0xff]   ;;  %v7320_v34 = vld [vmem:[%s9925_s1 + $0xe0] sm:$0xff]  }
  0x18   : > { %v7322_v35 = vld [vmem:[%s8044_s11 + $0x154] ss:$84 sps:$4 sm:$0xff]   ;;  %v7321_v37 = vld [vmem:[%s9925_s1 + $0xa0] sm:$0xff]   ;;  %v7330_v41 = vld [vmem:[%s9925_s1 + $0x98] sm:$0xff]  }
  0x19   : > { %v7324_v36 = vld [vmem:[%s8044_s11 + $0x934] ss:$84 sps:$4 sm:$0xff]   ;;  %v7326_v38 = vld [vmem:[%s8044_s11 + $0x150] ss:$84 sps:$4 sm:$0xff]   ;;  %v7338_v49 = vld [vmem:[%s8044_s11 + $0x1f8] ss:$84 sps:$4 sm:$0xff]  }
  0x1a   : > { %6058 = vmatpush3.bf16.msra.mxu0 %v7291_v7  ;;  %7254 = vmatpush3.bf16.msra.mxu1 %v7291_v7  ;;  %v7327_v39 = vld [vmem:[%s8044_s11 + $0x930] ss:$84 sps:$4 sm:$0xff]   ;;  %v7343_v43 = vld [vmem:[%s9925_s1 + $0x168] sm:$0xff]   ;;  %v7351_v59 = vld [vmem:[%s8044_s11 + $0x2a0] ss:$84 sps:$4 sm:$0xff]  }
  0x1b   : > { %6059 = vmatprep.subr.bf16.mxu0 %v7292_v8  ;;  %7247 = vmatprep.subr.bf16.mxu1 %v7292_v8  ;;  %v7332_v42 = vld [vmem:[%s9925_s1 + $0xd0] sm:$0xff]   ;;  %v7345_v46 = vld [vmem:[%s9925_s1 + $0x128] sm:$0xff]   ;;  %v7342_v52 = vld [vmem:[%s9925_s1 + $0xc0] sm:$0xff]  }
  0x1c   : > { %v7334_v44 = vld [vmem:[%s8044_s11 + $0x1fc] ss:$84 sps:$4 sm:$0xff]   ;;  %v7340_v48 = vld [vmem:[%s9925_s1 + $0xc8] sm:$0xff]   ;;  %v7346_v53 = vld [vmem:[%s8044_s11 + $0x2a4] ss:$84 sps:$4 sm:$0xff]  }
  0x1d   : > { %v7336_v45 = vld [vmem:[%s8044_s11 + $0x9dc] ss:$84 sps:$4 sm:$0xff]   ;;  %v7339_v50 = vld [vmem:[%s8044_s11 + $0x9d8] ss:$84 sps:$4 sm:$0xff]   ;;  %v7360_v55 = vld [vmem:[%s9925_s1 + $0x160] sm:$0xff]  }
  0x1e   : > { %6060 = vmatpush3.bf16.msra.mxu0 %v7293_v9  ;;  %7255 = vmatpush3.bf16.msra.mxu1 %v7293_v9  ;;  %v7333_v47 = vld [vmem:[%s9925_s1 + $0x90] sm:$0xff]   ;;  %v7341_v51 = vld [vmem:[%s9925_s1 + $0x88] sm:$0xff]   ;;  %v7361_v56 = vld [vmem:[%s9925_s1 + $0x120] sm:$0xff]  }
  0x1f   : > { %6061 = vmatprep.subr.bf16.mxu0 %v7294_v10  ;;  %7248 = vmatprep.subr.bf16.mxu1 %v7294_v10  ;;  %v7350_v54 = vld [vmem:[%s8044_s11 + $0xc] ss:$84 sps:$4 sm:$0xff]   ;;  %v7348_v58 = vld [vmem:[%s8044_s11 + $0x8] ss:$84 sps:$4 sm:$0xff]   ;;  %v7368_v1 = vld [vmem:[%s9925_s1 + $0x1f0] sm:$0xff]  }
  0x20   : > { %v7344_v57 = vld [vmem:[%s9925_s1 + $0x80] sm:$0xff]   ;;  %v7352_v60 = vld [vmem:[%s9925_s1 + $0x1f8] sm:$0xff]   ;;  %v7356_v63 = vld [vmem:[%s8044_s11 + $0xb4] ss:$84 sps:$4 sm:$0xff]  }
  0x21   : > { %v7353_v61 = vld [vmem:[%s9925_s1 + $0x1b8] sm:$0xff]   ;;  %v7354_v62 = vld [vmem:[%s8044_s11 + $0x34c] ss:$84 sps:$4 sm:$0xff]   ;;  %v7369_v3 = vld [vmem:[%s9925_s1 + $0x1b0] sm:$0xff]  }
  0x22   : > { %6062 = vmatpush3.bf16.msra.mxu0 %v7295_v13  ;;  %7256 = vmatpush3.bf16.msra.mxu1 %v7295_v13  ;;  %v7370_v0 = vld [vmem:[%s9925_s1 + $0x158] sm:$0xff]   ;;  %v7359_v5 = vld [vmem:[%s8044_s11 + $0xb0] ss:$84 sps:$4 sm:$0xff]   ;;  %v7362_v6 = vld [vmem:[%s8044_s11 + $0x3f4] ss:$84 sps:$4 sm:$0xff]  }
  0x23   : > { %6063 = vmatprep.subr.bf16.mxu0 %v7296_v14  ;;  %7249 = vmatprep.subr.bf16.mxu1 %v7296_v14  ;;  %v7371_v2 = vld [vmem:[%s9925_s1 + $0x118] sm:$0xff]   ;;  %v7384_v8 = vld [vmem:[%s9925_s1 + $0x150] sm:$0xff]   ;;  %v7385_v9 = vld [vmem:[%s9925_s1 + $0x1e8] sm:$0xff]  }
  0x24   : > { %v7358_v4 = vld [vmem:[%s8044_s11 + $0x348] ss:$84 sps:$4 sm:$0xff]   ;;  %v7386_v10 = vld [vmem:[%s9925_s1 + $0x110] sm:$0xff]   ;;  %v7367_v13 = vld [vmem:[%s8044_s11 + $0x158] ss:$84 sps:$4 sm:$0xff]  }
  0x25   : > { %v7364_v7 = vld [vmem:[%s8044_s11 + $0x15c] ss:$84 sps:$4 sm:$0xff]   ;;  %v7387_v11 = vld [vmem:[%s9925_s1 + $0x1a8] sm:$0xff]  }
  0x26   : > { %6064 = vmatpush3.bf16.msra.mxu0 %v7297_v15  ;;  %7257 = vmatpush3.bf16.msra.mxu1 %v7297_v15  ;;  %v7366_v12 = vld [vmem:[%s8044_s11 + $0x3f0] ss:$84 sps:$4 sm:$0xff]   ;;  %v7394_v15 = vld [vmem:[%s9925_s1 + $0x148] sm:$0xff]  }
  0x27   : > { %6065 = vmatprep.subr.bf16.mxu0 %v7298_v16  ;;  %7250 = vmatprep.subr.bf16.mxu1 %v7298_v16  ;;  %v7372_v14 = vld [vmem:[%s8044_s11 + $0x49c] ss:$84 sps:$4 sm:$0xff]   ;;  %v7395_v16 = vld [vmem:[%s9925_s1 + $0x108] sm:$0xff]  }
  0x2a   : > { %6066 = vmatpush3.bf16.msra.mxu0 %v7299_v17  ;;  %7258 = vmatpush3.bf16.msra.mxu1 %v7299_v17  ;;  %v7374_v17 = vld [vmem:[%s8044_s11 + $0x204] ss:$84 sps:$4 sm:$0xff]  }
  0x2b   : > { %6163 = vmatprep.subr.bf16.mxu1 %v7306_v18  ;;  %6275 = vmatprep.subr.bf16.mxu0 %v7309_v21  ;;  %v7402_v18 = vld [vmem:[%s9925_s1 + $0x1e0] sm:$0xff]  }
  0x2c   : > { %v7377_v21 = vld [vmem:[%s8044_s11 + $0x200] ss:$84 sps:$4 sm:$0xff]  }
  0x2d   : > { %3661 = vmatmul.mubr.bf16.vlgmr.msra.gmra.mxu0 %v7300_v19  ;;  %3757 = vmatmul.mubr.bf16.vlgmr.msra.gmra.mxu1 %v7303_v20  ;;  %v7403_v19 = vld [vmem:[%s9925_s1 + $0x1a0] sm:$0xff]   ;;  %v7376_v20 = vld [vmem:[%s8044_s11 + $0x498] ss:$84 sps:$4 sm:$0xff]  }
  0x2e   : > { %6164 = vmatpush3.bf16.msra.mxu1 %v7307_v22  ;;  %6276 = vmatpush3.bf16.msra.mxu0 %v7311_v24  ;;  %v7378_v22 = vld [vmem:[%s8044_s11 + $0x544] ss:$84 sps:$4 sm:$0xff]  }
  0x2f   : > { %6165 = vmatprep.subr.bf16.mxu1 %v7308_v23  ;;  %3668 = vmatprep.mubr.bf16.mxu0 %v7312_v25  ;;  %v7380_v23 = vld [vmem:[%s8044_s11 + $0x2ac] ss:$84 sps:$4 sm:$0xff]  }
  0x30   : > { %3764 = vmatprep.mubr.bf16.mxu1 %v7314_v26  ;;  %6277 = vmatprep.subr.bf16.mxu0 %v7329_v28  ;;  %v7410_v24 = vld [vmem:[%s9925_s1 + $0x140] sm:$0xff]   ;;  %v7418_v26 = vld [vmem:[%s9925_s1 + $0x1d8] sm:$0xff]  }
  0x31   : > { %v7411_v25 = vld [vmem:[%s9925_s1 + $0x100] sm:$0xff]   ;;  %v7383_v28 = vld [vmem:[%s8044_s11 + $0x2a8] ss:$84 sps:$4 sm:$0xff]  }
  0x32   : > { %6166 = vmatpush3.bf16.msra.mxu1 %v7310_v27  ;;  %6278 = vmatpush3.bf16.msra.mxu0 %v7331_v33  ;;  %v7382_v27 = vld [vmem:[%s8044_s11 + $0x540] ss:$84 sps:$4 sm:$0xff]   ;;  %v7392_v33 = vld [vmem:[%s8044_s11 + $0x5e8] ss:$84 sps:$4 sm:$0xff]  }
  0x33   : > { %6167 = vmatprep.subr.bf16.mxu1 %v7318_v31  ;;  %6279 = vmatprep.subr.bf16.mxu0 %v7343_v43  ;;  %v7388_v31 = vld [vmem:[%s8044_s11 + $0x5ec] ss:$84 sps:$4 sm:$0xff]  }
  0x34   : > { %v7450_v43 = vld [vmem:[%s9925_s1 + $0x1c8] sm:$0xff]  }
  0x35   : > { %3669 = vmatmul.mubr.bf16.gmra.mxu0 %v7316_v29  ;;  %3765 = vmatmul.mubr.bf16.gmra.mxu1 %v7317_v30  ;;  %v7419_v29 = vld [vmem:[%s9925_s1 + $0x198] sm:$0xff]  }
  0x36   : > { %6168 = vmatpush3.bf16.msra.mxu1 %v7319_v32  ;;  %3676 = vmatprep.mubr.bf16.mxu0 %v7322_v35  ;;  %v7420_v30 = vld [vmem:[%s9925_s1 + $0x278] sm:$0xff]   ;;  %v7390_v32 = vld [vmem:[%s8044_s11 + $0x354] ss:$84 sps:$4 sm:$0xff]  }
  0x37   : > { %6169 = vmatprep.subr.bf16.mxu1 %v7320_v34  ;;  %3772 = vmatprep.mubr.bf16.mxu1 %v7324_v36  ;;  %v7393_v34 = vld [vmem:[%s8044_s11 + $0x350] ss:$84 sps:$4 sm:$0xff]  }
  0x38   : > { %6280 = vmatpush3.bf16.msra.mxu0 %v7345_v46  ;;  %v7434_v35 = vld [vmem:[%s9925_s1 + $0x1d0] sm:$0xff]  }
  0x39   : > { %6281 = vmatprep.subr.bf16.mxu0 %v7360_v55  ;;  %v7435_v36 = vld [vmem:[%s9925_s1 + $0x190] sm:$0xff]  }
  0x3a   : > { %6170 = vmatpush3.bf16.msra.mxu1 %v7321_v37  ;;  %v7396_v37 = vld [vmem:[%s8044_s11 + $0x694] ss:$84 sps:$4 sm:$0xff]   ;;  %v7424_v55 = vld [vmem:[%s8044_s11 + $0xbc] ss:$84 sps:$4 sm:$0xff]  }
  0x3b   : > { %6171 = vmatprep.subr.bf16.mxu1 %v7328_v40  ;;  %v7401_v40 = vld [vmem:[%s8044_s11 + $0x3f8] ss:$84 sps:$4 sm:$0xff]   ;;  %v7409_v46 = vld [vmem:[%s8044_s11 + $0x4a0] ss:$84 sps:$4 sm:$0xff]  }
  0x3c   : > { %6282 = vmatpush3.bf16.msra.mxu0 %v7361_v56  ;;  %v7436_v56 = vld [vmem:[%s9925_s1 + $0x270] sm:$0xff]  }
  0x3d   : > { %3677 = vmatmul.mubr.bf16.gmra.mxu0 %v7326_v38  ;;  %3773 = vmatmul.mubr.bf16.gmra.mxu1 %v7327_v39  ;;  %v7398_v38 = vld [vmem:[%s8044_s11 + $0x3fc] ss:$84 sps:$4 sm:$0xff]  }
  0x3e   : > { %6172 = vmatpush3.bf16.msra.mxu1 %v7330_v41  ;;  %3684 = vmatprep.mubr.bf16.mxu0 %v7334_v44  ;;  %v7400_v39 = vld [vmem:[%s8044_s11 + $0x690] ss:$84 sps:$4 sm:$0xff]   ;;  %v7451_v44 = vld [vmem:[%s9925_s1 + $0x188] sm:$0xff]  }
  0x3f   : > { %6173 = vmatprep.subr.bf16.mxu1 %v7332_v42  ;;  %3780 = vmatprep.mubr.bf16.mxu1 %v7336_v45  ;;  %v7404_v41 = vld [vmem:[%s8044_s11 + $0x73c] ss:$84 sps:$4 sm:$0xff]   ;;  %v7406_v42 = vld [vmem:[%s8044_s11 + $0x4a4] ss:$84 sps:$4 sm:$0xff]  }
  0x40   : > { %6283 = vmatprep.subr.bf16.mxu0 %v7370_v0  ;;  %v7408_v45 = vld [vmem:[%s8044_s11 + $0x738] ss:$84 sps:$4 sm:$0xff]  }
  0x41   : > { %6284 = vmatpush3.bf16.msra.mxu0 %v7371_v2  ;;  %v7453_v0 = vld [vmem:[%s9925_s1 + $0x228] sm:$0xff]  }
  0x42   : > { %6174 = vmatpush3.bf16.msra.mxu1 %v7333_v47  ;;  %6285 = vmatprep.subr.bf16.mxu0 %v7384_v8  ;;  %v7412_v47 = vld [vmem:[%s8044_s11 + $0x54c] ss:$84 sps:$4 sm:$0xff]   ;;  %v7485_v8 = vld [vmem:[%s9925_s1 + $0x218] sm:$0xff]  }
  0x43   : > { %6175 = vmatprep.subr.bf16.mxu1 %v7340_v48  ;;  %v7416_v48 = vld [vmem:[%s8044_s11 + $0x14] ss:$84 sps:$4 sm:$0xff]   ;;  %v7432_v2 = vld [vmem:[%s8044_s11 + $0x698] ss:$84 sps:$4 sm:$0xff]  }
  0x45   : > { %3685 = vmatmul.mubr.bf16.gmra.mxu0 %v7338_v49  ;;  %3781 = vmatmul.mubr.bf16.gmra.mxu1 %v7339_v50  ;;  %v7466_v49 = vld [vmem:[%s9925_s1 + $0x1c0] sm:$0xff]  }
  0x46   : > { %6176 = vmatpush3.bf16.msra.mxu1 %v7341_v51  ;;  %3692 = vmatprep.mubr.bf16.mxu0 %v7346_v53  ;;  %v7467_v50 = vld [vmem:[%s9925_s1 + $0x180] sm:$0xff]   ;;  %v7421_v53 = vld [vmem:[%s9925_s1 + $0x238] sm:$0xff]  }
  0x47   : > { %6177 = vmatprep.subr.bf16.mxu1 %v7342_v52  ;;  %3821 = vmatprep.mubr.bf16.mxu1 %v7350_v54  ;;  %v7414_v51 = vld [vmem:[%s8044_s11 + $0x10] ss:$84 sps:$4 sm:$0xff]   ;;  %v7417_v52 = vld [vmem:[%s8044_s11 + $0x548] ss:$84 sps:$4 sm:$0xff]  }
  0x48   : > { %6286 = vmatpush3.bf16.msra.mxu0 %v7386_v10  ;;  %v7422_v54 = vld [vmem:[%s8044_s11 + $0x5f4] ss:$84 sps:$4 sm:$0xff]  }
  0x49   : > { %6287 = vmatprep.subr.bf16.mxu0 %v7394_v15  ;;  %v7442_v10 = vld [vmem:[%s8044_s11 + $0x740] ss:$84 sps:$4 sm:$0xff]  }
  0x4a   : > { %6178 = vmatpush3.bf16.msra.mxu1 %v7344_v57  ;;  %v7482_v57 = vld [vmem:[%s9925_s1 + $0x2f8] sm:$0xff]   ;;  %v7446_v15 = vld [vmem:[%s8044_s11 + $0x2b4] ss:$84 sps:$4 sm:$0xff]  }
  0x4b   : > { %6387 = vmatprep.subr.bf16.mxu1 %v7352_v60  ;;  %v7426_v60 = vld [vmem:[%s8044_s11 + $0x5f0] ss:$84 sps:$4 sm:$0xff]  }
  0x4c   : > { %6288 = vmatpush3.bf16.msra.mxu0 %v7395_v16  ;;  %v7517_v16 = vld [vmem:[%s9925_s1 + $0x208] sm:$0xff]  }
  0x4d   : > { %3693 = vmatmul.mubr.bf16.gmra.mxu0 %v7351_v59  ;;  %3822 = vmatmul.mubr.bf16.vlgmr.msra.gmra.mxu1 %v7348_v58  ;;  %v7437_v58 = vld [vmem:[%s9925_s1 + $0x230] sm:$0xff]   ;;  %v7452_v59 = vld [vmem:[%s9925_s1 + $0x268] sm:$0xff]  }
  0x4e   : > { %6388 = vmatpush3.bf16.msra.mxu1 %v7353_v61  ;;  %3700 = vmatprep.mubr.bf16.mxu0 %v7354_v62  ;;  %v7427_v61 = vld [vmem:[%s8044_s11 + $0xb8] ss:$84 sps:$4 sm:$0xff]   ;;  %v7428_v62 = vld [vmem:[%s8044_s11 + $0x69c] ss:$84 sps:$4 sm:$0xff]  }
  0x4f   : > { %3829 = vmatprep.mubr.bf16.mxu1 %v7356_v63  ;;  %6389 = vmatprep.subr.bf16.mxu1 %v7368_v1  ;;  %v7430_v63 = vld [vmem:[%s8044_s11 + $0x164] ss:$84 sps:$4 sm:$0xff]  }
  0x50   : > { %6289 = vmatprep.subr.bf16.mxu0 %v7410_v24  ;;  %v7468_v1 = vld [vmem:[%s9925_s1 + $0x260] sm:$0xff]   ;;  %v7459_v24 = vld [vmem:[%s8044_s11 + $0x358] ss:$84 sps:$4 sm:$0xff]  }
  0x51   : > { %6290 = vmatpush3.bf16.msra.mxu0 %v7411_v25  ;;  %v7460_v25 = vld [vmem:[%s8044_s11 + $0x93c] ss:$84 sps:$4 sm:$0xff]  }
  0x52   : > { %6390 = vmatpush3.bf16.msra.mxu1 %v7369_v3  ;;  %6499 = vmatprep.subr.bf16.mxu0 %v7420_v30  ;;  %v7469_v3 = vld [vmem:[%s9925_s1 + $0x220] sm:$0xff]  }
  0x53   : > { %6391 = vmatprep.subr.bf16.mxu1 %v7385_v9  ;;  %v7500_v9 = vld [vmem:[%s9925_s1 + $0x250] sm:$0xff]   ;;  %v7470_v30 = vld [vmem:[%s8044_s11 + $0x9e4] ss:$84 sps:$4 sm:$0xff]  }
  0x55   : > { %3701 = vmatmul.mubr.bf16.gmra.mxu0 %v7358_v4  ;;  %3830 = vmatmul.mubr.bf16.gmra.mxu1 %v7359_v5  ;;  %v7484_v4 = vld [vmem:[%s9925_s1 + $0x258] sm:$0xff]   ;;  %v7433_v5 = vld [vmem:[%s8044_s11 + $0x160] ss:$84 sps:$4 sm:$0xff]  }
  0x56   : > { %3708 = vmatprep.mubr.bf16.mxu0 %v7362_v6  ;;  %3837 = vmatprep.mubr.bf16.mxu1 %v7364_v7  ;;  %v7438_v6 = vld [vmem:[%s8044_s11 + $0x744] ss:$84 sps:$4 sm:$0xff]   ;;  %v7440_v7 = vld [vmem:[%s8044_s11 + $0x20c] ss:$84 sps:$4 sm:$0xff]  }
  0x57   : > { %6392 = vmatpush3.bf16.msra.mxu1 %v7387_v11  ;;  %v7443_v11 = vld [vmem:[%s8044_s11 + $0x208] ss:$84 sps:$4 sm:$0xff]  }
  0x58   : > { %6393 = vmatprep.subr.bf16.mxu1 %v7402_v18  ;;  %v7449_v18 = vld [vmem:[%s8044_s11 + $0x2b0] ss:$84 sps:$4 sm:$0xff]  }
  0x5b   : > { %6394 = vmatpush3.bf16.msra.mxu1 %v7403_v19  ;;  %v7454_v19 = vld [vmem:[%s8044_s11 + $0x894] ss:$84 sps:$4 sm:$0xff]  }
  0x5c   : > { %6395 = vmatprep.subr.bf16.mxu1 %v7418_v26  ;;  %v7462_v26 = vld [vmem:[%s8044_s11 + $0x404] ss:$84 sps:$4 sm:$0xff]  }
  0x5d   : > { %3709 = vmatmul.mubr.bf16.gmra.mxu0 %v7366_v12  ;;  %3838 = vmatmul.mubr.bf16.gmra.mxu1 %v7367_v13  ;;  %v7501_v12 = vld [vmem:[%s9925_s1 + $0x210] sm:$0xff]   ;;  %v7516_v13 = vld [vmem:[%s9925_s1 + $0x248] sm:$0xff]  }
  0x5e   : > { %3716 = vmatprep.mubr.bf16.mxu0 %v7372_v14  ;;  %3845 = vmatprep.mubr.bf16.mxu1 %v7374_v17  ;;  %v7444_v14 = vld [vmem:[%s8044_s11 + $0x7ec] ss:$84 sps:$4 sm:$0xff]   ;;  %v7448_v17 = vld [vmem:[%s8044_s11 + $0x7e8] ss:$84 sps:$4 sm:$0xff]  }
  0x5f   : > { %6396 = vmatpush3.bf16.msra.mxu1 %v7419_v29  ;;  %v7465_v29 = vld [vmem:[%s8044_s11 + $0x400] ss:$84 sps:$4 sm:$0xff]  }
  0x60   : > { %6397 = vmatprep.subr.bf16.mxu1 %v7434_v35  ;;  %v7480_v35 = vld [vmem:[%s8044_s11 + $0x1c] ss:$84 sps:$4 sm:$0xff]  }
  0x63   : > { %6398 = vmatpush3.bf16.msra.mxu1 %v7435_v36  ;;  %v7478_v36 = vld [vmem:[%s8044_s11 + $0x18] ss:$84 sps:$4 sm:$0xff]  }
  0x64   : > { %6399 = vmatprep.subr.bf16.mxu1 %v7450_v43  ;;  %v7514_v43 = vld [vmem:[%s9925_s1 + $0x2e8] sm:$0xff]  }
  0x65   : > { %3717 = vmatmul.mubr.bf16.gmra.mxu0 %v7376_v20  ;;  %3846 = vmatmul.mubr.bf16.gmra.mxu1 %v7377_v21  ;;  %v7456_v20 = vld [vmem:[%s8044_s11 + $0x35c] ss:$84 sps:$4 sm:$0xff]   ;;  %v7532_v21 = vld [vmem:[%s9925_s1 + $0x240] sm:$0xff]  }
  0x66   : > { %3724 = vmatprep.mubr.bf16.mxu0 %v7378_v22  ;;  %3853 = vmatprep.mubr.bf16.mxu1 %v7380_v23  ;;  %v7533_v22 = vld [vmem:[%s9925_s1 + $0x200] sm:$0xff]  }
  0x67   : > { %6400 = vmatpush3.bf16.msra.mxu1 %v7451_v44  ;;  %v7458_v23 = vld [vmem:[%s8044_s11 + $0x890] ss:$84 sps:$4 sm:$0xff]   ;;  %v7490_v44 = vld [vmem:[%s8044_s11 + $0x5f8] ss:$84 sps:$4 sm:$0xff]  }
  0x68   : > { %6401 = vmatprep.subr.bf16.mxu1 %v7466_v49  ;;  %v7530_v49 = vld [vmem:[%s9925_s1 + $0x2e0] sm:$0xff]  }
  0x6b   : > { %6402 = vmatpush3.bf16.msra.mxu1 %v7467_v50  ;;  %v7496_v50 = vld [vmem:[%s8044_s11 + $0x6a0] ss:$84 sps:$4 sm:$0xff]  }
  0x6c   : > { %6611 = vmatprep.subr.bf16.mxu1 %v7482_v57  ;;  %v7562_v57 = vld [vmem:[%s9925_s1 + $0x2d0] sm:$0xff]  }
  0x6d   : > { %3725 = vmatmul.mubr.bf16.gmra.mxu0 %v7382_v27  ;;  %3854 = vmatmul.mubr.bf16.gmra.mxu1 %v7383_v28  ;;  %v7548_v27 = vld [vmem:[%s9925_s1 + $0x378] sm:$0xff]  }
  0x6e   : > { %3732 = vmatprep.mubr.bf16.mxu0 %v7388_v31  ;;  %3861 = vmatprep.mubr.bf16.mxu1 %v7390_v32  ;;  %v7464_v28 = vld [vmem:[%s8044_s11 + $0x938] ss:$84 sps:$4 sm:$0xff]   ;;  %v7474_v32 = vld [vmem:[%s8044_s11 + $0x9e0] ss:$84 sps:$4 sm:$0xff]  }
  0x6f   : > { %v7472_v31 = vld [vmem:[%s8044_s11 + $0x4ac] ss:$84 sps:$4 sm:$0xff]  }
  0x75   : > { %3733 = vmatmul.mubr.bf16.gmra.mxu0 %v7392_v33  ;;  %3862 = vmatmul.mubr.bf16.gmra.mxu1 %v7393_v34  ;;  %v7475_v33 = vld [vmem:[%s8044_s11 + $0x4a8] ss:$84 sps:$4 sm:$0xff]  }
  0x76   : > { %3740 = vmatprep.mubr.bf16.mxu0 %v7396_v37  ;;  %3869 = vmatprep.mubr.bf16.mxu1 %v7398_v38  ;;  %v7476_v34 = vld [vmem:[%s8044_s11 + $0x554] ss:$84 sps:$4 sm:$0xff]   ;;  %v7481_v37 = vld [vmem:[%s8044_s11 + $0x550] ss:$84 sps:$4 sm:$0xff]   ;;  %v7483_v38 = vld [vmem:[%s9925_s1 + $0x2b8] sm:$0xff]  }
  0x7d   : > { %3741 = vmatmul.mubr.bf16.gmra.mxu0 %v7400_v39  ;;  %3870 = vmatmul.mubr.bf16.gmra.mxu1 %v7401_v40  ;;  %v7486_v39 = vld [vmem:[%s8044_s11 + $0x5fc] ss:$84 sps:$4 sm:$0xff]   ;;  %v7488_v40 = vld [vmem:[%s8044_s11 + $0xc4] ss:$84 sps:$4 sm:$0xff]  }
  0x7e   : > { %3748 = vmatprep.mubr.bf16.mxu0 %v7404_v41  ;;  %3877 = vmatprep.mubr.bf16.mxu1 %v7406_v42  ;;  %v7498_v41 = vld [vmem:[%s9925_s1 + $0x2f0] sm:$0xff]  }
  0x7f   : > { %v7499_v42 = vld [vmem:[%s9925_s1 + $0x2b0] sm:$0xff]  }
  0x85   : > { %3749 = vmatmul.mubr.bf16.gmra.mxu0 %v7408_v45  ;;  %3878 = vmatmul.mubr.bf16.gmra.mxu1 %v7409_v46  ;;  %v7491_v45 = vld [vmem:[%s8044_s11 + $0xc0] ss:$84 sps:$4 sm:$0xff]   ;;  %v7492_v46 = vld [vmem:[%s8044_s11 + $0x6a4] ss:$84 sps:$4 sm:$0xff]  }
  0x86   : > { %3885 = vmatprep.mubr.bf16.mxu1 %v7412_v47  ;;  %3982 = vmatprep.mubr.bf16.mxu0 %v7416_v48  ;;  %v7494_v47 = vld [vmem:[%s8044_s11 + $0x16c] ss:$84 sps:$4 sm:$0xff]  }
  0x87   : > { %v7515_v48 = vld [vmem:[%s9925_s1 + $0x2a8] sm:$0xff]  }
  0x8d   : > { %3886 = vmatmul.mubr.bf16.gmra.mxu1 %v7417_v52  ;;  %3983 = vmatmul.mubr.bf16.vlgmr.msra.gmra.mxu0 %v7414_v51  ;;  %v7497_v51 = vld [vmem:[%s8044_s11 + $0x168] ss:$84 sps:$4 sm:$0xff]   ;;  %v7531_v52 = vld [vmem:[%s9925_s1 + $0x2a0] sm:$0xff]  }
  0x8e   : > { %6500 = vmatpush3.bf16.msra.mxu0 %v7421_v53  ;;  %3893 = vmatprep.mubr.bf16.mxu1 %v7422_v54  ;;  %v7546_v53 = vld [vmem:[%s9925_s1 + $0x2d8] sm:$0xff]   ;;  %v7502_v54 = vld [vmem:[%s8044_s11 + $0x74c] ss:$84 sps:$4 sm:$0xff]  }
  0x8f   : > { %3990 = vmatprep.mubr.bf16.mxu0 %v7424_v55  ;;  %6501 = vmatprep.subr.bf16.mxu0 %v7436_v56  ;;  %v7504_v55 = vld [vmem:[%s8044_s11 + $0x214] ss:$84 sps:$4 sm:$0xff]   ;;  %v7547_v56 = vld [vmem:[%s9925_s1 + $0x298] sm:$0xff]  }
  0x92   : > { %6502 = vmatpush3.bf16.msra.mxu0 %v7437_v58  ;;  %v7506_v58 = vld [vmem:[%s8044_s11 + $0x748] ss:$84 sps:$4 sm:$0xff]  }
  0x93   : > { %6503 = vmatprep.subr.bf16.mxu0 %v7452_v59  ;;  %v7507_v59 = vld [vmem:[%s8044_s11 + $0x210] ss:$84 sps:$4 sm:$0xff]  }
  0x95   : > { %3894 = vmatmul.mubr.bf16.gmra.mxu1 %v7426_v60  ;;  %3991 = vmatmul.mubr.bf16.gmra.mxu0 %v7427_v61  ;;  %v7563_v60 = vld [vmem:[%s9925_s1 + $0x290] sm:$0xff]   ;;  %v7578_v61 = vld [vmem:[%s9925_s1 + $0x2c8] sm:$0xff]  }
  0x96   : > { %3901 = vmatprep.mubr.bf16.mxu1 %v7428_v62  ;;  %3998 = vmatprep.mubr.bf16.mxu0 %v7430_v63  ;;  %v7508_v62 = vld [vmem:[%s8044_s11 + $0x7f4] ss:$84 sps:$4 sm:$0xff]   ;;  %v7510_v63 = vld [vmem:[%s8044_s11 + $0x2bc] ss:$84 sps:$4 sm:$0xff]  }
  0x97   : > { %6504 = vmatpush3.bf16.msra.mxu0 %v7453_v0  ;;  %v7579_v0 = vld [vmem:[%s9925_s1 + $0x288] sm:$0xff]  }
  0x98   : > { %6505 = vmatprep.subr.bf16.mxu0 %v7468_v1  ;;  %v7594_v1 = vld [vmem:[%s9925_s1 + $0x2c0] sm:$0xff]  }
  0x9b   : > { %6506 = vmatpush3.bf16.msra.mxu0 %v7469_v3  ;;  %v7610_v3 = vld [vmem:[%s9925_s1 + $0x3f8] sm:$0xff]  }
  0x9c   : > { %6507 = vmatprep.subr.bf16.mxu0 %v7484_v4  ;;  %v7512_v4 = vld [vmem:[%s8044_s11 + $0x7f0] ss:$84 sps:$4 sm:$0xff]  }
  0x9d   : > { %3902 = vmatmul.mubr.bf16.gmra.mxu1 %v7432_v2  ;;  %3999 = vmatmul.mubr.bf16.gmra.mxu0 %v7433_v5  ;;  %v7595_v2 = vld [vmem:[%s9925_s1 + $0x280] sm:$0xff]   ;;  %v7513_v5 = vld [vmem:[%s8044_s11 + $0x2b8] ss:$84 sps:$4 sm:$0xff]  }
  0x9e   : > { %3909 = vmatprep.mubr.bf16.mxu1 %v7438_v6  ;;  %4006 = vmatprep.mubr.bf16.mxu0 %v7440_v7  ;;  %v7518_v6 = vld [vmem:[%s8044_s11 + $0x89c] ss:$84 sps:$4 sm:$0xff]   ;;  %v7520_v7 = vld [vmem:[%s8044_s11 + $0x364] ss:$84 sps:$4 sm:$0xff]  }
  0x9f   : > { %6508 = vmatpush3.bf16.msra.mxu0 %v7485_v8 }
  0xa0   : > { %6509 = vmatprep.subr.bf16.mxu0 %v7500_v9 }
  0xa3   : > { %6510 = vmatpush3.bf16.msra.mxu0 %v7501_v12  ;;  %v7522_v12 = vld [vmem:[%s8044_s11 + $0x898] ss:$84 sps:$4 sm:$0xff]  }
  0xa4   : > { %6511 = vmatprep.subr.bf16.mxu0 %v7516_v13  ;;  %v7523_v13 = vld [vmem:[%s8044_s11 + $0x360] ss:$84 sps:$4 sm:$0xff]  }
  0xa5   : > { %3910 = vmatmul.mubr.bf16.gmra.mxu1 %v7442_v10  ;;  %4007 = vmatmul.mubr.bf16.gmra.mxu0 %v7443_v11 }
  0xa6   : > { %3917 = vmatprep.mubr.bf16.mxu1 %v7444_v14  ;;  %4014 = vmatprep.mubr.bf16.mxu0 %v7446_v15 }
  0xa7   : > { %6512 = vmatpush3.bf16.msra.mxu0 %v7517_v16 }
  0xa8   : > { %6513 = vmatprep.subr.bf16.mxu0 %v7532_v21 }
  0xab   : > { %6514 = vmatpush3.bf16.msra.mxu0 %v7533_v22 }
  0xac   : > { %6723 = vmatprep.subr.bf16.mxu0 %v7548_v27 }
  0xad   : > { %3918 = vmatmul.mubr.bf16.gmra.mxu1 %v7448_v17  ;;  %4015 = vmatmul.mubr.bf16.gmra.mxu0 %v7449_v18  ;;  %v7524_v18 = vld [vmem:[%s8044_s11 + $0x944] ss:$84 sps:$4 sm:$0xff]  }
  0xae   : > { %3925 = vmatprep.mubr.bf16.mxu1 %v7454_v19  ;;  %4022 = vmatprep.mubr.bf16.mxu0 %v7456_v20  ;;  %v7526_v19 = vld [vmem:[%s8044_s11 + $0x40c] ss:$84 sps:$4 sm:$0xff]  }
  0xb5   : > { %3926 = vmatmul.mubr.bf16.gmra.mxu1 %v7458_v23  ;;  %4023 = vmatmul.mubr.bf16.gmra.mxu0 %v7459_v24 }
  0xb6   : > { %3933 = vmatprep.mubr.bf16.mxu1 %v7460_v25  ;;  %4030 = vmatprep.mubr.bf16.mxu0 %v7462_v26 }
  0xbd   : > { %3934 = vmatmul.mubr.bf16.gmra.mxu1 %v7464_v28  ;;  %4031 = vmatmul.mubr.bf16.gmra.mxu0 %v7465_v29  ;;  %v7528_v28 = vld [vmem:[%s8044_s11 + $0x940] ss:$84 sps:$4 sm:$0xff]   ;;  %v7529_v29 = vld [vmem:[%s8044_s11 + $0x408] ss:$84 sps:$4 sm:$0xff]  }
  0xbe   : > { %3941 = vmatprep.mubr.bf16.mxu1 %v7470_v30  ;;  %4038 = vmatprep.mubr.bf16.mxu0 %v7472_v31 }
  0xc5   : > { %3942 = vmatmul.mubr.bf16.gmra.mxu1 %v7474_v32  ;;  %4039 = vmatmul.mubr.bf16.gmra.mxu0 %v7475_v33 }
  0xc6   : > { %4046 = vmatprep.mubr.bf16.mxu0 %v7476_v34  ;;  %4143 = vmatprep.mubr.bf16.mxu1 %v7480_v35  ;;  %v7534_v34 = vld [vmem:[%s8044_s11 + $0x9ec] ss:$84 sps:$4 sm:$0xff]   ;;  %v7536_v35 = vld [vmem:[%s8044_s11 + $0x4b4] ss:$84 sps:$4 sm:$0xff]  }
  0xcd   : > { %4047 = vmatmul.mubr.bf16.gmra.mxu0 %v7481_v37  ;;  %4144 = vmatmul.mubr.bf16.vlgmr.msra.gmra.mxu1 %v7478_v36 }
  0xce   : > { %6612 = vmatpush3.bf16.msra.mxu1 %v7483_v38  ;;  %4054 = vmatprep.mubr.bf16.mxu0 %v7486_v39 }
  0xcf   : > { %4151 = vmatprep.mubr.bf16.mxu1 %v7488_v40  ;;  %6613 = vmatprep.subr.bf16.mxu1 %v7498_v41 }
  0xd2   : > { %6614 = vmatpush3.bf16.msra.mxu1 %v7499_v42 }
  0xd3   : > { %6615 = vmatprep.subr.bf16.mxu1 %v7514_v43 }
  0xd5   : > { %4055 = vmatmul.mubr.bf16.gmra.mxu0 %v7490_v44  ;;  %4152 = vmatmul.mubr.bf16.gmra.mxu1 %v7491_v45  ;;  %v7538_v44 = vld [vmem:[%s8044_s11 + $0x9e8] ss:$84 sps:$4 sm:$0xff]   ;;  %v7539_v45 = vld [vmem:[%s8044_s11 + $0x4b0] ss:$84 sps:$4 sm:$0xff]  }
  0xd6   : > { %4062 = vmatprep.mubr.bf16.mxu0 %v7492_v46  ;;  %4159 = vmatprep.mubr.bf16.mxu1 %v7494_v47 }
  0xd7   : > { %6616 = vmatpush3.bf16.msra.mxu1 %v7515_v48 }
  0xd8   : > { %6617 = vmatprep.subr.bf16.mxu1 %v7530_v49 }
  0xdb   : > { %6618 = vmatpush3.bf16.msra.mxu1 %v7531_v52 }
  0xdc   : > { %6619 = vmatprep.subr.bf16.mxu1 %v7546_v53 }
  0xdd   : > { %4063 = vmatmul.mubr.bf16.gmra.mxu0 %v7496_v50  ;;  %4160 = vmatmul.mubr.bf16.gmra.mxu1 %v7497_v51  ;;  %v7542_v50 = vld [vmem:[%s8044_s11 + $0x55c] ss:$84 sps:$4 sm:$0xff]   ;;  %v7545_v51 = vld [vmem:[%s8044_s11 + $0x24] ss:$84 sps:$4 sm:$0xff]  }
  0xde   : > { %4070 = vmatprep.mubr.bf16.mxu0 %v7502_v54  ;;  %4167 = vmatprep.mubr.bf16.mxu1 %v7504_v55 }
  0xdf   : > { %6620 = vmatpush3.bf16.msra.mxu1 %v7547_v56 }
  0xe0   : > { %6621 = vmatprep.subr.bf16.mxu1 %v7562_v57 }
  0xe3   : > { %6622 = vmatpush3.bf16.msra.mxu1 %v7563_v60  ;;  %v7540_v60 = vld [vmem:[%s8044_s11 + $0x558] ss:$84 sps:$4 sm:$0xff]  }
  0xe4   : > { %6623 = vmatprep.subr.bf16.mxu1 %v7578_v61  ;;  %v7543_v61 = vld [vmem:[%s8044_s11 + $0x20] ss:$84 sps:$4 sm:$0xff]  }
  0xe5   : > { %4071 = vmatmul.mubr.bf16.gmra.mxu0 %v7506_v58  ;;  %4168 = vmatmul.mubr.bf16.gmra.mxu1 %v7507_v59 }
  0xe6   : > { %4078 = vmatprep.mubr.bf16.mxu0 %v7508_v62  ;;  %4175 = vmatprep.mubr.bf16.mxu1 %v7510_v63 }
  0xe7   : > { %6624 = vmatpush3.bf16.msra.mxu1 %v7579_v0 }
  0xe8   : > { %6625 = vmatprep.subr.bf16.mxu1 %v7594_v1 }
  0xeb   : > { %6626 = vmatpush3.bf16.msra.mxu1 %v7595_v2  ;;  %v7549_v2 = vld [vmem:[%s9925_s1 + $0x338] sm:$0xff]  }
  0xec   : > { %6835 = vmatprep.subr.bf16.mxu1 %v7610_v3  ;;  %v7552_v3 = vld [vmem:[%s8044_s11 + $0x604] ss:$84 sps:$4 sm:$0xff]  }
  0xed   : > { %v6067_v8 = vpop.f32.mrf.mxu0  ;;  %v6139_v9 = vpop.f32.mrf.mxu1  ;;  %4079 = vmatmul.mubr.bf16.gmra.mxu0 %v7512_v4  ;;  %4176 = vmatmul.mubr.bf16.gmra.mxu1 %v7513_v5 }
  0xee   : > { %4086 = vmatprep.mubr.bf16.mxu0 %v7518_v6  ;;  %4183 = vmatprep.mubr.bf16.mxu1 %v7520_v7  ;;  %v7555_v6 = vld [vmem:[%s8044_s11 + $0xcc] ss:$84 sps:$4 sm:$0xff]   ;;  %v7564_v7 = vld [vmem:[%s9925_s1 + $0x370] sm:$0xff]  }
  0xef   : > { %v6068_v10 = vpop.f32.mrf.mxu0  ;;  %v6140_v11 = vpop.f32.mrf.mxu1 }
  0xf0   : > { %v8417_v14 = vadd.f32 %v6068_v10, %v6067_v8  ;;  %v8419_v15 = vadd.f32 %v6140_v11, %v6139_v9  ;;  %v8472_v10 = vld [vmem:[%s9926_s2] ss:$0 sm:$0xff] }
  0xf1   : > { %v6070_v16 = vpop.f32.mrf.mxu0  ;;  %v6142_v17 = vpop.f32.mrf.mxu1 }
  0xf3   : > { %v6071_v20 = vpop.f32.mrf.mxu0  ;;  %v6143_v21 = vpop.f32.mrf.mxu1 }
  0xf4   : > { %v8423_v22 = vadd.f32 %v6071_v20, %v6070_v16  ;;  %v8425_v23 = vadd.f32 %v6143_v21, %v6142_v17  ;;  %v7580_v16 = vld [vmem:[%s9925_s1 + $0x368] sm:$0xff]   ;;  %v3663_v21 = vadd.f32 %v8417_v14, %v8472_v10  ;;  %v7596_v14 = vld [vmem:[%s9925_s1 + $0x360] sm:$0xff]  }
  0xf5   : > { %v6073_v24 = vpop.f32.mrf.mxu0  ;;  %v6145_v25 = vpop.f32.mrf.mxu1  ;;  %4087 = vmatmul.mubr.bf16.gmra.mxu0 %v7522_v12  ;;  %4184 = vmatmul.mubr.bf16.gmra.mxu1 %v7523_v13  ;;  %v7565_v13 = vld [vmem:[%s9925_s1 + $0x330] sm:$0xff]   ;;  %v7553_v20 = vld [vmem:[%s8044_s11 + $0xc8] ss:$84 sps:$4 sm:$0xff]  }
  0xf6   : > { %4094 = vmatprep.mubr.bf16.mxu0 %v7524_v18  ;;  %4191 = vmatprep.mubr.bf16.mxu1 %v7526_v19  ;;  %v7550_v19 = vld [vmem:[%s8044_s11 + $0x600] ss:$84 sps:$4 sm:$0xff]  }
  0xf7   : > { %v6074_v26 = vpop.f32.mrf.mxu0  ;;  %v6146_v27 = vpop.f32.mrf.mxu1 }
  0xf8   : > { %v8429_v30 = vadd.f32 %v6074_v26, %v6073_v24  ;;  %v8431_v31 = vadd.f32 %v6146_v27, %v6145_v25 }
  0xf9   : > { %v6076_v32 = vpop.f32.mrf.mxu0  ;;  %v6148_v33 = vpop.f32.mrf.mxu1 }
  0xfb   : > { %v6077_v36 = vpop.f32.mrf.mxu0  ;;  %v6149_v37 = vpop.f32.mrf.mxu1 }
  0xfc   : > { %v8435_v38 = vadd.f32 %v6077_v36, %v6076_v32  ;;  %v8437_v39 = vadd.f32 %v6149_v37, %v6148_v33  ;;  %v7561_v32 = vld [vmem:[%s8044_s11 + $0x174] ss:$84 sps:$4 sm:$0xff]   ;;  %v3666_v36 = vadd.f32 %v8423_v22, %v8472_v10  ;;  %v7612_v22 = vld [vmem:[%s9925_s1 + $0x358] sm:$0xff]  }
  0xfd   : > { %v6079_v40 = vpop.f32.mrf.mxu0  ;;  %v6151_v41 = vpop.f32.mrf.mxu1  ;;  %4095 = vmatmul.mubr.bf16.gmra.mxu0 %v7528_v28  ;;  %4192 = vmatmul.mubr.bf16.gmra.mxu1 %v7529_v29  ;;  %v7558_v29 = vld [vmem:[%s8044_s11 + $0x6ac] ss:$84 sps:$4 sm:$0xff]  }
  0xfe   : > { %4102 = vmatprep.mubr.bf16.mxu0 %v7534_v34  ;;  %4199 = vmatprep.mubr.bf16.mxu1 %v7536_v35  ;;  %v7581_v35 = vld [vmem:[%s9925_s1 + $0x328] sm:$0xff]  }
  0xff   : > { %v6080_v42 = vpop.f32.mrf.mxu0  ;;  %v6152_v43 = vpop.f32.mrf.mxu1 }
 0x100   : > { %v8441_v46 = vadd.f32 %v6080_v42, %v6079_v40  ;;  %v8443_v47 = vadd.f32 %v6152_v43, %v6151_v41  ;;  %v7597_v43 = vld [vmem:[%s9925_s1 + $0x320] sm:$0xff]  }
 0x101   : > { %v6082_v48 = vpop.f32.mrf.mxu0  ;;  %v6154_v49 = vpop.f32.mrf.mxu1 }
 0x103   : > { %v6083_v52 = vpop.f32.mrf.mxu0  ;;  %v6155_v53 = vpop.f32.mrf.mxu1 }
 0x104   : > { %v8447_v54 = vadd.f32 %v6083_v52, %v6082_v48  ;;  %v8449_v55 = vadd.f32 %v6155_v53, %v6154_v49  ;;  %v7556_v49 = vld [vmem:[%s8044_s11 + $0x6a8] ss:$84 sps:$4 sm:$0xff]  }
 0x105   : > { %v6085_v56 = vpop.f32.mrf.mxu0  ;;  %v6157_v57 = vpop.f32.mrf.mxu1  ;;  %4103 = vmatmul.mubr.bf16.gmra.mxu0 %v7538_v44  ;;  %4200 = vmatmul.mubr.bf16.gmra.mxu1 %v7539_v45 }
 0x106   : > { %4207 = vmatprep.mubr.bf16.mxu1 %v7542_v50  ;;  %4304 = vmatprep.mubr.bf16.mxu0 %v7545_v51  ;;  %v7559_v50 = vld [vmem:[%s8044_s11 + $0x170] ss:$84 sps:$4 sm:$0xff]   ;;  %v3671_v51 = vadd.f32 %v8429_v30, %v8472_v10 }
 0x107   : > { %v6086_v58 = vpop.f32.mrf.mxu0  ;;  %v6158_v59 = vpop.f32.mrf.mxu1  ;;  %v7628_v30 = vld [vmem:[%s9925_s1 + $0x350] sm:$0xff]  }
 0x108   : > { %v8453_v62 = vadd.f32 %v6086_v58, %v6085_v56  ;;  %v8455_v63 = vadd.f32 %v6158_v59, %v6157_v57  ;;  %v7568_v59 = vld [vmem:[%s8044_s11 + $0x754] ss:$84 sps:$4 sm:$0xff]  }
 0x109   : > { %v6088_v0 = vpop.f32.mrf.mxu0  ;;  %v6160_v1 = vpop.f32.mrf.mxu1 }
 0x10b   : > { %v6089_v4 = vpop.f32.mrf.mxu0  ;;  %v6161_v5 = vpop.f32.mrf.mxu1 }
 0x10c   : > { %v8465_v8 = vadd.f32 %v6089_v4, %v6088_v0  ;;  %v8467_v9 = vadd.f32 %v6161_v5, %v6160_v1  ;;  %v7613_v1 = vld [vmem:[%s9925_s1 + $0x318] sm:$0xff]  }
 0x10d   : > { %v6091_v11 = vpop.f32.mrf.mxu0  ;;  %v6179_v12 = vpop.f32.mrf.mxu1  ;;  %4208 = vmatmul.mubr.bf16.gmra.mxu1 %v7540_v60  ;;  %4305 = vmatmul.mubr.bf16.vlgmr.msra.gmra.mxu0 %v7543_v61  ;;  %v7571_v60 = vld [vmem:[%s8044_s11 + $0x21c] ss:$84 sps:$4 sm:$0xff]  }
 0x10e   : > { %6724 = vmatpush3.bf16.msra.mxu0 %v7549_v2  ;;  %4215 = vmatprep.mubr.bf16.mxu1 %v7552_v3  ;;  %v3674_v2 = vadd.f32 %v8435_v38, %v8472_v10  ;;  %v7644_v38 = vld [vmem:[%s9925_s1 + $0x348] sm:$0xff]  }
 0x10f   : > { %v6092_v17 = vpop.f32.mrf.mxu0  ;;  %v6180_v18 = vpop.f32.mrf.mxu1  ;;  %4312 = vmatprep.mubr.bf16.mxu0 %v7555_v6  ;;  %6725 = vmatprep.subr.bf16.mxu0 %v7564_v7 }
 0x110   : > { %v8484_v24 = vadd.f32 %v6092_v17, %v6091_v11  ;;  %v6181_v25 = vadd.f32 %v6180_v18, %v6179_v12  ;;  %v7629_v11 = vld [vmem:[%s9925_s1 + $0x310] sm:$0xff]   ;;  %v7569_v17 = vld [vmem:[%s8044_s11 + $0x218] ss:$84 sps:$4 sm:$0xff]   ;;  %v3679_v18 = vadd.f32 %v8441_v46, %v8472_v10  ;;  %v7660_v46 = vld [vmem:[%s9925_s1 + $0x340] sm:$0xff]  }
 0x111   : > { %v6094_v26 = vpop.f32.mrf.mxu0  ;;  %v6182_v27 = vpop.f32.mrf.mxu1 }
 0x112   : > { %v8486_v28 = vadd.f32 %v6181_v25, %v3663_v21  ;;  %6726 = vmatpush3.bf16.msra.mxu0 %v7565_v13 }
 0x113   : > { %v6095_v33 = vpop.f32.mrf.mxu0  ;;  %v6183_v34 = vpop.f32.mrf.mxu1  ;;  %6727 = vmatprep.subr.bf16.mxu0 %v7580_v16  ;;  %v7566_v16 = vld [vmem:[%s8044_s11 + $0x750] ss:$84 sps:$4 sm:$0xff]  }
 0x114   : > { %v8498_v37 = vadd.f32 %v6095_v33, %v6094_v26  ;;  %v6184_v40 = vadd.f32 %v6183_v34, %v6182_v27  ;;  %v7574_v27 = vld [vmem:[%s8044_s11 + $0x7fc] ss:$84 sps:$4 sm:$0xff]   ;;  %v7645_v34 = vld [vmem:[%s9925_s1 + $0x308] sm:$0xff]  }
 0x115   : > { %v6097_v41 = vpop.f32.mrf.mxu0  ;;  %v6185_v42 = vpop.f32.mrf.mxu1  ;;  %4216 = vmatmul.mubr.bf16.gmra.mxu1 %v7550_v19  ;;  %4313 = vmatmul.mubr.bf16.gmra.mxu0 %v7553_v20 }
 0x116   : > { %v8503_v44 = vadd.f32 %v6184_v40, %v3666_v36  ;;  %4223 = vmatprep.mubr.bf16.mxu1 %v7558_v29  ;;  %4320 = vmatprep.mubr.bf16.mxu0 %v7561_v32  ;;  %v7577_v29 = vld [vmem:[%s8044_s11 + $0x2c4] ss:$84 sps:$4 sm:$0xff]  }
 0x117   : > { %v6098_v45 = vpop.f32.mrf.mxu0  ;;  %v6186_v48 = vpop.f32.mrf.mxu1  ;;  %6728 = vmatpush3.bf16.msra.mxu0 %v7581_v35  ;;  %v3682_v35 = vadd.f32 %v8447_v54, %v8472_v10  ;;  %v7676_v54 = vld [vmem:[%s9925_s1 + $0x478] sm:$0xff]  }
 0x118   : > { %v8512_v52 = vadd.f32 %v6098_v45, %v6097_v41  ;;  %v6187_v53 = vadd.f32 %v6186_v48, %v6185_v42  ;;  %6729 = vmatprep.subr.bf16.mxu0 %v7596_v14  ;;  %v7661_v42 = vld [vmem:[%s9925_s1 + $0x300] sm:$0xff]   ;;  %v7572_v48 = vld [vmem:[%s8044_s11 + $0x7f8] ss:$84 sps:$4 sm:$0xff]  }
 0x119   : > { %v6100_v56 = vpop.f32.mrf.mxu0  ;;  %v6188_v57 = vpop.f32.mrf.mxu1 }
 0x11a   : > { %v8514_v58 = vadd.f32 %v6187_v53, %v3671_v51 }
 0x11b   : > { %v6101_v61 = vpop.f32.mrf.mxu0  ;;  %v6189_v0 = vpop.f32.mrf.mxu1  ;;  %6730 = vmatpush3.bf16.msra.mxu0 %v7597_v43 }
 0x11c   : > { %v8526_v3 = vadd.f32 %v6101_v61, %v6100_v56  ;;  %v6190_v4 = vadd.f32 %v6189_v0, %v6188_v57  ;;  %6731 = vmatprep.subr.bf16.mxu0 %v7612_v22  ;;  %v7587_v61 = vld [vmem:[%s8044_s11 + $0x36c] ss:$84 sps:$4 sm:$0xff]  }
 0x11d   : > { %v6103_v5 = vpop.f32.mrf.mxu0  ;;  %v6191_v6 = vpop.f32.mrf.mxu1  ;;  %4224 = vmatmul.mubr.bf16.gmra.mxu1 %v7556_v49  ;;  %4321 = vmatmul.mubr.bf16.gmra.mxu0 %v7559_v50  ;;  %v7575_v49 = vld [vmem:[%s8044_s11 + $0x2c0] ss:$84 sps:$4 sm:$0xff]   ;;  %v3687_v50 = vadd.f32 %v8453_v62, %v8472_v10 }
 0x11e   : > { %v8528_v7 = vadd.f32 %v6190_v4, %v3674_v2  ;;  %4231 = vmatprep.mubr.bf16.mxu1 %v7568_v59  ;;  %4328 = vmatprep.mubr.bf16.mxu0 %v7571_v60  ;;  %v7584_v60 = vld [vmem:[%s8044_s11 + $0x8a4] ss:$84 sps:$4 sm:$0xff]  }
 0x11f   : > { %v6104_v12 = vpop.f32.mrf.mxu0  ;;  %v6192_v13 = vpop.f32.mrf.mxu1  ;;  %6732 = vmatpush3.bf16.msra.mxu0 %v7613_v1 }
 0x120   : > { %v8540_v19 = vadd.f32 %v6104_v12, %v6103_v5  ;;  %v6193_v20 = vadd.f32 %v6192_v13, %v6191_v6  ;;  %6733 = vmatprep.subr.bf16.mxu0 %v7628_v30  ;;  %v3690_v30 = vadd.f32 %v8465_v8, %v8472_v10  ;;  %v7582_v12 = vld [vmem:[%s8044_s11 + $0x8a0] ss:$84 sps:$4 sm:$0xff]   ;;  %v7585_v13 = vld [vmem:[%s8044_s11 + $0x368] ss:$84 sps:$4 sm:$0xff]   ;;  %v3695_v8 = vadd.f32 %v8484_v24, %v8472_v10 }
 0x121   : > { %v6106_v21 = vpop.f32.mrf.mxu0  ;;  %v6194_v25 = vpop.f32.mrf.mxu1 }
 0x122   : > { %v8542_v26 = vadd.f32 %v6193_v20, %v3679_v18 }
 0x123   : > { %v6107_v32 = vpop.f32.mrf.mxu0  ;;  %v6195_v33 = vpop.f32.mrf.mxu1  ;;  %6734 = vmatpush3.bf16.msra.mxu0 %v7629_v11 }
 0x124   : > { %v8554_v14 = vadd.f32 %v6107_v32, %v6106_v21  ;;  %v6196_v36 = vadd.f32 %v6195_v33, %v6194_v25  ;;  %6735 = vmatprep.subr.bf16.mxu0 %v7644_v38  ;;  %v7590_v25 = vld [vmem:[%s8044_s11 + $0x94c] ss:$84 sps:$4 sm:$0xff]   ;;  %v3698_v33 = vadd.f32 %v8498_v37, %v8472_v10  ;;  %v3703_v37 = vadd.f32 %v8512_v52, %v8472_v10 }
 0x125   : > { %v6109_v40 = vpop.f32.mrf.mxu0  ;;  %v6197_v41 = vpop.f32.mrf.mxu1  ;;  %4232 = vmatmul.mubr.bf16.gmra.mxu1 %v7566_v16  ;;  %4329 = vmatmul.mubr.bf16.gmra.mxu0 %v7569_v17 }
 0x126   : > { %v8559_v43 = vadd.f32 %v6196_v36, %v3682_v35  ;;  %4239 = vmatprep.mubr.bf16.mxu1 %v7574_v27  ;;  %4336 = vmatprep.mubr.bf16.mxu0 %v7577_v29  ;;  %v7593_v27 = vld [vmem:[%s8044_s11 + $0x414] ss:$84 sps:$4 sm:$0xff]  }
 0x127   : > { %v6110_v22 = vpop.f32.mrf.mxu0  ;;  %v6198_v45 = vpop.f32.mrf.mxu1  ;;  %6736 = vmatpush3.bf16.msra.mxu0 %v7645_v34 }
 0x128   : > { %v8568_v51 = vadd.f32 %v6110_v22, %v6109_v40  ;;  %v6199_v53 = vadd.f32 %v6198_v45, %v6197_v41  ;;  %6737 = vmatprep.subr.bf16.mxu0 %v7660_v46 }
 0x129   : > { %v6112_v56 = vpop.f32.mrf.mxu0  ;;  %v6200_v57 = vpop.f32.mrf.mxu1 }
 0x12a   : > { %v8570_v59 = vadd.f32 %v6199_v53, %v3687_v50  ;;  %v7600_v53 = vld [vmem:[%s8044_s11 + $0x9f4] ss:$84 sps:$4 sm:$0xff]  }
 0x12b   : > { %v6113_v0 = vpop.f32.mrf.mxu0  ;;  %v6201_v1 = vpop.f32.mrf.mxu1  ;;  %6738 = vmatpush3.bf16.msra.mxu0 %v7661_v42  ;;  %v7588_v42 = vld [vmem:[%s8044_s11 + $0x948] ss:$84 sps:$4 sm:$0xff]  }
 0x12c   : > { %v8576_v2 = vadd.f32 %v6113_v0, %v6112_v56  ;;  %v6202_v62 = vadd.f32 %v6201_v1, %v6200_v57  ;;  %6947 = vmatprep.subr.bf16.mxu0 %v7676_v54  ;;  %v7591_v54 = vld [vmem:[%s8044_s11 + $0x410] ss:$84 sps:$4 sm:$0xff]  }
 0x12d   : > { %v6115_v4 = vpop.f32.mrf.mxu0  ;;  %v6203_v5 = vpop.f32.mrf.mxu1  ;;  %4240 = vmatmul.mubr.bf16.gmra.mxu1 %v7572_v48  ;;  %4337 = vmatmul.mubr.bf16.gmra.mxu0 %v7575_v49  ;;  %v7603_v56 = vld [vmem:[%s8044_s11 + $0x4bc] ss:$84 sps:$4 sm:$0xff]  }
 0x12e   : > { %v8578_v6 = vadd.f32 %v6202_v62, %v3690_v30  ;;  %4247 = vmatprep.mubr.bf16.mxu1 %v7584_v60  ;;  %4344 = vmatprep.mubr.bf16.mxu0 %v7587_v61  ;;  %v3706_v61 = vadd.f32 %v8526_v3, %v8472_v10  ;;  %v3711_v3 = vadd.f32 %v8540_v19, %v8472_v10 }
 0x12f   : > { %v6116_v11 = vpop.f32.mrf.mxu0  ;;  %v6204_v38 = vpop.f32.mrf.mxu1 }
 0x130   : > { %v8584_v16 = vadd.f32 %v6116_v11, %v6115_v4  ;;  %v6205_v17 = vadd.f32 %v6204_v38, %v6203_v5  ;;  %v7598_v11 = vld [vmem:[%s8044_s11 + $0x9f0] ss:$84 sps:$4 sm:$0xff]   ;;  %v7601_v38 = vld [vmem:[%s8044_s11 + $0x4b8] ss:$84 sps:$4 sm:$0xff]  }
 0x131   : > { %v6118_v18 = vpop.f32.mrf.mxu0  ;;  %v6206_v20 = vpop.f32.mrf.mxu1 }
 0x132   : > { %v8586_v21 = vadd.f32 %v6205_v17, %v3695_v8 }
 0x133   : > { %v6119_v29 = vpop.f32.mrf.mxu0  ;;  %v6207_v32 = vpop.f32.mrf.mxu1 }
 0x134   : > { %v8592_v34 = vadd.f32 %v6119_v29, %v6118_v18  ;;  %v6208_v46 = vadd.f32 %v6207_v32, %v6206_v20  ;;  %v7606_v20 = vld [vmem:[%s8044_s11 + $0x564] ss:$84 sps:$4 sm:$0xff]   ;;  %v3714_v32 = vadd.f32 %v8554_v14, %v8472_v10  ;;  %v3719_v14 = vadd.f32 %v8568_v51, %v8472_v10  ;;  %v7626_v51 = vld [vmem:[%s9925_s1 + $0x3f0] sm:$0xff]  }
 0x135   : > { %v6121_v24 = vpop.f32.mrf.mxu0  ;;  %v6209_v35 = vpop.f32.mrf.mxu1  ;;  %4248 = vmatmul.mubr.bf16.gmra.mxu1 %v7582_v12  ;;  %4345 = vmatmul.mubr.bf16.gmra.mxu0 %v7585_v13 }
 0x136   : > { %v8594_v36 = vadd.f32 %v6208_v46, %v3698_v33  ;;  %4255 = vmatprep.mubr.bf16.mxu1 %v7590_v25  ;;  %4352 = vmatprep.mubr.bf16.mxu0 %v7593_v27  ;;  %v7609_v25 = vld [vmem:[%s8044_s11 + $0x2c] ss:$84 sps:$4 sm:$0xff]  }
 0x137   : > { %v6122_v40 = vpop.f32.mrf.mxu0  ;;  %v6210_v41 = vpop.f32.mrf.mxu1 }
 0x138   : > { %v8600_v22 = vadd.f32 %v6122_v40, %v6121_v24  ;;  %v6211_v45 = vadd.f32 %v6210_v41, %v6209_v35 }
 0x139   : > { %v6124_v48 = vpop.f32.mrf.mxu0  ;;  %v6212_v49 = vpop.f32.mrf.mxu1 }
 0x13a   : > { %v8602_v50 = vadd.f32 %v6211_v45, %v3703_v37 }
 0x13b   : > { %v6125_v57 = vpop.f32.mrf.mxu0  ;;  %v6213_v60 = vpop.f32.mrf.mxu1 }
 0x13c   : > { %v8608_v0 = vadd.f32 %v6125_v57, %v6124_v48  ;;  %v6214_v1 = vadd.f32 %v6213_v60, %v6212_v49  ;;  %v7616_v57 = vld [vmem:[%s8044_s11 + $0x60c] ss:$84 sps:$4 sm:$0xff]  }
 0x13d   : > { %v6127_v52 = vpop.f32.mrf.mxu0  ;;  %v6215_v30 = vpop.f32.mrf.mxu1  ;;  %4256 = vmatmul.mubr.bf16.gmra.mxu1 %v7588_v42  ;;  %4353 = vmatmul.mubr.bf16.gmra.mxu0 %v7591_v54  ;;  %v7604_v42 = vld [vmem:[%s8044_s11 + $0x560] ss:$84 sps:$4 sm:$0xff]   ;;  %v7607_v54 = vld [vmem:[%s8044_s11 + $0x28] ss:$84 sps:$4 sm:$0xff]  }
 0x13e   : > { %v8610_v62 = vadd.f32 %v6214_v1, %v3706_v61  ;;  %4263 = vmatprep.mubr.bf16.mxu1 %v7600_v53  ;;  %4360 = vmatprep.mubr.bf16.mxu0 %v7603_v56  ;;  %v7611_v56 = vld [vmem:[%s9925_s1 + $0x3b8] sm:$0xff]   ;;  %v7619_v1 = vld [vmem:[%s8044_s11 + $0xd4] ss:$84 sps:$4 sm:$0xff]  }
 0x13f   : > { %v6128_v4 = vpop.f32.mrf.mxu0  ;;  %v6216_v5 = vpop.f32.mrf.mxu1 }
 0x140   : > { %v8616_v12 = vadd.f32 %v6128_v4, %v6127_v52  ;;  %v6217_v13 = vadd.f32 %v6216_v5, %v6215_v30  ;;  %v3722_v52 = vadd.f32 %v8576_v2, %v8472_v10  ;;  %v7642_v2 = vld [vmem:[%s9925_s1 + $0x3e8] sm:$0xff]  }
 0x141   : > { %v6130_v8 = vpop.f32.mrf.mxu0  ;;  %v6218_v17 = vpop.f32.mrf.mxu1 }
 0x142   : > { %v8618_v18 = vadd.f32 %v6217_v13, %v3711_v3  ;;  %v7627_v3 = vld [vmem:[%s9925_s1 + $0x3b0] sm:$0xff]  }
 0x143   : > { %v6131_v27 = vpop.f32.mrf.mxu0  ;;  %v6219_v29 = vpop.f32.mrf.mxu1 }
 0x144   : > { %v8624_v33 = vadd.f32 %v6131_v27, %v6130_v8  ;;  %v6220_v46 = vadd.f32 %v6219_v29, %v6218_v17  ;;  %v7614_v17 = vld [vmem:[%s8044_s11 + $0x608] ss:$84 sps:$4 sm:$0xff]  }
 0x145   : > { %v6133_v19 = vpop.f32.mrf.mxu0  ;;  %v6221_v24 = vpop.f32.mrf.mxu1  ;;  %4264 = vmatmul.mubr.bf16.gmra.mxu1 %v7598_v11  ;;  %4361 = vmatmul.mubr.bf16.gmra.mxu0 %v7601_v38 }
 0x146   : > { %v8626_v35 = vadd.f32 %v6220_v46, %v3714_v32  ;;  %4368 = vmatprep.mubr.bf16.mxu0 %v7606_v20  ;;  %4465 = vmatprep.mubr.bf16.mxu1 %v7609_v25  ;;  %v7617_v20 = vld [vmem:[%s8044_s11 + $0xd0] ss:$84 sps:$4 sm:$0xff]   ;;  %v3727_v25 = vadd.f32 %v8584_v16, %v8472_v10 }
 0x147   : > { %v6134_v40 = vpop.f32.mrf.mxu0  ;;  %v6222_v41 = vpop.f32.mrf.mxu1  ;;  %v7658_v16 = vld [vmem:[%s9925_s1 + $0x3e0] sm:$0xff]  }
 0x148   : > { %v8632_v37 = vadd.f32 %v6134_v40, %v6133_v19  ;;  %v6223_v45 = vadd.f32 %v6222_v41, %v6221_v24  ;;  %v7622_v40 = vld [vmem:[%s8044_s11 + $0x6b4] ss:$84 sps:$4 sm:$0xff]   ;;  %v7625_v41 = vld [vmem:[%s8044_s11 + $0x17c] ss:$84 sps:$4 sm:$0xff]  }
 0x149   : > { %v6136_v48 = vpop.f32.mrf.mxu0  ;;  %v6224_v49 = vpop.f32.mrf.mxu1 }
 0x14a   : > { %v8634_v53 = vadd.f32 %v6223_v45, %v3719_v14  ;;  %v7643_v14 = vld [vmem:[%s9925_s1 + $0x3a8] sm:$0xff]   ;;  %v3730_v45 = vadd.f32 %v8592_v34, %v8472_v10  ;;  %v7674_v34 = vld [vmem:[%s9925_s1 + $0x3d8] sm:$0xff]  }
 0x14b   : > { %v6137_v60 = vpop.f32.mrf.mxu0  ;;  %v6225_v61 = vpop.f32.mrf.mxu1 }
 0x14c   : > { %v8646_v30 = vadd.f32 %v6137_v60, %v6136_v48  ;;  %v6226_v4 = vadd.f32 %v6225_v61, %v6224_v49 }
 0x14d   : > { %v6227_v5 = vpop.f32.mrf.mxu1  ;;  %v6291_v11 = vpop.f32.mrf.mxu0  ;;  %4369 = vmatmul.mubr.bf16.gmra.mxu0 %v7604_v42  ;;  %4466 = vmatmul.mubr.bf16.vlgmr.msra.gmra.mxu1 %v7607_v54 }
 0x14e   : > { %v8648_v38 = vadd.f32 %v6226_v4, %v3722_v52  ;;  %6836 = vmatpush3.bf16.msra.mxu1 %v7611_v56  ;;  %4376 = vmatprep.mubr.bf16.mxu0 %v7616_v57  ;;  %v7659_v57 = vld [vmem:[%s9925_s1 + $0x3a0] sm:$0xff]   ;;  %v7623_v4 = vld [vmem:[%s8044_s11 + $0x178] ss:$84 sps:$4 sm:$0xff]  }
 0x14f   : > { %v6228_v13 = vpop.f32.mrf.mxu1  ;;  %v6292_v8 = vpop.f32.mrf.mxu0  ;;  %4473 = vmatprep.mubr.bf16.mxu1 %v7619_v1  ;;  %6837 = vmatprep.subr.bf16.mxu1 %v7626_v51  ;;  %v7620_v52 = vld [vmem:[%s8044_s11 + $0x6b0] ss:$84 sps:$4 sm:$0xff]  }
 0x150   : > { %v6229_v27 = vadd.f32 %v6228_v13, %v6227_v5  ;;  %v6293_v29 = vadd.f32 %v6292_v8, %v6291_v11  ;;  %v3735_v5 = vadd.f32 %v8600_v22, %v8472_v10  ;;  %v7690_v22 = vld [vmem:[%s9925_s1 + $0x3d0] sm:$0xff]  }
 0x151   : > { %v6230_v32 = vpop.f32.mrf.mxu1  ;;  %v6294_v46 = vpop.f32.mrf.mxu0 }
 0x152   : > { %v8660_v19 = vadd.f32 %v6229_v27, %v3727_v25  ;;  %v8663_v24 = vadd.f32 %v6293_v29, %v8486_v28  ;;  %6838 = vmatpush3.bf16.msra.mxu1 %v7627_v3  ;;  %v7675_v29 = vld [vmem:[%s9925_s1 + $0x398] sm:$0xff]  }
 0x153   : > { %v6231_v42 = vpop.f32.mrf.mxu1  ;;  %v6295_v54 = vpop.f32.mrf.mxu0  ;;  %6839 = vmatprep.subr.bf16.mxu1 %v7642_v2 }
 0x154   : > { %v6232_v28 = vadd.f32 %v6231_v42, %v6230_v32  ;;  %v6296_v48 = vadd.f32 %v6295_v54, %v6294_v46  ;;  %v3738_v32 = vadd.f32 %v8608_v0, %v8472_v10  ;;  %v7691_v0 = vld [vmem:[%s9925_s1 + $0x390] sm:$0xff]  }
 0x155   : > { %v6233_v49 = vpop.f32.mrf.mxu1  ;;  %v6297_v56 = vpop.f32.mrf.mxu0  ;;  %4377 = vmatmul.mubr.bf16.gmra.mxu0 %v7614_v17  ;;  %4474 = vmatmul.mubr.bf16.gmra.mxu1 %v7617_v20  ;;  %v7632_v17 = vld [vmem:[%s8044_s11 + $0x75c] ss:$84 sps:$4 sm:$0xff]   ;;  %v7635_v20 = vld [vmem:[%s8044_s11 + $0x224] ss:$84 sps:$4 sm:$0xff]  }
 0x156   : > { %v8678_v60 = vadd.f32 %v6232_v28, %v3730_v45  ;;  %v8681_v61 = vadd.f32 %v6296_v48, %v8503_v44  ;;  %4384 = vmatprep.mubr.bf16.mxu0 %v7622_v40  ;;  %4481 = vmatprep.mubr.bf16.mxu1 %v7625_v41  ;;  %v7630_v28 = vld [vmem:[%s8044_s11 + $0x758] ss:$84 sps:$4 sm:$0xff]   ;;  %v7633_v48 = vld [vmem:[%s8044_s11 + $0x220] ss:$84 sps:$4 sm:$0xff]  }
 0x157   : > { %v6234_v1 = vpop.f32.mrf.mxu1  ;;  %v6298_v51 = vpop.f32.mrf.mxu0  ;;  %6840 = vmatpush3.bf16.msra.mxu1 %v7643_v14  ;;  %v7706_v14 = vld [vmem:[%s9925_s1 + $0x3c8] sm:$0xff]  }
 0x158   : > { %v6235_v11 = vadd.f32 %v6234_v1, %v6233_v49  ;;  %v6299_v3 = vadd.f32 %v6298_v51, %v6297_v56  ;;  %6841 = vmatprep.subr.bf16.mxu1 %v7658_v16 }
 0x159   : > { %v6236_v44 = vpop.f32.mrf.mxu1  ;;  %v6300_v2 = vpop.f32.mrf.mxu0 }
 0x15a   : > { %v8690_v13 = vadd.f32 %v6235_v11, %v3735_v5  ;;  %v8693_v8 = vadd.f32 %v6299_v3, %v8514_v58  ;;  %v7707_v3 = vld [vmem:[%s9925_s1 + $0x388] sm:$0xff]  }
 0x15b   : > { %v6237_v25 = vpop.f32.mrf.mxu1  ;;  %v6301_v27 = vpop.f32.mrf.mxu0  ;;  %6842 = vmatpush3.bf16.msra.mxu1 %v7659_v57 }
 0x15c   : > { %v6238_v46 = vadd.f32 %v6237_v25, %v6236_v44  ;;  %v6302_v58 = vadd.f32 %v6301_v27, %v6300_v2  ;;  %6843 = vmatprep.subr.bf16.mxu1 %v7674_v34  ;;  %v7723_v25 = vld [vmem:[%s9925_s1 + $0x380] sm:$0xff]  }
 0x15d   : > { %v6239_v40 = vpop.f32.mrf.mxu1  ;;  %v6303_v41 = vpop.f32.mrf.mxu0  ;;  %4385 = vmatmul.mubr.bf16.gmra.mxu0 %v7620_v52  ;;  %4482 = vmatmul.mubr.bf16.gmra.mxu1 %v7623_v4  ;;  %v7638_v52 = vld [vmem:[%s8044_s11 + $0x804] ss:$84 sps:$4 sm:$0xff]   ;;  %v7641_v4 = vld [vmem:[%s8044_s11 + $0x2cc] ss:$84 sps:$4 sm:$0xff]  }
 0x15e   : > { %v8705_v42 = vadd.f32 %v6238_v46, %v3738_v32  ;;  %v8708_v54 = vadd.f32 %v6302_v58, %v8528_v7  ;;  %4392 = vmatprep.mubr.bf16.mxu0 %v7632_v17  ;;  %4489 = vmatprep.mubr.bf16.mxu1 %v7635_v20  ;;  %v3743_v7 = vadd.f32 %v8616_v12, %v8472_v10  ;;  %v7722_v10 = vld [vmem:[%s9925_s1 + $0x3c0] sm:$0xff]   ;;  %v7639_v58 = vld [vmem:[%s8044_s11 + $0x2c8] ss:$84 sps:$4 sm:$0xff]  }
 0x15f   : > { %v6240_v16 = vpop.f32.mrf.mxu1  ;;  %v6304_v45 = vpop.f32.mrf.mxu0  ;;  %6844 = vmatpush3.bf16.msra.mxu1 %v7675_v29  ;;  %v8736_v12 = vld [vmem:[%s9926_s2] ss:$0 sm:$0xff] }
 0x160   : > { %v6241_v49 = vadd.f32 %v6240_v16, %v6239_v40  ;;  %v6305_v56 = vadd.f32 %v6304_v45, %v6303_v41  ;;  %6845 = vmatprep.subr.bf16.mxu1 %v7690_v22  ;;  %v7636_v46 = vld [vmem:[%s8044_s11 + $0x800] ss:$84 sps:$4 sm:$0xff]   ;;  %v3751_v40 = vadd.f32 %v8736_v12, %v8632_v37 }
 0x161   : > { %v6242_v57 = vpop.f32.mrf.mxu1  ;;  %v6306_v34 = vpop.f32.mrf.mxu0 }
 0x162   : > { %v8720_v1 = vadd.f32 %v6241_v49, %v3743_v7  ;;  %v8723_v51 = vadd.f32 %v6305_v56, %v8542_v26  ;;  %v3746_v26 = vadd.f32 %v8736_v12, %v8624_v33  ;;  %v7738_v33 = vld [vmem:[%s9925_s1 + $0x4f8] sm:$0xff]   ;;  %v3754_v56 = vadd.f32 %v8736_v12, %v8646_v30 }
 0x163   : > { %v6243_v5 = vpop.f32.mrf.mxu1  ;;  %v6307_v11 = vpop.f32.mrf.mxu0  ;;  %6846 = vmatpush3.bf16.msra.mxu1 %v7691_v0 }
 0x164   : > { %v6244_v44 = vadd.f32 %v6243_v5, %v6242_v57  ;;  %v6308_v2 = vadd.f32 %v6307_v11, %v6306_v34  ;;  %6847 = vmatprep.subr.bf16.mxu1 %v7706_v14  ;;  %v3759_v11 = vadd.f32 %v8736_v12, %v8419_v15 }
 0x165   : > { %v6245_v17 = vpop.f32.mrf.mxu1  ;;  %v6309_v20 = vpop.f32.mrf.mxu0  ;;  %4393 = vmatmul.mubr.bf16.gmra.mxu0 %v7630_v28  ;;  %4490 = vmatmul.mubr.bf16.gmra.mxu1 %v7633_v48  ;;  %v7648_v28 = vld [vmem:[%s8044_s11 + $0x8ac] ss:$84 sps:$4 sm:$0xff]   ;;  %v7651_v48 = vld [vmem:[%s8044_s11 + $0x374] ss:$84 sps:$4 sm:$0xff]  }
 0x166   : > { %v8743_v27 = vadd.f32 %v6244_v44, %v3746_v26  ;;  %v8746_v29 = vadd.f32 %v6308_v2, %v8559_v43  ;;  %4400 = vmatprep.mubr.bf16.mxu0 %v7638_v52  ;;  %4497 = vmatprep.mubr.bf16.mxu1 %v7641_v4  ;;  %v7646_v2 = vld [vmem:[%s8044_s11 + $0x8a8] ss:$84 sps:$4 sm:$0xff]  }
 0x167   : > { %v6246_v22 = vpop.f32.mrf.mxu1  ;;  %v6310_v32 = vpop.f32.mrf.mxu0  ;;  %6848 = vmatpush3.bf16.msra.mxu1 %v7707_v3 }
 0x168   : > { %v6247_v41 = vadd.f32 %v6246_v22, %v6245_v17  ;;  %v6311_v0 = vadd.f32 %v6310_v32, %v6309_v20  ;;  %6849 = vmatprep.subr.bf16.mxu1 %v7722_v10  ;;  %v7649_v17 = vld [vmem:[%s8044_s11 + $0x370] ss:$84 sps:$4 sm:$0xff]  }
 0x169   : > { %v6248_v43 = vpop.f32.mrf.mxu1  ;;  %v6312_v14 = vpop.f32.mrf.mxu0 }
 0x16a   : > { %v8755_v16 = vadd.f32 %v6247_v41, %v3751_v40  ;;  %v8758_v45 = vadd.f32 %v6311_v0, %v8570_v59 }
 0x16b   : > { %v6249_v7 = vpop.f32.mrf.mxu1  ;;  %v6313_v49 = vpop.f32.mrf.mxu0  ;;  %6850 = vmatpush3.bf16.msra.mxu1 %v7723_v25 }
 0x16c   : > { %v6250_v57 = vadd.f32 %v6249_v7, %v6248_v43  ;;  %v6314_v37 = vadd.f32 %v6313_v49, %v6312_v14  ;;  %7059 = vmatprep.subr.bf16.mxu1 %v7738_v33  ;;  %v7657_v33 = vld [vmem:[%s8044_s11 + $0x41c] ss:$84 sps:$4 sm:$0xff]  }
 0x16d   : > { %v6251_v34 = vpop.f32.mrf.mxu1  ;;  %v6315_v52 = vpop.f32.mrf.mxu0  ;;  %4401 = vmatmul.mubr.bf16.gmra.mxu0 %v7636_v46  ;;  %4498 = vmatmul.mubr.bf16.gmra.mxu1 %v7639_v58  ;;  %v3762_v46 = vadd.f32 %v8736_v12, %v8425_v23  ;;  %v3767_v23 = vadd.f32 %v8736_v12, %v8431_v31 }
 0x16e   : > { %v8764_v59 = vadd.f32 %v6250_v57, %v3754_v56  ;;  %v8767_v4 = vadd.f32 %v6314_v37, %v8578_v6  ;;  %4408 = vmatprep.mubr.bf16.mxu0 %v7648_v28  ;;  %4505 = vmatprep.mubr.bf16.mxu1 %v7651_v48  ;;  %v7654_v6 = vld [vmem:[%s8044_s11 + $0x954] ss:$84 sps:$4 sm:$0xff]   ;;  %v7652_v56 = vld [vmem:[%s8044_s11 + $0x950] ss:$84 sps:$4 sm:$0xff]   ;;  %v7655_v57 = vld [vmem:[%s8044_s11 + $0x418] ss:$84 sps:$4 sm:$0xff]  }
 0x16f   : > { %v6252_v5 = vpop.f32.mrf.mxu1  ;;  %v6316_v30 = vpop.f32.mrf.mxu0 }
 0x170   : > { %v6253_v3 = vadd.f32 %v6252_v5, %v6251_v34  ;;  %v6317_v10 = vadd.f32 %v6316_v30, %v6315_v52  ;;  %v7667_v52 = vld [vmem:[%s8044_s11 + $0x4c4] ss:$84 sps:$4 sm:$0xff]  }
 0x171   : > { %v6254_v26 = vpop.f32.mrf.mxu1  ;;  %v6318_v44 = vpop.f32.mrf.mxu0 }
 0x172   : > { %v8773_v20 = vadd.f32 %v6253_v3, %v3759_v11  ;;  %v8776_v25 = vadd.f32 %v6317_v10, %v8586_v21  ;;  %v3770_v11 = vadd.f32 %v8736_v12, %v8437_v39  ;;  %v3775_v39 = vadd.f32 %v8736_v12, %v8443_v47 }
 0x173   : > { %v6255_v22 = vpop.f32.mrf.mxu1  ;;  %v6319_v32 = vpop.f32.mrf.mxu0 }
 0x174   : > { %v6256_v58 = vadd.f32 %v6255_v22, %v6254_v26  ;;  %v6320_v15 = vadd.f32 %v6319_v32, %v6318_v44 }
 0x175   : > { %v6257_v40 = vpop.f32.mrf.mxu1  ;;  %v6321_v41 = vpop.f32.mrf.mxu0  ;;  %4409 = vmatmul.mubr.bf16.gmra.mxu0 %v7646_v2  ;;  %4506 = vmatmul.mubr.bf16.gmra.mxu1 %v7649_v17 }
 0x176   : > { %v8782_v0 = vadd.f32 %v6256_v58, %v3762_v46  ;;  %v8785_v21 = vadd.f32 %v6320_v15, %v8594_v36  ;;  %4416 = vmatprep.mubr.bf16.mxu0 %v7654_v6  ;;  %4513 = vmatprep.mubr.bf16.mxu1 %v7657_v33  ;;  %v7664_v36 = vld [vmem:[%s8044_s11 + $0x9fc] ss:$84 sps:$4 sm:$0xff]   ;;  %v7662_v46 = vld [vmem:[%s8044_s11 + $0x9f8] ss:$84 sps:$4 sm:$0xff]   ;;  %v7665_v58 = vld [vmem:[%s8044_s11 + $0x4c0] ss:$84 sps:$4 sm:$0xff]  }
 0x177   : > { %v6258_v43 = vpop.f32.mrf.mxu1  ;;  %v6322_v14 = vpop.f32.mrf.mxu0 }
 0x178   : > { %v6259_v28 = vadd.f32 %v6258_v43, %v6257_v40  ;;  %v6323_v48 = vadd.f32 %v6322_v14, %v6321_v41  ;;  %v7673_v41 = vld [vmem:[%s8044_s11 + $0x34] ss:$84 sps:$4 sm:$0xff]  }
 0x179   : > { %v6260_v7 = vpop.f32.mrf.mxu1  ;;  %v6324_v49 = vpop.f32.mrf.mxu0 }
 0x17a   : > { %v8791_v37 = vadd.f32 %v6259_v28, %v3767_v23  ;;  %v8794_v34 = vadd.f32 %v6323_v48, %v8602_v50  ;;  %v3778_v23 = vadd.f32 %v8736_v12, %v8449_v55  ;;  %v3783_v55 = vadd.f32 %v8736_v12, %v8455_v63  ;;  %v7692_v63 = vld [vmem:[%s9925_s1 + $0x470] sm:$0xff]  }
 0x17b   : > { %v6261_v5 = vpop.f32.mrf.mxu1  ;;  %v6325_v30 = vpop.f32.mrf.mxu0 }
 0x17c   : > { %v6262_v3 = vadd.f32 %v6261_v5, %v6260_v7  ;;  %v6326_v31 = vadd.f32 %v6325_v30, %v6324_v49 }
 0x17d   : > { %v6263_v10 = vpop.f32.mrf.mxu1  ;;  %v6327_v26 = vpop.f32.mrf.mxu0  ;;  %4417 = vmatmul.mubr.bf16.gmra.mxu0 %v7652_v56  ;;  %4514 = vmatmul.mubr.bf16.gmra.mxu1 %v7655_v57 }
 0x17e   : > { %v8800_v44 = vadd.f32 %v6262_v3, %v3770_v11  ;;  %v8803_v50 = vadd.f32 %v6326_v31, %v8610_v62  ;;  %4424 = vmatprep.mubr.bf16.mxu0 %v7664_v36  ;;  %4521 = vmatprep.mubr.bf16.mxu1 %v7667_v52  ;;  %v7670_v62 = vld [vmem:[%s8044_s11 + $0x56c] ss:$84 sps:$4 sm:$0xff]   ;;  %v7668_v11 = vld [vmem:[%s8044_s11 + $0x568] ss:$84 sps:$4 sm:$0xff]   ;;  %v7671_v3 = vld [vmem:[%s8044_s11 + $0x30] ss:$84 sps:$4 sm:$0xff]  }
 0x17f   : > { %v6264_v2 = vpop.f32.mrf.mxu1  ;;  %v6328_v17 = vpop.f32.mrf.mxu0 }
 0x180   : > { %v6265_v6 = vadd.f32 %v6264_v2, %v6263_v10  ;;  %v6329_v33 = vadd.f32 %v6328_v17, %v6327_v26  ;;  %v7680_v26 = vld [vmem:[%s8044_s11 + $0x614] ss:$84 sps:$4 sm:$0xff]  }
 0x181   : > { %v6266_v22 = vpop.f32.mrf.mxu1  ;;  %v6330_v32 = vpop.f32.mrf.mxu0 }
 0x182   : > { %v8809_v15 = vadd.f32 %v6265_v6, %v3775_v39  ;;  %v8812_v40 = vadd.f32 %v6329_v33, %v8618_v18  ;;  %v7683_v39 = vld [vmem:[%s8044_s11 + $0xdc] ss:$84 sps:$4 sm:$0xff]   ;;  %v3786_v6 = vadd.f32 %v8736_v12, %v8467_v9 }
 0x183   : > { %v6267_v43 = vpop.f32.mrf.mxu1  ;;  %v6331_v14 = vpop.f32.mrf.mxu0  ;;  %v7693_v9 = vld [vmem:[%s9925_s1 + $0x430] sm:$0xff]  }
 0x184   : > { %v6268_v28 = vadd.f32 %v6267_v43, %v6266_v22  ;;  %v6332_v47 = vadd.f32 %v6331_v14, %v6330_v32 }
 0x185   : > { %v6269_v48 = vpop.f32.mrf.mxu1  ;;  %v6333_v7 = vpop.f32.mrf.mxu0  ;;  %4425 = vmatmul.mubr.bf16.gmra.mxu0 %v7662_v46  ;;  %4522 = vmatmul.mubr.bf16.gmra.mxu1 %v7665_v58 }
 0x186   : > { %v8818_v49 = vadd.f32 %v6268_v28, %v3778_v23  ;;  %v8821_v18 = vadd.f32 %v6332_v47, %v8626_v35  ;;  %4529 = vmatprep.mubr.bf16.mxu1 %v7670_v62  ;;  %4626 = vmatprep.mubr.bf16.mxu0 %v7673_v41  ;;  %v7677_v35 = vld [vmem:[%s9925_s1 + $0x438] sm:$0xff]   ;;  %v7708_v41 = vld [vmem:[%s9925_s1 + $0x468] sm:$0xff]   ;;  %v7678_v28 = vld [vmem:[%s8044_s11 + $0x610] ss:$84 sps:$4 sm:$0xff]  }
 0x187   : > { %v6270_v56 = vpop.f32.mrf.mxu1  ;;  %v6334_v57 = vpop.f32.mrf.mxu0  ;;  %v7681_v47 = vld [vmem:[%s8044_s11 + $0xd8] ss:$84 sps:$4 sm:$0xff]  }
 0x188   : > { %v6271_v36 = vadd.f32 %v6270_v56, %v6269_v48  ;;  %v6335_v52 = vadd.f32 %v6334_v57, %v6333_v7  ;;  %v7686_v56 = vld [vmem:[%s8044_s11 + $0x6bc] ss:$84 sps:$4 sm:$0xff]   ;;  %v7689_v57 = vld [vmem:[%s8044_s11 + $0x184] ss:$84 sps:$4 sm:$0xff]  }
 0x189   : > { %v6272_v5 = vpop.f32.mrf.mxu1  ;;  %v6336_v30 = vpop.f32.mrf.mxu0 }
 0x18a   : > { %v8827_v31 = vadd.f32 %v6271_v36, %v3783_v55  ;;  %v8830_v10 = vadd.f32 %v6335_v52, %v8634_v53  ;;  %v7709_v52 = vld [vmem:[%s9925_s1 + $0x428] sm:$0xff]  }
 0x18b   : > { %v6273_v2 = vpop.f32.mrf.mxu1  ;;  %v6337_v17 = vpop.f32.mrf.mxu0 }
 0x18c   : > { %v6274_v33 = vadd.f32 %v6273_v2, %v6272_v5  ;;  %v6338_v22 = vadd.f32 %v6337_v17, %v6336_v30  ;;  %v7725_v17 = vld [vmem:[%s9925_s1 + $0x420] sm:$0xff]  }
 0x18d   : > { %v6339_v32 = vpop.f32.mrf.mxu0  ;;  %v6403_v53 = vpop.f32.mrf.mxu1  ;;  %4530 = vmatmul.mubr.bf16.gmra.mxu1 %v7668_v11  ;;  %4627 = vmatmul.mubr.bf16.vlgmr.msra.gmra.mxu0 %v7671_v3 }
 0x18e   : > { %v8842_v46 = vadd.f32 %v6274_v33, %v3786_v6  ;;  %v8845_v58 = vadd.f32 %v6338_v22, %v8648_v38  ;;  %6948 = vmatpush3.bf16.msra.mxu0 %v7677_v35  ;;  %4537 = vmatprep.mubr.bf16.mxu1 %v7680_v26  ;;  %v7684_v33 = vld [vmem:[%s8044_s11 + $0x6b8] ss:$84 sps:$4 sm:$0xff]   ;;  %v7687_v22 = vld [vmem:[%s8044_s11 + $0x180] ss:$84 sps:$4 sm:$0xff]  }
 0x18f   : > { %v6340_v12 = vpop.f32.mrf.mxu0  ;;  %v6404_v62 = vpop.f32.mrf.mxu1  ;;  %4634 = vmatprep.mubr.bf16.mxu0 %v7683_v39  ;;  %6949 = vmatprep.subr.bf16.mxu0 %v7692_v63 }
 0x190   : > { %v6341_v43 = vadd.f32 %v6340_v12, %v6339_v32  ;;  %v6405_v14 = vadd.f32 %v6404_v62, %v6403_v53  ;;  %v7699_v12 = vld [vmem:[%s8044_s11 + $0x22c] ss:$84 sps:$4 sm:$0xff]  }
 0x191   : > { %v6342_v38 = vpop.f32.mrf.mxu0  ;;  %v6406_v23 = vpop.f32.mrf.mxu1 }
 0x192   : > { %v8856_v48 = vadd.f32 %v6341_v43, %v8660_v19  ;;  %v8859_v7 = vadd.f32 %v6405_v14, %v8663_v24  ;;  %6950 = vmatpush3.bf16.msra.mxu0 %v7693_v9  ;;  %v7724_v19 = vld [vmem:[%s9925_s1 + $0x460] sm:$0xff]   ;;  %v7741_v43 = vld [vmem:[%s9925_s1 + $0x418] sm:$0xff]  }
 0x193   : > { %v6343_v55 = vpop.f32.mrf.mxu0  ;;  %v6407_v36 = vpop.f32.mrf.mxu1  ;;  %6951 = vmatprep.subr.bf16.mxu0 %v7708_v41  ;;  %v7696_v9 = vld [vmem:[%s8044_s11 + $0x764] ss:$84 sps:$4 sm:$0xff]  }
 0x194   : > { %v6344_v5 = vadd.f32 %v6343_v55, %v6342_v38  ;;  %v6408_v30 = vadd.f32 %v6407_v36, %v6406_v23  ;;  %v7757_v55 = vld [vmem:[%s9925_s1 + $0x410] sm:$0xff]  }
 0x195   : > { %v6345_v11 = vpop.f32.mrf.mxu0  ;;  %v6409_v3 = vpop.f32.mrf.mxu1  ;;  %4538 = vmatmul.mubr.bf16.gmra.mxu1 %v7678_v28  ;;  %4635 = vmatmul.mubr.bf16.gmra.mxu0 %v7681_v47 }
 0x196   : > { %v8870_v24 = vadd.f32 %v6344_v5, %v8678_v60  ;;  %v8873_v35 = vadd.f32 %v6408_v30, %v8681_v61  ;;  %4545 = vmatprep.mubr.bf16.mxu1 %v7686_v56  ;;  %4642 = vmatprep.mubr.bf16.mxu0 %v7689_v57  ;;  %v7740_v60 = vld [vmem:[%s9925_s1 + $0x458] sm:$0xff]   ;;  %v7694_v30 = vld [vmem:[%s8044_s11 + $0x760] ss:$84 sps:$4 sm:$0xff]  }
 0x197   : > { %v6346_v26 = vpop.f32.mrf.mxu0  ;;  %v6410_v2 = vpop.f32.mrf.mxu1  ;;  %6952 = vmatpush3.bf16.msra.mxu0 %v7709_v52 }
 0x198   : > { %v6347_v39 = vadd.f32 %v6346_v26, %v6345_v11  ;;  %v6411_v63 = vadd.f32 %v6410_v2, %v6409_v3  ;;  %6953 = vmatprep.subr.bf16.mxu0 %v7724_v19  ;;  %v7697_v19 = vld [vmem:[%s8044_s11 + $0x228] ss:$84 sps:$4 sm:$0xff]   ;;  %v7702_v26 = vld [vmem:[%s8044_s11 + $0x80c] ss:$84 sps:$4 sm:$0xff]  }
 0x199   : > { %v6348_v61 = vpop.f32.mrf.mxu0  ;;  %v6412_v6 = vpop.f32.mrf.mxu1  ;;  %v7705_v2 = vld [vmem:[%s8044_s11 + $0x2d4] ss:$84 sps:$4 sm:$0xff]  }
 0x19a   : > { %v8884_v32 = vadd.f32 %v6347_v39, %v8690_v13  ;;  %v8887_v53 = vadd.f32 %v6411_v63, %v8693_v8  ;;  %v7756_v13 = vld [vmem:[%s9925_s1 + $0x450] sm:$0xff]   ;;  %v7773_v63 = vld [vmem:[%s9925_s1 + $0x408] sm:$0xff]  }
 0x19b   : > { %v6349_v62 = vpop.f32.mrf.mxu0  ;;  %v6413_v41 = vpop.f32.mrf.mxu1  ;;  %6954 = vmatpush3.bf16.msra.mxu0 %v7725_v17 }
 0x19c   : > { %v6350_v14 = vadd.f32 %v6349_v62, %v6348_v61  ;;  %v6414_v38 = vadd.f32 %v6413_v41, %v6412_v6  ;;  %6955 = vmatprep.subr.bf16.mxu0 %v7740_v60  ;;  %v7789_v62 = vld [vmem:[%s9925_s1 + $0x400] sm:$0xff]  }
 0x19d   : > { %v6351_v23 = vpop.f32.mrf.mxu0  ;;  %v6415_v28 = vpop.f32.mrf.mxu1  ;;  %4546 = vmatmul.mubr.bf16.gmra.mxu1 %v7684_v33  ;;  %4643 = vmatmul.mubr.bf16.gmra.mxu0 %v7687_v22 }
 0x19e   : > { %v8898_v8 = vadd.f32 %v6350_v14, %v8705_v42  ;;  %v8901_v47 = vadd.f32 %v6414_v38, %v8708_v54  ;;  %4553 = vmatprep.mubr.bf16.mxu1 %v7696_v9  ;;  %4650 = vmatprep.mubr.bf16.mxu0 %v7699_v12  ;;  %v7772_v42 = vld [vmem:[%s9925_s1 + $0x448] sm:$0xff]  }
 0x19f   : > { %v6352_v56 = vpop.f32.mrf.mxu0  ;;  %v6416_v57 = vpop.f32.mrf.mxu1  ;;  %6956 = vmatpush3.bf16.msra.mxu0 %v7741_v43  ;;  %v7700_v38 = vld [vmem:[%s8044_s11 + $0x808] ss:$84 sps:$4 sm:$0xff]  }
 0x1a0   : > { %v6353_v36 = vadd.f32 %v6352_v56, %v6351_v23  ;;  %v6417_v52 = vadd.f32 %v6416_v57, %v6415_v28  ;;  %6957 = vmatprep.subr.bf16.mxu0 %v7756_v13  ;;  %v7703_v13 = vld [vmem:[%s8044_s11 + $0x2d0] ss:$84 sps:$4 sm:$0xff]   ;;  %v7712_v56 = vld [vmem:[%s8044_s11 + $0x8b4] ss:$84 sps:$4 sm:$0xff]  }
 0x1a1   : > { %v6354_v54 = vpop.f32.mrf.mxu0  ;;  %v6418_v5 = vpop.f32.mrf.mxu1  ;;  %v7715_v57 = vld [vmem:[%s8044_s11 + $0x37c] ss:$84 sps:$4 sm:$0xff]  }
 0x1a2   : > { %v8912_v11 = vadd.f32 %v6353_v36, %v8720_v1  ;;  %v8915_v3 = vadd.f32 %v6417_v52, %v8723_v51  ;;  %v7788_v1 = vld [vmem:[%s9925_s1 + $0x440] sm:$0xff]  }
 0x1a3   : > { %v6355_v17 = vpop.f32.mrf.mxu0  ;;  %v6419_v39 = vpop.f32.mrf.mxu1  ;;  %6958 = vmatpush3.bf16.msra.mxu0 %v7757_v55 }
 0x1a4   : > { %v6356_v60 = vadd.f32 %v6355_v17, %v6354_v54  ;;  %v6420_v61 = vadd.f32 %v6419_v39, %v6418_v5  ;;  %6959 = vmatprep.subr.bf16.mxu0 %v7772_v42 }
 0x1a5   : > { %v6357_v6 = vpop.f32.mrf.mxu0  ;;  %v6421_v33 = vpop.f32.mrf.mxu1  ;;  %4554 = vmatmul.mubr.bf16.gmra.mxu1 %v7694_v30  ;;  %4651 = vmatmul.mubr.bf16.gmra.mxu0 %v7697_v19 }
 0x1a6   : > { %v8926_v51 = vadd.f32 %v6356_v60, %v8743_v27  ;;  %v8929_v22 = vadd.f32 %v6420_v61, %v8746_v29  ;;  %4561 = vmatprep.mubr.bf16.mxu1 %v7702_v26  ;;  %4658 = vmatprep.mubr.bf16.mxu0 %v7705_v2  ;;  %v8937_v27 = vld [vmem:[%s9925_s1 + $0x538] sm:$0xff]  }
 0x1a7   : > { %v6358_v9 = vpop.f32.mrf.mxu0  ;;  %v6422_v12 = vpop.f32.mrf.mxu1  ;;  %6960 = vmatpush3.bf16.msra.mxu0 %v7773_v63  ;;  %v7710_v63 = vld [vmem:[%s8044_s11 + $0x8b0] ss:$84 sps:$4 sm:$0xff]   ;;  %v7713_v60 = vld [vmem:[%s8044_s11 + $0x378] ss:$84 sps:$4 sm:$0xff]  }
 0x1a8   : > { %v6359_v41 = vadd.f32 %v6358_v9, %v6357_v6  ;;  %v6423_v43 = vadd.f32 %v6422_v12, %v6421_v33  ;;  %6961 = vmatprep.subr.bf16.mxu0 %v7788_v1  ;;  %v7721_v6 = vld [vmem:[%s8044_s11 + $0x424] ss:$84 sps:$4 sm:$0xff]  }
 0x1a9   : > { %v6360_v29 = vpop.f32.mrf.mxu0  ;;  %v6424_v14 = vpop.f32.mrf.mxu1 }
 0x1aa   : > { %v8942_v23 = vadd.f32 %v6359_v41, %v8755_v16  ;;  %v8945_v28 = vadd.f32 %v6423_v43, %v8758_v45 }
 0x1ab   : > { %v6361_v55 = vpop.f32.mrf.mxu0  ;;  %v6425_v36 = vpop.f32.mrf.mxu1  ;;  %6962 = vmatpush3.bf16.msra.mxu0 %v7789_v62 }
 0x1ac   : > { %v6362_v52 = vadd.f32 %v6361_v55, %v6360_v29  ;;  %v6426_v42 = vadd.f32 %v6425_v36, %v6424_v14  ;;  %7195 = vmatprep.subr.bf16.mxu0 %v8937_v27  ;;  %v7719_v55 = vld [vmem:[%s8044_s11 + $0x420] ss:$84 sps:$4 sm:$0xff]  }
 0x1ad   : > { %v6363_v54 = vpop.f32.mrf.mxu0  ;;  %v6427_v5 = vpop.f32.mrf.mxu1  ;;  %4562 = vmatmul.mubr.bf16.gmra.mxu1 %v7700_v38  ;;  %4659 = vmatmul.mubr.bf16.gmra.mxu0 %v7703_v13 }
 0x1ae   : > { %v8951_v16 = vadd.f32 %v6362_v52, %v8764_v59  ;;  %v8954_v45 = vadd.f32 %v6426_v42, %v8767_v4  ;;  %4569 = vmatprep.mubr.bf16.mxu1 %v7712_v56  ;;  %4666 = vmatprep.mubr.bf16.mxu0 %v7715_v57  ;;  %v7718_v59 = vld [vmem:[%s8044_s11 + $0x95c] ss:$84 sps:$4 sm:$0xff]   ;;  %v7716_v57 = vld [vmem:[%s8044_s11 + $0x958] ss:$84 sps:$4 sm:$0xff]  }
 0x1af   : > { %v6364_v30 = vpop.f32.mrf.mxu0  ;;  %v6428_v19 = vpop.f32.mrf.mxu1  ;;  %v7731_v42 = vld [vmem:[%s8044_s11 + $0x4cc] ss:$84 sps:$4 sm:$0xff]  }
 0x1b0   : > { %v6365_v26 = vadd.f32 %v6364_v30, %v6363_v54  ;;  %v6429_v2 = vadd.f32 %v6428_v19, %v6427_v5 }
 0x1b1   : > { %v6366_v17 = vpop.f32.mrf.mxu0  ;;  %v6430_v39 = vpop.f32.mrf.mxu1 }
 0x1b2   : > { %v8959_v61 = vadd.f32 %v6365_v26, %v8773_v20  ;;  %v8962_v1 = vadd.f32 %v6429_v2, %v8776_v25 }
 0x1b3   : > { %v6367_v4 = vpop.f32.mrf.mxu0  ;;  %v6431_v33 = vpop.f32.mrf.mxu1 }
 0x1b4   : > { %v6368_v9 = vadd.f32 %v6367_v4, %v6366_v17  ;;  %v6432_v12 = vadd.f32 %v6431_v33, %v6430_v39  ;;  %v7729_v4 = vld [vmem:[%s8044_s11 + $0x4c8] ss:$84 sps:$4 sm:$0xff]  }
 0x1b5   : > { %v6369_v62 = vpop.f32.mrf.mxu0  ;;  %v6433_v41 = vpop.f32.mrf.mxu1  ;;  %4570 = vmatmul.mubr.bf16.gmra.mxu1 %v7710_v63  ;;  %4667 = vmatmul.mubr.bf16.gmra.mxu0 %v7713_v60 }
 0x1b6   : > { %v8967_v20 = vadd.f32 %v6368_v9, %v8782_v0  ;;  %v8970_v25 = vadd.f32 %v6432_v12, %v8785_v21  ;;  %4577 = vmatprep.mubr.bf16.mxu1 %v7718_v59  ;;  %4674 = vmatprep.mubr.bf16.mxu0 %v7721_v6  ;;  %v7728_v0 = vld [vmem:[%s8044_s11 + $0xa04] ss:$84 sps:$4 sm:$0xff]   ;;  %v7726_v6 = vld [vmem:[%s8044_s11 + $0xa00] ss:$84 sps:$4 sm:$0xff]   ;;  %v7737_v12 = vld [vmem:[%s8044_s11 + $0x3c] ss:$84 sps:$4 sm:$0xff]  }
 0x1b7   : > { %v6370_v43 = vpop.f32.mrf.mxu0  ;;  %v6434_v29 = vpop.f32.mrf.mxu1 }
 0x1b8   : > { %v6371_v14 = vadd.f32 %v6370_v43, %v6369_v62  ;;  %v6435_v38 = vadd.f32 %v6434_v29, %v6433_v41 }
 0x1b9   : > { %v6372_v13 = vpop.f32.mrf.mxu0  ;;  %v6436_v56 = vpop.f32.mrf.mxu1 }
 0x1ba   : > { %v8975_v36 = vadd.f32 %v6371_v14, %v8791_v37  ;;  %v8978_v52 = vadd.f32 %v6435_v38, %v8794_v34 }
 0x1bb   : > { %v6373_v21 = vpop.f32.mrf.mxu0  ;;  %v6437_v54 = vpop.f32.mrf.mxu1 }
 0x1bc   : > { %v6374_v5 = vadd.f32 %v6373_v21, %v6372_v13  ;;  %v6438_v30 = vadd.f32 %v6437_v54, %v6436_v56  ;;  %v7735_v21 = vld [vmem:[%s8044_s11 + $0x38] ss:$84 sps:$4 sm:$0xff]  }
 0x1bd   : > { %v6375_v19 = vpop.f32.mrf.mxu0  ;;  %v6439_v26 = vpop.f32.mrf.mxu1  ;;  %4578 = vmatmul.mubr.bf16.gmra.mxu1 %v7716_v57  ;;  %4675 = vmatmul.mubr.bf16.gmra.mxu0 %v7719_v55 }
 0x1be   : > { %v8983_v37 = vadd.f32 %v6374_v5, %v8800_v44  ;;  %v8986_v34 = vadd.f32 %v6438_v30, %v8803_v50  ;;  %4585 = vmatprep.mubr.bf16.mxu1 %v7728_v0  ;;  %4682 = vmatprep.mubr.bf16.mxu0 %v7731_v42  ;;  %v7734_v44 = vld [vmem:[%s8044_s11 + $0x574] ss:$84 sps:$4 sm:$0xff]   ;;  %v7732_v42 = vld [vmem:[%s8044_s11 + $0x570] ss:$84 sps:$4 sm:$0xff]  }
 0x1bf   : > { %v6376_v2 = vpop.f32.mrf.mxu0  ;;  %v6440_v17 = vpop.f32.mrf.mxu1  ;;  %v7744_v5 = vld [vmem:[%s8044_s11 + $0x61c] ss:$84 sps:$4 sm:$0xff]  }
 0x1c0   : > { %v6377_v39 = vadd.f32 %v6376_v2, %v6375_v19  ;;  %v6441_v63 = vadd.f32 %v6440_v17, %v6439_v26  ;;  %v7747_v26 = vld [vmem:[%s8044_s11 + $0xe4] ss:$84 sps:$4 sm:$0xff]   ;;  %v7754_v2 = vld [vmem:[%s9925_s1 + $0x4f0] sm:$0xff]  }
 0x1c1   : > { %v6378_v60 = vpop.f32.mrf.mxu0  ;;  %v6442_v59 = vpop.f32.mrf.mxu1 }
 0x1c2   : > { %v8991_v33 = vadd.f32 %v6377_v39, %v8809_v15  ;;  %v8994_v9 = vadd.f32 %v6441_v63, %v8812_v40 }
 0x1c3   : > { %v6379_v50 = vpop.f32.mrf.mxu0  ;;  %v6443_v62 = vpop.f32.mrf.mxu1 }
 0x1c4   : > { %v6380_v41 = vadd.f32 %v6379_v50, %v6378_v60  ;;  %v6444_v43 = vadd.f32 %v6443_v62, %v6442_v59  ;;  %v7755_v59 = vld [vmem:[%s9925_s1 + $0x4b0] sm:$0xff]   ;;  %v7742_v62 = vld [vmem:[%s8044_s11 + $0x618] ss:$84 sps:$4 sm:$0xff]  }
 0x1c5   : > { %v6381_v29 = vpop.f32.mrf.mxu0  ;;  %v6445_v14 = vpop.f32.mrf.mxu1  ;;  %4586 = vmatmul.mubr.bf16.gmra.mxu1 %v7726_v6  ;;  %4683 = vmatmul.mubr.bf16.gmra.mxu0 %v7729_v4 }
 0x1c6   : > { %v8999_v38 = vadd.f32 %v6380_v41, %v8818_v49  ;;  %v9002_v15 = vadd.f32 %v6444_v43, %v8821_v18  ;;  %4690 = vmatprep.mubr.bf16.mxu0 %v7734_v44  ;;  %4787 = vmatprep.mubr.bf16.mxu1 %v7737_v12  ;;  %v7739_v18 = vld [vmem:[%s9925_s1 + $0x4b8] sm:$0xff]   ;;  %v7745_v41 = vld [vmem:[%s8044_s11 + $0xe0] ss:$84 sps:$4 sm:$0xff]  }
 0x1c7   : > { %v6382_v40 = vpop.f32.mrf.mxu0  ;;  %v6446_v13 = vpop.f32.mrf.mxu1 }
 0x1c8   : > { %v6383_v56 = vadd.f32 %v6382_v40, %v6381_v29  ;;  %v6447_v57 = vadd.f32 %v6446_v13, %v6445_v14  ;;  %v7750_v14 = vld [vmem:[%s8044_s11 + $0x6c4] ss:$84 sps:$4 sm:$0xff]   ;;  %v7753_v40 = vld [vmem:[%s8044_s11 + $0x18c] ss:$84 sps:$4 sm:$0xff]  }
 0x1c9   : > { %v6384_v55 = vpop.f32.mrf.mxu0  ;;  %v6448_v0 = vpop.f32.mrf.mxu1 }
 0x1ca   : > { %v9007_v54 = vadd.f32 %v6383_v56, %v8827_v31  ;;  %v9010_v49 = vadd.f32 %v6447_v57, %v8830_v10  ;;  %v7771_v57 = vld [vmem:[%s9925_s1 + $0x4a8] sm:$0xff]  }
 0x1cb   : > { %v6385_v30 = vpop.f32.mrf.mxu0  ;;  %v6449_v19 = vpop.f32.mrf.mxu1 }
 0x1cc   : > { %v6386_v17 = vadd.f32 %v6385_v30, %v6384_v55  ;;  %v6450_v39 = vadd.f32 %v6449_v19, %v6448_v0  ;;  %v7787_v19 = vld [vmem:[%s9925_s1 + $0x4a0] sm:$0xff]  }
 0x1cd   : > { %v6451_v63 = vpop.f32.mrf.mxu1  ;;  %v6515_v31 = vpop.f32.mrf.mxu0  ;;  %4691 = vmatmul.mubr.bf16.gmra.mxu0 %v7732_v42  ;;  %4788 = vmatmul.mubr.bf16.vlgmr.msra.gmra.mxu1 %v7735_v21 }
 0x1ce   : > { %v9021_v10 = vadd.f32 %v6386_v17, %v8842_v46  ;;  %v9024_v60 = vadd.f32 %v6450_v39, %v8845_v58  ;;  %7060 = vmatpush3.bf16.msra.mxu1 %v7739_v18  ;;  %4698 = vmatprep.mubr.bf16.mxu0 %v7744_v5  ;;  %v7770_v46 = vld [vmem:[%s9925_s1 + $0x4e8] sm:$0xff]   ;;  %v7748_v39 = vld [vmem:[%s8044_s11 + $0x6c0] ss:$84 sps:$4 sm:$0xff]  }
 0x1cf   : > { %v6452_v6 = vpop.f32.mrf.mxu1  ;;  %v6516_v4 = vpop.f32.mrf.mxu0  ;;  %4795 = vmatprep.mubr.bf16.mxu1 %v7747_v26  ;;  %7061 = vmatprep.subr.bf16.mxu1 %v7754_v2 }
 0x1d0   : > { %v6453_v44 = vadd.f32 %v6452_v6, %v6451_v63  ;;  %v6517_v12 = vadd.f32 %v6516_v4, %v6515_v31  ;;  %v7751_v63 = vld [vmem:[%s8044_s11 + $0x188] ss:$84 sps:$4 sm:$0xff]   ;;  %v7760_v6 = vld [vmem:[%s8044_s11 + $0x76c] ss:$84 sps:$4 sm:$0xff]  }
 0x1d1   : > { %v6454_v58 = vpop.f32.mrf.mxu1  ;;  %v6518_v50 = vpop.f32.mrf.mxu0  ;;  %v7763_v4 = vld [vmem:[%s8044_s11 + $0x234] ss:$84 sps:$4 sm:$0xff]  }
 0x1d2   : > { %v9035_v43 = vadd.f32 %v6453_v44, %v8856_v48  ;;  %v9038_v29 = vadd.f32 %v6517_v12, %v8859_v7  ;;  %7062 = vmatpush3.bf16.msra.mxu1 %v7755_v59  ;;  %v7786_v48 = vld [vmem:[%s9925_s1 + $0x4e0] sm:$0xff]   ;;  %v7803_v12 = vld [vmem:[%s9925_s1 + $0x498] sm:$0xff]  }
 0x1d3   : > { %v6455_v13 = vpop.f32.mrf.mxu1  ;;  %v6519_v56 = vpop.f32.mrf.mxu0  ;;  %7063 = vmatprep.subr.bf16.mxu1 %v7770_v46 }
 0x1d4   : > { %v6456_v55 = vadd.f32 %v6455_v13, %v6454_v58  ;;  %v6520_v0 = vadd.f32 %v6519_v56, %v6518_v50  ;;  %v7818_v56 = vld [vmem:[%s9925_s1 + $0x490] sm:$0xff]  }
 0x1d5   : > { %v6457_v42 = vpop.f32.mrf.mxu1  ;;  %v6521_v21 = vpop.f32.mrf.mxu0  ;;  %4699 = vmatmul.mubr.bf16.gmra.mxu0 %v7742_v62  ;;  %4796 = vmatmul.mubr.bf16.gmra.mxu1 %v7745_v41 }
 0x1d6   : > { %v9049_v7 = vadd.f32 %v6456_v55, %v8870_v24  ;;  %v9052_v18 = vadd.f32 %v6520_v0, %v8873_v35  ;;  %4706 = vmatprep.mubr.bf16.mxu0 %v7750_v14  ;;  %4803 = vmatprep.mubr.bf16.mxu1 %v7753_v40  ;;  %v7802_v24 = vld [vmem:[%s9925_s1 + $0x4d8] sm:$0xff]  }
 0x1d7   : > { %v6458_v5 = vpop.f32.mrf.mxu1  ;;  %v6522_v30 = vpop.f32.mrf.mxu0  ;;  %7064 = vmatpush3.bf16.msra.mxu1 %v7771_v57 }
 0x1d8   : > { %v6459_v26 = vadd.f32 %v6458_v5, %v6457_v42  ;;  %v6523_v2 = vadd.f32 %v6522_v30, %v6521_v21  ;;  %7065 = vmatprep.subr.bf16.mxu1 %v7786_v48  ;;  %v7758_v48 = vld [vmem:[%s8044_s11 + $0x768] ss:$84 sps:$4 sm:$0xff]   ;;  %v7761_v42 = vld [vmem:[%s8044_s11 + $0x230] ss:$84 sps:$4 sm:$0xff]  }
 0x1d9   : > { %v6460_v35 = vpop.f32.mrf.mxu1  ;;  %v6524_v17 = vpop.f32.mrf.mxu0  ;;  %v7766_v30 = vld [vmem:[%s8044_s11 + $0x814] ss:$84 sps:$4 sm:$0xff]  }
 0x1da   : > { %v9063_v31 = vadd.f32 %v6459_v26, %v8884_v32  ;;  %v9066_v59 = vadd.f32 %v6523_v2, %v8887_v53  ;;  %v7817_v32 = vld [vmem:[%s9925_s1 + $0x4d0] sm:$0xff]  }
 0x1db   : > { %v6461_v46 = vpop.f32.mrf.mxu1  ;;  %v6525_v44 = vpop.f32.mrf.mxu0  ;;  %7066 = vmatpush3.bf16.msra.mxu1 %v7787_v19  ;;  %v7769_v19 = vld [vmem:[%s8044_s11 + $0x2dc] ss:$84 sps:$4 sm:$0xff]  }
 0x1dc   : > { %v6462_v58 = vadd.f32 %v6461_v46, %v6460_v35  ;;  %v6526_v50 = vadd.f32 %v6525_v44, %v6524_v17  ;;  %7067 = vmatprep.subr.bf16.mxu1 %v7802_v24  ;;  %v7833_v24 = vld [vmem:[%s9925_s1 + $0x488] sm:$0xff]   ;;  %v7848_v44 = vld [vmem:[%s9925_s1 + $0x480] sm:$0xff]  }
 0x1dd   : > { %v6463_v62 = vpop.f32.mrf.mxu1  ;;  %v6527_v41 = vpop.f32.mrf.mxu0  ;;  %4707 = vmatmul.mubr.bf16.gmra.mxu0 %v7748_v39  ;;  %4804 = vmatmul.mubr.bf16.gmra.mxu1 %v7751_v63 }
 0x1de   : > { %v9077_v53 = vadd.f32 %v6462_v58, %v8898_v8  ;;  %v9080_v14 = vadd.f32 %v6526_v50, %v8901_v47  ;;  %4714 = vmatprep.mubr.bf16.mxu0 %v7760_v6  ;;  %4811 = vmatprep.mubr.bf16.mxu1 %v7763_v4  ;;  %v7832_v8 = vld [vmem:[%s9925_s1 + $0x4c8] sm:$0xff]  }
 0x1df   : > { %v6464_v40 = vpop.f32.mrf.mxu1  ;;  %v6528_v13 = vpop.f32.mrf.mxu0  ;;  %7068 = vmatpush3.bf16.msra.mxu1 %v7803_v12 }
 0x1e0   : > { %v6465_v57 = vadd.f32 %v6464_v40, %v6463_v62  ;;  %v6529_v55 = vadd.f32 %v6528_v13, %v6527_v41  ;;  %7069 = vmatprep.subr.bf16.mxu1 %v7817_v32  ;;  %v7764_v32 = vld [vmem:[%s8044_s11 + $0x810] ss:$84 sps:$4 sm:$0xff]   ;;  %v7767_v62 = vld [vmem:[%s8044_s11 + $0x2d8] ss:$84 sps:$4 sm:$0xff]  }
 0x1e1   : > { %v6466_v47 = vpop.f32.mrf.mxu1  ;;  %v6530_v0 = vpop.f32.mrf.mxu0  ;;  %v7776_v40 = vld [vmem:[%s8044_s11 + $0x8bc] ss:$84 sps:$4 sm:$0xff]   ;;  %v7779_v13 = vld [vmem:[%s8044_s11 + $0x384] ss:$84 sps:$4 sm:$0xff]  }
 0x1e2   : > { %v9091_v21 = vadd.f32 %v6465_v57, %v8912_v11  ;;  %v9094_v5 = vadd.f32 %v6529_v55, %v8915_v3  ;;  %v7847_v11 = vld [vmem:[%s9925_s1 + $0x4c0] sm:$0xff]  }
 0x1e3   : > { %v6467_v26 = vpop.f32.mrf.mxu1  ;;  %v6531_v2 = vpop.f32.mrf.mxu0  ;;  %7070 = vmatpush3.bf16.msra.mxu1 %v7818_v56 }
 0x1e4   : > { %v6468_v35 = vadd.f32 %v6467_v26, %v6466_v47  ;;  %v6532_v17 = vadd.f32 %v6531_v2, %v6530_v0  ;;  %7071 = vmatprep.subr.bf16.mxu1 %v7832_v8 }
 0x1e5   : > { %v6469_v39 = vpop.f32.mrf.mxu1  ;;  %v6533_v63 = vpop.f32.mrf.mxu0  ;;  %4715 = vmatmul.mubr.bf16.gmra.mxu0 %v7758_v48  ;;  %4812 = vmatmul.mubr.bf16.gmra.mxu1 %v7761_v42 }
 0x1e6   : > { %v9105_v3 = vadd.f32 %v6468_v35, %v8926_v51  ;;  %v9108_v6 = vadd.f32 %v6532_v17, %v8929_v22  ;;  %4722 = vmatprep.mubr.bf16.mxu0 %v7766_v30  ;;  %4819 = vmatprep.mubr.bf16.mxu1 %v7769_v19  ;;  %v7777_v35 = vld [vmem:[%s8044_s11 + $0x380] ss:$84 sps:$4 sm:$0xff]  }
 0x1e7   : > { %v6470_v4 = vpop.f32.mrf.mxu1  ;;  %v6534_v46 = vpop.f32.mrf.mxu0  ;;  %7072 = vmatpush3.bf16.msra.mxu1 %v7833_v24  ;;  %v7774_v24 = vld [vmem:[%s8044_s11 + $0x8b8] ss:$84 sps:$4 sm:$0xff]  }
 0x1e8   : > { %v6471_v12 = vadd.f32 %v6470_v4, %v6469_v39  ;;  %v6535_v58 = vadd.f32 %v6534_v46, %v6533_v63  ;;  %7073 = vmatprep.subr.bf16.mxu1 %v7847_v11  ;;  %v7785_v39 = vld [vmem:[%s8044_s11 + $0x42c] ss:$84 sps:$4 sm:$0xff]  }
 0x1e9   : > { %v6472_v50 = vpop.f32.mrf.mxu1  ;;  %v6536_v51 = vpop.f32.mrf.mxu0 }
 0x1ea   : > { %v9116_v22 = vadd.f32 %v6471_v12, %v8942_v23  ;;  %v9119_v41 = vadd.f32 %v6535_v58, %v8945_v28 }
 0x1eb   : > { %v6473_v56 = vpop.f32.mrf.mxu1  ;;  %v6537_v57 = vpop.f32.mrf.mxu0  ;;  %7074 = vmatpush3.bf16.msra.mxu1 %v7848_v44 }
 0x1ec   : > { %v6474_v55 = vadd.f32 %v6473_v56, %v6472_v50  ;;  %v6538_v8 = vadd.f32 %v6537_v57, %v6536_v51  ;;  %v7783_v56 = vld [vmem:[%s8044_s11 + $0x428] ss:$84 sps:$4 sm:$0xff]  }
 0x1ed   : > { %v6475_v47 = vpop.f32.mrf.mxu1  ;;  %v6539_v0 = vpop.f32.mrf.mxu0  ;;  %4723 = vmatmul.mubr.bf16.gmra.mxu0 %v7764_v32  ;;  %4820 = vmatmul.mubr.bf16.gmra.mxu1 %v7767_v62 }
 0x1ee   : > { %v9124_v23 = vadd.f32 %v6474_v55, %v8951_v16  ;;  %v9127_v28 = vadd.f32 %v6538_v8, %v8954_v45  ;;  %4730 = vmatprep.mubr.bf16.mxu0 %v7776_v40  ;;  %4827 = vmatprep.mubr.bf16.mxu1 %v7779_v13  ;;  %v7782_v16 = vld [vmem:[%s8044_s11 + $0x964] ss:$84 sps:$4 sm:$0xff]   ;;  %v7780_v13 = vld [vmem:[%s8044_s11 + $0x960] ss:$84 sps:$4 sm:$0xff]  }
 0x1ef   : > { %v6476_v48 = vpop.f32.mrf.mxu1  ;;  %v6540_v42 = vpop.f32.mrf.mxu0  ;;  %v7795_v8 = vld [vmem:[%s8044_s11 + $0x4d4] ss:$84 sps:$4 sm:$0xff]  }
 0x1f0   : > { %v6477_v30 = vadd.f32 %v6476_v48, %v6475_v47  ;;  %v6541_v19 = vadd.f32 %v6540_v42, %v6539_v0 }
 0x1f1   : > { %v6478_v26 = vpop.f32.mrf.mxu1  ;;  %v6542_v2 = vpop.f32.mrf.mxu0 }
 0x1f2   : > { %v9132_v17 = vadd.f32 %v6477_v30, %v8959_v61  ;;  %v9135_v11 = vadd.f32 %v6541_v19, %v8962_v1 }
 0x1f3   : > { %v6479_v45 = vpop.f32.mrf.mxu1  ;;  %v6543_v63 = vpop.f32.mrf.mxu0 }
 0x1f4   : > { %v6480_v4 = vadd.f32 %v6479_v45, %v6478_v26  ;;  %v6544_v46 = vadd.f32 %v6543_v63, %v6542_v2  ;;  %v7793_v45 = vld [vmem:[%s8044_s11 + $0x4d0] ss:$84 sps:$4 sm:$0xff]  }
 0x1f5   : > { %v6481_v44 = vpop.f32.mrf.mxu1  ;;  %v6545_v12 = vpop.f32.mrf.mxu0  ;;  %4731 = vmatmul.mubr.bf16.gmra.mxu0 %v7774_v24  ;;  %4828 = vmatmul.mubr.bf16.gmra.mxu1 %v7777_v35 }
 0x1f6   : > { %v9140_v61 = vadd.f32 %v6480_v4, %v8967_v20  ;;  %v9143_v1 = vadd.f32 %v6544_v46, %v8970_v25  ;;  %4738 = vmatprep.mubr.bf16.mxu0 %v7782_v16  ;;  %4835 = vmatprep.mubr.bf16.mxu1 %v7785_v39  ;;  %v7792_v20 = vld [vmem:[%s8044_s11 + $0xa0c] ss:$84 sps:$4 sm:$0xff]   ;;  %v7790_v39 = vld [vmem:[%s8044_s11 + $0xa08] ss:$84 sps:$4 sm:$0xff]   ;;  %v7801_v46 = vld [vmem:[%s8044_s11 + $0x44] ss:$84 sps:$4 sm:$0xff]  }
 0x1f7   : > { %v6482_v58 = vpop.f32.mrf.mxu1  ;;  %v6546_v50 = vpop.f32.mrf.mxu0 }
 0x1f8   : > { %v6483_v51 = vadd.f32 %v6482_v58, %v6481_v44  ;;  %v6547_v32 = vadd.f32 %v6546_v50, %v6545_v12 }
 0x1f9   : > { %v6484_v62 = vpop.f32.mrf.mxu1  ;;  %v6548_v40 = vpop.f32.mrf.mxu0 }
 0x1fa   : > { %v9148_v57 = vadd.f32 %v6483_v51, %v8975_v36  ;;  %v9151_v55 = vadd.f32 %v6547_v32, %v8978_v52 }
 0x1fb   : > { %v6485_v25 = vpop.f32.mrf.mxu1  ;;  %v6549_v47 = vpop.f32.mrf.mxu0 }
 0x1fc   : > { %v6486_v0 = vadd.f32 %v6485_v25, %v6484_v62  ;;  %v6550_v48 = vadd.f32 %v6549_v47, %v6548_v40  ;;  %v7799_v25 = vld [vmem:[%s8044_s11 + $0x40] ss:$84 sps:$4 sm:$0xff]  }
 0x1fd   : > { %v6487_v42 = vpop.f32.mrf.mxu1  ;;  %v6551_v30 = vpop.f32.mrf.mxu0  ;;  %4739 = vmatmul.mubr.bf16.gmra.mxu0 %v7780_v13  ;;  %4836 = vmatmul.mubr.bf16.gmra.mxu1 %v7783_v56 }
 0x1fe   : > { %v9156_v36 = vadd.f32 %v6486_v0, %v8983_v37  ;;  %v9159_v52 = vadd.f32 %v6550_v48, %v8986_v34  ;;  %4746 = vmatprep.mubr.bf16.mxu0 %v7792_v20  ;;  %4843 = vmatprep.mubr.bf16.mxu1 %v7795_v8  ;;  %v7798_v37 = vld [vmem:[%s8044_s11 + $0x57c] ss:$84 sps:$4 sm:$0xff]   ;;  %v7796_v8 = vld [vmem:[%s8044_s11 + $0x578] ss:$84 sps:$4 sm:$0xff]  }
 0x1ff   : > { %v6488_v19 = vpop.f32.mrf.mxu1  ;;  %v6552_v26 = vpop.f32.mrf.mxu0  ;;  %v7807_v0 = vld [vmem:[%s8044_s11 + $0x624] ss:$84 sps:$4 sm:$0xff]  }
 0x200   : > { %v6489_v2 = vadd.f32 %v6488_v19, %v6487_v42  ;;  %v6553_v24 = vadd.f32 %v6552_v26, %v6551_v30  ;;  %v7810_v42 = vld [vmem:[%s8044_s11 + $0xec] ss:$84 sps:$4 sm:$0xff]   ;;  %v7819_v30 = vld [vmem:[%s9925_s1 + $0x530] sm:$0xff]  }
 0x201   : > { %v6490_v35 = vpop.f32.mrf.mxu1  ;;  %v6554_v16 = vpop.f32.mrf.mxu0 }
 0x202   : > { %v9164_v63 = vadd.f32 %v6489_v2, %v8991_v33  ;;  %v9167_v4 = vadd.f32 %v6553_v24, %v8994_v9 }
 0x203   : > { %v6491_v34 = vpop.f32.mrf.mxu1  ;;  %v6555_v44 = vpop.f32.mrf.mxu0 }
 0x204   : > { %v6492_v12 = vadd.f32 %v6491_v34, %v6490_v35  ;;  %v6556_v58 = vadd.f32 %v6555_v44, %v6554_v16  ;;  %v7805_v34 = vld [vmem:[%s8044_s11 + $0x620] ss:$84 sps:$4 sm:$0xff]  }
 0x205   : > { %v6493_v50 = vpop.f32.mrf.mxu1  ;;  %v6557_v51 = vpop.f32.mrf.mxu0  ;;  %4747 = vmatmul.mubr.bf16.gmra.mxu0 %v7790_v39  ;;  %4844 = vmatmul.mubr.bf16.gmra.mxu1 %v7793_v45  ;;  %v7834_v39 = vld [vmem:[%s9925_s1 + $0x528] sm:$0xff]  }
 0x206   : > { %v9172_v32 = vadd.f32 %v6492_v12, %v8999_v38  ;;  %v9175_v33 = vadd.f32 %v6556_v58, %v9002_v15  ;;  %4851 = vmatprep.mubr.bf16.mxu1 %v7798_v37  ;;  %4948 = vmatprep.mubr.bf16.mxu0 %v7801_v46  ;;  %v7813_v12 = vld [vmem:[%s8044_s11 + $0x6cc] ss:$84 sps:$4 sm:$0xff]   ;;  %v7816_v58 = vld [vmem:[%s8044_s11 + $0x194] ss:$84 sps:$4 sm:$0xff]  }
 0x207   : > { %v6494_v9 = vpop.f32.mrf.mxu1  ;;  %v6558_v62 = vpop.f32.mrf.mxu0 }
 0x208   : > { %v6495_v40 = vadd.f32 %v6494_v9, %v6493_v50  ;;  %v6559_v13 = vadd.f32 %v6558_v62, %v6557_v51 }
 0x209   : > { %v6496_v56 = vpop.f32.mrf.mxu1  ;;  %v6560_v20 = vpop.f32.mrf.mxu0 }
 0x20a   : > { %v9180_v47 = vadd.f32 %v6495_v40, %v9007_v54  ;;  %v9183_v38 = vadd.f32 %v6559_v13, %v9010_v49  ;;  %v7849_v40 = vld [vmem:[%s9925_s1 + $0x520] sm:$0xff]  }
 0x20b   : > { %v6497_v15 = vpop.f32.mrf.mxu1  ;;  %v6561_v48 = vpop.f32.mrf.mxu0 }
 0x20c   : > { %v6498_v19 = vadd.f32 %v6497_v15, %v6496_v56  ;;  %v6562_v26 = vadd.f32 %v6561_v48, %v6560_v20  ;;  %v7862_v15 = vld [vmem:[%s9925_s1 + $0x518] sm:$0xff]  }
 0x20d   : > { %v6563_v2 = vpop.f32.mrf.mxu0  ;;  %v6627_v24 = vpop.f32.mrf.mxu1  ;;  %4852 = vmatmul.mubr.bf16.gmra.mxu1 %v7796_v8  ;;  %4949 = vmatmul.mubr.bf16.vlgmr.msra.gmra.mxu0 %v7799_v25 }
 0x20e   : > { %v9191_v54 = vadd.f32 %v6498_v19, %v9021_v10  ;;  %v9194_v49 = vadd.f32 %v6562_v26, %v9024_v60  ;;  %7196 = vmatpush3.bf16.msra.mxu0 %v8937_v27  ;;  %4859 = vmatprep.mubr.bf16.mxu1 %v7807_v0  ;;  %v7808_v60 = vld [vmem:[%s8044_s11 + $0xe8] ss:$84 sps:$4 sm:$0xff]  }
 0x20f   : > { %v6564_v35 = vpop.f32.mrf.mxu0  ;;  %v6628_v16 = vpop.f32.mrf.mxu1  ;;  %4956 = vmatprep.mubr.bf16.mxu0 %v7810_v42  ;;  %7197 = vmatprep.subr.bf16.mxu0 %v7819_v30  ;;  %v7811_v42 = vld [vmem:[%s8044_s11 + $0x6c8] ss:$84 sps:$4 sm:$0xff]  }
 0x210   : > { %v6565_v45 = vadd.f32 %v6564_v35, %v6563_v2  ;;  %v6629_v37 = vadd.f32 %v6628_v16, %v6627_v24  ;;  %v7822_v26 = vld [vmem:[%s8044_s11 + $0x774] ss:$84 sps:$4 sm:$0xff]   ;;  %v7825_v2 = vld [vmem:[%s8044_s11 + $0x23c] ss:$84 sps:$4 sm:$0xff]  }
 0x211   : > { %v6566_v10 = vpop.f32.mrf.mxu0  ;;  %v6630_v46 = vpop.f32.mrf.mxu1 }
 0x212   : > { %v9203_v44 = vadd.f32 %v6565_v45, %v9035_v43  ;;  %v9206_v27 = vadd.f32 %v6629_v37, %v9038_v29  ;;  %7198 = vmatpush3.bf16.msra.mxu0 %v7819_v30  ;;  %v7814_v30 = vld [vmem:[%s8044_s11 + $0x190] ss:$84 sps:$4 sm:$0xff]  }
 0x213   : > { %v6567_v50 = vpop.f32.mrf.mxu0  ;;  %v6631_v51 = vpop.f32.mrf.mxu1  ;;  %7199 = vmatprep.subr.bf16.mxu0 %v7834_v39  ;;  %v7875_v45 = vld [vmem:[%s9925_s1 + $0x510] sm:$0xff]  }
 0x214   : > { %v6568_v9 = vadd.f32 %v6567_v50, %v6566_v10  ;;  %v6632_v62 = vadd.f32 %v6631_v51, %v6630_v46  ;;  %v7820_v51 = vld [vmem:[%s8044_s11 + $0x770] ss:$84 sps:$4 sm:$0xff]  }
 0x215   : > { %v6569_v13 = vpop.f32.mrf.mxu0  ;;  %v6633_v56 = vpop.f32.mrf.mxu1  ;;  %4860 = vmatmul.mubr.bf16.gmra.mxu1 %v7805_v34  ;;  %4957 = vmatmul.mubr.bf16.gmra.mxu0 %v7808_v60 }
 0x216   : > { %v9214_v43 = vadd.f32 %v6568_v9, %v9049_v7  ;;  %v9217_v29 = vadd.f32 %v6632_v62, %v9052_v18  ;;  %4867 = vmatprep.mubr.bf16.mxu1 %v7813_v12  ;;  %4964 = vmatprep.mubr.bf16.mxu0 %v7816_v58  ;;  %v7888_v58 = vld [vmem:[%s9925_s1 + $0x508] sm:$0xff]  }
 0x217   : > { %v6570_v20 = vpop.f32.mrf.mxu0  ;;  %v6634_v8 = vpop.f32.mrf.mxu1  ;;  %7200 = vmatpush3.bf16.msra.mxu0 %v7834_v39  ;;  %v7823_v9 = vld [vmem:[%s8044_s11 + $0x238] ss:$84 sps:$4 sm:$0xff]  }
 0x218   : > { %v6571_v25 = vadd.f32 %v6570_v20, %v6569_v13  ;;  %v6635_v0 = vadd.f32 %v6634_v8, %v6633_v56  ;;  %7201 = vmatprep.subr.bf16.mxu0 %v7849_v40  ;;  %v7831_v13 = vld [vmem:[%s8044_s11 + $0x2e4] ss:$84 sps:$4 sm:$0xff]  }
 0x219   : > { %v6572_v48 = vpop.f32.mrf.mxu0  ;;  %v6636_v7 = vpop.f32.mrf.mxu1 }
 0x21a   : > { %v9225_v18 = vadd.f32 %v6571_v25, %v9063_v31  ;;  %v9228_v19 = vadd.f32 %v6635_v0, %v9066_v59  ;;  %v7901_v0 = vld [vmem:[%s9925_s1 + $0x500] sm:$0xff]  }
 0x21b   : > { %v6573_v24 = vpop.f32.mrf.mxu0  ;;  %v6637_v35 = vpop.f32.mrf.mxu1  ;;  %7202 = vmatpush3.bf16.msra.mxu0 %v7849_v40  ;;  %v7828_v40 = vld [vmem:[%s8044_s11 + $0x81c] ss:$84 sps:$4 sm:$0xff]  }
 0x21c   : > { %v6574_v16 = vadd.f32 %v6573_v24, %v6572_v48  ;;  %v6638_v39 = vadd.f32 %v6637_v35, %v6636_v7  ;;  %7203 = vmatprep.subr.bf16.mxu0 %v7862_v15  ;;  %v7826_v35 = vld [vmem:[%s8044_s11 + $0x818] ss:$84 sps:$4 sm:$0xff]  }
 0x21d   : > { %v6575_v37 = vpop.f32.mrf.mxu0  ;;  %v6639_v10 = vpop.f32.mrf.mxu1  ;;  %4868 = vmatmul.mubr.bf16.gmra.mxu1 %v7811_v42  ;;  %4965 = vmatmul.mubr.bf16.gmra.mxu0 %v7814_v30 }
 0x21e   : > { %v9236_v31 = vadd.f32 %v6574_v16, %v9077_v53  ;;  %v9239_v59 = vadd.f32 %v6638_v39, %v9080_v14  ;;  %4875 = vmatprep.mubr.bf16.mxu1 %v7822_v26  ;;  %4972 = vmatprep.mubr.bf16.mxu0 %v7825_v2  ;;  %v7829_v16 = vld [vmem:[%s8044_s11 + $0x2e0] ss:$84 sps:$4 sm:$0xff]  }
 0x21f   : > { %v6576_v46 = vpop.f32.mrf.mxu0  ;;  %v6640_v34 = vpop.f32.mrf.mxu1  ;;  %7204 = vmatpush3.bf16.msra.mxu0 %v7862_v15 }
 0x220   : > { %v6577_v60 = vadd.f32 %v6576_v46, %v6575_v37  ;;  %v6641_v12 = vadd.f32 %v6640_v34, %v6639_v10  ;;  %7205 = vmatprep.subr.bf16.mxu0 %v7875_v45 }
 0x221   : > { %v6578_v50 = vpop.f32.mrf.mxu0  ;;  %v6642_v53 = vpop.f32.mrf.mxu1 }
 0x222   : > { %v9247_v14 = vadd.f32 %v6577_v60, %v9091_v21  ;;  %v9250_v62 = vadd.f32 %v6641_v12, %v9094_v5 }
 0x223   : > { %v6579_v56 = vpop.f32.mrf.mxu0  ;;  %v6643_v20 = vpop.f32.mrf.mxu1  ;;  %7206 = vmatpush3.bf16.msra.mxu0 %v7875_v45  ;;  %v7840_v45 = vld [vmem:[%s8044_s11 + $0x38c] ss:$84 sps:$4 sm:$0xff]  }
 0x224   : > { %v6580_v8 = vadd.f32 %v6579_v56, %v6578_v50  ;;  %v6644_v25 = vadd.f32 %v6643_v20, %v6642_v53  ;;  %7207 = vmatprep.subr.bf16.mxu0 %v7888_v58  ;;  %v7838_v56 = vld [vmem:[%s8044_s11 + $0x388] ss:$84 sps:$4 sm:$0xff]  }
 0x225   : > { %v6581_v15 = vpop.f32.mrf.mxu0  ;;  %v6645_v48 = vpop.f32.mrf.mxu1  ;;  %4876 = vmatmul.mubr.bf16.gmra.mxu1 %v7820_v51  ;;  %4973 = vmatmul.mubr.bf16.gmra.mxu0 %v7823_v9 }
 0x226   : > { %v9258_v21 = vadd.f32 %v6580_v8, %v9105_v3  ;;  %v9261_v5 = vadd.f32 %v6644_v25, %v9108_v6  ;;  %4883 = vmatprep.mubr.bf16.mxu1 %v7828_v40  ;;  %4980 = vmatprep.mubr.bf16.mxu0 %v7831_v13  ;;  %v7837_v6 = vld [vmem:[%s8044_s11 + $0x8c4] ss:$84 sps:$4 sm:$0xff]   ;;  %v7835_v13 = vld [vmem:[%s8044_s11 + $0x8c0] ss:$84 sps:$4 sm:$0xff]  }
 0x227   : > { %v6582_v7 = vpop.f32.mrf.mxu0  ;;  %v6646_v42 = vpop.f32.mrf.mxu1  ;;  %7208 = vmatpush3.bf16.msra.mxu0 %v7888_v58  ;;  %v7846_v25 = vld [vmem:[%s8044_s11 + $0x434] ss:$84 sps:$4 sm:$0xff]  }
 0x228   : > { %v6583_v30 = vadd.f32 %v6582_v7, %v6581_v15  ;;  %v6647_v26 = vadd.f32 %v6646_v42, %v6645_v48  ;;  %7209 = vmatprep.subr.bf16.mxu0 %v7901_v0 }
 0x229   : > { %v6584_v2 = vpop.f32.mrf.mxu0  ;;  %v6648_v24 = vpop.f32.mrf.mxu1 }
 0x22a   : > { %v9266_v3 = vadd.f32 %v6583_v30, %v9116_v22  ;;  %v9269_v39 = vadd.f32 %v6647_v26, %v9119_v41 }
 0x22b   : > { %v6585_v37 = vpop.f32.mrf.mxu0  ;;  %v6649_v10 = vpop.f32.mrf.mxu1  ;;  %7210 = vmatpush3.bf16.msra.mxu0 %v7901_v0 }
 0x22c   : > { %v6586_v46 = vadd.f32 %v6585_v37, %v6584_v2  ;;  %v6650_v34 = vadd.f32 %v6649_v10, %v6648_v24 }
 0x22d   : > { %v6587_v60 = vpop.f32.mrf.mxu0  ;;  %v6651_v12 = vpop.f32.mrf.mxu1  ;;  %4884 = vmatmul.mubr.bf16.gmra.mxu1 %v7826_v35  ;;  %4981 = vmatmul.mubr.bf16.gmra.mxu0 %v7829_v16 }
 0x22e   : > { %v9274_v22 = vadd.f32 %v6586_v46, %v9124_v23  ;;  %v9277_v41 = vadd.f32 %v6650_v34, %v9127_v28  ;;  %4891 = vmatprep.mubr.bf16.mxu1 %v7837_v6  ;;  %4988 = vmatprep.mubr.bf16.mxu0 %v7840_v45  ;;  %v7843_v23 = vld [vmem:[%s8044_s11 + $0x96c] ss:$84 sps:$4 sm:$0xff]   ;;  %v7841_v6 = vld [vmem:[%s8044_s11 + $0x968] ss:$84 sps:$4 sm:$0xff]   ;;  %v7844_v45 = vld [vmem:[%s8044_s11 + $0x430] ss:$84 sps:$4 sm:$0xff]  }
 0x22f   : > { %v6588_v58 = vpop.f32.mrf.mxu0  ;;  %v6652_v50 = vpop.f32.mrf.mxu1  ;;  %v7855_v46 = vld [vmem:[%s8044_s11 + $0x4dc] ss:$84 sps:$4 sm:$0xff]  }
 0x230   : > { %v6589_v53 = vadd.f32 %v6588_v58, %v6587_v60  ;;  %v6653_v51 = vadd.f32 %v6652_v50, %v6651_v12 }
 0x231   : > { %v6590_v9 = vpop.f32.mrf.mxu0  ;;  %v6654_v40 = vpop.f32.mrf.mxu1 }
 0x232   : > { %v9282_v20 = vadd.f32 %v6589_v53, %v9132_v17  ;;  %v9285_v8 = vadd.f32 %v6653_v51, %v9135_v11 }
 0x233   : > { %v6591_v28 = vpop.f32.mrf.mxu0  ;;  %v6655_v0 = vpop.f32.mrf.mxu1 }
 0x234   : > { %v6592_v15 = vadd.f32 %v6591_v28, %v6590_v9  ;;  %v6656_v48 = vadd.f32 %v6655_v0, %v6654_v40 }
 0x235   : > { %v6593_v7 = vpop.f32.mrf.mxu0  ;;  %v6657_v42 = vpop.f32.mrf.mxu1  ;;  %4892 = vmatmul.mubr.bf16.gmra.mxu1 %v7835_v13  ;;  %4989 = vmatmul.mubr.bf16.gmra.mxu0 %v7838_v56 }
 0x236   : > { %v9290_v17 = vadd.f32 %v6592_v15, %v9140_v61  ;;  %v9293_v11 = vadd.f32 %v6656_v48, %v9143_v1  ;;  %4899 = vmatprep.mubr.bf16.mxu1 %v7843_v23  ;;  %4996 = vmatprep.mubr.bf16.mxu0 %v7846_v25  ;;  %v7852_v61 = vld [vmem:[%s8044_s11 + $0xa14] ss:$84 sps:$4 sm:$0xff]   ;;  %v7850_v23 = vld [vmem:[%s8044_s11 + $0xa10] ss:$84 sps:$4 sm:$0xff]   ;;  %v7853_v25 = vld [vmem:[%s8044_s11 + $0x4d8] ss:$84 sps:$4 sm:$0xff]  }
 0x237   : > { %v6594_v30 = vpop.f32.mrf.mxu0  ;;  %v6658_v26 = vpop.f32.mrf.mxu1  ;;  %v7861_v15 = vld [vmem:[%s8044_s11 + $0x4c] ss:$84 sps:$4 sm:$0xff]  }
 0x238   : > { %v6595_v2 = vadd.f32 %v6594_v30, %v6593_v7  ;;  %v6659_v24 = vadd.f32 %v6658_v26, %v6657_v42 }
 0x239   : > { %v6596_v35 = vpop.f32.mrf.mxu0  ;;  %v6660_v16 = vpop.f32.mrf.mxu1 }
 0x23a   : > { %v9298_v37 = vadd.f32 %v6595_v2, %v9148_v57  ;;  %v9301_v10 = vadd.f32 %v6659_v24, %v9151_v55 }
 0x23b   : > { %v6597_v1 = vpop.f32.mrf.mxu0  ;;  %v6661_v34 = vpop.f32.mrf.mxu1 }
 0x23c   : > { %v6598_v60 = vadd.f32 %v6597_v1, %v6596_v35  ;;  %v6662_v12 = vadd.f32 %v6661_v34, %v6660_v16 }
 0x23d   : > { %v6599_v58 = vpop.f32.mrf.mxu0  ;;  %v6663_v50 = vpop.f32.mrf.mxu1  ;;  %4900 = vmatmul.mubr.bf16.gmra.mxu1 %v7841_v6  ;;  %4997 = vmatmul.mubr.bf16.gmra.mxu0 %v7844_v45 }
 0x23e   : > { %v9306_v57 = vadd.f32 %v6598_v60, %v9156_v36  ;;  %v9309_v55 = vadd.f32 %v6662_v12, %v9159_v52  ;;  %4907 = vmatprep.mubr.bf16.mxu1 %v7852_v61  ;;  %5004 = vmatprep.mubr.bf16.mxu0 %v7855_v46  ;;  %v7858_v36 = vld [vmem:[%s8044_s11 + $0x584] ss:$84 sps:$4 sm:$0xff]   ;;  %v7856_v61 = vld [vmem:[%s8044_s11 + $0x580] ss:$84 sps:$4 sm:$0xff]   ;;  %v7859_v46 = vld [vmem:[%s8044_s11 + $0x48] ss:$84 sps:$4 sm:$0xff]  }
 0x23f   : > { %v6600_v53 = vpop.f32.mrf.mxu0  ;;  %v6664_v51 = vpop.f32.mrf.mxu1  ;;  %v7868_v60 = vld [vmem:[%s8044_s11 + $0xf4] ss:$84 sps:$4 sm:$0xff]  }
 0x240   : > { %v6601_v9 = vadd.f32 %v6600_v53, %v6599_v58  ;;  %v6665_v40 = vadd.f32 %v6664_v51, %v6663_v50 }
 0x241   : > { %v6602_v13 = vpop.f32.mrf.mxu0  ;;  %v6666_v56 = vpop.f32.mrf.mxu1 }
 0x242   : > { %v9314_v28 = vadd.f32 %v6601_v9, %v9164_v63  ;;  %v9317_v0 = vadd.f32 %v6665_v40, %v9167_v4 }
 0x243   : > { %v6603_v52 = vpop.f32.mrf.mxu0  ;;  %v6667_v48 = vpop.f32.mrf.mxu1 }
 0x244   : > { %v6604_v7 = vadd.f32 %v6603_v52, %v6602_v13  ;;  %v6668_v42 = vadd.f32 %v6667_v48, %v6666_v56 }
 0x245   : > { %v6605_v30 = vpop.f32.mrf.mxu0  ;;  %v6669_v26 = vpop.f32.mrf.mxu1  ;;  %4908 = vmatmul.mubr.bf16.gmra.mxu1 %v7850_v23  ;;  %5005 = vmatmul.mubr.bf16.gmra.mxu0 %v7853_v25 }
 0x246   : > { %v9322_v63 = vadd.f32 %v6604_v7, %v9172_v32  ;;  %v9325_v4 = vadd.f32 %v6668_v42, %v9175_v33  ;;  %5012 = vmatprep.mubr.bf16.mxu0 %v7858_v36  ;;  %5109 = vmatprep.mubr.bf16.mxu1 %v7861_v15  ;;  %v7865_v32 = vld [vmem:[%s8044_s11 + $0x62c] ss:$84 sps:$4 sm:$0xff]   ;;  %v7863_v36 = vld [vmem:[%s8044_s11 + $0x628] ss:$84 sps:$4 sm:$0xff]   ;;  %v7866_v15 = vld [vmem:[%s8044_s11 + $0xf0] ss:$84 sps:$4 sm:$0xff]  }
 0x247   : > { %v6606_v2 = vpop.f32.mrf.mxu0  ;;  %v6670_v24 = vpop.f32.mrf.mxu1  ;;  %v7874_v7 = vld [vmem:[%s8044_s11 + $0x19c] ss:$84 sps:$4 sm:$0xff]  }
 0x248   : > { %v6607_v35 = vadd.f32 %v6606_v2, %v6605_v30  ;;  %v6671_v16 = vadd.f32 %v6670_v24, %v6669_v26 }
 0x249   : > { %v6608_v6 = vpop.f32.mrf.mxu0  ;;  %v6672_v45 = vpop.f32.mrf.mxu1 }
 0x24a   : > { %v9330_v1 = vadd.f32 %v6607_v35, %v9180_v47  ;;  %v9333_v34 = vadd.f32 %v6671_v16, %v9183_v38 }
 0x24b   : > { %v6609_v33 = vpop.f32.mrf.mxu0  ;;  %v6673_v12 = vpop.f32.mrf.mxu1 }
 0x24c   : > { %v6610_v58 = vadd.f32 %v6609_v33, %v6608_v6  ;;  %v6674_v50 = vadd.f32 %v6673_v12, %v6672_v45 }
 0x24d   : > { %v6675_v53 = vpop.f32.mrf.mxu1  ;;  %v6739_v51 = vpop.f32.mrf.mxu0  ;;  %5013 = vmatmul.mubr.bf16.gmra.mxu0 %v7856_v61  ;;  %5110 = vmatmul.mubr.bf16.vlgmr.msra.gmra.mxu1 %v7859_v46 }
 0x24e   : > { %v9338_v47 = vadd.f32 %v6610_v58, %v9191_v54  ;;  %v9341_v38 = vadd.f32 %v6674_v50, %v9194_v49  ;;  %5020 = vmatprep.mubr.bf16.mxu0 %v7865_v32  ;;  %5117 = vmatprep.mubr.bf16.mxu1 %v7868_v60  ;;  %v7871_v54 = vld [vmem:[%s8044_s11 + $0x6d4] ss:$84 sps:$4 sm:$0xff]   ;;  %v7869_v32 = vld [vmem:[%s8044_s11 + $0x6d0] ss:$84 sps:$4 sm:$0xff]   ;;  %v7872_v60 = vld [vmem:[%s8044_s11 + $0x198] ss:$84 sps:$4 sm:$0xff]  }
 0x24f   : > { %v6676_v9 = vpop.f32.mrf.mxu1  ;;  %v6740_v40 = vpop.f32.mrf.mxu0  ;;  %v7881_v58 = vld [vmem:[%s8044_s11 + $0x244] ss:$84 sps:$4 sm:$0xff]  }
 0x250   : > { %v6677_v13 = vadd.f32 %v6676_v9, %v6675_v53  ;;  %v6741_v56 = vadd.f32 %v6740_v40, %v6739_v51 }
 0x251   : > { %v6678_v23 = vpop.f32.mrf.mxu1  ;;  %v6742_v25 = vpop.f32.mrf.mxu0 }
 0x252   : > { %v9346_v52 = vadd.f32 %v6677_v13, %v9203_v44  ;;  %v9349_v48 = vadd.f32 %v6741_v56, %v9206_v27 }
 0x253   : > { %v6679_v49 = vpop.f32.mrf.mxu1  ;;  %v6743_v42 = vpop.f32.mrf.mxu0 }
 0x254   : > { %v6680_v30 = vadd.f32 %v6679_v49, %v6678_v23  ;;  %v6744_v26 = vadd.f32 %v6743_v42, %v6742_v25 }
 0x255   : > { %v6681_v2 = vpop.f32.mrf.mxu1  ;;  %v6745_v24 = vpop.f32.mrf.mxu0  ;;  %5021 = vmatmul.mubr.bf16.gmra.mxu0 %v7863_v36  ;;  %5118 = vmatmul.mubr.bf16.gmra.mxu1 %v7866_v15 }
 0x256   : > { %v9354_v44 = vadd.f32 %v6680_v30, %v9214_v43  ;;  %v9357_v27 = vadd.f32 %v6744_v26, %v9217_v29  ;;  %5028 = vmatprep.mubr.bf16.mxu0 %v7871_v54  ;;  %5125 = vmatprep.mubr.bf16.mxu1 %v7874_v7  ;;  %v7878_v43 = vld [vmem:[%s8044_s11 + $0x77c] ss:$84 sps:$4 sm:$0xff]   ;;  %v7876_v54 = vld [vmem:[%s8044_s11 + $0x778] ss:$84 sps:$4 sm:$0xff]   ;;  %v7879_v7 = vld [vmem:[%s8044_s11 + $0x240] ss:$84 sps:$4 sm:$0xff]  }
 0x257   : > { %v6682_v35 = vpop.f32.mrf.mxu1  ;;  %v6746_v16 = vpop.f32.mrf.mxu0  ;;  %v7887_v30 = vld [vmem:[%s8044_s11 + $0x2ec] ss:$84 sps:$4 sm:$0xff]  }
 0x258   : > { %v6683_v6 = vadd.f32 %v6682_v35, %v6681_v2  ;;  %v6747_v45 = vadd.f32 %v6746_v16, %v6745_v24 }
 0x259   : > { %v6684_v61 = vpop.f32.mrf.mxu1  ;;  %v6748_v46 = vpop.f32.mrf.mxu0 }
 0x25a   : > { %v9362_v33 = vadd.f32 %v6683_v6, %v9225_v18  ;;  %v9365_v12 = vadd.f32 %v6747_v45, %v9228_v19 }
 0x25b   : > { %v6685_v29 = vpop.f32.mrf.mxu1  ;;  %v6749_v50 = vpop.f32.mrf.mxu0 }
 0x25c   : > { %v6686_v53 = vadd.f32 %v6685_v29, %v6684_v61  ;;  %v6750_v51 = vadd.f32 %v6749_v50, %v6748_v46 }
 0x25d   : > { %v6687_v9 = vpop.f32.mrf.mxu1  ;;  %v6751_v40 = vpop.f32.mrf.mxu0  ;;  %5029 = vmatmul.mubr.bf16.gmra.mxu0 %v7869_v32  ;;  %5126 = vmatmul.mubr.bf16.gmra.mxu1 %v7872_v60 }
 0x25e   : > { %v9370_v18 = vadd.f32 %v6686_v53, %v9236_v31  ;;  %v9373_v19 = vadd.f32 %v6750_v51, %v9239_v59  ;;  %5036 = vmatprep.mubr.bf16.mxu0 %v7878_v43  ;;  %5133 = vmatprep.mubr.bf16.mxu1 %v7881_v58  ;;  %v7884_v31 = vld [vmem:[%s8044_s11 + $0x824] ss:$84 sps:$4 sm:$0xff]   ;;  %v7882_v43 = vld [vmem:[%s8044_s11 + $0x820] ss:$84 sps:$4 sm:$0xff]   ;;  %v7885_v58 = vld [vmem:[%s8044_s11 + $0x2e8] ss:$84 sps:$4 sm:$0xff]  }
 0x25f   : > { %v6688_v13 = vpop.f32.mrf.mxu1  ;;  %v6752_v56 = vpop.f32.mrf.mxu0  ;;  %v7894_v53 = vld [vmem:[%s8044_s11 + $0x394] ss:$84 sps:$4 sm:$0xff]  }
 0x260   : > { %v6689_v23 = vadd.f32 %v6688_v13, %v6687_v9  ;;  %v6753_v25 = vadd.f32 %v6752_v56, %v6751_v40 }
 0x261   : > { %v6690_v36 = vpop.f32.mrf.mxu1  ;;  %v6754_v15 = vpop.f32.mrf.mxu0 }
 0x262   : > { %v9378_v49 = vadd.f32 %v6689_v23, %v9247_v14  ;;  %v9381_v42 = vadd.f32 %v6753_v25, %v9250_v62 }
 0x263   : > { %v6691_v59 = vpop.f32.mrf.mxu1  ;;  %v6755_v26 = vpop.f32.mrf.mxu0 }
 0x264   : > { %v6692_v2 = vadd.f32 %v6691_v59, %v6690_v36  ;;  %v6756_v24 = vadd.f32 %v6755_v26, %v6754_v15 }
 0x265   : > { %v6693_v35 = vpop.f32.mrf.mxu1  ;;  %v6757_v16 = vpop.f32.mrf.mxu0  ;;  %5037 = vmatmul.mubr.bf16.gmra.mxu0 %v7876_v54  ;;  %5134 = vmatmul.mubr.bf16.gmra.mxu1 %v7879_v7 }
 0x266   : > { %v9386_v14 = vadd.f32 %v6692_v2, %v9258_v21  ;;  %v9389_v62 = vadd.f32 %v6756_v24, %v9261_v5  ;;  %5044 = vmatprep.mubr.bf16.mxu0 %v7884_v31  ;;  %5141 = vmatprep.mubr.bf16.mxu1 %v7887_v30  ;;  %v7891_v21 = vld [vmem:[%s8044_s11 + $0x8cc] ss:$84 sps:$4 sm:$0xff]   ;;  %v7889_v31 = vld [vmem:[%s8044_s11 + $0x8c8] ss:$84 sps:$4 sm:$0xff]   ;;  %v7892_v30 = vld [vmem:[%s8044_s11 + $0x390] ss:$84 sps:$4 sm:$0xff]  }
 0x267   : > { %v6694_v6 = vpop.f32.mrf.mxu1  ;;  %v6758_v45 = vpop.f32.mrf.mxu0  ;;  %v7900_v2 = vld [vmem:[%s8044_s11 + $0x43c] ss:$84 sps:$4 sm:$0xff]  }
 0x268   : > { %v6695_v61 = vadd.f32 %v6694_v6, %v6693_v35  ;;  %v6759_v46 = vadd.f32 %v6758_v45, %v6757_v16 }
 0x269   : > { %v6696_v32 = vpop.f32.mrf.mxu1  ;;  %v6760_v60 = vpop.f32.mrf.mxu0 }
 0x26a   : > { %v9394_v29 = vadd.f32 %v6695_v61, %v9266_v3  ;;  %v9397_v50 = vadd.f32 %v6759_v46, %v9269_v39 }
 0x26b   : > { %v6697_v5 = vpop.f32.mrf.mxu1  ;;  %v6761_v51 = vpop.f32.mrf.mxu0 }
 0x26c   : > { %v6698_v9 = vadd.f32 %v6697_v5, %v6696_v32  ;;  %v6762_v40 = vadd.f32 %v6761_v51, %v6760_v60 }
 0x26d   : > { %v6699_v13 = vpop.f32.mrf.mxu1  ;;  %v6763_v56 = vpop.f32.mrf.mxu0  ;;  %5045 = vmatmul.mubr.bf16.gmra.mxu0 %v7882_v43  ;;  %5142 = vmatmul.mubr.bf16.gmra.mxu1 %v7885_v58 }
 0x26e   : > { %v9402_v3 = vadd.f32 %v6698_v9, %v9274_v22  ;;  %v9405_v39 = vadd.f32 %v6762_v40, %v9277_v41  ;;  %5052 = vmatprep.mubr.bf16.mxu0 %v7891_v21  ;;  %5149 = vmatprep.mubr.bf16.mxu1 %v7894_v53  ;;  %v7897_v22 = vld [vmem:[%s8044_s11 + $0x974] ss:$84 sps:$4 sm:$0xff]   ;;  %v7895_v21 = vld [vmem:[%s8044_s11 + $0x970] ss:$84 sps:$4 sm:$0xff]   ;;  %v7898_v53 = vld [vmem:[%s8044_s11 + $0x438] ss:$84 sps:$4 sm:$0xff]  }
 0x26f   : > { %v6700_v23 = vpop.f32.mrf.mxu1  ;;  %v6764_v25 = vpop.f32.mrf.mxu0  ;;  %v7907_v9 = vld [vmem:[%s8044_s11 + $0x4e4] ss:$84 sps:$4 sm:$0xff]  }
 0x270   : > { %v6701_v36 = vadd.f32 %v6700_v23, %v6699_v13  ;;  %v6765_v15 = vadd.f32 %v6764_v25, %v6763_v56 }
 0x271   : > { %v6702_v54 = vpop.f32.mrf.mxu1  ;;  %v6766_v7 = vpop.f32.mrf.mxu0 }
 0x272   : > { %v9410_v59 = vadd.f32 %v6701_v36, %v9282_v20  ;;  %v9413_v26 = vadd.f32 %v6765_v15, %v9285_v8 }
 0x273   : > { %v6703_v41 = vpop.f32.mrf.mxu1  ;;  %v6767_v24 = vpop.f32.mrf.mxu0 }
 0x274   : > { %v6704_v35 = vadd.f32 %v6703_v41, %v6702_v54  ;;  %v6768_v16 = vadd.f32 %v6767_v24, %v6766_v7 }
 0x275   : > { %v6705_v6 = vpop.f32.mrf.mxu1  ;;  %v6769_v45 = vpop.f32.mrf.mxu0  ;;  %5053 = vmatmul.mubr.bf16.gmra.mxu0 %v7889_v31  ;;  %5150 = vmatmul.mubr.bf16.gmra.mxu1 %v7892_v30 }
 0x276   : > { %v9418_v20 = vadd.f32 %v6704_v35, %v9290_v17  ;;  %v9421_v8 = vadd.f32 %v6768_v16, %v9293_v11  ;;  %5060 = vmatprep.mubr.bf16.mxu0 %v7897_v22  ;;  %5157 = vmatprep.mubr.bf16.mxu1 %v7900_v2  ;;  %v7904_v17 = vld [vmem:[%s8044_s11 + $0xa1c] ss:$84 sps:$4 sm:$0xff]   ;;  %v7902_v22 = vld [vmem:[%s8044_s11 + $0xa18] ss:$84 sps:$4 sm:$0xff]   ;;  %v7905_v2 = vld [vmem:[%s8044_s11 + $0x4e0] ss:$84 sps:$4 sm:$0xff]  }
 0x277   : > { %v6706_v61 = vpop.f32.mrf.mxu1  ;;  %v6770_v46 = vpop.f32.mrf.mxu0  ;;  %v7911_v35 = vld [vmem:[%s8044_s11 + $0x50] ss:$84 sps:$4 sm:$0xff]  }
 0x278   : > { %v6707_v32 = vadd.f32 %v6706_v61, %v6705_v6  ;;  %v6771_v60 = vadd.f32 %v6770_v46, %v6769_v45 }
 0x279   : > { %v6708_v43 = vpop.f32.mrf.mxu1  ;;  %v6772_v58 = vpop.f32.mrf.mxu0 }
 0x27a   : > { %v9426_v5 = vadd.f32 %v6707_v32, %v9298_v37  ;;  %v9429_v51 = vadd.f32 %v6771_v60, %v9301_v10 }
 0x27b   : > { %v6709_v11 = vpop.f32.mrf.mxu1  ;;  %v6773_v40 = vpop.f32.mrf.mxu0 }
 0x27c   : > { %v6710_v13 = vadd.f32 %v6709_v11, %v6708_v43  ;;  %v6774_v56 = vadd.f32 %v6773_v40, %v6772_v58 }
 0x27d   : > { %v6711_v23 = vpop.f32.mrf.mxu1  ;;  %v6775_v25 = vpop.f32.mrf.mxu0  ;;  %5061 = vmatmul.mubr.bf16.gmra.mxu0 %v7895_v21  ;;  %5158 = vmatmul.mubr.bf16.gmra.mxu1 %v7898_v53 }
 0x27e   : > { %v9434_v37 = vadd.f32 %v6710_v13, %v9306_v57  ;;  %v9437_v10 = vadd.f32 %v6774_v56, %v9309_v55  ;;  %5068 = vmatprep.mubr.bf16.mxu0 %v7904_v17  ;;  %5165 = vmatprep.mubr.bf16.mxu1 %v7907_v9  ;;  %v7910_v57 = vld [vmem:[%s8044_s11 + $0x58c] ss:$84 sps:$4 sm:$0xff]   ;;  %v7908_v17 = vld [vmem:[%s8044_s11 + $0x588] ss:$84 sps:$4 sm:$0xff]  }
 0x27f   : > { %v6712_v36 = vpop.f32.mrf.mxu1  ;;  %v6776_v15 = vpop.f32.mrf.mxu0  ;;  %v7912_v9 = vld [vmem:[%s8044_s11 + $0xf8] ss:$84 sps:$4 sm:$0xff]   ;;  %v7916_v13 = vld [vmem:[%s8044_s11 + $0x1a0] ss:$84 sps:$4 sm:$0xff]  }
 0x280   : > { %v6713_v54 = vadd.f32 %v6712_v36, %v6711_v23  ;;  %v6777_v7 = vadd.f32 %v6776_v15, %v6775_v25 }
 0x281   : > { %v6714_v31 = vpop.f32.mrf.mxu1  ;;  %v6778_v30 = vpop.f32.mrf.mxu0 }
 0x282   : > { %v9442_v41 = vadd.f32 %v6713_v54, %v9314_v28  ;;  %v9445_v24 = vadd.f32 %v6777_v7, %v9317_v0 }
 0x283   : > { %v6715_v55 = vpop.f32.mrf.mxu1  ;;  %v6779_v16 = vpop.f32.mrf.mxu0 }
 0x284   : > { %v6716_v6 = vadd.f32 %v6715_v55, %v6714_v31  ;;  %v6780_v45 = vadd.f32 %v6779_v16, %v6778_v30 }
 0x285   : > { %v6717_v61 = vpop.f32.mrf.mxu1  ;;  %v6781_v46 = vpop.f32.mrf.mxu0  ;;  %5069 = vmatmul.mubr.bf16.gmra.mxu0 %v7902_v22  ;;  %5166 = vmatmul.mubr.bf16.gmra.mxu1 %v7905_v2 }
 0x286   : > { %v9450_v28 = vadd.f32 %v6716_v6, %v9322_v63  ;;  %v9453_v0 = vadd.f32 %v6780_v45, %v9325_v4  ;;  %5173 = vmatprep.mubr.bf16.mxu1 %v7910_v57  ;;  %7211 = vmatprep.mubr.bf16.mxu0 %v7911_v35  ;;  %v7915_v63 = vld [vmem:[%s8044_s11 + $0x634] ss:$84 sps:$4 sm:$0xff]   ;;  %v7913_v57 = vld [vmem:[%s8044_s11 + $0x630] ss:$84 sps:$4 sm:$0xff]  }
 0x287   : > { %v6718_v32 = vpop.f32.mrf.mxu1  ;;  %v6782_v60 = vpop.f32.mrf.mxu0  ;;  %v7917_v35 = vld [vmem:[%s8044_s11 + $0x248] ss:$84 sps:$4 sm:$0xff]   ;;  %v7921_v6 = vld [vmem:[%s8044_s11 + $0x2f0] ss:$84 sps:$4 sm:$0xff]  }
 0x288   : > { %v6719_v43 = vadd.f32 %v6718_v32, %v6717_v61  ;;  %v6783_v58 = vadd.f32 %v6782_v60, %v6781_v46 }
 0x289   : > { %v6720_v21 = vpop.f32.mrf.mxu1  ;;  %v6784_v53 = vpop.f32.mrf.mxu0 }
 0x28a   : > { %v9458_v11 = vadd.f32 %v6719_v43, %v9330_v1  ;;  %v9461_v40 = vadd.f32 %v6783_v58, %v9333_v34 }
 0x28b   : > { %v6721_v4 = vpop.f32.mrf.mxu1  ;;  %v6785_v56 = vpop.f32.mrf.mxu0 }
 0x28c   : > { %v6722_v23 = vadd.f32 %v6721_v4, %v6720_v21  ;;  %v6786_v25 = vadd.f32 %v6785_v56, %v6784_v53 }
 0x28d   : > { %v6787_v36 = vpop.f32.mrf.mxu0  ;;  %v6851_v15 = vpop.f32.mrf.mxu1  ;;  %5174 = vmatmul.mubr.bf16.gmra.mxu1 %v7908_v17  ;;  %7212 = vmatmul.mubr.bf16.vlgmr.msra.gmra.mxu0 %v7912_v9 }
 0x28e   : > { %v9466_v1 = vadd.f32 %v6722_v23, %v9338_v47  ;;  %v9469_v34 = vadd.f32 %v6786_v25, %v9341_v38  ;;  %5181 = vmatprep.mubr.bf16.mxu1 %v7915_v63  ;;  %7215 = vmatprep.mubr.bf16.mxu0 %v7916_v13  ;;  %v7920_v47 = vld [vmem:[%s8044_s11 + $0x6dc] ss:$84 sps:$4 sm:$0xff]   ;;  %v7918_v63 = vld [vmem:[%s8044_s11 + $0x6d8] ss:$84 sps:$4 sm:$0xff]   ;;  %v7926_v23 = vld [vmem:[%s8044_s11 + $0x440] ss:$84 sps:$4 sm:$0xff]  }
 0x28f   : > { %v6788_v54 = vpop.f32.mrf.mxu0  ;;  %v6852_v7 = vpop.f32.mrf.mxu1  ;;  %v7922_v13 = vld [vmem:[%s8044_s11 + $0x398] ss:$84 sps:$4 sm:$0xff]  }
 0x290   : > { %v6789_v31 = vadd.f32 %v6788_v54, %v6787_v36  ;;  %v6853_v30 = vadd.f32 %v6852_v7, %v6851_v15 }
 0x291   : > { %v6790_v22 = vpop.f32.mrf.mxu0  ;;  %v6854_v2 = vpop.f32.mrf.mxu1 }
 0x292   : > { %v9474_v55 = vadd.f32 %v6789_v31, %v9346_v52  ;;  %v9477_v16 = vadd.f32 %v6853_v30, %v9349_v48 }
 0x293   : > { %v6791_v38 = vpop.f32.mrf.mxu0  ;;  %v6855_v45 = vpop.f32.mrf.mxu1 }
 0x294   : > { %v6792_v61 = vadd.f32 %v6791_v38, %v6790_v22  ;;  %v6856_v46 = vadd.f32 %v6855_v45, %v6854_v2 }
 0x295   : > { %v6793_v32 = vpop.f32.mrf.mxu0  ;;  %v6857_v60 = vpop.f32.mrf.mxu1  ;;  %5182 = vmatmul.mubr.bf16.gmra.mxu1 %v7913_v57  ;;  %7216 = vmatmul.mubr.bf16.gmra.mxu0 %v7917_v35 }
 0x296   : > { %v9482_v52 = vadd.f32 %v6792_v61, %v9354_v44  ;;  %v9485_v48 = vadd.f32 %v6856_v46, %v9357_v27  ;;  %5189 = vmatprep.mubr.bf16.mxu1 %v7920_v47  ;;  %7219 = vmatprep.mubr.bf16.mxu0 %v7921_v6  ;;  %v7925_v44 = vld [vmem:[%s8044_s11 + $0x784] ss:$84 sps:$4 sm:$0xff]   ;;  %v7923_v47 = vld [vmem:[%s8044_s11 + $0x780] ss:$84 sps:$4 sm:$0xff]   ;;  %v7927_v6 = vld [vmem:[%s8044_s11 + $0x4e8] ss:$84 sps:$4 sm:$0xff]  }
 0x297   : > { %v6794_v43 = vpop.f32.mrf.mxu0  ;;  %v6858_v58 = vpop.f32.mrf.mxu1  ;;  %v7931_v61 = vld [vmem:[%s8044_s11 + $0x590] ss:$84 sps:$4 sm:$0xff]  }
 0x298   : > { %v6795_v21 = vadd.f32 %v6794_v43, %v6793_v32  ;;  %v6859_v53 = vadd.f32 %v6858_v58, %v6857_v60 }
 0x299   : > { %v6796_v17 = vpop.f32.mrf.mxu0  ;;  %v6860_v9 = vpop.f32.mrf.mxu1 }
 0x29a   : > { %v9490_v4 = vadd.f32 %v6795_v21, %v9362_v33  ;;  %v9493_v56 = vadd.f32 %v6859_v53, %v9365_v12 }
 0x29b   : > { %v6797_v27 = vpop.f32.mrf.mxu0  ;;  %v6861_v25 = vpop.f32.mrf.mxu1 }
 0x29c   : > { %v6798_v36 = vadd.f32 %v6797_v27, %v6796_v17  ;;  %v6862_v15 = vadd.f32 %v6861_v25, %v6860_v9 }
 0x29d   : > { %v6799_v54 = vpop.f32.mrf.mxu0  ;;  %v6863_v7 = vpop.f32.mrf.mxu1  ;;  %5190 = vmatmul.mubr.bf16.gmra.mxu1 %v7918_v63  ;;  %7220 = vmatmul.mubr.bf16.gmra.mxu0 %v7922_v13 }
 0x29e   : > { %v9498_v33 = vadd.f32 %v6798_v36, %v9370_v18  ;;  %v9501_v12 = vadd.f32 %v6862_v15, %v9373_v19  ;;  %5197 = vmatprep.mubr.bf16.mxu1 %v7925_v44  ;;  %7223 = vmatprep.mubr.bf16.mxu0 %v7926_v23  ;;  %v7930_v18 = vld [vmem:[%s8044_s11 + $0x82c] ss:$84 sps:$4 sm:$0xff]   ;;  %v7928_v44 = vld [vmem:[%s8044_s11 + $0x828] ss:$84 sps:$4 sm:$0xff]  }
 0x29f   : > { %v6800_v31 = vpop.f32.mrf.mxu0  ;;  %v6864_v30 = vpop.f32.mrf.mxu1  ;;  %v7932_v23 = vld [vmem:[%s8044_s11 + $0x638] ss:$84 sps:$4 sm:$0xff]   ;;  %v7936_v36 = vld [vmem:[%s8044_s11 + $0x6e0] ss:$84 sps:$4 sm:$0xff]  }
 0x2a0   : > { %v6801_v22 = vadd.f32 %v6800_v31, %v6799_v54  ;;  %v6865_v2 = vadd.f32 %v6864_v30, %v6863_v7 }
 0x2a1   : > { %v6802_v57 = vpop.f32.mrf.mxu0  ;;  %v6866_v35 = vpop.f32.mrf.mxu1 }
 0x2a2   : > { %v9506_v38 = vadd.f32 %v6801_v22, %v9378_v49  ;;  %v9509_v45 = vadd.f32 %v6865_v2, %v9381_v42 }
 0x2a3   : > { %v6803_v19 = vpop.f32.mrf.mxu0  ;;  %v6867_v46 = vpop.f32.mrf.mxu1 }
 0x2a4   : > { %v6804_v32 = vadd.f32 %v6803_v19, %v6802_v57  ;;  %v6868_v60 = vadd.f32 %v6867_v46, %v6866_v35 }
 0x2a5   : > { %v6805_v43 = vpop.f32.mrf.mxu0  ;;  %v6869_v58 = vpop.f32.mrf.mxu1  ;;  %5198 = vmatmul.mubr.bf16.gmra.mxu1 %v7923_v47  ;;  %7224 = vmatmul.mubr.bf16.gmra.mxu0 %v7927_v6 }
 0x2a6   : > { %v9514_v49 = vadd.f32 %v6804_v32, %v9386_v14  ;;  %v9517_v42 = vadd.f32 %v6868_v60, %v9389_v62  ;;  %5205 = vmatprep.mubr.bf16.mxu1 %v7930_v18  ;;  %7227 = vmatprep.mubr.bf16.mxu0 %v7931_v61  ;;  %v7935_v14 = vld [vmem:[%s8044_s11 + $0x8d4] ss:$84 sps:$4 sm:$0xff]   ;;  %v7933_v18 = vld [vmem:[%s8044_s11 + $0x8d0] ss:$84 sps:$4 sm:$0xff]  }
 0x2a7   : > { %v6806_v21 = vpop.f32.mrf.mxu0  ;;  %v6870_v53 = vpop.f32.mrf.mxu1  ;;  %v7937_v61 = vld [vmem:[%s8044_s11 + $0x788] ss:$84 sps:$4 sm:$0xff]   ;;  %v7941_v32 = vld [vmem:[%s8044_s11 + $0x830] ss:$84 sps:$4 sm:$0xff]  }
 0x2a8   : > { %v6807_v17 = vadd.f32 %v6806_v21, %v6805_v43  ;;  %v6871_v9 = vadd.f32 %v6870_v53, %v6869_v58 }
 0x2a9   : > { %v6808_v63 = vpop.f32.mrf.mxu0  ;;  %v6872_v13 = vpop.f32.mrf.mxu1 }
 0x2aa   : > { %v9522_v27 = vadd.f32 %v6807_v17, %v9394_v29  ;;  %v9525_v25 = vadd.f32 %v6871_v9, %v9397_v50 }
 0x2ab   : > { %v6809_v62 = vpop.f32.mrf.mxu0  ;;  %v6873_v15 = vpop.f32.mrf.mxu1 }
 0x2ac   : > { %v6810_v54 = vadd.f32 %v6809_v62, %v6808_v63  ;;  %v6874_v7 = vadd.f32 %v6873_v15, %v6872_v13 }
 0x2ad   : > { %v6811_v31 = vpop.f32.mrf.mxu0  ;;  %v6875_v30 = vpop.f32.mrf.mxu1  ;;  %5206 = vmatmul.mubr.bf16.gmra.mxu1 %v7928_v44  ;;  %7228 = vmatmul.mubr.bf16.gmra.mxu0 %v7932_v23 }
 0x2ae   : > { %v9530_v29 = vadd.f32 %v6810_v54, %v9402_v3  ;;  %v9533_v50 = vadd.f32 %v6874_v7, %v9405_v39  ;;  %5213 = vmatprep.mubr.bf16.mxu1 %v7935_v14  ;;  %7231 = vmatprep.mubr.bf16.mxu0 %v7936_v36  ;;  %v7940_v3 = vld [vmem:[%s8044_s11 + $0x97c] ss:$84 sps:$4 sm:$0xff]   ;;  %v7938_v14 = vld [vmem:[%s8044_s11 + $0x978] ss:$84 sps:$4 sm:$0xff]   ;;  %v7946_v54 = vld [vmem:[%s8044_s11 + $0x980] ss:$84 sps:$4 sm:$0xff]  }
 0x2af   : > { %v6812_v22 = vpop.f32.mrf.mxu0  ;;  %v6876_v2 = vpop.f32.mrf.mxu1  ;;  %v7942_v36 = vld [vmem:[%s8044_s11 + $0x8d8] ss:$84 sps:$4 sm:$0xff]  }
 0x2b0   : > { %v6813_v57 = vadd.f32 %v6812_v22, %v6811_v31  ;;  %v6877_v35 = vadd.f32 %v6876_v2, %v6875_v30 }
 0x2b1   : > { %v6814_v47 = vpop.f32.mrf.mxu0  ;;  %v6878_v6 = vpop.f32.mrf.mxu1 }
 0x2b2   : > { %v9538_v19 = vadd.f32 %v6813_v57, %v9410_v59  ;;  %v9541_v46 = vadd.f32 %v6877_v35, %v9413_v26 }
 0x2b3   : > { %v6815_v39 = vpop.f32.mrf.mxu0  ;;  %v6879_v60 = vpop.f32.mrf.mxu1 }
 0x2b4   : > { %v6816_v43 = vadd.f32 %v6815_v39, %v6814_v47  ;;  %v6880_v58 = vadd.f32 %v6879_v60, %v6878_v6 }
 0x2b5   : > { %v6817_v21 = vpop.f32.mrf.mxu0  ;;  %v6881_v53 = vpop.f32.mrf.mxu1  ;;  %5214 = vmatmul.mubr.bf16.gmra.mxu1 %v7933_v18  ;;  %7232 = vmatmul.mubr.bf16.gmra.mxu0 %v7937_v61 }
 0x2b6   : > { %v9546_v59 = vadd.f32 %v6816_v43, %v9418_v20  ;;  %v9549_v26 = vadd.f32 %v6880_v58, %v9421_v8  ;;  %5221 = vmatprep.mubr.bf16.mxu1 %v7940_v3  ;;  %7235 = vmatprep.mubr.bf16.mxu0 %v7941_v32  ;;  %v7945_v20 = vld [vmem:[%s8044_s11 + $0xa24] ss:$84 sps:$4 sm:$0xff]   ;;  %v7943_v3 = vld [vmem:[%s8044_s11 + $0xa20] ss:$84 sps:$4 sm:$0xff]   ;;  %v7947_v32 = vld [vmem:[%s8044_s11 + $0xa28] ss:$84 sps:$4 sm:$0xff]  }
 0x2b7   : > { %v6818_v17 = vpop.f32.mrf.mxu0  ;;  %v6882_v9 = vpop.f32.mrf.mxu1  ;;  %s5543_s11 = sshll.u32 %s9953_s18, 3 }
 0x2b8   : > { %v6819_v63 = vadd.f32 %v6818_v17, %v6817_v21  ;;  %v6883_v13 = vadd.f32 %v6882_v9, %v6881_v53  ;;  %s9811_s5 = scalar_lea.vmem %s9927_s3, %s5543_s11 }
 0x2b9   : > { %v6820_v44 = vpop.f32.mrf.mxu0  ;;  %v6884_v23 = vpop.f32.mrf.mxu1 }
 0x2ba   : > { %v9554_v62 = vadd.f32 %v6819_v63, %v9426_v5  ;;  %v9557_v15 = vadd.f32 %v6883_v13, %v9429_v51 }
 0x2bb   : > { %v6821_v8 = vpop.f32.mrf.mxu0  ;;  %v6885_v7 = vpop.f32.mrf.mxu1 }
 0x2bc   : > { %v6822_v31 = vadd.f32 %v6821_v8, %v6820_v44  ;;  %v6886_v30 = vadd.f32 %v6885_v7, %v6884_v23 }
 0x2bd   : > { %v6823_v22 = vpop.f32.mrf.mxu0  ;;  %v6887_v2 = vpop.f32.mrf.mxu1  ;;  %5222 = vmatmul.mubr.bf16.gmra.mxu1 %v7938_v14  ;;  %7236 = vmatmul.mubr.bf16.gmra.mxu0 %v7942_v36 }
 0x2be   : > { %v9562_v57 = vadd.f32 %v6822_v31, %v9434_v37  ;;  %v9565_v5 = vadd.f32 %v6886_v30, %v9437_v10  ;;  %5229 = vmatprep.mubr.bf16.mxu1 %v7945_v20  ;;  %7239 = vmatprep.mubr.bf16.mxu0 %v7946_v54 }
 0x2bf   : > { %v6824_v51 = vpop.f32.mrf.mxu0  ;;  %v6888_v35 = vpop.f32.mrf.mxu1 }
 0x2c0   : > { %v6825_v47 = vadd.f32 %v6824_v51, %v6823_v22  ;;  %v6889_v6 = vadd.f32 %v6888_v35, %v6887_v2 }
 0x2c1   : > { %v6826_v18 = vpop.f32.mrf.mxu0  ;;  %v6890_v61 = vpop.f32.mrf.mxu1 }
 0x2c2   : > { %v9570_v39 = vadd.f32 %v6825_v47, %v9442_v41  ;;  %v9573_v60 = vadd.f32 %v6889_v6, %v9445_v24 }
 0x2c3   : > { %v6827_v37 = vpop.f32.mrf.mxu0  ;;  %v6891_v43 = vpop.f32.mrf.mxu1 }
 0x2c4   : > { %v6828_v10 = vadd.f32 %v6827_v37, %v6826_v18  ;;  %v6892_v58 = vadd.f32 %v6891_v43, %v6890_v61 }
 0x2c5   : > { %v6829_v21 = vpop.f32.mrf.mxu0  ;;  %v6893_v53 = vpop.f32.mrf.mxu1  ;;  %5230 = vmatmul.mubr.bf16.gmra.mxu1 %v7943_v3  ;;  %7240 = vmatmul.mubr.bf16.gmra.mxu0 %v7947_v32 }
 0x2c6   : > { %v9576_v17 = vadd.f32 %v6828_v10, %v9450_v28  ;;  %v9579_v9 = vadd.f32 %v6892_v58, %v9453_v0 }
 0x2c7   : > { %v6830_v63 = vpop.f32.mrf.mxu0  ;;  %v6894_v41 = vpop.f32.mrf.mxu1 }
 0x2c8   : > { %v6831_v13 = vadd.f32 %v6830_v63, %v6829_v21  ;;  %v6895_v44 = vadd.f32 %v6894_v41, %v6893_v53 }
 0x2c9   : > { %v6832_v24 = vpop.f32.mrf.mxu0  ;;  %v6896_v23 = vpop.f32.mrf.mxu1 }
 0x2ca   : > { %v9582_v14 = vadd.f32 %v6831_v13, %v9458_v11  ;;  %v9585_v36 = vadd.f32 %v6895_v44, %v9461_v40 }
 0x2cb   : > { %v6833_v20 = vpop.f32.mrf.mxu0  ;;  %v6897_v54 = vpop.f32.mrf.mxu1 }
 0x2cc   : > { %v6834_v8 = vadd.f32 %v6833_v20, %v6832_v24  ;;  %v6898_v28 = vadd.f32 %v6897_v54, %v6896_v23 }
 0x2cd   : > { %v6899_v7 = vpop.f32.mrf.mxu1  ;;  %v6963_v31 = vpop.f32.mrf.mxu0 }
 0x2ce   : > { %v9588_v0 = vadd.f32 %v6834_v8, %v9466_v1  ;;  %v9591_v30 = vadd.f32 %v6898_v28, %v9469_v34 }
 0x2cf   : > { %v6900_v22 = vpop.f32.mrf.mxu1  ;;  %v6964_v2 = vpop.f32.mrf.mxu0 }
 0x2d0   : > { %v6901_v51 = vadd.f32 %v6900_v22, %v6899_v7  ;;  %v6965_v11 = vadd.f32 %v6964_v2, %v6963_v31 }
 0x2d1   : > { %v6902_v35 = vpop.f32.mrf.mxu1  ;;  %v6966_v47 = vpop.f32.mrf.mxu0 }
 0x2d2   : > { %v9594_v40 = vadd.f32 %v6901_v51, %v9474_v55  ;;  %v9597_v6 = vadd.f32 %v6965_v11, %v9477_v16 }
 0x2d3   : > { %v6903_v18 = vpop.f32.mrf.mxu1  ;;  %v6967_v61 = vpop.f32.mrf.mxu0 }
 0x2d4   : > { %v6904_v3 = vadd.f32 %v6903_v18, %v6902_v35  ;;  %v6968_v1 = vadd.f32 %v6967_v61, %v6966_v47 }
 0x2d5   : > { %v6905_v32 = vpop.f32.mrf.mxu1  ;;  %v6969_v37 = vpop.f32.mrf.mxu0 }
 0x2d6   : > { %v9600_v34 = vadd.f32 %v6904_v3, %v9482_v52  ;;  %v9603_v43 = vadd.f32 %v6968_v1, %v9485_v48 }
 0x2d7   : > { %v6906_v10 = vpop.f32.mrf.mxu1  ;;  %v6970_v58 = vpop.f32.mrf.mxu0 }
 0x2d8   : > { %v6907_v21 = vadd.f32 %v6906_v10, %v6905_v32  ;;  %v6971_v55 = vadd.f32 %v6970_v58, %v6969_v37 }
 0x2d9   : > { %v6908_v53 = vpop.f32.mrf.mxu1  ;;  %v6972_v63 = vpop.f32.mrf.mxu0 }
 0x2da   : > { %v9606_v16 = vadd.f32 %v6907_v21, %v9490_v4  ;;  %v9609_v41 = vadd.f32 %v6971_v55, %v9493_v56 }
 0x2db   : > { %v6909_v13 = vpop.f32.mrf.mxu1  ;;  %v6973_v44 = vpop.f32.mrf.mxu0 }
 0x2dc   : > { %v6910_v24 = vadd.f32 %v6909_v13, %v6908_v53  ;;  %v6974_v52 = vadd.f32 %v6973_v44, %v6972_v63 }
 0x2dd   : > { %v6911_v23 = vpop.f32.mrf.mxu1  ;;  %v6975_v20 = vpop.f32.mrf.mxu0 }
 0x2de   : > { %v9612_v48 = vadd.f32 %v6910_v24, %v9498_v33  ;;  %v9615_v54 = vadd.f32 %v6974_v52, %v9501_v12 }
 0x2df   : > { %v6912_v8 = vpop.f32.mrf.mxu1  ;;  %v6976_v28 = vpop.f32.mrf.mxu0 }
 0x2e0   : > { %v6913_v7 = vadd.f32 %v6912_v8, %v6911_v23  ;;  %v6977_v4 = vadd.f32 %v6976_v28, %v6975_v20 }
 0x2e1   : > { %v6914_v31 = vpop.f32.mrf.mxu1  ;;  %v6978_v22 = vpop.f32.mrf.mxu0 }
 0x2e2   : > { %v9618_v56 = vadd.f32 %v6913_v7, %v9506_v38  ;;  %v9621_v2 = vadd.f32 %v6977_v4, %v9509_v45 }
 0x2e3   : > { %v6915_v51 = vpop.f32.mrf.mxu1  ;;  %v6979_v11 = vpop.f32.mrf.mxu0 }
 0x2e4   : > { %v6916_v35 = vadd.f32 %v6915_v51, %v6914_v31  ;;  %v6980_v33 = vadd.f32 %v6979_v11, %v6978_v22 }
 0x2e5   : > { %v6917_v47 = vpop.f32.mrf.mxu1  ;;  %v6981_v18 = vpop.f32.mrf.mxu0 }
 0x2e6   : > { %v9624_v12 = vadd.f32 %v6916_v35, %v9514_v49  ;;  %v9627_v61 = vadd.f32 %v6980_v33, %v9517_v42 }
 0x2e7   : > { %v6918_v3 = vpop.f32.mrf.mxu1  ;;  %v6982_v1 = vpop.f32.mrf.mxu0 }
 0x2e8   : > { %v6919_v32 = vadd.f32 %v6918_v3, %v6917_v47  ;;  %v6983_v38 = vadd.f32 %v6982_v1, %v6981_v18 }
 0x2e9   : > { %v6920_v37 = vpop.f32.mrf.mxu1  ;;  %v6984_v10 = vpop.f32.mrf.mxu0 }
 0x2ea   : > { %v9630_v45 = vadd.f32 %v6919_v32, %v9522_v27  ;;  %v9633_v58 = vadd.f32 %v6983_v38, %v9525_v25 }
 0x2eb   : > { %v6921_v21 = vpop.f32.mrf.mxu1  ;;  %v6985_v55 = vpop.f32.mrf.mxu0 }
 0x2ec   : > { %v6922_v53 = vadd.f32 %v6921_v21, %v6920_v37  ;;  %v6986_v49 = vadd.f32 %v6985_v55, %v6984_v10 }
 0x2ed   : > { %v6923_v63 = vpop.f32.mrf.mxu1  ;;  %v6987_v13 = vpop.f32.mrf.mxu0 }
 0x2ee   : > { %v9636_v42 = vadd.f32 %v6922_v53, %v9530_v29  ;;  %v9639_v44 = vadd.f32 %v6986_v49, %v9533_v50 }
 0x2ef   : > { %v6924_v24 = vpop.f32.mrf.mxu1  ;;  %v6988_v52 = vpop.f32.mrf.mxu0 }
 0x2f0   : > { %v6925_v23 = vadd.f32 %v6924_v24, %v6923_v63  ;;  %v6989_v27 = vadd.f32 %v6988_v52, %v6987_v13 }
 0x2f1   : > { %v6926_v20 = vpop.f32.mrf.mxu1  ;;  %v6990_v8 = vpop.f32.mrf.mxu0 }
 0x2f2   : > { %v9642_v25 = vadd.f32 %v6925_v23, %v9538_v19  ;;  %v9645_v28 = vadd.f32 %v6989_v27, %v9541_v46 }
 0x2f3   : > { %v6927_v7 = vpop.f32.mrf.mxu1  ;;  %v6991_v4 = vpop.f32.mrf.mxu0 }
 0x2f4   : > { %v6928_v31 = vadd.f32 %v6927_v7, %v6926_v20  ;;  %v6992_v29 = vadd.f32 %v6991_v4, %v6990_v8 }
 0x2f5   : > { %v6929_v22 = vpop.f32.mrf.mxu1  ;;  %v6993_v51 = vpop.f32.mrf.mxu0 }
 0x2f6   : > { %v9648_v50 = vadd.f32 %v6928_v31, %v9546_v59  ;;  %v9651_v11 = vadd.f32 %v6992_v29, %v9549_v26 }
 0x2f7   : > { %v6930_v35 = vpop.f32.mrf.mxu1  ;;  %v6994_v33 = vpop.f32.mrf.mxu0 }
 0x2f8   : > { %v6931_v47 = vadd.f32 %v6930_v35, %v6929_v22  ;;  %v6995_v19 = vadd.f32 %v6994_v33, %v6993_v51 }
 0x2f9   : > { %v6932_v18 = vpop.f32.mrf.mxu1  ;;  %v6996_v3 = vpop.f32.mrf.mxu0 }
 0x2fa   : > { %v9654_v46 = vadd.f32 %v6931_v47, %v9554_v62  ;;  %v9657_v1 = vadd.f32 %v6995_v19, %v9557_v15 }
 0x2fb   : > { %v6933_v32 = vpop.f32.mrf.mxu1  ;;  %v6997_v38 = vpop.f32.mrf.mxu0 }
 0x2fc   : > { %v6934_v37 = vadd.f32 %v6933_v32, %v6932_v18  ;;  %v6998_v59 = vadd.f32 %v6997_v38, %v6996_v3 }
 0x2fd   : > { %v6935_v10 = vpop.f32.mrf.mxu1  ;;  %v6999_v21 = vpop.f32.mrf.mxu0 }
 0x2fe   : > { %v9660_v26 = vadd.f32 %v6934_v37, %v9562_v57  ;;  %v9663_v55 = vadd.f32 %v6998_v59, %v9565_v5 }
 0x2ff   : > { %v6936_v53 = vpop.f32.mrf.mxu1  ;;  %v7000_v49 = vpop.f32.mrf.mxu0 }
 0x300   : > { %v6937_v63 = vadd.f32 %v6936_v53, %v6935_v10  ;;  %v7001_v62 = vadd.f32 %v7000_v49, %v6999_v21 }
 0x301   : > { %v6938_v13 = vpop.f32.mrf.mxu1  ;;  %v7002_v24 = vpop.f32.mrf.mxu0 }
 0x302   : > { %v9666_v15 = vadd.f32 %v6937_v63, %v9570_v39  ;;  %v9669_v52 = vadd.f32 %v7001_v62, %v9573_v60 }
 0x303   : > { %v6939_v23 = vpop.f32.mrf.mxu1  ;;  %v7003_v27 = vpop.f32.mrf.mxu0 }
 0x304   : > { %v6940_v20 = vadd.f32 %v6939_v23, %v6938_v13  ;;  %v7004_v57 = vadd.f32 %v7003_v27, %v7002_v24 }
 0x305   : > { %v6941_v8 = vpop.f32.mrf.mxu1  ;;  %v7005_v7 = vpop.f32.mrf.mxu0 }
 0x306   : > { %v9672_v5 = vadd.f32 %v6940_v20, %v9576_v17  ;;  %v9675_v4 = vadd.f32 %v7004_v57, %v9579_v9 }
 0x307   : > { %v6942_v31 = vpop.f32.mrf.mxu1  ;;  %v7006_v29 = vpop.f32.mrf.mxu0 }
 0x308   : > { %v6943_v22 = vadd.f32 %v6942_v31, %v6941_v8  ;;  %v7007_v39 = vadd.f32 %v7006_v29, %v7005_v7 }
 0x309   : > { %v6944_v51 = vpop.f32.mrf.mxu1  ;;  %v7008_v35 = vpop.f32.mrf.mxu0 }
 0x30a   : > { %v9678_v60 = vadd.f32 %v6943_v22, %v9582_v14  ;;  %v9681_v33 = vadd.f32 %v7007_v39, %v9585_v36 }
 0x30b   : > { %v6945_v47 = vpop.f32.mrf.mxu1  ;;  %v7009_v19 = vpop.f32.mrf.mxu0 }
 0x30c   : > { %v6946_v18 = vadd.f32 %v6945_v47, %v6944_v51  ;;  %v7010_v17 = vadd.f32 %v7009_v19, %v7008_v35 }
 0x30d   : > { %v7011_v3 = vpop.f32.mrf.mxu0  ;;  %v9683_v32 = vpop.f32.mrf.mxu1 }
 0x30e   : > { %v9686_v9 = vadd.f32 %v6946_v18, %v9588_v0  ;;  %v9689_v38 = vadd.f32 %v7010_v17, %v9591_v30 }
 0x30f   : > { %v7012_v37 = vpop.f32.mrf.mxu0  ;;  %v9691_v59 = vpop.f32.mrf.mxu1 }
 0x310   : > { %v7013_v14 = vadd.f32 %v7012_v37, %v7011_v3 }
 0x311   : > { %v7014_v10 = vpop.f32.mrf.mxu0  ;;  %v9693_v36 = vpop.f32.mrf.mxu1 }
 0x312   : > { %v9696_v21 = vadd.f32 %v7013_v14, %v9594_v40 }
 0x313   : > { %v7015_v53 = vpop.f32.mrf.mxu0  ;;  %v9698_v49 = vpop.f32.mrf.mxu1 }
 0x314   : > { %v7016_v63 = vadd.f32 %v7015_v53, %v7014_v10 }
 0x315   : > { %v7017_v62 = vpop.f32.mrf.mxu0  ;;  %v9700_v0 = vpop.f32.mrf.mxu1 }
 0x316   : > { %v9703_v30 = vadd.f32 %v7016_v63, %v9600_v34 }
 0x317   : > { %v7018_v13 = vpop.f32.mrf.mxu0  ;;  %v9705_v24 = vpop.f32.mrf.mxu1 }
 0x318   : > { %9928 = vst [vmem:[#allocation2_spill] sm:$0xff] %v9703_v30  ;;  %v7019_v23 = vadd.f32 %v7018_v13, %v7017_v62 }
 0x319   : > { %v7020_v27 = vpop.f32.mrf.mxu0  ;;  %v9707_v20 = vpop.f32.mrf.mxu1 }
 0x31a   : > { %v9710_v40 = vadd.f32 %v7019_v23, %v9606_v16 }
 0x31b   : > { %v7021_v57 = vpop.f32.mrf.mxu0  ;;  %v9712_v8 = vpop.f32.mrf.mxu1 }
 0x31c   : > { %v7022_v7 = vadd.f32 %v7021_v57, %v7020_v27 }
 0x31d   : > { %v7023_v31 = vpop.f32.mrf.mxu0  ;;  %v9714_v29 = vpop.f32.mrf.mxu1 }
 0x31e   : > { %v9717_v34 = vadd.f32 %v7022_v7, %v9612_v48 }
 0x31f   : > { %v7024_v22 = vpop.f32.mrf.mxu0  ;;  %v9719_v39 = vpop.f32.mrf.mxu1 }
 0x320   : > { %v7025_v51 = vadd.f32 %v7024_v22, %v7023_v31 }
 0x321   : > { %v7026_v35 = vpop.f32.mrf.mxu0  ;;  %v9721_v47 = vpop.f32.mrf.mxu1 }
 0x322   : > { %v9724_v16 = vadd.f32 %v7025_v51, %v9618_v56 }
 0x323   : > { %v7027_v19 = vpop.f32.mrf.mxu0  ;;  %v9726_v18 = vpop.f32.mrf.mxu1 }
 0x324   : > { %9929 = vst [vmem:[#allocation3_spill] sm:$0xff] %v9724_v16  ;;  %v7028_v17 = vadd.f32 %v7027_v19, %v7026_v35 }
 0x325   : > { %v7029_v3 = vpop.f32.mrf.mxu0  ;;  %v9728_v37 = vpop.f32.mrf.mxu1 }
 0x326   : > { %v9731_v48 = vadd.f32 %v7028_v17, %v9624_v12 }
 0x327   : > { %v7030_v14 = vpop.f32.mrf.mxu0  ;;  %v9733_v10 = vpop.f32.mrf.mxu1 }
 0x328   : > { %9930 = vst [vmem:[#allocation4_spill] sm:$0xff] %v9731_v48  ;;  %v7031_v53 = vadd.f32 %v7030_v14, %v7029_v3 }
 0x329   : > { %v7032_v63 = vpop.f32.mrf.mxu0  ;;  %v9735_v62 = vpop.f32.mrf.mxu1 }
 0x32a   : > { %v9738_v56 = vadd.f32 %v7031_v53, %v9630_v45 }
 0x32b   : > { %v7033_v13 = vpop.f32.mrf.mxu0  ;;  %v9740_v23 = vpop.f32.mrf.mxu1 }
 0x32c   : > { %9931 = vst [vmem:[#allocation5_spill] sm:$0xff] %v9738_v56  ;;  %v7034_v27 = vadd.f32 %v7033_v13, %v7032_v63 }
 0x32d   : > { %v7035_v57 = vpop.f32.mrf.mxu0  ;;  %v9742_v7 = vpop.f32.mrf.mxu1 }
 0x32e   : > { %v9745_v12 = vadd.f32 %v7034_v27, %v9636_v42 }
 0x32f   : > { %v7036_v31 = vpop.f32.mrf.mxu0  ;;  %v9747_v22 = vpop.f32.mrf.mxu1 }
 0x330   : > { %9932 = vst [vmem:[#allocation6_spill] sm:$0xff] %v9745_v12  ;;  %v7037_v51 = vadd.f32 %v7036_v31, %v7035_v57 }
 0x331   : > { %v7038_v35 = vpop.f32.mrf.mxu0  ;;  %v9749_v19 = vpop.f32.mrf.mxu1 }
 0x332   : > { %v9752_v45 = vadd.f32 %v7037_v51, %v9642_v25 }
 0x333   : > { %v7039_v17 = vpop.f32.mrf.mxu0  ;;  %v9754_v3 = vpop.f32.mrf.mxu1 }
 0x334   : > { %9933 = vst [vmem:[#allocation7_spill] sm:$0xff] %v9752_v45  ;;  %v7040_v14 = vadd.f32 %v7039_v17, %v7038_v35 }
 0x335   : > { %v7041_v53 = vpop.f32.mrf.mxu0  ;;  %v9756_v63 = vpop.f32.mrf.mxu1 }
 0x336   : > { %v9759_v42 = vadd.f32 %v7040_v14, %v9648_v50 }
 0x337   : > { %v7042_v13 = vpop.f32.mrf.mxu0  ;;  %v9761_v27 = vpop.f32.mrf.mxu1 }
 0x338   : > { %9934 = vst [vmem:[#allocation8_spill] sm:$0xff] %v9759_v42  ;;  %v7043_v57 = vadd.f32 %v7042_v13, %v7041_v53 }
 0x339   : > { %v7044_v31 = vpop.f32.mrf.mxu0  ;;  %v9763_v48 = vpop.f32.mrf.mxu1 }
 0x33a   : > { %v9766_v25 = vadd.f32 %v7043_v57, %v9654_v46 }
 0x33b   : > { %v7045_v51 = vpop.f32.mrf.mxu0  ;;  %v9768_v45 = vpop.f32.mrf.mxu1 }
 0x33c   : > { %9935 = vst [vmem:[#allocation9_spill] sm:$0xff] %v9766_v25  ;;  %v7046_v35 = vadd.f32 %v7045_v51, %v7044_v31 }
 0x33d   : > { %v7047_v17 = vpop.f32.mrf.mxu0  ;;  %v9770_v12 = vpop.f32.mrf.mxu1 }
 0x33e   : > { %v9773_v50 = vadd.f32 %v7046_v35, %v9660_v26 }
 0x33f   : > { %v7048_v14 = vpop.f32.mrf.mxu0  ;;  %v9775_v42 = vpop.f32.mrf.mxu1 }
 0x340   : > { %9936 = vst [vmem:[#allocation10_spill] sm:$0xff] %v9773_v50  ;;  %v7049_v53 = vadd.f32 %v7048_v14, %v7047_v17  ;;  %v7083_v17 = vadd.f32 %v9705_v24, %v9700_v0 }
 0x341   : > { %v7050_v13 = vpop.f32.mrf.mxu0  ;;  %v9777_v16 = vpop.f32.mrf.mxu1 }
 0x342   : > { %v9780_v46 = vadd.f32 %v7049_v53, %v9666_v15  ;;  %v7077_v53 = vadd.f32 %v9691_v59, %v9683_v32  ;;  %v5120_v0 = vadd.f32 %v7083_v17, %v9609_v41  ;;  %v7080_v32 = vadd.f32 %v9698_v49, %v9693_v36 }
 0x343   : > { %v7051_v57 = vpop.f32.mrf.mxu0  ;;  %v9782_v25 = vpop.f32.mrf.mxu1 }
 0x344   : > { %v7052_v31 = vadd.f32 %v7051_v57, %v7050_v13  ;;  %v5115_v49 = vadd.f32 %v7080_v32, %v9603_v43 }
 0x345   : > { %v7053_v51 = vpop.f32.mrf.mxu0  ;;  %v9784_v56 = vpop.f32.mrf.mxu1 }
 0x346   : > { %v9787_v26 = vadd.f32 %v7052_v31, %v9672_v5  ;;  %v7086_v31 = vadd.f32 %v9712_v8, %v9707_v20 }
 0x347   : > { %v7054_v35 = vpop.f32.mrf.mxu0  ;;  %v9789_v50 = vpop.f32.mrf.mxu1 }
 0x348   : > { %9937 = vst [vmem:[#allocation11_spill] sm:$0xff] %v9787_v26  ;;  %v7055_v14 = vadd.f32 %v7054_v35, %v7053_v51  ;;  %v7095_v51 = vadd.f32 %v9733_v10, %v9728_v37  ;;  %v5123_v17 = vadd.f32 %v7086_v31, %v9615_v54  ;;  %v7098_v37 = vadd.f32 %v9740_v23, %v9735_v62 }
 0x349   : > { %v7056_v30 = vpop.f32.mrf.mxu0  ;;  %v9793_v15 = vpop.f32.mrf.mxu1  ;;  %v7107_v62 = vadd.f32 %v9761_v27, %v9756_v63  ;;  %v7110_v63 = vadd.f32 %v9768_v45, %v9763_v48  ;;  %v7119_v48 = vadd.f32 %v9789_v50, %v9784_v56 }
 0x34a   : > { %v9798_v13 = vadd.f32 %v7055_v14, %v9678_v60  ;;  %v5136_v10 = vadd.f32 %v7095_v51, %v9633_v58  ;;  %v5139_v58 = vadd.f32 %v7098_v37, %v9639_v44 }
 0x34b   : > { %v7057_v57 = vpop.f32.mrf.mxu0  ;;  %v9801_v5 = vpop.f32.mrf.mxu1  ;;  %v5152_v44 = vadd.f32 %v7107_v62, %v9657_v1  ;;  %v5155_v1 = vadd.f32 %v7110_v63, %v9663_v55  ;;  %v5168_v55 = vadd.f32 %v7119_v48, %v9681_v33  ;;  %v9938_v63 = vld [vmem:[#allocation2_spill] sm:$0xff]  ;;  %v9940_v48 = vld [vmem:[#allocation3_spill] sm:$0xff] }
 0x34c   : > { %v7058_v26 = vadd.f32 %v7057_v57, %v7056_v30  ;;  %v5112_v30 = vadd.f32 %v7077_v53, %v9597_v6  ;;  %v7122_v56 = vadd.f32 %v9801_v5, %v9793_v15 }
 0x34d   : > { %v9806_v24 = vpop.f32.mrf.mxu1  ;;  %v7213_v60 = vpop.f32.mrf.mxu0 }
 0x34e   : > { %v9816_v59 = vadd.f32 %v7058_v26, %v9686_v9  ;;  %v5281_v20 = vadd.f32 %v7213_v60, %v5120_v0  ;;  %v7089_v9 = vadd.f32 %v9719_v39, %v9714_v29  ;;  %v7092_v29 = vadd.f32 %v9726_v18, %v9721_v47 }
 0x34f   : > { %v9819_v41 = vpop.f32.mrf.mxu1  ;;  %v5272_v8 = vpop.f32.mrf.mxu0  ;;  %v7101_v47 = vadd.f32 %v9747_v22, %v9742_v7  ;;  %v7104_v7 = vadd.f32 %v9754_v3, %v9749_v19  ;;  %v7113_v19 = vadd.f32 %v9775_v42, %v9770_v12  ;;  %v7116_v12 = vadd.f32 %v9782_v25, %v9777_v16 }
 0x350   : > { %5401 = vst [vmem:[%s9811_s5 + $0x10] sm:$0xff] %v5281_v20  ;;  %v5273_v35 = vadd.f32 %v5272_v8, %v5112_v30  ;;  %v5128_v43 = vadd.f32 %v7089_v9, %v9621_v2  ;;  %v5131_v2 = vadd.f32 %v7092_v29, %v9627_v61  ;;  %v5171_v5 = vadd.f32 %v7122_v56, %v9689_v38 }
 0x351   : > { %v9825_v14 = vpop.f32.mrf.mxu1  ;;  %v7214_v36 = vpop.f32.mrf.mxu0  ;;  %v5144_v61 = vadd.f32 %v7101_v47, %v9645_v28  ;;  %v5147_v28 = vadd.f32 %v7104_v7, %v9651_v11  ;;  %v5160_v11 = vadd.f32 %v7113_v19, %v9669_v52  ;;  %v5163_v25 = vadd.f32 %v7116_v12, %v9675_v4  ;;  %v9941_v19 = vld [vmem:[#allocation6_spill] sm:$0xff] }
 0x352   : > { %5399 = vst [vmem:[%s9811_s5] sm:$0xff] %v5273_v35  ;;  %v5284_v6 = vadd.f32 %v7214_v36, %v5123_v17 }
 0x353   : > { %v9831_v26 = vpop.f32.mrf.mxu1  ;;  %v5275_v53 = vpop.f32.mrf.mxu0 }
 0x354   : > { %5402 = vst [vmem:[%s9811_s5 + $0x18] sm:$0xff] %v5284_v6  ;;  %v5276_v54 = vadd.f32 %v5275_v53, %v5115_v49 }
 0x355   : > { %v7129_v57 = vpop.f32.mrf.mxu1  ;;  %v7217_v31 = vpop.f32.mrf.mxu0 }
 0x356   : > { %5400 = vst [vmem:[%s9811_s5 + $0x8] sm:$0xff] %v5276_v54  ;;  %v5297_v39 = vadd.f32 %v7217_v31, %v5136_v10 }
 0x357   : > { %v7130_v0 = vpop.f32.mrf.mxu1  ;;  %v5288_v60 = vpop.f32.mrf.mxu0 }
 0x358   : > { %5405 = vst [vmem:[%s9811_s5 + $0x30] sm:$0xff] %v5297_v39  ;;  %v5289_v23 = vadd.f32 %v5288_v60, %v5128_v43  ;;  %v7131_v29 = vadd.f32 %v7130_v0, %v7129_v57  ;;  %v7125_v43 = vadd.f32 %v9819_v41, %v9806_v24 }
 0x359   : > { %v7132_v32 = vpop.f32.mrf.mxu1  ;;  %v7218_v20 = vpop.f32.mrf.mxu0 }
 0x35a   : > { %5403 = vst [vmem:[%s9811_s5 + $0x20] sm:$0xff] %v5289_v23  ;;  %v5300_v18 = vadd.f32 %v7218_v20, %v5139_v58  ;;  %v5184_v0 = vadd.f32 %v7131_v29, %v9710_v40  ;;  %v7128_v58 = vadd.f32 %v9831_v26, %v9825_v14  ;;  %v5176_v41 = vadd.f32 %v7125_v43, %v9696_v21 }
 0x35b   : > { %v7133_v30 = vpop.f32.mrf.mxu1  ;;  %v5291_v8 = vpop.f32.mrf.mxu0 }
 0x35c   : > { %5406 = vst [vmem:[%s9811_s5 + $0x38] sm:$0xff] %v5300_v18  ;;  %v5292_v27 = vadd.f32 %v5291_v8, %v5131_v2  ;;  %v7134_v62 = vadd.f32 %v7133_v30, %v7132_v32  ;;  %v5179_v14 = vadd.f32 %v7128_v58, %v9938_v63 }
 0x35d   : > { %v7135_v51 = vpop.f32.mrf.mxu1  ;;  %v7221_v35 = vpop.f32.mrf.mxu0 }
 0x35e   : > { %5404 = vst [vmem:[%s9811_s5 + $0x28] sm:$0xff] %v5292_v27  ;;  %v5313_v22 = vadd.f32 %v7221_v35, %v5152_v44  ;;  %v5187_v18 = vadd.f32 %v7134_v62, %v9717_v34  ;;  %v9939_v35 = vld [vmem:[#allocation5_spill] sm:$0xff] }
 0x35f   : > { %v7136_v17 = vpop.f32.mrf.mxu1  ;;  %v5304_v36 = vpop.f32.mrf.mxu0 }
 0x360   : > { %5409 = vst [vmem:[%s9811_s5 + $0x50] sm:$0xff] %v5313_v22  ;;  %v5305_v45 = vadd.f32 %v5304_v36, %v5144_v61  ;;  %v7137_v30 = vadd.f32 %v7136_v17, %v7135_v51 }
 0x361   : > { %v7138_v9 = vpop.f32.mrf.mxu1  ;;  %v7222_v6 = vpop.f32.mrf.mxu0 }
 0x362   : > { %5407 = vst [vmem:[%s9811_s5 + $0x40] sm:$0xff] %v5305_v45  ;;  %v5316_v3 = vadd.f32 %v7222_v6, %v5155_v1  ;;  %v5192_v51 = vadd.f32 %v7137_v30, %v9940_v48 }
 0x363   : > { %v7139_v49 = vpop.f32.mrf.mxu1  ;;  %v5307_v53 = vpop.f32.mrf.mxu0 }
 0x364   : > { %5410 = vst [vmem:[%s9811_s5 + $0x58] sm:$0xff] %v5316_v3  ;;  %v5308_v50 = vadd.f32 %v5307_v53, %v5147_v28  ;;  %v7140_v34 = vadd.f32 %v7139_v49, %v7138_v9 }
 0x365   : > { %v7141_v37 = vpop.f32.mrf.mxu1  ;;  %v7225_v54 = vpop.f32.mrf.mxu0 }
 0x366   : > { %5408 = vst [vmem:[%s9811_s5 + $0x48] sm:$0xff] %v5308_v50  ;;  %v5329_v42 = vadd.f32 %v7225_v54, %v5168_v55  ;;  %v9942_v55 = vld [vmem:[#allocation4_spill] sm:$0xff] }
 0x367   : > { %v7142_v10 = vpop.f32.mrf.mxu1  ;;  %v5320_v31 = vpop.f32.mrf.mxu0  ;;  %v5195_v9 = vadd.f32 %v7140_v34, %v9942_v55 }
 0x368   : > { %5413 = vst [vmem:[%s9811_s5 + $0x70] sm:$0xff] %v5329_v42  ;;  %v5321_v15 = vadd.f32 %v5320_v31, %v5160_v11  ;;  %v7143_v47 = vadd.f32 %v7142_v10, %v7141_v37  ;;  %v9943_v42 = vld [vmem:[#allocation9_spill] sm:$0xff] }
 0x369   : > { %v7144_v33 = vpop.f32.mrf.mxu1  ;;  %v7226_v39 = vpop.f32.mrf.mxu0 }
 0x36a   : > { %5411 = vst [vmem:[%s9811_s5 + $0x60] sm:$0xff] %v5321_v15  ;;  %v5332_v16 = vadd.f32 %v7226_v39, %v5171_v5  ;;  %v5200_v7 = vadd.f32 %v7143_v47, %v9939_v35  ;;  %v9944_v5 = vld [vmem:[#allocation7_spill] sm:$0xff] }
 0x36b   : > { %v7145_v52 = vpop.f32.mrf.mxu1  ;;  %v5323_v60 = vpop.f32.mrf.mxu0 }
 0x36c   : > { %5414 = vst [vmem:[%s9811_s5 + $0x78] sm:$0xff] %v5332_v16  ;;  %v5324_v57 = vadd.f32 %v5323_v60, %v5163_v25  ;;  %v7146_v21 = vadd.f32 %v7145_v52, %v7144_v33  ;;  %v9945_v25 = vld [vmem:[#allocation10_spill] sm:$0xff] }
 0x36d   : > { %v7147_v38 = vpop.f32.mrf.mxu1  ;;  %v7229_v23 = vpop.f32.mrf.mxu0 }
 0x36e   : > { %5412 = vst [vmem:[%s9811_s5 + $0x68] sm:$0xff] %v5324_v57  ;;  %v5345_v24 = vadd.f32 %v7229_v23, %v5184_v0  ;;  %v5203_v3 = vadd.f32 %v7146_v21, %v9941_v19 }
 0x36f   : > { %v7148_v4 = vpop.f32.mrf.mxu1  ;;  %v5336_v20 = vpop.f32.mrf.mxu0 }
 0x370   : > { %5417 = vst [vmem:[%s9811_s5 + $0x90] sm:$0xff] %v5345_v24  ;;  %v5337_v32 = vadd.f32 %v5336_v20, %v5176_v41  ;;  %v7149_v56 = vadd.f32 %v7148_v4, %v7147_v38  ;;  %v9946_v38 = vld [vmem:[#allocation8_spill] sm:$0xff] }
 0x371   : > { %v7150_v40 = vpop.f32.mrf.mxu1  ;;  %v7230_v2 = vpop.f32.mrf.mxu0 }
 0x372   : > { %5415 = vst [vmem:[%s9811_s5 + $0x80] sm:$0xff] %v5337_v32  ;;  %v5348_v8 = vadd.f32 %v7230_v2, %v5187_v18  ;;  %v5208_v33 = vadd.f32 %v7149_v56, %v9944_v5 }
 0x373   : > { %v7151_v26 = vpop.f32.mrf.mxu1  ;;  %v5339_v27 = vpop.f32.mrf.mxu0 }
 0x374   : > { %5418 = vst [vmem:[%s9811_s5 + $0x98] sm:$0xff] %v5348_v8  ;;  %v5340_v44 = vadd.f32 %v5339_v27, %v5179_v14  ;;  %v7152_v29 = vadd.f32 %v7151_v26, %v7150_v40  ;;  %v9947_v26 = vld [vmem:[#allocation11_spill] sm:$0xff] }
 0x375   : > { %v7153_v22 = vpop.f32.mrf.mxu1  ;;  %v7233_v61 = vpop.f32.mrf.mxu0 }
 0x376   : > { %5416 = vst [vmem:[%s9811_s5 + $0x88] sm:$0xff] %v5340_v44  ;;  %v5361_v36 = vadd.f32 %v7233_v61, %v5200_v7  ;;  %v5211_v23 = vadd.f32 %v7152_v29, %v9946_v38 }
 0x377   : > { %v7154_v17 = vpop.f32.mrf.mxu1  ;;  %v5352_v45 = vpop.f32.mrf.mxu0 }
 0x378   : > { %5421 = vst [vmem:[%s9811_s5 + $0xb0] sm:$0xff] %v5361_v36  ;;  %v7155_v1 = vadd.f32 %v7154_v17, %v7153_v22  ;;  %v5353_v6 = vadd.f32 %v5352_v45, %v5192_v51 }
 0x379   : > { %v7156_v28 = vpop.f32.mrf.mxu1  ;;  %v7234_v53 = vpop.f32.mrf.mxu0 }
 0x37a   : > { %5419 = vst [vmem:[%s9811_s5 + $0xa0] sm:$0xff] %v5353_v6  ;;  %v5364_v50 = vadd.f32 %v7234_v53, %v5203_v3  ;;  %v5216_v11 = vadd.f32 %v7155_v1, %v9943_v42 }
 0x37b   : > { %v7157_v49 = vpop.f32.mrf.mxu1  ;;  %v5355_v37 = vpop.f32.mrf.mxu0 }
 0x37c   : > { %5422 = vst [vmem:[%s9811_s5 + $0xb8] sm:$0xff] %v5364_v50  ;;  %v7158_v54 = vadd.f32 %v7157_v49, %v7156_v28  ;;  %v5356_v12 = vadd.f32 %v5355_v37, %v5195_v9 }
 0x37d   : > { %v7159_v10 = vpop.f32.mrf.mxu1  ;;  %v7237_v31 = vpop.f32.mrf.mxu0 }
 0x37e   : > { %5420 = vst [vmem:[%s9811_s5 + $0xa8] sm:$0xff] %v5356_v12  ;;  %v5377_v15 = vadd.f32 %v7237_v31, %v5216_v11  ;;  %v5219_v52 = vadd.f32 %v7158_v54, %v9945_v25 }
 0x37f   : > { %v7160_v39 = vpop.f32.mrf.mxu1  ;;  %v5368_v43 = vpop.f32.mrf.mxu0 }
 0x380   : > { %5425 = vst [vmem:[%s9811_s5 + $0xd0] sm:$0xff] %v5377_v15  ;;  %v5369_v16 = vadd.f32 %v5368_v43, %v5208_v33  ;;  %v7161_v57 = vadd.f32 %v7160_v39, %v7159_v10 }
 0x381   : > { %v7162_v60 = vpop.f32.mrf.mxu1  ;;  %v7238_v62 = vpop.f32.mrf.mxu0 }
 0x382   : > { %5423 = vst [vmem:[%s9811_s5 + $0xc0] sm:$0xff] %v5369_v16  ;;  %v5380_v0 = vadd.f32 %v7238_v62, %v5219_v52  ;;  %v5224_v32 = vadd.f32 %v7161_v57, %v9780_v46 }
 0x383   : > { %v7163_v58 = vpop.f32.mrf.mxu1  ;;  %v5371_v24 = vpop.f32.mrf.mxu0 }
 0x384   : > { %5426 = vst [vmem:[%s9811_s5 + $0xd8] sm:$0xff] %v5380_v0  ;;  %v5372_v41 = vadd.f32 %v5371_v24, %v5211_v23  ;;  %v7164_v47 = vadd.f32 %v7163_v58, %v7162_v60 }
 0x385   : > { %v7165_v4 = vpop.f32.mrf.mxu1  ;;  %v7241_v20 = vpop.f32.mrf.mxu0 }
 0x386   : > { %5424 = vst [vmem:[%s9811_s5 + $0xc8] sm:$0xff] %v5372_v41  ;;  %v5227_v27 = vadd.f32 %v7164_v47, %v9947_v26 }
 0x387   : > { %v7166_v18 = vpop.f32.mrf.mxu1  ;;  %v5384_v40 = vpop.f32.mrf.mxu0 }
 0x388   : > { %v7167_v2 = vadd.f32 %v7166_v18, %v7165_v4  ;;  %v5385_v30 = vadd.f32 %v5384_v40, %v5224_v32 }
 0x389   : > { %v7168_v8 = vpop.f32.mrf.mxu1  ;;  %v7242_v63 = vpop.f32.mrf.mxu0 }
 0x38a   : > { %v5232_v14 = vadd.f32 %v7167_v2, %v9798_v13  ;;  %5427 = vst [vmem:[%s9811_s5 + $0xe0] sm:$0xff] %v5385_v30 }
 0x38b   : > { %v7169_v21 = vpop.f32.mrf.mxu1  ;;  %v5387_v44 = vpop.f32.mrf.mxu0 }
 0x38c   : > { %v5393_v35 = vadd.f32 %v7241_v20, %v5232_v14  ;;  %v7170_v7 = vadd.f32 %v7169_v21, %v7168_v8  ;;  %v5388_v22 = vadd.f32 %v5387_v44, %v5227_v27 }
 0x38e   : > { %5429 = vst [vmem:[%s9811_s5 + $0xf0] sm:$0xff] %v5393_v35  ;;  %v5235_v46 = vadd.f32 %v7170_v7, %v9816_v59  ;;  %5428 = vst [vmem:[%s9811_s5 + $0xe8] sm:$0xff] %v5388_v22 }
 0x390   : > { %v5396_v61 = vadd.f32 %v7242_v63, %v5235_v46 }
 0x392   : > { %5430 = vst [vmem:[%s9811_s5 + $0xf8] sm:$0xff] %v5396_v61 }
 0x393 PF: > { %s13_s14 = sadd.s32 1, %s7971_s14   ;;  %s9948_s12 = smov %s7967_s13 }
 0x394   : > { %p10_p5 = scmp.ge.s32.totalorder %s13_s14, 4   ;;  %s9949_s13 = smov %s9951_s15 }
 0x396   :  { %12 = sbr.rel (!%p10_p5) target bundleno = 2 (0x2), region = 68 }

</bundles_post_ra>
